<compile_context>
chip_gen: v5e
topology: v5e:2x2
jax: 0.10.0
libtpu: 0.0.40
codegen_flags: <defaults>
</compile_context>

<pallas_src>
import functools

import jax
import jax.numpy as jnp
from jax import lax
from jax.experimental import pallas as pl
from jax.experimental.pallas import tpu as pltpu


# ------------------------------- kernel --------------------------------------


def _bottleneck_kernel(x_ref, w1_ref, b1_ref, w2_ref, b2_ref, w3_ref, b3_ref,
                       o_ref, h1p_ref, *, nb, h, w, cin, cmid, cout,
                       tap_accumulate):
    """Fused Bottleneck residual block for NB images.

    x_ref  : (NB, H, W*Cin) or (NB, H, W, Cin)   activations (input dtype)
    w1_ref : (Cin, Cmid)        conv1 1x1 weight, BN1 folded (compute dtype)
    b1_ref : (1, Cmid)          folded BN1 bias (f32)
    w2_ref : (9*Cmid, Cmid)     conv2 3x3 weight, BN2 folded, tap-major packed
    b2_ref : (1, Cmid)          folded BN2 bias (f32)
    w3_ref : (Cmid, Cout)       conv3 1x1 weight, BN3 folded
    b3_ref : (1, Cout)          folded BN3 bias (f32)
    o_ref  : (NB, H, W*Cout) or (NB, H, W, Cout) output
    h1p_ref: VMEM (NB, H+2, W+2, Cmid) scratch holding zero-padded h1.
    """
    del cout
    cdt = h1p_ref.dtype
    m = nb * h * w

    # Residual identity stays in the input dtype (exact add in f32 below).
    xv = x_ref[...].reshape(m, cin)

    # ---- conv1 (1x1) + BN1 + ReLU  (f32 accumulation on the MXU) ----
    h1 = jnp.dot(xv.astype(cdt), w1_ref[...],
                 preferred_element_type=jnp.float32)
    h1 = jnp.maximum(h1 + b1_ref[...], 0.0)

    # ---- zero-padded h1, VMEM-resident only.  Zero just the 1-px border; the
    # interior is fully overwritten every step (correct under megacore too).
    zr = jnp.zeros((nb, 1, w + 2, cmid), cdt)
    h1p_ref[:, 0:1, :, :] = zr
    h1p_ref[:, h + 1:h + 2, :, :] = zr
    zc = jnp.zeros((nb, h + 2, 1, cmid), cdt)
    h1p_ref[:, :, 0:1, :] = zc
    h1p_ref[:, :, w + 1:w + 2, :] = zc
    h1p_ref[:, 1:h + 1, 1:w + 1, :] = h1.astype(cdt).reshape(nb, h, w, cmid)

    def tap(dy, dx):
        return h1p_ref[:, dy:dy + h, dx:dx + w, :].reshape(m, cmid)

    offsets = [(dy, dx) for dy in range(3) for dx in range(3)]

    # ---- conv2 (3x3) + BN2 + ReLU ----
    if tap_accumulate:
        # v7x-friendly: 9 accumulating tap matmuls (MRB accumulates in place),
        # no concat copies and no (H*W, 9*Cmid) patches buffer.
        h2 = jnp.zeros((m, cmid), jnp.float32)
        for t, (dy, dx) in enumerate(offsets):
            h2 = h2 + jnp.dot(tap(dy, dx),
                              w2_ref[t * cmid:(t + 1) * cmid, :],
                              preferred_element_type=jnp.float32)
    else:
        # v5e/v6e-friendly: ONE fat im2col matmul (single MXU push/drain).
        patches = jnp.concatenate([tap(dy, dx) for dy, dx in offsets], axis=-1)
        h2 = jnp.dot(patches, w2_ref[...], preferred_element_type=jnp.float32)
    h2 = jnp.maximum(h2 + b2_ref[...], 0.0)

    # ---- conv3 (1x1) + BN3, residual add (identity = x), final ReLU ----
    # Epilogue stays in f32 (v5e VPU/EUP have no bf16 datapath anyway).
    h3 = jnp.dot(h2.astype(cdt), w3_ref[...],
                 preferred_element_type=jnp.float32)
    y = jnp.maximum(h3 + b3_ref[...] + xv.astype(jnp.float32), 0.0)
    o_ref[...] = y.astype(o_ref.dtype).reshape(o_ref.shape)


# --------------------------- pallas wrapper -----------------------------------


def _device_kind():
    try:
        return jax.devices()[0].device_kind.lower()
    except Exception:  # pragma: no cover
        return ""


def _prefer_tap_conv2():
    k = _device_kind()
    return ("v7" in k) or ("7x" in k)


def _auto_images_per_block(n, h, w):
    # Feed the MXU >= ~2048 spatial rows per step when images are small.
    nb = max(1, min(n, 2048 // max(1, h * w)))
    while n % nb:
        nb -= 1
    return nb


def _vmem_limit_bytes(nb, h, w, cin, cmid, cout, cdt):
    cb = jnp.dtype(cdt).itemsize
    m = nb * h * w
    acts = 2 * m * (cin + cout) * cb                     # double-buffered blocks
    weights = (cin * cmid + 9 * cmid * cmid + cmid * cout) * cb \
        + (2 * cmid + cout) * 4
    scratch = nb * (h + 2) * (w + 2) * cmid * cb
    interm = m * (9 * cmid + 3 * cmid + 2 * cout) * 4    # im2col + f32 temps
    est = 2 * (acts + weights + scratch + interm) + (4 << 20)
    k = _device_kind()
    cap = (100 << 20) if ("v5" in k or "v6" in k) else (48 << 20)  # v7x: 64 MiB phys
    return int(min(max(est, 32 << 20), cap))


def _const_spec(shape, single_buffer):
    nd = len(shape)
    imap = lambda n, _nd=nd: (0,) * _nd
    if single_buffer:
        # Grid-invariant operand: one VMEM copy instead of a double buffer.
        return pl.BlockSpec(shape, imap, pipeline_mode=pl.Buffered(1))
    return pl.BlockSpec(shape, imap)


def bottleneck_forward(x_nhwc, params, *, compute_dtype=jnp.bfloat16,
                       images_per_block=None, conv2_taps=None):
    """x_nhwc: (N, H, W, Cin).  Returns (N, H, W, Cout) in x_nhwc.dtype."""
    w1, b1 = params["w1"], params["b1"]      # (Cin, Cmid), (1, Cmid)
    w2p, b2 = params["w2"], params["b2"]     # (9*Cmid, Cmid), (1, Cmid)
    w3, b3 = params["w3"], params["b3"]      # (Cmid, Cout), (1, Cout)

    N, H, W, Cin = x_nhwc.shape
    Cmid = w1.shape[1]
    Cout = w3.shape[1]
    assert Cin == Cout, "identity add needs in_planes == out_planes*EXPANSION"

    if conv2_taps is None:
        conv2_taps = _prefer_tap_conv2()
    nb = (_auto_images_per_block(N, H, W) if images_per_block is None
          else images_per_block)
    assert N % nb == 0
    grid = (N // nb,)

    cdt = compute_dtype
    args_w = (w1.astype(cdt), b1.astype(jnp.float32),
              w2p.astype(cdt), b2.astype(jnp.float32),
              w3.astype(cdt), b3.astype(jnp.float32))

    kern = functools.partial(_bottleneck_kernel, nb=nb, h=H, w=W, cin=Cin,
                             cmid=Cmid, cout=Cout, tap_accumulate=conv2_taps)

    cost = pl.CostEstimate(
        flops=int(2 * N * H * W * (Cin * Cmid + 9 * Cmid * Cmid + Cmid * Cout)),
        transcendentals=0,
        bytes_accessed=int(
            N * H * W * (Cin * jnp.dtype(x_nhwc.dtype).itemsize
                         + Cout * jnp.dtype(x_nhwc.dtype).itemsize)
            + sum(int(a.size) * jnp.dtype(a.dtype).itemsize for a in args_w)))

    def run(lane_dense, single_buffer):
        if lane_dense:
            # Lane-dense HBM blocks: last dim W*C is a multiple of 128.
            x_in = x_nhwc.reshape(N, H, W * Cin)
            in_blk = pl.BlockSpec((nb, H, W * Cin), lambda n: (n, 0, 0))
            out_blk = pl.BlockSpec((nb, H, W * Cout), lambda n: (n, 0, 0))
            out_shape = jax.ShapeDtypeStruct((N, H, W * Cout), x_nhwc.dtype)
        else:
            x_in = x_nhwc
            in_blk = pl.BlockSpec((nb, H, W, Cin), lambda n: (n, 0, 0, 0))
            out_blk = pl.BlockSpec((nb, H, W, Cout), lambda n: (n, 0, 0, 0))
            out_shape = jax.ShapeDtypeStruct((N, H, W, Cout), x_nhwc.dtype)

        in_specs = [in_blk] + [_const_spec(a.shape, single_buffer)
                               for a in args_w]

        y = pl.pallas_call(
            kern,
            out_shape=out_shape,
            grid=grid,
            in_specs=in_specs,
            out_specs=out_blk,
            scratch_shapes=[pltpu.VMEM((nb, H + 2, W + 2, Cmid), cdt)],
            compiler_params=pltpu.CompilerParams(
                dimension_semantics=("parallel",),
                vmem_limit_bytes=_vmem_limit_bytes(nb, H, W, Cin, Cmid, Cout,
                                                   cdt)),
            cost_estimate=cost,
        )(x_in, *args_w)
        return y.reshape(N, H, W, Cout)

    # Prefer lane-dense HBM blocks + single-buffered weights; fall back if this
    # Pallas/Mosaic build rejects pipeline_mode=Buffered(1) or the lane<->sublane
    # shape-cast, ending at the plain NHWC / double-buffered configuration.
    last_err = None
    for lane_dense, single_buffer in ((True, True), (True, False),
                                      (False, False)):
        try:
            return jax.block_until_ready(run(lane_dense, single_buffer))
        except Exception as e:  # pragma: no cover - feature fallback
            last_err = e
    raise last_err


# ------------------------------ BN folding ------------------------------------


def fold_bn(w, gamma, beta, mean, var, eps=1e-5):
    """Fold eval-mode BatchNorm into conv weight (..., Cout) and a bias."""
    scale = gamma / jnp.sqrt(var + eps)
    w_eff = w * scale                       # broadcast over last axis (Cout)
    b_eff = beta - mean * scale
    return w_eff.astype(jnp.float32), b_eff.reshape(1, -1).astype(jnp.float32)


# ------------------------------- reference ------------------------------------


def bottleneck_reference(x_nhwc, params_ref):
    w1, b1 = params_ref["w1"], params_ref["b1"]
    w2, b2 = params_ref["w2"], params_ref["b2"]   # w2: (3,3,Ci,Co)  HWIO
    w3, b3 = params_ref["w3"], params_ref["b3"]
    h1 = jax.nn.relu(jnp.einsum("nhwc,cd->nhwd", x_nhwc, w1) + b1[0])
    h2 = lax.conv_general_dilated(
        h1, w2, window_strides=(1, 1), padding=((1, 1), (1, 1)),
        dimension_numbers=("NHWC", "HWIO", "NHWC"))
    h2 = jax.nn.relu(h2 + b2[0])
    h3 = jnp.einsum("nhwc,cd->nhwd", h2, w3) + b3[0]
    return jax.nn.relu(x_nhwc + h3)


# --------------------------------- main ----------------------------------------


if __name__ == "__main__":
    # Module config (defaults): out_planes=4 -> Cout = 4*EXPANSION = 16,
    # in_planes must equal 16 so the no-downsample identity add is valid.
    # width = int(out_planes * (64 // 64)) * groups = 4.
    N, H, W = 2, 16, 16
    out_planes, expansion, groups, width_per_group = 4, 4, 1, 64
    in_planes = out_planes * expansion                          # 16
    width = int(out_planes * (width_per_group // 64)) * groups  # 4
    out_ch = out_planes * expansion                             # 16
    eps = 1e-5

    key = jax.random.PRNGKey(0)
    keys = jax.random.split(key, 8)

    # Conv weights in PyTorch layout, then converted.
    conv1_w = 0.1 * jax.random.normal(keys[0], (width, in_planes, 1, 1), jnp.float32)
    conv2_w = 0.1 * jax.random.normal(keys[1], (width, width, 3, 3), jnp.float32)
    conv3_w = 0.1 * jax.random.normal(keys[2], (out_ch, width, 1, 1), jnp.float32)

    def bn_params(k, c):
        k1, k2, k3, k4 = jax.random.split(k, 4)
        gamma = 1.0 + 0.05 * jax.random.normal(k1, (c,), jnp.float32)
        beta = 0.05 * jax.random.normal(k2, (c,), jnp.float32)
        mean = 0.05 * jax.random.normal(k3, (c,), jnp.float32)
        var = jnp.abs(jax.random.normal(k4, (c,), jnp.float32)) + 0.5
        return gamma, beta, mean, var

    g1, be1, m1, v1 = bn_params(keys[3], width)
    g2, be2, m2, v2 = bn_params(keys[4], width)
    g3, be3, m3, v3 = bn_params(keys[5], out_ch)

    # PyTorch (Cout, Cin, kh, kw) -> kernel layouts.
    w1 = jnp.transpose(conv1_w[:, :, 0, 0], (1, 0))   # (Cin, width)
    w2 = jnp.transpose(conv2_w, (2, 3, 1, 0))         # (3, 3, width, width) HWIO
    w3 = jnp.transpose(conv3_w[:, :, 0, 0], (1, 0))   # (width, out_ch)

    w1f, b1f = fold_bn(w1, g1, be1, m1, v1, eps)
    w2f, b2f = fold_bn(w2, g2, be2, m2, v2, eps)
    w3f, b3f = fold_bn(w3, g3, be3, m3, v3, eps)

    # Pack the 3x3 weight for the in-kernel taps: rows = (dy, dx, cin).
    w2_packed = w2f.reshape(9 * width, width)

    params = {"w1": w1f, "b1": b1f, "w2": w2_packed, "b2": b2f,
              "w3": w3f, "b3": b3f}
    params_ref = {"w1": w1f, "b1": b1f, "w2": w2f, "b2": b2f,
                  "w3": w3f, "b3": b3f}

    # Input: PyTorch would see NCHW (2, 16, 16, 16); kernel layout is NHWC.
    x_nchw = jax.random.normal(keys[6], (N, in_planes, H, W), jnp.float32)
    x_nhwc = jnp.transpose(x_nchw, (0, 2, 3, 1))

    y_ref = jax.block_until_ready(bottleneck_reference(x_nhwc, params_ref))

    # f32, fat-im2col conv2 (v5e/v6e path), auto multi-image blocks.
    y_a = jax.block_until_ready(bottleneck_forward(
        x_nhwc, params, compute_dtype=jnp.float32, conv2_taps=False))
    assert y_a.shape == (N, H, W, out_ch)
    err_a = float(jnp.max(jnp.abs(y_a - y_ref)))
    assert jnp.allclose(y_a, y_ref, atol=2e-4, rtol=2e-4), err_a

    # f32, 9-tap accumulating conv2 (v7x path), one image per grid step.
    y_b = jax.block_until_ready(bottleneck_forward(
        x_nhwc, params, compute_dtype=jnp.float32, conv2_taps=True,
        images_per_block=1))
    err_b = float(jnp.max(jnp.abs(y_b - y_ref)))
    assert jnp.allclose(y_b, y_ref, atol=2e-4, rtol=2e-4), err_b

    # bf16 operands / f32 accumulation, chip-default conv2 path.
    y_c = jax.block_until_ready(bottleneck_forward(
        x_nhwc, params, compute_dtype=jnp.bfloat16))
    err_c = float(jnp.max(jnp.abs(y_c - y_ref)))
    assert jnp.allclose(y_c, y_ref, atol=5e-2, rtol=5e-2), err_c

    print("KERNEL_OK")
</pallas_src>

<mosaic_0001>
module attributes {stable_mosaic.version = 11 : i64} {
  func.func @_bottleneck_kernel(%arg0: i32, %arg1: memref<2x16x256xf32, #tpu.memory_space<vmem>>, %arg2: memref<16x4xf32, #tpu.memory_space<vmem>>, %arg3: memref<1x4xf32, #tpu.memory_space<vmem>>, %arg4: memref<36x4xf32, #tpu.memory_space<vmem>>, %arg5: memref<1x4xf32, #tpu.memory_space<vmem>>, %arg6: memref<4x16xf32, #tpu.memory_space<vmem>>, %arg7: memref<1x16xf32, #tpu.memory_space<vmem>>, %arg8: memref<2x16x256xf32, #tpu.memory_space<vmem>>, %arg9: memref<2x18x18x4xf32, #tpu.memory_space<vmem>>) attributes {dimension_semantics = [#tpu.dimension_semantics<parallel>], iteration_bounds = array<i64: 1>, scalar_prefetch = 0 : i64, scratch_operands = 1 : i64, tpu.core_type = #tpu.core_type<tc>, window_params = [{transform_indices = @transform_0, window_bounds = array<i64: 2, 16, 256>}, {pipeline_mode = #tpu.pipeline_mode<synchronous>, transform_indices = @transform_1, window_bounds = array<i64: 16, 4>}, {pipeline_mode = #tpu.pipeline_mode<synchronous>, transform_indices = @transform_2, window_bounds = array<i64: 1, 4>}, {pipeline_mode = #tpu.pipeline_mode<synchronous>, transform_indices = @transform_3, window_bounds = array<i64: 36, 4>}, {pipeline_mode = #tpu.pipeline_mode<synchronous>, transform_indices = @transform_4, window_bounds = array<i64: 1, 4>}, {pipeline_mode = #tpu.pipeline_mode<synchronous>, transform_indices = @transform_5, window_bounds = array<i64: 4, 16>}, {pipeline_mode = #tpu.pipeline_mode<synchronous>, transform_indices = @transform_6, window_bounds = array<i64: 1, 16>}, {transform_indices = @transform_7, window_bounds = array<i64: 2, 16, 256>}]} {
    %c0 = arith.constant 0 : index
    %c0_0 = arith.constant 0 : index
    %c0_1 = arith.constant 0 : index
    %0 = vector.load %arg1[%c0, %c0_0, %c0_1] : memref<2x16x256xf32, #tpu.memory_space<vmem>>, vector<2x16x256xf32>
    %1 = vector.shape_cast %0 : vector<2x16x256xf32> to vector<512x16xf32>
    %c0_2 = arith.constant 0 : index
    %c0_3 = arith.constant 0 : index
    %2 = vector.load %arg2[%c0_2, %c0_3] : memref<16x4xf32, #tpu.memory_space<vmem>>, vector<16x4xf32>
    %cst = arith.constant dense<0.000000e+00> : vector<512x4xf32>
    %3 = tpu.matmul %1, %2, %cst {dimension_numbers = #tpu.dot_dimension_numbers<[1], [0], [0], [1], [0, 0, 1, 1], [], []>} : vector<512x16xf32>, vector<16x4xf32>, vector<512x4xf32> -> vector<512x4xf32>
    %c0_4 = arith.constant 0 : index
    %c0_5 = arith.constant 0 : index
    %4 = vector.load %arg3[%c0_4, %c0_5] : memref<1x4xf32, #tpu.memory_space<vmem>>, vector<1x4xf32>
    %5 = vector.broadcast %4 : vector<1x4xf32> to vector<512x4xf32>
    %6 = arith.addf %3, %5 : vector<512x4xf32>
    %cst_6 = arith.constant 0.000000e+00 : f32
    %7 = vector.broadcast %cst_6 : f32 to vector<512x4xf32>
    %8 = arith.maximumf %6, %7 : vector<512x4xf32>
    %cst_7 = arith.constant 0.000000e+00 : f32
    %9 = vector.broadcast %cst_7 : f32 to vector<2x1x18x4xf32>
    %c0_8 = arith.constant 0 : index
    %c0_9 = arith.constant 0 : index
    %c0_10 = arith.constant 0 : index
    %c0_11 = arith.constant 0 : index
    %10 = vector.load %arg9[%c0_8, %c0_9, %c0_10, %c0_11] : memref<2x18x18x4xf32, #tpu.memory_space<vmem>>, vector<2x1x18x4xf32>
    tpu.vector_store %arg9[%c0_8, %c0_9, %c0_10, %c0_11], %9 {strides = array<i32>} : memref<2x18x18x4xf32, #tpu.memory_space<vmem>>, vector<2x1x18x4xf32>,
    %c0_12 = arith.constant 0 : index
    %c17 = arith.constant 17 : index
    %c0_13 = arith.constant 0 : index
    %c0_14 = arith.constant 0 : index
    %11 = vector.load %arg9[%c0_12, %c17, %c0_13, %c0_14] : memref<2x18x18x4xf32, #tpu.memory_space<vmem>>, vector<2x1x18x4xf32>
    tpu.vector_store %arg9[%c0_12, %c17, %c0_13, %c0_14], %9 {strides = array<i32>} : memref<2x18x18x4xf32, #tpu.memory_space<vmem>>, vector<2x1x18x4xf32>,
    %cst_15 = arith.constant 0.000000e+00 : f32
    %12 = vector.broadcast %cst_15 : f32 to vector<2x18x1x4xf32>
    %c0_16 = arith.constant 0 : index
    %c0_17 = arith.constant 0 : index
    %c0_18 = arith.constant 0 : index
    %c0_19 = arith.constant 0 : index
    %13 = vector.load %arg9[%c0_16, %c0_17, %c0_18, %c0_19] : memref<2x18x18x4xf32, #tpu.memory_space<vmem>>, vector<2x18x1x4xf32>
    tpu.vector_store %arg9[%c0_16, %c0_17, %c0_18, %c0_19], %12 {strides = array<i32>} : memref<2x18x18x4xf32, #tpu.memory_space<vmem>>, vector<2x18x1x4xf32>,
    %c0_20 = arith.constant 0 : index
    %c0_21 = arith.constant 0 : index
    %c17_22 = arith.constant 17 : index
    %c0_23 = arith.constant 0 : index
    %14 = vector.load %arg9[%c0_20, %c0_21, %c17_22, %c0_23] : memref<2x18x18x4xf32, #tpu.memory_space<vmem>>, vector<2x18x1x4xf32>
    tpu.vector_store %arg9[%c0_20, %c0_21, %c17_22, %c0_23], %12 {strides = array<i32>} : memref<2x18x18x4xf32, #tpu.memory_space<vmem>>, vector<2x18x1x4xf32>,
    %15 = vector.shape_cast %8 : vector<512x4xf32> to vector<2x16x16x4xf32>
    %c0_24 = arith.constant 0 : index
    %c1 = arith.constant 1 : index
    %c1_25 = arith.constant 1 : index
    %c0_26 = arith.constant 0 : index
    %16 = vector.load %arg9[%c0_24, %c1, %c1_25, %c0_26] : memref<2x18x18x4xf32, #tpu.memory_space<vmem>>, vector<2x16x16x4xf32>
    tpu.vector_store %arg9[%c0_24, %c1, %c1_25, %c0_26], %15 {strides = array<i32>} : memref<2x18x18x4xf32, #tpu.memory_space<vmem>>, vector<2x16x16x4xf32>,
    %c0_27 = arith.constant 0 : index
    %c0_28 = arith.constant 0 : index
    %c0_29 = arith.constant 0 : index
    %c0_30 = arith.constant 0 : index
    %17 = vector.load %arg9[%c0_27, %c0_28, %c0_29, %c0_30] : memref<2x18x18x4xf32, #tpu.memory_space<vmem>>, vector<2x16x16x4xf32>
    %18 = vector.shape_cast %17 : vector<2x16x16x4xf32> to vector<512x4xf32>
    %c0_31 = arith.constant 0 : index
    %c0_32 = arith.constant 0 : index
    %c1_33 = arith.constant 1 : index
    %c0_34 = arith.constant 0 : index
    %19 = vector.load %arg9[%c0_31, %c0_32, %c1_33, %c0_34] : memref<2x18x18x4xf32, #tpu.memory_space<vmem>>, vector<2x16x16x4xf32>
    %20 = vector.shape_cast %19 : vector<2x16x16x4xf32> to vector<512x4xf32>
    %c0_35 = arith.constant 0 : index
    %c0_36 = arith.constant 0 : index
    %c2 = arith.constant 2 : index
    %c0_37 = arith.constant 0 : index
    %21 = vector.load %arg9[%c0_35, %c0_36, %c2, %c0_37] : memref<2x18x18x4xf32, #tpu.memory_space<vmem>>, vector<2x16x16x4xf32>
    %22 = vector.shape_cast %21 : vector<2x16x16x4xf32> to vector<512x4xf32>
    %c0_38 = arith.constant 0 : index
    %c1_39 = arith.constant 1 : index
    %c0_40 = arith.constant 0 : index
    %c0_41 = arith.constant 0 : index
    %23 = vector.load %arg9[%c0_38, %c1_39, %c0_40, %c0_41] : memref<2x18x18x4xf32, #tpu.memory_space<vmem>>, vector<2x16x16x4xf32>
    %24 = vector.shape_cast %23 : vector<2x16x16x4xf32> to vector<512x4xf32>
    %c0_42 = arith.constant 0 : index
    %c1_43 = arith.constant 1 : index
    %c1_44 = arith.constant 1 : index
    %c0_45 = arith.constant 0 : index
    %25 = vector.load %arg9[%c0_42, %c1_43, %c1_44, %c0_45] : memref<2x18x18x4xf32, #tpu.memory_space<vmem>>, vector<2x16x16x4xf32>
    %26 = vector.shape_cast %25 : vector<2x16x16x4xf32> to vector<512x4xf32>
    %c0_46 = arith.constant 0 : index
    %c1_47 = arith.constant 1 : index
    %c2_48 = arith.constant 2 : index
    %c0_49 = arith.constant 0 : index
    %27 = vector.load %arg9[%c0_46, %c1_47, %c2_48, %c0_49] : memref<2x18x18x4xf32, #tpu.memory_space<vmem>>, vector<2x16x16x4xf32>
    %28 = vector.shape_cast %27 : vector<2x16x16x4xf32> to vector<512x4xf32>
    %c0_50 = arith.constant 0 : index
    %c2_51 = arith.constant 2 : index
    %c0_52 = arith.constant 0 : index
    %c0_53 = arith.constant 0 : index
    %29 = vector.load %arg9[%c0_50, %c2_51, %c0_52, %c0_53] : memref<2x18x18x4xf32, #tpu.memory_space<vmem>>, vector<2x16x16x4xf32>
    %30 = vector.shape_cast %29 : vector<2x16x16x4xf32> to vector<512x4xf32>
    %c0_54 = arith.constant 0 : index
    %c2_55 = arith.constant 2 : index
    %c1_56 = arith.constant 1 : index
    %c0_57 = arith.constant 0 : index
    %31 = vector.load %arg9[%c0_54, %c2_55, %c1_56, %c0_57] : memref<2x18x18x4xf32, #tpu.memory_space<vmem>>, vector<2x16x16x4xf32>
    %32 = vector.shape_cast %31 : vector<2x16x16x4xf32> to vector<512x4xf32>
    %c0_58 = arith.constant 0 : index
    %c2_59 = arith.constant 2 : index
    %c2_60 = arith.constant 2 : index
    %c0_61 = arith.constant 0 : index
    %33 = vector.load %arg9[%c0_58, %c2_59, %c2_60, %c0_61] : memref<2x18x18x4xf32, #tpu.memory_space<vmem>>, vector<2x16x16x4xf32>
    %34 = vector.shape_cast %33 : vector<2x16x16x4xf32> to vector<512x4xf32>
    %35 = tpu.concatenate %18, %20, %22, %24, %26, %28, %30, %32, %34 in 1 : vector<512x4xf32>, vector<512x4xf32>, vector<512x4xf32>, vector<512x4xf32>, vector<512x4xf32>, vector<512x4xf32>, vector<512x4xf32>, vector<512x4xf32>, vector<512x4xf32> -> vector<512x36xf32>
    %c0_62 = arith.constant 0 : index
    %c0_63 = arith.constant 0 : index
    %36 = vector.load %arg4[%c0_62, %c0_63] : memref<36x4xf32, #tpu.memory_space<vmem>>, vector<36x4xf32>
    %cst_64 = arith.constant dense<0.000000e+00> : vector<512x4xf32>
    %37 = tpu.matmul %35, %36, %cst_64 {dimension_numbers = #tpu.dot_dimension_numbers<[1], [0], [0], [1], [0, 0, 1, 1], [], []>} : vector<512x36xf32>, vector<36x4xf32>, vector<512x4xf32> -> vector<512x4xf32>
    %c0_65 = arith.constant 0 : index
    %c0_66 = arith.constant 0 : index
    %38 = vector.load %arg5[%c0_65, %c0_66] : memref<1x4xf32, #tpu.memory_space<vmem>>, vector<1x4xf32>
    %39 = vector.broadcast %38 : vector<1x4xf32> to vector<512x4xf32>
    %40 = arith.addf %37, %39 : vector<512x4xf32>
    %cst_67 = arith.constant 0.000000e+00 : f32
    %41 = vector.broadcast %cst_67 : f32 to vector<512x4xf32>
    %42 = arith.maximumf %40, %41 : vector<512x4xf32>
    %c0_68 = arith.constant 0 : index
    %c0_69 = arith.constant 0 : index
    %43 = vector.load %arg6[%c0_68, %c0_69] : memref<4x16xf32, #tpu.memory_space<vmem>>, vector<4x16xf32>
    %cst_70 = arith.constant dense<0.000000e+00> : vector<512x16xf32>
    %44 = tpu.matmul %42, %43, %cst_70 {dimension_numbers = #tpu.dot_dimension_numbers<[1], [0], [0], [1], [0, 0, 1, 1], [], []>} : vector<512x4xf32>, vector<4x16xf32>, vector<512x16xf32> -> vector<512x16xf32>
    %c0_71 = arith.constant 0 : index
    %c0_72 = arith.constant 0 : index
    %45 = vector.load %arg7[%c0_71, %c0_72] : memref<1x16xf32, #tpu.memory_space<vmem>>, vector<1x16xf32>
    %46 = vector.broadcast %45 : vector<1x16xf32> to vector<512x16xf32>
    %47 = arith.addf %44, %46 : vector<512x16xf32>
    %48 = arith.addf %47, %1 : vector<512x16xf32>
    %cst_73 = arith.constant 0.000000e+00 : f32
    %49 = vector.broadcast %cst_73 : f32 to vector<512x16xf32>
    %50 = arith.maximumf %48, %49 : vector<512x16xf32>
    %51 = vector.shape_cast %50 : vector<512x16xf32> to vector<2x16x256xf32>
    %c0_74 = arith.constant 0 : index
    %c0_75 = arith.constant 0 : index
    %c0_76 = arith.constant 0 : index
    %52 = vector.load %arg8[%c0_74, %c0_75, %c0_76] : memref<2x16x256xf32, #tpu.memory_space<vmem>>, vector<2x16x256xf32>
    tpu.vector_store %arg8[%c0_74, %c0_75, %c0_76], %51 {strides = array<i32>} : memref<2x16x256xf32, #tpu.memory_space<vmem>>, vector<2x16x256xf32>,
    return
  }
  func.func @transform_0(%arg0: i32) -> (i32, i32, i32) {
    %c0_i32 = arith.constant 0 : i32
    %c0_i32_0 = arith.constant 0 : i32
    %c0_i32_1 = arith.constant 0 : i32
    return %arg0, %c0_i32, %c0_i32_0 : i32, i32, i32
  }
  func.func @transform_1(%arg0: i32) -> (i32, i32) {
    %c0_i32 = arith.constant 0 : i32
    %c0_i32_0 = arith.constant 0 : i32
    %c0_i32_1 = arith.constant 0 : i32
    return %c0_i32, %c0_i32_0 : i32, i32
  }
  func.func @transform_2(%arg0: i32) -> (i32, i32) {
    %c0_i32 = arith.constant 0 : i32
    %c0_i32_0 = arith.constant 0 : i32
    %c0_i32_1 = arith.constant 0 : i32
    return %c0_i32, %c0_i32_0 : i32, i32
  }
  func.func @transform_3(%arg0: i32) -> (i32, i32) {
    %c0_i32 = arith.constant 0 : i32
    %c0_i32_0 = arith.constant 0 : i32
    %c0_i32_1 = arith.constant 0 : i32
    return %c0_i32, %c0_i32_0 : i32, i32
  }
  func.func @transform_4(%arg0: i32) -> (i32, i32) {
    %c0_i32 = arith.constant 0 : i32
    %c0_i32_0 = arith.constant 0 : i32
    %c0_i32_1 = arith.constant 0 : i32
    return %c0_i32, %c0_i32_0 : i32, i32
  }
  func.func @transform_5(%arg0: i32) -> (i32, i32) {
    %c0_i32 = arith.constant 0 : i32
    %c0_i32_0 = arith.constant 0 : i32
    %c0_i32_1 = arith.constant 0 : i32
    return %c0_i32, %c0_i32_0 : i32, i32
  }
  func.func @transform_6(%arg0: i32) -> (i32, i32) {
    %c0_i32 = arith.constant 0 : i32
    %c0_i32_0 = arith.constant 0 : i32
    %c0_i32_1 = arith.constant 0 : i32
    return %c0_i32, %c0_i32_0 : i32, i32
  }
  func.func @transform_7(%arg0: i32) -> (i32, i32, i32) {
    %c0_i32 = arith.constant 0 : i32
    %c0_i32_0 = arith.constant 0 : i32
    %c0_i32_1 = arith.constant 0 : i32
    return %arg0, %c0_i32, %c0_i32_0 : i32, i32, i32
  }
}

module attributes {stable_mosaic.version = 11 : i64} {
  func.func @_bottleneck_kernel(%arg0: i32, %arg1: memref<2x16x256xf32, #tpu.memory_space<vmem>>, %arg2: memref<16x4xf32, #tpu.memory_space<vmem>>, %arg3: memref<1x4xf32, #tpu.memory_space<vmem>>, %arg4: memref<36x4xf32, #tpu.memory_space<vmem>>, %arg5: memref<1x4xf32, #tpu.memory_space<vmem>>, %arg6: memref<4x16xf32, #tpu.memory_space<vmem>>, %arg7: memref<1x16xf32, #tpu.memory_space<vmem>>, %arg8: memref<2x16x256xf32, #tpu.memory_space<vmem>>, %arg9: memref<2x18x18x4xf32, #tpu.memory_space<vmem>>) attributes {dimension_semantics = [#tpu.dimension_semantics<parallel>], iteration_bounds = array<i64: 1>, scalar_prefetch = 0 : i64, scratch_operands = 1 : i64, tpu.core_type = #tpu.core_type<tc>, window_params = [{transform_indices = @transform_0, window_bounds = array<i64: 2, 16, 256>}, {pipeline_mode = #tpu.pipeline_mode<synchronous>, transform_indices = @transform_1, window_bounds = array<i64: 16, 4>}, {pipeline_mode = #tpu.pipeline_mode<synchronous>, transform_indices = @transform_2, window_bounds = array<i64: 1, 4>}, {pipeline_mode = #tpu.pipeline_mode<synchronous>, transform_indices = @transform_3, window_bounds = array<i64: 36, 4>}, {pipeline_mode = #tpu.pipeline_mode<synchronous>, transform_indices = @transform_4, window_bounds = array<i64: 1, 4>}, {pipeline_mode = #tpu.pipeline_mode<synchronous>, transform_indices = @transform_5, window_bounds = array<i64: 4, 16>}, {pipeline_mode = #tpu.pipeline_mode<synchronous>, transform_indices = @transform_6, window_bounds = array<i64: 1, 16>}, {transform_indices = @transform_7, window_bounds = array<i64: 2, 16, 256>}]} {
    %c0 = arith.constant 0 : index
    %c0_0 = arith.constant 0 : index
    %c0_1 = arith.constant 0 : index
    %0 = vector.load %arg1[%c0, %c0_0, %c0_1] : memref<2x16x256xf32, #tpu.memory_space<vmem>>, vector<2x16x256xf32>
    %1 = vector.shape_cast %0 : vector<2x16x256xf32> to vector<512x16xf32>
    %c0_2 = arith.constant 0 : index
    %c0_3 = arith.constant 0 : index
    %2 = vector.load %arg2[%c0_2, %c0_3] : memref<16x4xf32, #tpu.memory_space<vmem>>, vector<16x4xf32>
    %cst = arith.constant dense<0.000000e+00> : vector<512x4xf32>
    %3 = tpu.matmul %1, %2, %cst {dimension_numbers = #tpu.dot_dimension_numbers<[1], [0], [0], [1], [0, 0, 1, 1], [], []>} : vector<512x16xf32>, vector<16x4xf32>, vector<512x4xf32> -> vector<512x4xf32>
    %c0_4 = arith.constant 0 : index
    %c0_5 = arith.constant 0 : index
    %4 = vector.load %arg3[%c0_4, %c0_5] : memref<1x4xf32, #tpu.memory_space<vmem>>, vector<1x4xf32>
    %5 = vector.broadcast %4 : vector<1x4xf32> to vector<512x4xf32>
    %6 = arith.addf %3, %5 : vector<512x4xf32>
    %cst_6 = arith.constant 0.000000e+00 : f32
    %7 = vector.broadcast %cst_6 : f32 to vector<512x4xf32>
    %8 = arith.maximumf %6, %7 : vector<512x4xf32>
    %cst_7 = arith.constant 0.000000e+00 : f32
    %9 = vector.broadcast %cst_7 : f32 to vector<2x1x18x4xf32>
    %c0_8 = arith.constant 0 : index
    %c0_9 = arith.constant 0 : index
    %c0_10 = arith.constant 0 : index
    %c0_11 = arith.constant 0 : index
    %10 = vector.load %arg9[%c0_8, %c0_9, %c0_10, %c0_11] : memref<2x18x18x4xf32, #tpu.memory_space<vmem>>, vector<2x1x18x4xf32>
    tpu.vector_store %arg9[%c0_8, %c0_9, %c0_10, %c0_11], %9 {strides = array<i32>} : memref<2x18x18x4xf32, #tpu.memory_space<vmem>>, vector<2x1x18x4xf32>,
    %c0_12 = arith.constant 0 : index
    %c17 = arith.constant 17 : index
    %c0_13 = arith.constant 0 : index
    %c0_14 = arith.constant 0 : index
    %11 = vector.load %arg9[%c0_12, %c17, %c0_13, %c0_14] : memref<2x18x18x4xf32, #tpu.memory_space<vmem>>, vector<2x1x18x4xf32>
    tpu.vector_store %arg9[%c0_12, %c17, %c0_13, %c0_14], %9 {strides = array<i32>} : memref<2x18x18x4xf32, #tpu.memory_space<vmem>>, vector<2x1x18x4xf32>,
    %cst_15 = arith.constant 0.000000e+00 : f32
    %12 = vector.broadcast %cst_15 : f32 to vector<2x18x1x4xf32>
    %c0_16 = arith.constant 0 : index
    %c0_17 = arith.constant 0 : index
    %c0_18 = arith.constant 0 : index
    %c0_19 = arith.constant 0 : index
    %13 = vector.load %arg9[%c0_16, %c0_17, %c0_18, %c0_19] : memref<2x18x18x4xf32, #tpu.memory_space<vmem>>, vector<2x18x1x4xf32>
    tpu.vector_store %arg9[%c0_16, %c0_17, %c0_18, %c0_19], %12 {strides = array<i32>} : memref<2x18x18x4xf32, #tpu.memory_space<vmem>>, vector<2x18x1x4xf32>,
    %c0_20 = arith.constant 0 : index
    %c0_21 = arith.constant 0 : index
    %c17_22 = arith.constant 17 : index
    %c0_23 = arith.constant 0 : index
    %14 = vector.load %arg9[%c0_20, %c0_21, %c17_22, %c0_23] : memref<2x18x18x4xf32, #tpu.memory_space<vmem>>, vector<2x18x1x4xf32>
    tpu.vector_store %arg9[%c0_20, %c0_21, %c17_22, %c0_23], %12 {strides = array<i32>} : memref<2x18x18x4xf32, #tpu.memory_space<vmem>>, vector<2x18x1x4xf32>,
    %15 = vector.shape_cast %8 : vector<512x4xf32> to vector<2x16x16x4xf32>
    %c0_24 = arith.constant 0 : index
    %c1 = arith.constant 1 : index
    %c1_25 = arith.constant 1 : index
    %c0_26 = arith.constant 0 : index
    %16 = vector.load %arg9[%c0_24, %c1, %c1_25, %c0_26] : memref<2x18x18x4xf32, #tpu.memory_space<vmem>>, vector<2x16x16x4xf32>
    tpu.vector_store %arg9[%c0_24, %c1, %c1_25, %c0_26], %15 {strides = array<i32>} : memref<2x18x18x4xf32, #tpu.memory_space<vmem>>, vector<2x16x16x4xf32>,
    %c0_27 = arith.constant 0 : index
    %c0_28 = arith.constant 0 : index
    %c0_29 = arith.constant 0 : index
    %c0_30 = arith.constant 0 : index
    %17 = vector.load %arg9[%c0_27, %c0_28, %c0_29, %c0_30] : memref<2x18x18x4xf32, #tpu.memory_space<vmem>>, vector<2x16x16x4xf32>
    %18 = vector.shape_cast %17 : vector<2x16x16x4xf32> to vector<512x4xf32>
    %c0_31 = arith.constant 0 : index
    %c0_32 = arith.constant 0 : index
    %c1_33 = arith.constant 1 : index
    %c0_34 = arith.constant 0 : index
    %19 = vector.load %arg9[%c0_31, %c0_32, %c1_33, %c0_34] : memref<2x18x18x4xf32, #tpu.memory_space<vmem>>, vector<2x16x16x4xf32>
    %20 = vector.shape_cast %19 : vector<2x16x16x4xf32> to vector<512x4xf32>
    %c0_35 = arith.constant 0 : index
    %c0_36 = arith.constant 0 : index
    %c2 = arith.constant 2 : index
    %c0_37 = arith.constant 0 : index
    %21 = vector.load %arg9[%c0_35, %c0_36, %c2, %c0_37] : memref<2x18x18x4xf32, #tpu.memory_space<vmem>>, vector<2x16x16x4xf32>
    %22 = vector.shape_cast %21 : vector<2x16x16x4xf32> to vector<512x4xf32>
    %c0_38 = arith.constant 0 : index
    %c1_39 = arith.constant 1 : index
    %c0_40 = arith.constant 0 : index
    %c0_41 = arith.constant 0 : index
    %23 = vector.load %arg9[%c0_38, %c1_39, %c0_40, %c0_41] : memref<2x18x18x4xf32, #tpu.memory_space<vmem>>, vector<2x16x16x4xf32>
    %24 = vector.shape_cast %23 : vector<2x16x16x4xf32> to vector<512x4xf32>
    %c0_42 = arith.constant 0 : index
    %c1_43 = arith.constant 1 : index
    %c1_44 = arith.constant 1 : index
    %c0_45 = arith.constant 0 : index
    %25 = vector.load %arg9[%c0_42, %c1_43, %c1_44, %c0_45] : memref<2x18x18x4xf32, #tpu.memory_space<vmem>>, vector<2x16x16x4xf32>
    %26 = vector.shape_cast %25 : vector<2x16x16x4xf32> to vector<512x4xf32>
    %c0_46 = arith.constant 0 : index
    %c1_47 = arith.constant 1 : index
    %c2_48 = arith.constant 2 : index
    %c0_49 = arith.constant 0 : index
    %27 = vector.load %arg9[%c0_46, %c1_47, %c2_48, %c0_49] : memref<2x18x18x4xf32, #tpu.memory_space<vmem>>, vector<2x16x16x4xf32>
    %28 = vector.shape_cast %27 : vector<2x16x16x4xf32> to vector<512x4xf32>
    %c0_50 = arith.constant 0 : index
    %c2_51 = arith.constant 2 : index
    %c0_52 = arith.constant 0 : index
    %c0_53 = arith.constant 0 : index
    %29 = vector.load %arg9[%c0_50, %c2_51, %c0_52, %c0_53] : memref<2x18x18x4xf32, #tpu.memory_space<vmem>>, vector<2x16x16x4xf32>
    %30 = vector.shape_cast %29 : vector<2x16x16x4xf32> to vector<512x4xf32>
    %c0_54 = arith.constant 0 : index
    %c2_55 = arith.constant 2 : index
    %c1_56 = arith.constant 1 : index
    %c0_57 = arith.constant 0 : index
    %31 = vector.load %arg9[%c0_54, %c2_55, %c1_56, %c0_57] : memref<2x18x18x4xf32, #tpu.memory_space<vmem>>, vector<2x16x16x4xf32>
    %32 = vector.shape_cast %31 : vector<2x16x16x4xf32> to vector<512x4xf32>
    %c0_58 = arith.constant 0 : index
    %c2_59 = arith.constant 2 : index
    %c2_60 = arith.constant 2 : index
    %c0_61 = arith.constant 0 : index
    %33 = vector.load %arg9[%c0_58, %c2_59, %c2_60, %c0_61] : memref<2x18x18x4xf32, #tpu.memory_space<vmem>>, vector<2x16x16x4xf32>
    %34 = vector.shape_cast %33 : vector<2x16x16x4xf32> to vector<512x4xf32>
    %35 = tpu.concatenate %18, %20, %22, %24, %26, %28, %30, %32, %34 in 1 : vector<512x4xf32>, vector<512x4xf32>, vector<512x4xf32>, vector<512x4xf32>, vector<512x4xf32>, vector<512x4xf32>, vector<512x4xf32>, vector<512x4xf32>, vector<512x4xf32> -> vector<512x36xf32>
    %c0_62 = arith.constant 0 : index
    %c0_63 = arith.constant 0 : index
    %36 = vector.load %arg4[%c0_62, %c0_63] : memref<36x4xf32, #tpu.memory_space<vmem>>, vector<36x4xf32>
    %cst_64 = arith.constant dense<0.000000e+00> : vector<512x4xf32>
    %37 = tpu.matmul %35, %36, %cst_64 {dimension_numbers = #tpu.dot_dimension_numbers<[1], [0], [0], [1], [0, 0, 1, 1], [], []>} : vector<512x36xf32>, vector<36x4xf32>, vector<512x4xf32> -> vector<512x4xf32>
    %c0_65 = arith.constant 0 : index
    %c0_66 = arith.constant 0 : index
    %38 = vector.load %arg5[%c0_65, %c0_66] : memref<1x4xf32, #tpu.memory_space<vmem>>, vector<1x4xf32>
    %39 = vector.broadcast %38 : vector<1x4xf32> to vector<512x4xf32>
    %40 = arith.addf %37, %39 : vector<512x4xf32>
    %cst_67 = arith.constant 0.000000e+00 : f32
    %41 = vector.broadcast %cst_67 : f32 to vector<512x4xf32>
    %42 = arith.maximumf %40, %41 : vector<512x4xf32>
    %c0_68 = arith.constant 0 : index
    %c0_69 = arith.constant 0 : index
    %43 = vector.load %arg6[%c0_68, %c0_69] : memref<4x16xf32, #tpu.memory_space<vmem>>, vector<4x16xf32>
    %cst_70 = arith.constant dense<0.000000e+00> : vector<512x16xf32>
    %44 = tpu.matmul %42, %43, %cst_70 {dimension_numbers = #tpu.dot_dimension_numbers<[1], [0], [0], [1], [0, 0, 1, 1], [], []>} : vector<512x4xf32>, vector<4x16xf32>, vector<512x16xf32> -> vector<512x16xf32>
    %c0_71 = arith.constant 0 : index
    %c0_72 = arith.constant 0 : index
    %45 = vector.load %arg7[%c0_71, %c0_72] : memref<1x16xf32, #tpu.memory_space<vmem>>, vector<1x16xf32>
    %46 = vector.broadcast %45 : vector<1x16xf32> to vector<512x16xf32>
    %47 = arith.addf %44, %46 : vector<512x16xf32>
    %48 = arith.addf %47, %1 : vector<512x16xf32>
    %cst_73 = arith.constant 0.000000e+00 : f32
    %49 = vector.broadcast %cst_73 : f32 to vector<512x16xf32>
    %50 = arith.maximumf %48, %49 : vector<512x16xf32>
    %51 = vector.shape_cast %50 : vector<512x16xf32> to vector<2x16x256xf32>
    %c0_74 = arith.constant 0 : index
    %c0_75 = arith.constant 0 : index
    %c0_76 = arith.constant 0 : index
    %52 = vector.load %arg8[%c0_74, %c0_75, %c0_76] : memref<2x16x256xf32, #tpu.memory_space<vmem>>, vector<2x16x256xf32>
    tpu.vector_store %arg8[%c0_74, %c0_75, %c0_76], %51 {strides = array<i32>} : memref<2x16x256xf32, #tpu.memory_space<vmem>>, vector<2x16x256xf32>,
    return
  }
  func.func @transform_0(%arg0: i32) -> (i32, i32, i32) {
    %c0_i32 = arith.constant 0 : i32
    %c0_i32_0 = arith.constant 0 : i32
    %c0_i32_1 = arith.constant 0 : i32
    return %arg0, %c0_i32, %c0_i32_0 : i32, i32, i32
  }
  func.func @transform_1(%arg0: i32) -> (i32, i32) {
    %c0_i32 = arith.constant 0 : i32
    %c0_i32_0 = arith.constant 0 : i32
    %c0_i32_1 = arith.constant 0 : i32
    return %c0_i32, %c0_i32_0 : i32, i32
  }
  func.func @transform_2(%arg0: i32) -> (i32, i32) {
    %c0_i32 = arith.constant 0 : i32
    %c0_i32_0 = arith.constant 0 : i32
    %c0_i32_1 = arith.constant 0 : i32
    return %c0_i32, %c0_i32_0 : i32, i32
  }
  func.func @transform_3(%arg0: i32) -> (i32, i32) {
    %c0_i32 = arith.constant 0 : i32
    %c0_i32_0 = arith.constant 0 : i32
    %c0_i32_1 = arith.constant 0 : i32
    return %c0_i32, %c0_i32_0 : i32, i32
  }
  func.func @transform_4(%arg0: i32) -> (i32, i32) {
    %c0_i32 = arith.constant 0 : i32
    %c0_i32_0 = arith.constant 0 : i32
    %c0_i32_1 = arith.constant 0 : i32
    return %c0_i32, %c0_i32_0 : i32, i32
  }
  func.func @transform_5(%arg0: i32) -> (i32, i32) {
    %c0_i32 = arith.constant 0 : i32
    %c0_i32_0 = arith.constant 0 : i32
    %c0_i32_1 = arith.constant 0 : i32
    return %c0_i32, %c0_i32_0 : i32, i32
  }
  func.func @transform_6(%arg0: i32) -> (i32, i32) {
    %c0_i32 = arith.constant 0 : i32
    %c0_i32_0 = arith.constant 0 : i32
    %c0_i32_1 = arith.constant 0 : i32
    return %c0_i32, %c0_i32_0 : i32, i32
  }
  func.func @transform_7(%arg0: i32) -> (i32, i32, i32) {
    %c0_i32 = arith.constant 0 : i32
    %c0_i32_0 = arith.constant 0 : i32
    %c0_i32_1 = arith.constant 0 : i32
    return %arg0, %c0_i32, %c0_i32_0 : i32, i32, i32
  }
}

module attributes {stable_mosaic.version = 11 : i64} {
  func.func @_bottleneck_kernel(%arg0: i32, %arg1: memref<2x16x16x16xf32, #tpu.memory_space<vmem>>, %arg2: memref<16x4xf32, #tpu.memory_space<vmem>>, %arg3: memref<1x4xf32, #tpu.memory_space<vmem>>, %arg4: memref<36x4xf32, #tpu.memory_space<vmem>>, %arg5: memref<1x4xf32, #tpu.memory_space<vmem>>, %arg6: memref<4x16xf32, #tpu.memory_space<vmem>>, %arg7: memref<1x16xf32, #tpu.memory_space<vmem>>, %arg8: memref<2x16x16x16xf32, #tpu.memory_space<vmem>>, %arg9: memref<2x18x18x4xf32, #tpu.memory_space<vmem>>) attributes {dimension_semantics = [#tpu.dimension_semantics<parallel>], iteration_bounds = array<i64: 1>, scalar_prefetch = 0 : i64, scratch_operands = 1 : i64, tpu.core_type = #tpu.core_type<tc>, window_params = [{transform_indices = @transform_0, window_bounds = array<i64: 2, 16, 16, 16>}, {pipeline_mode = #tpu.pipeline_mode<synchronous>, transform_indices = @transform_1, window_bounds = array<i64: 16, 4>}, {pipeline_mode = #tpu.pipeline_mode<synchronous>, transform_indices = @transform_2, window_bounds = array<i64: 1, 4>}, {pipeline_mode = #tpu.pipeline_mode<synchronous>, transform_indices = @transform_3, window_bounds = array<i64: 36, 4>}, {pipeline_mode = #tpu.pipeline_mode<synchronous>, transform_indices = @transform_4, window_bounds = array<i64: 1, 4>}, {pipeline_mode = #tpu.pipeline_mode<synchronous>, transform_indices = @transform_5, window_bounds = array<i64: 4, 16>}, {pipeline_mode = #tpu.pipeline_mode<synchronous>, transform_indices = @transform_6, window_bounds = array<i64: 1, 16>}, {transform_indices = @transform_7, window_bounds = array<i64: 2, 16, 16, 16>}]} {
    %c0 = arith.constant 0 : index
    %c0_0 = arith.constant 0 : index
    %c0_1 = arith.constant 0 : index
    %c0_2 = arith.constant 0 : index
    %0 = vector.load %arg1[%c0, %c0_0, %c0_1, %c0_2] : memref<2x16x16x16xf32, #tpu.memory_space<vmem>>, vector<2x16x16x16xf32>
    %1 = vector.shape_cast %0 : vector<2x16x16x16xf32> to vector<512x16xf32>
    %c0_3 = arith.constant 0 : index
    %c0_4 = arith.constant 0 : index
    %2 = vector.load %arg2[%c0_3, %c0_4] : memref<16x4xf32, #tpu.memory_space<vmem>>, vector<16x4xf32>
    %cst = arith.constant dense<0.000000e+00> : vector<512x4xf32>
    %3 = tpu.matmul %1, %2, %cst {dimension_numbers = #tpu.dot_dimension_numbers<[1], [0], [0], [1], [0, 0, 1, 1], [], []>} : vector<512x16xf32>, vector<16x4xf32>, vector<512x4xf32> -> vector<512x4xf32>
    %c0_5 = arith.constant 0 : index
    %c0_6 = arith.constant 0 : index
    %4 = vector.load %arg3[%c0_5, %c0_6] : memref<1x4xf32, #tpu.memory_space<vmem>>, vector<1x4xf32>
    %5 = vector.broadcast %4 : vector<1x4xf32> to vector<512x4xf32>
    %6 = arith.addf %3, %5 : vector<512x4xf32>
    %cst_7 = arith.constant 0.000000e+00 : f32
    %7 = vector.broadcast %cst_7 : f32 to vector<512x4xf32>
    %8 = arith.maximumf %6, %7 : vector<512x4xf32>
    %cst_8 = arith.constant 0.000000e+00 : f32
    %9 = vector.broadcast %cst_8 : f32 to vector<2x1x18x4xf32>
    %c0_9 = arith.constant 0 : index
    %c0_10 = arith.constant 0 : index
    %c0_11 = arith.constant 0 : index
    %c0_12 = arith.constant 0 : index
    %10 = vector.load %arg9[%c0_9, %c0_10, %c0_11, %c0_12] : memref<2x18x18x4xf32, #tpu.memory_space<vmem>>, vector<2x1x18x4xf32>
    tpu.vector_store %arg9[%c0_9, %c0_10, %c0_11, %c0_12], %9 {strides = array<i32>} : memref<2x18x18x4xf32, #tpu.memory_space<vmem>>, vector<2x1x18x4xf32>,
    %c0_13 = arith.constant 0 : index
    %c17 = arith.constant 17 : index
    %c0_14 = arith.constant 0 : index
    %c0_15 = arith.constant 0 : index
    %11 = vector.load %arg9[%c0_13, %c17, %c0_14, %c0_15] : memref<2x18x18x4xf32, #tpu.memory_space<vmem>>, vector<2x1x18x4xf32>
    tpu.vector_store %arg9[%c0_13, %c17, %c0_14, %c0_15], %9 {strides = array<i32>} : memref<2x18x18x4xf32, #tpu.memory_space<vmem>>, vector<2x1x18x4xf32>,
    %cst_16 = arith.constant 0.000000e+00 : f32
    %12 = vector.broadcast %cst_16 : f32 to vector<2x18x1x4xf32>
    %c0_17 = arith.constant 0 : index
    %c0_18 = arith.constant 0 : index
    %c0_19 = arith.constant 0 : index
    %c0_20 = arith.constant 0 : index
    %13 = vector.load %arg9[%c0_17, %c0_18, %c0_19, %c0_20] : memref<2x18x18x4xf32, #tpu.memory_space<vmem>>, vector<2x18x1x4xf32>
    tpu.vector_store %arg9[%c0_17, %c0_18, %c0_19, %c0_20], %12 {strides = array<i32>} : memref<2x18x18x4xf32, #tpu.memory_space<vmem>>, vector<2x18x1x4xf32>,
    %c0_21 = arith.constant 0 : index
    %c0_22 = arith.constant 0 : index
    %c17_23 = arith.constant 17 : index
    %c0_24 = arith.constant 0 : index
    %14 = vector.load %arg9[%c0_21, %c0_22, %c17_23, %c0_24] : memref<2x18x18x4xf32, #tpu.memory_space<vmem>>, vector<2x18x1x4xf32>
    tpu.vector_store %arg9[%c0_21, %c0_22, %c17_23, %c0_24], %12 {strides = array<i32>} : memref<2x18x18x4xf32, #tpu.memory_space<vmem>>, vector<2x18x1x4xf32>,
    %15 = vector.shape_cast %8 : vector<512x4xf32> to vector<2x16x16x4xf32>
    %c0_25 = arith.constant 0 : index
    %c1 = arith.constant 1 : index
    %c1_26 = arith.constant 1 : index
    %c0_27 = arith.constant 0 : index
    %16 = vector.load %arg9[%c0_25, %c1, %c1_26, %c0_27] : memref<2x18x18x4xf32, #tpu.memory_space<vmem>>, vector<2x16x16x4xf32>
    tpu.vector_store %arg9[%c0_25, %c1, %c1_26, %c0_27], %15 {strides = array<i32>} : memref<2x18x18x4xf32, #tpu.memory_space<vmem>>, vector<2x16x16x4xf32>,
    %c0_28 = arith.constant 0 : index
    %c0_29 = arith.constant 0 : index
    %c0_30 = arith.constant 0 : index
    %c0_31 = arith.constant 0 : index
    %17 = vector.load %arg9[%c0_28, %c0_29, %c0_30, %c0_31] : memref<2x18x18x4xf32, #tpu.memory_space<vmem>>, vector<2x16x16x4xf32>
    %18 = vector.shape_cast %17 : vector<2x16x16x4xf32> to vector<512x4xf32>
    %c0_32 = arith.constant 0 : index
    %c0_33 = arith.constant 0 : index
    %c1_34 = arith.constant 1 : index
    %c0_35 = arith.constant 0 : index
    %19 = vector.load %arg9[%c0_32, %c0_33, %c1_34, %c0_35] : memref<2x18x18x4xf32, #tpu.memory_space<vmem>>, vector<2x16x16x4xf32>
    %20 = vector.shape_cast %19 : vector<2x16x16x4xf32> to vector<512x4xf32>
    %c0_36 = arith.constant 0 : index
    %c0_37 = arith.constant 0 : index
    %c2 = arith.constant 2 : index
    %c0_38 = arith.constant 0 : index
    %21 = vector.load %arg9[%c0_36, %c0_37, %c2, %c0_38] : memref<2x18x18x4xf32, #tpu.memory_space<vmem>>, vector<2x16x16x4xf32>
    %22 = vector.shape_cast %21 : vector<2x16x16x4xf32> to vector<512x4xf32>
    %c0_39 = arith.constant 0 : index
    %c1_40 = arith.constant 1 : index
    %c0_41 = arith.constant 0 : index
    %c0_42 = arith.constant 0 : index
    %23 = vector.load %arg9[%c0_39, %c1_40, %c0_41, %c0_42] : memref<2x18x18x4xf32, #tpu.memory_space<vmem>>, vector<2x16x16x4xf32>
    %24 = vector.shape_cast %23 : vector<2x16x16x4xf32> to vector<512x4xf32>
    %c0_43 = arith.constant 0 : index
    %c1_44 = arith.constant 1 : index
    %c1_45 = arith.constant 1 : index
    %c0_46 = arith.constant 0 : index
    %25 = vector.load %arg9[%c0_43, %c1_44, %c1_45, %c0_46] : memref<2x18x18x4xf32, #tpu.memory_space<vmem>>, vector<2x16x16x4xf32>
    %26 = vector.shape_cast %25 : vector<2x16x16x4xf32> to vector<512x4xf32>
    %c0_47 = arith.constant 0 : index
    %c1_48 = arith.constant 1 : index
    %c2_49 = arith.constant 2 : index
    %c0_50 = arith.constant 0 : index
    %27 = vector.load %arg9[%c0_47, %c1_48, %c2_49, %c0_50] : memref<2x18x18x4xf32, #tpu.memory_space<vmem>>, vector<2x16x16x4xf32>
    %28 = vector.shape_cast %27 : vector<2x16x16x4xf32> to vector<512x4xf32>
    %c0_51 = arith.constant 0 : index
    %c2_52 = arith.constant 2 : index
    %c0_53 = arith.constant 0 : index
    %c0_54 = arith.constant 0 : index
    %29 = vector.load %arg9[%c0_51, %c2_52, %c0_53, %c0_54] : memref<2x18x18x4xf32, #tpu.memory_space<vmem>>, vector<2x16x16x4xf32>
    %30 = vector.shape_cast %29 : vector<2x16x16x4xf32> to vector<512x4xf32>
    %c0_55 = arith.constant 0 : index
    %c2_56 = arith.constant 2 : index
    %c1_57 = arith.constant 1 : index
    %c0_58 = arith.constant 0 : index
    %31 = vector.load %arg9[%c0_55, %c2_56, %c1_57, %c0_58] : memref<2x18x18x4xf32, #tpu.memory_space<vmem>>, vector<2x16x16x4xf32>
    %32 = vector.shape_cast %31 : vector<2x16x16x4xf32> to vector<512x4xf32>
    %c0_59 = arith.constant 0 : index
    %c2_60 = arith.constant 2 : index
    %c2_61 = arith.constant 2 : index
    %c0_62 = arith.constant 0 : index
    %33 = vector.load %arg9[%c0_59, %c2_60, %c2_61, %c0_62] : memref<2x18x18x4xf32, #tpu.memory_space<vmem>>, vector<2x16x16x4xf32>
    %34 = vector.shape_cast %33 : vector<2x16x16x4xf32> to vector<512x4xf32>
    %35 = tpu.concatenate %18, %20, %22, %24, %26, %28, %30, %32, %34 in 1 : vector<512x4xf32>, vector<512x4xf32>, vector<512x4xf32>, vector<512x4xf32>, vector<512x4xf32>, vector<512x4xf32>, vector<512x4xf32>, vector<512x4xf32>, vector<512x4xf32> -> vector<512x36xf32>
    %c0_63 = arith.constant 0 : index
    %c0_64 = arith.constant 0 : index
    %36 = vector.load %arg4[%c0_63, %c0_64] : memref<36x4xf32, #tpu.memory_space<vmem>>, vector<36x4xf32>
    %cst_65 = arith.constant dense<0.000000e+00> : vector<512x4xf32>
    %37 = tpu.matmul %35, %36, %cst_65 {dimension_numbers = #tpu.dot_dimension_numbers<[1], [0], [0], [1], [0, 0, 1, 1], [], []>} : vector<512x36xf32>, vector<36x4xf32>, vector<512x4xf32> -> vector<512x4xf32>
    %c0_66 = arith.constant 0 : index
    %c0_67 = arith.constant 0 : index
    %38 = vector.load %arg5[%c0_66, %c0_67] : memref<1x4xf32, #tpu.memory_space<vmem>>, vector<1x4xf32>
    %39 = vector.broadcast %38 : vector<1x4xf32> to vector<512x4xf32>
    %40 = arith.addf %37, %39 : vector<512x4xf32>
    %cst_68 = arith.constant 0.000000e+00 : f32
    %41 = vector.broadcast %cst_68 : f32 to vector<512x4xf32>
    %42 = arith.maximumf %40, %41 : vector<512x4xf32>
    %c0_69 = arith.constant 0 : index
    %c0_70 = arith.constant 0 : index
    %43 = vector.load %arg6[%c0_69, %c0_70] : memref<4x16xf32, #tpu.memory_space<vmem>>, vector<4x16xf32>
    %cst_71 = arith.constant dense<0.000000e+00> : vector<512x16xf32>
    %44 = tpu.matmul %42, %43, %cst_71 {dimension_numbers = #tpu.dot_dimension_numbers<[1], [0], [0], [1], [0, 0, 1, 1], [], []>} : vector<512x4xf32>, vector<4x16xf32>, vector<512x16xf32> -> vector<512x16xf32>
    %c0_72 = arith.constant 0 : index
    %c0_73 = arith.constant 0 : index
    %45 = vector.load %arg7[%c0_72, %c0_73] : memref<1x16xf32, #tpu.memory_space<vmem>>, vector<1x16xf32>
    %46 = vector.broadcast %45 : vector<1x16xf32> to vector<512x16xf32>
    %47 = arith.addf %44, %46 : vector<512x16xf32>
    %48 = arith.addf %47, %1 : vector<512x16xf32>
    %cst_74 = arith.constant 0.000000e+00 : f32
    %49 = vector.broadcast %cst_74 : f32 to vector<512x16xf32>
    %50 = arith.maximumf %48, %49 : vector<512x16xf32>
    %51 = vector.shape_cast %50 : vector<512x16xf32> to vector<2x16x16x16xf32>
    %c0_75 = arith.constant 0 : index
    %c0_76 = arith.constant 0 : index
    %c0_77 = arith.constant 0 : index
    %c0_78 = arith.constant 0 : index
    %52 = vector.load %arg8[%c0_75, %c0_76, %c0_77, %c0_78] : memref<2x16x16x16xf32, #tpu.memory_space<vmem>>, vector<2x16x16x16xf32>
    tpu.vector_store %arg8[%c0_75, %c0_76, %c0_77, %c0_78], %51 {strides = array<i32>} : memref<2x16x16x16xf32, #tpu.memory_space<vmem>>, vector<2x16x16x16xf32>,
    return
  }
  func.func @transform_0(%arg0: i32) -> (i32, i32, i32, i32) {
    %c0_i32 = arith.constant 0 : i32
    %c0_i32_0 = arith.constant 0 : i32
    %c0_i32_1 = arith.constant 0 : i32
    %c0_i32_2 = arith.constant 0 : i32
    return %arg0, %c0_i32, %c0_i32_0, %c0_i32_1 : i32, i32, i32, i32
  }
  func.func @transform_1(%arg0: i32) -> (i32, i32) {
    %c0_i32 = arith.constant 0 : i32
    %c0_i32_0 = arith.constant 0 : i32
    %c0_i32_1 = arith.constant 0 : i32
    return %c0_i32, %c0_i32_0 : i32, i32
  }
  func.func @transform_2(%arg0: i32) -> (i32, i32) {
    %c0_i32 = arith.constant 0 : i32
    %c0_i32_0 = arith.constant 0 : i32
    %c0_i32_1 = arith.constant 0 : i32
    return %c0_i32, %c0_i32_0 : i32, i32
  }
  func.func @transform_3(%arg0: i32) -> (i32, i32) {
    %c0_i32 = arith.constant 0 : i32
    %c0_i32_0 = arith.constant 0 : i32
    %c0_i32_1 = arith.constant 0 : i32
    return %c0_i32, %c0_i32_0 : i32, i32
  }
  func.func @transform_4(%arg0: i32) -> (i32, i32) {
    %c0_i32 = arith.constant 0 : i32
    %c0_i32_0 = arith.constant 0 : i32
    %c0_i32_1 = arith.constant 0 : i32
    return %c0_i32, %c0_i32_0 : i32, i32
  }
  func.func @transform_5(%arg0: i32) -> (i32, i32) {
    %c0_i32 = arith.constant 0 : i32
    %c0_i32_0 = arith.constant 0 : i32
    %c0_i32_1 = arith.constant 0 : i32
    return %c0_i32, %c0_i32_0 : i32, i32
  }
  func.func @transform_6(%arg0: i32) -> (i32, i32) {
    %c0_i32 = arith.constant 0 : i32
    %c0_i32_0 = arith.constant 0 : i32
    %c0_i32_1 = arith.constant 0 : i32
    return %c0_i32, %c0_i32_0 : i32, i32
  }
  func.func @transform_7(%arg0: i32) -> (i32, i32, i32, i32) {
    %c0_i32 = arith.constant 0 : i32
    %c0_i32_0 = arith.constant 0 : i32
    %c0_i32_1 = arith.constant 0 : i32
    %c0_i32_2 = arith.constant 0 : i32
    return %arg0, %c0_i32, %c0_i32_0, %c0_i32_1 : i32, i32, i32, i32
  }
}

</mosaic_0001>

<bundles_post_ra>
// kernel: tpu_custom_call.1
= control target key start
LH: loop header
LB: loop body
LE: loop exit
PB: predicated region body
PF: predicated region fallthrough
CT: control target
= control target key end

     0   :  { %12 = vsyncpa [#allocation4], 0  ;;  %s8541_s0 = inlined_call_operand.hbm [shape: f32[2,16,16,16], index: 0, kind: input, shape index: {}]   ;;  %s8542_s1 = inlined_call_operand.vmem [shape: f32[16,4], index: 1, kind: input, shape index: {}]   ;;  %s8543_s2 = inlined_call_operand.vmem [shape: f32[1,4], index: 2, kind: input, shape index: {}]   ;;  %s8544_s3 = inlined_call_operand.vmem [shape: f32[36,4], index: 3, kind: input, shape index: {}]   ;;  %s8545_s4 = inlined_call_operand.vmem [shape: f32[1,4], index: 4, kind: input, shape index: {}]   ;;  %s8546_s5 = inlined_call_operand.vmem [shape: f32[4,16], index: 5, kind: input, shape index: {}]   ;;  %s8547_s6 = inlined_call_operand.vmem [shape: f32[1,16], index: 6, kind: input, shape index: {}]   ;;  %s8548_s7 = inlined_call_operand.hbm [shape: f32[2,16,16,16], index: 7, kind: output, shape index: {}]  }
   0x1   :  { %13 = vsyncpa [#allocation5], 0  ;;  %s18_s26 = sshll.u32 %s8541_s0, 4  ;;  %s5372_s27 = smov [#allocation3]   ;;  %s19_s26 = int_to_ptr.hbm [resolvable:$true] %s18_s26 }
   0x2   :  { %s20_s28 = sshll.u32 %s5372_s27, 4  ;;  %s5373_s29 = smov 128   ;;  %s21_s28 = int_to_ptr.vmem [resolvable:$true] %s20_s28 }
   0x3   :  { %s5374_s30 = smov 8  }
   0x4   :  { %26 = dma.hbm_to_vmem [thread:$0]  %s19_s26, 8192, %s21_s28, [#allocation4], %s5373_s29, %s5373_s29, %s5374_s30  }
   0x5   :  { %5368 = dma.done.wait [#allocation4], 8192  }
   0x6   :  { %5369 = vsyncadd [#allocation4], 4294959104  ;;  %v108_v0 = vld [vmem:[%s8542_s1 + $0x8] sm:$0xff]  ;;  %v107_v1 = vld [vmem:[%s8542_s1] sm:$0xff]  ;;  %vm113_vm0 = vcmask 130048   ;;  %vm579_vm1 = vcmask 31744  }
   0x7   :  { %320 = vmatpush.msra.mxu0 %v108_v0  ;;  %5168 = vmatpush.msra.mxu3 %v108_v0  ;;  %v43_v2 = vld [vmem:[#allocation3] sm:$0xff]  ;;  %v92_v3 = vld [vmem:[#allocation3 + $0x188] sm:$0xff]  ;;  %v93_v5 = vld [vmem:[#allocation3 + $0x190] sm:$0xff]  ;;  %v5375_v18 = vmov 0.0   ;;  %vm582_vm2 = vcmask 25600   ;;  %s5376_s0 = smov 4  }
   0x8   :  { %v44_v4 = vld [vmem:[#allocation3 + $0x8] sm:$0xff]  ;;  %v45_v6 = vld [vmem:[#allocation3 + $0x10] sm:$0xff]  ;;  %v94_v7 = vld [vmem:[#allocation3 + $0x198] sm:$0xff]  ;;  %580 = vst.msk [vmem:[#allocation2] sm:$0xff] %vm579_vm1, %v5375_v18  ;;  %vm594_vm3 = vcmask 24576   ;;  %s5377_s13 = smov 16  }
   0x9   :  { %321 = vmatpush.msra.mxu0 %v107_v1  ;;  %5169 = vmatpush.msra.mxu3 %v107_v1  ;;  %v46_v8 = vld [vmem:[#allocation3 + $0x18] sm:$0xff]  ;;  %v95_v9 = vld [vmem:[#allocation3 + $0x1a0] sm:$0xff]  ;;  %v96_v11 = vld [vmem:[#allocation3 + $0x1a8] sm:$0xff]  ;;  %581 = vst.msk [vmem:[#allocation2 + $0x8] sm:$0xff] %vm579_vm1, %v5375_v18  ;;  %s5378_s14 = smov 12   ;;  %s5380_s17 = smov 28  }
   0xa   :  { %4974 = vmatmul.msk.f32.vlgmr.msra.gmra.mxu0 %vm113_vm0, %v43_v2  ;;  %5023 = vmatmul.msk.f32.vlgmr.msra.gmra.mxu3 %vm113_vm0, %v92_v3  ;;  %v47_v10 = vld [vmem:[#allocation3 + $0x20] sm:$0xff]  ;;  %v48_v12 = vld [vmem:[#allocation3 + $0x28] sm:$0xff]  ;;  %v97_v13 = vld [vmem:[#allocation3 + $0x1b0] sm:$0xff]  ;;  %584 = vst.msk [vmem:[#allocation2 + $0x1b0] sm:$0xff] %vm579_vm1, %v5375_v18  ;;  %s5381_s18 = smov 24   ;;  %s5382_s19 = smov 32  }
   0xb   :  { %v49_v14 = vld [vmem:[#allocation3 + $0x30] sm:$0xff]  ;;  %v98_v15 = vld [vmem:[#allocation3 + $0x1b8] sm:$0xff]  ;;  %v51_v17 = vld [vmem:[#allocation3 + $0x40] sm:$0xff]  ;;  %585 = vst.msk [vmem:[#allocation2 + $0x1b8] sm:$0xff] %vm579_vm1, %v5375_v18  ;;  %vm4077_vm4 = vcmask 1043456   ;;  %vm3421_vm5 = vcmask 64512  }
   0xc   :  { %v50_v16 = vld [vmem:[#allocation3 + $0x38] sm:$0xff]  ;;  %v52_v19 = vld [vmem:[#allocation3 + $0x48] sm:$0xff]  ;;  %588 = vst.msk [vmem:[#allocation2 + $0x198] sm:$0xff] %vm579_vm1, %v5375_v18  ;;  %v53_v21 = vld [vmem:[#allocation3 + $0x50] sm:$0xff]  ;;  %vm3486_vm6 = vcmask 97280   ;;  %vm3680_vm7 = vcmask 195584  }
   0xd   :  { %589 = vst.msk [vmem:[#allocation2 + $0x1a0] sm:$0xff] %vm579_vm1, %v5375_v18  ;;  %v99_v24 = vld [vmem:[#allocation3 + $0x1c0] sm:$0xff]  ;;  %v54_v25 = vld [vmem:[#allocation3 + $0x58] sm:$0xff]  ;;  %v100_v28 = vld [vmem:[#allocation3 + $0x1c8] sm:$0xff]  ;;  %vm3615_vm8 = vcmask 162816   ;;  %vm3745_vm9 = vcmask 228352  }
   0xe   :  { %591 = vst.msk [vmem:[#allocation2 + $0x348] sm:$0xff] %vm579_vm1, %v5375_v18  ;;  %v55_v29 = vld [vmem:[#allocation3 + $0x60] sm:$0xff]  ;;  %v56_v32 = vld [vmem:[#allocation3 + $0x68] sm:$0xff]  ;;  %v57_v33 = vld [vmem:[#allocation3 + $0x70] sm:$0xff]  ;;  %vm3810_vm10 = vcmask 261120   ;;  %vm3884_vm11 = vcmask 293888  }
   0xf   :  { %592 = vst.msk [vmem:[#allocation2 + $0x350] sm:$0xff] %vm579_vm1, %v5375_v18  ;;  %v58_v34 = vld [vmem:[#allocation3 + $0x78] sm:$0xff]  ;;  %v5555_v35 = vld [vmem:[%s8543_s2] ss:$0 sm:$0xff]  ;;  %v101_v40 = vld [vmem:[#allocation3 + $0x1d0] sm:$0xff]  ;;  %s4961_s20 = sshll.u32 %s8548_s7, 4  ;;  %s4962_s20 = int_to_ptr.hbm [resolvable:$true] %s4961_s20 }
  0x10   :  { %v796_v20 = vld [vmem:[#allocation2 + $0x1] sm:$0xff]  ;;  %583 = vst.msk [vmem:[#allocation2 + $0x10] sm:$0x3] %vm582_vm2, %v5375_v18  ;;  %v102_v45 = vld [vmem:[#allocation3 + $0x1d8] sm:$0xff]  ;;  %v61_v48 = vld [vmem:[#allocation3 + $0x90] sm:$0xff] }
  0x11   :  { %1373 = vrot.lane.b32.xlu0 %v796_v20, %s5376_s0  ;;  %586 = vst.msk [vmem:[#allocation2 + $0x1c0] sm:$0x3] %vm582_vm2, %v5375_v18  ;;  %v860_v22 = vld [vmem:[#allocation2 + $0x2] sm:$0xff]  ;;  %v62_v52 = vld [vmem:[#allocation3 + $0x98] sm:$0xff]  ;;  %v65_v20 = vld [vmem:[#allocation3 + $0xb0] sm:$0xff] }
  0x12   :  { %4975 = vmatmul.msk.f32.gmra.mxu0 %vm113_vm0, %v44_v4  ;;  %5024 = vmatmul.msk.f32.gmra.mxu3 %vm113_vm0, %v93_v5  ;;  %590 = vst.msk [vmem:[#allocation2 + $0x1a8] sm:$0x3] %vm582_vm2, %v5375_v18  ;;  %v828_v27 = vld [vmem:[#allocation2 + $0x1b1] sm:$0xff]  ;;  %v59_v37 = vld [vmem:[#allocation3 + $0x80] sm:$0xff]  ;;  %v60_v42 = vld [vmem:[#allocation3 + $0x88] sm:$0xff] }
  0x13   :  { %593 = vst.msk [vmem:[#allocation2 + $0x358] sm:$0x3] %vm582_vm2, %v5375_v18  ;;  %1629 = vrot.lane.b32.xlu1 %v860_v22, %s5374_s30  ;;  %1437 = vrot.lane.b32.xlu2 %v828_v27, %s5376_s0  ;;  %v892_v30 = vld [vmem:[#allocation2 + $0x1b2] sm:$0xff]  ;;  %v103_v50 = vld [vmem:[#allocation3 + $0x1e0] sm:$0xff]  ;;  %v104_v57 = vld [vmem:[#allocation3 + $0x1e8] sm:$0xff] }
  0x14   :  { %631 = vst.msk [vmem:[#allocation2 + $0x11] sm:$0x1] %vm594_vm3, %v5375_v18  ;;  %v63_v60 = vld [vmem:[#allocation3 + $0xa0] sm:$0xff] }
  0x15   :  { %595 = vst.msk [vmem:[#allocation2] sm:$0x1] %vm594_vm3, %v5375_v18 }
  0x16   :  { %596 = vst.msk [vmem:[#allocation2 + $0x18] sm:$0x1] %vm594_vm3, %v5375_v18 }
  0x17   :  { %v797_v23 = vld [vmem:[#allocation2 + $0x9] sm:$0xff]  ;;  %597 = vst.msk [vmem:[#allocation2 + $0x30] sm:$0x1] %vm594_vm3, %v5375_v18 }
  0x18   :  { %v829_v26 = vld [vmem:[#allocation2 + $0x1b9] sm:$0xff]  ;;  %598 = vst.msk [vmem:[#allocation2 + $0x48] sm:$0x1] %vm594_vm3, %v5375_v18 }
  0x19   :  { %1375 = vrot.lane.b32.xlu0 %v797_v23, %s5376_s0  ;;  %599 = vst.msk [vmem:[#allocation2 + $0x60] sm:$0x1] %vm594_vm3, %v5375_v18 }
  0x1a   :  { %4976 = vmatmul.msk.f32.gmra.mxu0 %vm113_vm0, %v45_v6  ;;  %5025 = vmatmul.msk.f32.gmra.mxu3 %vm113_vm0, %v94_v7  ;;  %600 = vst.msk [vmem:[#allocation2 + $0x78] sm:$0x1] %vm594_vm3, %v5375_v18 }
  0x1b   :  { %v861_v31 = vld [vmem:[#allocation2 + $0xa] sm:$0xff]  ;;  %601 = vst.msk [vmem:[#allocation2 + $0x90] sm:$0x1] %vm594_vm3, %v5375_v18 }
  0x1c   :  { %1631 = vrot.lane.b32.xlu2 %v861_v31, %s5374_s30  ;;  %602 = vst.msk [vmem:[#allocation2 + $0xa8] sm:$0x1] %vm594_vm3, %v5375_v18 }
  0x1d   :  { %603 = vst.msk [vmem:[#allocation2 + $0xc0] sm:$0x1] %vm594_vm3, %v5375_v18 }
  0x1e   :  { %604 = vst.msk [vmem:[#allocation2 + $0xd8] sm:$0x1] %vm594_vm3, %v5375_v18 }
  0x1f   :  { %605 = vst.msk [vmem:[#allocation2 + $0xf0] sm:$0x1] %vm594_vm3, %v5375_v18 }
  0x20   :  { %606 = vst.msk [vmem:[#allocation2 + $0x108] sm:$0x1] %vm594_vm3, %v5375_v18 }
  0x21   :  { %1439 = vrot.lane.b32.xlu0 %v829_v26, %s5376_s0  ;;  %607 = vst.msk [vmem:[#allocation2 + $0x120] sm:$0x1] %vm594_vm3, %v5375_v18 }
  0x22   :  { %4977 = vmatmul.msk.f32.gmra.mxu0 %vm113_vm0, %v46_v8  ;;  %5026 = vmatmul.msk.f32.gmra.mxu3 %vm113_vm0, %v95_v9  ;;  %608 = vst.msk [vmem:[#allocation2 + $0x138] sm:$0x1] %vm594_vm3, %v5375_v18 }
  0x23   :  { %609 = vst.msk [vmem:[#allocation2 + $0x150] sm:$0x1] %vm594_vm3, %v5375_v18 }
  0x24   :  { %610 = vst.msk [vmem:[#allocation2 + $0x168] sm:$0x1] %vm594_vm3, %v5375_v18 }
  0x25   :  { %611 = vst.msk [vmem:[#allocation2 + $0x180] sm:$0x1] %vm594_vm3, %v5375_v18 }
  0x26   :  { %612 = vst.msk [vmem:[#allocation2 + $0x198] sm:$0x1] %vm594_vm3, %v5375_v18 }
  0x27   :  { %613 = vst.msk [vmem:[#allocation2 + $0x1b0] sm:$0x1] %vm594_vm3, %v5375_v18 }
  0x28   :  { %614 = vst.msk [vmem:[#allocation2 + $0x1c8] sm:$0x1] %vm594_vm3, %v5375_v18 }
  0x29   :  { %1693 = vrot.lane.b32.xlu0 %v892_v30, %s5374_s30  ;;  %615 = vst.msk [vmem:[#allocation2 + $0x1e0] sm:$0x1] %vm594_vm3, %v5375_v18 }
  0x2a   :  { %4978 = vmatmul.msk.f32.gmra.mxu0 %vm113_vm0, %v47_v10  ;;  %5027 = vmatmul.msk.f32.gmra.mxu3 %vm113_vm0, %v96_v11  ;;  %616 = vst.msk [vmem:[#allocation2 + $0x1f8] sm:$0x1] %vm594_vm3, %v5375_v18  ;;  %v64_v10 = vld [vmem:[#allocation3 + $0xa8] sm:$0xff] }
  0x2b   :  { %617 = vst.msk [vmem:[#allocation2 + $0x210] sm:$0x1] %vm594_vm3, %v5375_v18 }
  0x2c   :  { %618 = vst.msk [vmem:[#allocation2 + $0x228] sm:$0x1] %vm594_vm3, %v5375_v18 }
  0x2d   :  { %619 = vst.msk [vmem:[#allocation2 + $0x240] sm:$0x1] %vm594_vm3, %v5375_v18 }
  0x2e   :  { %620 = vst.msk [vmem:[#allocation2 + $0x258] sm:$0x1] %vm594_vm3, %v5375_v18 }
  0x2f   :  { %621 = vst.msk [vmem:[#allocation2 + $0x270] sm:$0x1] %vm594_vm3, %v5375_v18 }
  0x30   :  { %622 = vst.msk [vmem:[#allocation2 + $0x288] sm:$0x1] %vm594_vm3, %v5375_v18 }
  0x31   :  { %623 = vst.msk [vmem:[#allocation2 + $0x2a0] sm:$0x1] %vm594_vm3, %v5375_v18 }
  0x32   :  { %4979 = vmatmul.msk.f32.gmra.mxu0 %vm113_vm0, %v48_v12  ;;  %5028 = vmatmul.msk.f32.gmra.mxu3 %vm113_vm0, %v97_v13  ;;  %624 = vst.msk [vmem:[#allocation2 + $0x2b8] sm:$0x1] %vm594_vm3, %v5375_v18 }
  0x33   :  { %625 = vst.msk [vmem:[#allocation2 + $0x2d0] sm:$0x1] %vm594_vm3, %v5375_v18 }
  0x34   :  { %626 = vst.msk [vmem:[#allocation2 + $0x2e8] sm:$0x1] %vm594_vm3, %v5375_v18 }
  0x35   :  { %627 = vst.msk [vmem:[#allocation2 + $0x300] sm:$0x1] %vm594_vm3, %v5375_v18 }
  0x36   :  { %628 = vst.msk [vmem:[#allocation2 + $0x318] sm:$0x1] %vm594_vm3, %v5375_v18 }
  0x37   :  { %629 = vst.msk [vmem:[#allocation2 + $0x330] sm:$0x1] %vm594_vm3, %v5375_v18 }
  0x38   :  { %630 = vst.msk [vmem:[#allocation2 + $0x348] sm:$0x1] %vm594_vm3, %v5375_v18 }
  0x39   :  { %632 = vst.msk [vmem:[#allocation2 + $0x29] sm:$0x1] %vm594_vm3, %v5375_v18 }
  0x3a   :  { %4980 = vmatmul.msk.f32.gmra.mxu0 %vm113_vm0, %v49_v14  ;;  %5029 = vmatmul.msk.f32.gmra.mxu3 %vm113_vm0, %v98_v15  ;;  %633 = vst.msk [vmem:[#allocation2 + $0x41] sm:$0x1] %vm594_vm3, %v5375_v18 }
  0x3b   :  { %634 = vst.msk [vmem:[#allocation2 + $0x59] sm:$0x1] %vm594_vm3, %v5375_v18 }
  0x3c   :  { %635 = vst.msk [vmem:[#allocation2 + $0x71] sm:$0x1] %vm594_vm3, %v5375_v18 }
  0x3d   :  { %636 = vst.msk [vmem:[#allocation2 + $0x89] sm:$0x1] %vm594_vm3, %v5375_v18 }
  0x3e   :  { %637 = vst.msk [vmem:[#allocation2 + $0xa1] sm:$0x1] %vm594_vm3, %v5375_v18 }
  0x3f   :  { %638 = vst.msk [vmem:[#allocation2 + $0xb9] sm:$0x1] %vm594_vm3, %v5375_v18 }
  0x40   :  { %639 = vst.msk [vmem:[#allocation2 + $0xd1] sm:$0x1] %vm594_vm3, %v5375_v18 }
  0x41   :  { %640 = vst.msk [vmem:[#allocation2 + $0xe9] sm:$0x1] %vm594_vm3, %v5375_v18 }
  0x42   :  { %4981 = vmatmul.msk.f32.gmra.mxu0 %vm113_vm0, %v50_v16  ;;  %5030 = vmatmul.msk.f32.gmra.mxu3 %vm113_vm0, %v99_v24  ;;  %641 = vst.msk [vmem:[#allocation2 + $0x101] sm:$0x1] %vm594_vm3, %v5375_v18 }
  0x43   :  { %642 = vst.msk [vmem:[#allocation2 + $0x119] sm:$0x1] %vm594_vm3, %v5375_v18 }
  0x44   :  { %643 = vst.msk [vmem:[#allocation2 + $0x131] sm:$0x1] %vm594_vm3, %v5375_v18 }
  0x45   :  { %644 = vst.msk [vmem:[#allocation2 + $0x149] sm:$0x1] %vm594_vm3, %v5375_v18 }
  0x46   :  { %645 = vst.msk [vmem:[#allocation2 + $0x161] sm:$0x1] %vm594_vm3, %v5375_v18 }
  0x47   :  { %646 = vst.msk [vmem:[#allocation2 + $0x179] sm:$0x1] %vm594_vm3, %v5375_v18 }
  0x48   :  { %647 = vst.msk [vmem:[#allocation2 + $0x191] sm:$0x1] %vm594_vm3, %v5375_v18 }
  0x49   :  { %648 = vst.msk [vmem:[#allocation2 + $0x1a9] sm:$0x1] %vm594_vm3, %v5375_v18 }
  0x4a   :  { %4982 = vmatmul.msk.f32.gmra.mxu0 %vm113_vm0, %v51_v17  ;;  %5031 = vmatmul.msk.f32.gmra.mxu3 %vm113_vm0, %v100_v28  ;;  %649 = vst.msk [vmem:[#allocation2 + $0x1c1] sm:$0x1] %vm594_vm3, %v5375_v18  ;;  %v66_v28 = vld [vmem:[#allocation3 + $0xb8] sm:$0xff] }
  0x4b   :  { %650 = vst.msk [vmem:[#allocation2 + $0x1d9] sm:$0x1] %vm594_vm3, %v5375_v18 }
  0x4c   :  { %651 = vst.msk [vmem:[#allocation2 + $0x1f1] sm:$0x1] %vm594_vm3, %v5375_v18 }
  0x4d   :  { %652 = vst.msk [vmem:[#allocation2 + $0x209] sm:$0x1] %vm594_vm3, %v5375_v18 }
  0x4e   :  { %653 = vst.msk [vmem:[#allocation2 + $0x221] sm:$0x1] %vm594_vm3, %v5375_v18 }
  0x4f   :  { %654 = vst.msk [vmem:[#allocation2 + $0x239] sm:$0x1] %vm594_vm3, %v5375_v18 }
  0x50   :  { %655 = vst.msk [vmem:[#allocation2 + $0x251] sm:$0x1] %vm594_vm3, %v5375_v18 }
  0x51   :  { %656 = vst.msk [vmem:[#allocation2 + $0x269] sm:$0x1] %vm594_vm3, %v5375_v18  ;;  %v893_v53 = vld [vmem:[#allocation2 + $0x1ba] sm:$0xff] }
  0x52   :  { %4983 = vmatmul.msk.f32.gmra.mxu0 %vm113_vm0, %v52_v19  ;;  %5032 = vmatmul.msk.f32.gmra.mxu3 %vm113_vm0, %v101_v40  ;;  %657 = vst.msk [vmem:[#allocation2 + $0x281] sm:$0x1] %vm594_vm3, %v5375_v18 }
  0x53   :  { %1695 = vrot.lane.b32.xlu1 %v893_v53, %s5374_s30  ;;  %658 = vst.msk [vmem:[#allocation2 + $0x299] sm:$0x1] %vm594_vm3, %v5375_v18 }
  0x54   :  { %659 = vst.msk [vmem:[#allocation2 + $0x2b1] sm:$0x1] %vm594_vm3, %v5375_v18 }
  0x55   :  { %660 = vst.msk [vmem:[#allocation2 + $0x2c9] sm:$0x1] %vm594_vm3, %v5375_v18 }
  0x56   :  { %661 = vst.msk [vmem:[#allocation2 + $0x2e1] sm:$0x1] %vm594_vm3, %v5375_v18 }
  0x57   :  { %662 = vst.msk [vmem:[#allocation2 + $0x2f9] sm:$0x1] %vm594_vm3, %v5375_v18 }
  0x58   :  { %663 = vst.msk [vmem:[#allocation2 + $0x311] sm:$0x1] %vm594_vm3, %v5375_v18 }
  0x59   :  { %664 = vst.msk [vmem:[#allocation2 + $0x329] sm:$0x1] %vm594_vm3, %v5375_v18 }
  0x5a   :  { %4984 = vmatmul.msk.f32.gmra.mxu0 %vm113_vm0, %v53_v21  ;;  %5033 = vmatmul.msk.f32.gmra.mxu3 %vm113_vm0, %v102_v45  ;;  %665 = vst.msk [vmem:[#allocation2 + $0x341] sm:$0x1] %vm594_vm3, %v5375_v18  ;;  %v105_v45 = vld [vmem:[#allocation3 + $0x1f0] sm:$0xff] }
  0x5b   :  { %666 = vst.msk [vmem:[#allocation2 + $0x359] sm:$0x1] %vm594_vm3, %v5375_v18 }
  0x62   :  { %4985 = vmatmul.msk.f32.gmra.mxu0 %vm113_vm0, %v54_v25  ;;  %5034 = vmatmul.msk.f32.gmra.mxu3 %vm113_vm0, %v103_v50 }
  0x6a   :  { %4986 = vmatmul.msk.f32.gmra.mxu0 %vm113_vm0, %v55_v29  ;;  %5035 = vmatmul.msk.f32.gmra.mxu3 %vm113_vm0, %v104_v57  ;;  %v69_v57 = vld [vmem:[#allocation3 + $0xd0] sm:$0xff] }
  0x72   :  { %4987 = vmatmul.msk.f32.gmra.mxu0 %vm113_vm0, %v56_v32  ;;  %5036 = vmatmul.msk.f32.gmra.mxu3 %vm113_vm0, %v105_v45 }
  0x7a   :  { %4988 = vmatmul.msk.f32.gmra.mxu0 %vm113_vm0, %v57_v33 }
  0x82   :  { %4989 = vmatmul.msk.f32.gmra.mxu0 %vm113_vm0, %v58_v34 }
  0x87   :  { %v323_v36 = vpop.f32.mrf.mxu0 }
  0x88   :  { %v324_v38 = vadd.f32 %v5555_v35, %v323_v36 }
  0x8a   :  { %v515_v39 = vmax.f32 %v324_v38, 0.0  ;;  %4990 = vmatmul.msk.f32.gmra.mxu0 %vm113_vm0, %v59_v37  ;;  %v67_v37 = vld [vmem:[#allocation3 + $0xc0] sm:$0xff] }
  0x8c   :  { %668 = vst.msk [vmem:[#allocation2 + $0x19] sm:$0xff] %vm579_vm1, %v515_v39 }
  0x8d   :  { %v470_v46 = vpop.f32.mrf.mxu3 }
  0x8e   :  { %v471_v55 = vadd.f32 %v5555_v35, %v470_v46 }
  0x8f   :  { %v326_v41 = vpop.f32.mrf.mxu0 }
  0x90   :  { %v327_v54 = vadd.f32 %v5555_v35, %v326_v41  ;;  %v564_v0 = vmax.f32 %v471_v55, 0.0  ;;  %v106_v55 = vld [vmem:[#allocation3 + $0x1f8] sm:$0xff] }
  0x91   :  { %5037 = vmatmul.msk.f32.gmra.mxu3 %vm113_vm0, %v106_v55 }
  0x92   :  { %4991 = vmatmul.msk.f32.gmra.mxu0 %vm113_vm0, %v60_v42  ;;  %v516_v62 = vmax.f32 %v327_v54, 0.0  ;;  %717 = vst.msk [vmem:[#allocation2 + $0x291] sm:$0xff] %vm579_vm1, %v564_v0  ;;  %v70_v0 = vld [vmem:[#allocation3 + $0xd8] sm:$0xff] }
  0x93   :  { %v988_v43 = vld [vmem:[#allocation2 + $0x19] sm:$0xff] }
  0x94   :  { %v924_v44 = vld [vmem:[#allocation2 + $0x18] sm:$0xff]  ;;  %2141 = vrot.lane.b32.xlu0 %v988_v43, %s5377_s13  ;;  %1377 = vrot.lane.b32.xlu1 %v988_v43, %s5376_s0  ;;  %669 = vst.msk [vmem:[#allocation2 + $0x21] sm:$0xff] %vm579_vm1, %v516_v62 }
  0x95   :  { %1885 = vrot.lane.b32.xlu2 %v924_v44, %s5378_s14  ;;  %v473_v49 = vpop.f32.mrf.mxu3 }
  0x96   :  { %v474_v63 = vadd.f32 %v5555_v35, %v473_v49 }
  0x97   :  { %v329_v47 = vpop.f32.mrf.mxu0 }
  0x98   :  { %v330_v58 = vadd.f32 %v5555_v35, %v329_v47  ;;  %v565_v5 = vmax.f32 %v474_v63, 0.0  ;;  %v68_v47 = vld [vmem:[#allocation3 + $0xc8] sm:$0xff] }
  0x99   :  { %v847_v15 = vld [vmem:[#allocation2 + $0x291] sm:$0xff] }
  0x9a   :  { %4992 = vmatmul.msk.f32.gmra.mxu0 %vm113_vm0, %v61_v48  ;;  %v517_v2 = vmax.f32 %v330_v58, 0.0  ;;  %718 = vst.msk [vmem:[#allocation2 + $0x2a1] sm:$0xff] %vm579_vm1, %v565_v5  ;;  %v911_v16 = vld [vmem:[#allocation2 + $0x292] sm:$0xff] }
  0x9b   :  { %v799_v25 = vld [vmem:[#allocation2 + $0x21] sm:$0xff] }
  0x9c   :  { %670 = vst.msk [vmem:[#allocation2 + $0x31] sm:$0xff] %vm579_vm1, %v517_v2  ;;  %1475 = vrot.lane.b32.xlu0 %v847_v15, %s5376_s0  ;;  %1731 = vrot.lane.b32.xlu1 %v911_v16, %s5374_s30  ;;  %v862_v26 = vld [vmem:[#allocation2 + $0x1a] sm:$0xff]  ;;  %v863_v33 = vld [vmem:[#allocation2 + $0x22] sm:$0xff] }
  0x9d   :  { %v476_v56 = vpop.f32.mrf.mxu3  ;;  %v925_v32 = vld [vmem:[#allocation2 + $0x20] sm:$0xff] }
  0x9e   :  { %v477_v3 = vadd.f32 %v5555_v35, %v476_v56 }
  0x9f   :  { %v332_v51 = vpop.f32.mrf.mxu0 }
  0xa0   :  { %v333_v61 = vadd.f32 %v5555_v35, %v332_v51  ;;  %v566_v8 = vmax.f32 %v477_v3, 0.0 }
  0xa1   :  { %v848_v53 = vld [vmem:[#allocation2 + $0x2a1] sm:$0xff] }
  0xa2   :  { %4993 = vmatmul.msk.f32.gmra.mxu0 %vm113_vm0, %v62_v52  ;;  %v518_v4 = vmax.f32 %v333_v61, 0.0  ;;  %719 = vst.msk [vmem:[#allocation2 + $0x2a9] sm:$0xff] %vm579_vm1, %v566_v8  ;;  %v974_v62 = vld [vmem:[#allocation2 + $0x2a0] sm:$0xff] }
  0xa3   :  { %v800_v17 = vld [vmem:[#allocation2 + $0x31] sm:$0xff] }
  0xa4   :  { %671 = vst.msk [vmem:[#allocation2 + $0x39] sm:$0xff] %vm579_vm1, %v518_v4  ;;  %1381 = vrot.lane.b32.xlu2 %v800_v17, %s5376_s0  ;;  %1633 = vrot.lane.b32.xlu0 %v862_v26, %s5374_s30  ;;  %v926_v4 = vld [vmem:[#allocation2 + $0x30] sm:$0xff] }
  0xa5   :  { %v479_v7 = vpop.f32.mrf.mxu3  ;;  %1379 = vrot.lane.b32.xlu1 %v799_v25, %s5376_s0 }
  0xa6   :  { %v480_v11 = vadd.f32 %v5555_v35, %v479_v7  ;;  %v71_v7 = vld [vmem:[#allocation3 + $0xe0] sm:$0xff] }
  0xa7   :  { %v335_v59 = vpop.f32.mrf.mxu0 }
  0xa8   :  { %v336_v1 = vadd.f32 %v5555_v35, %v335_v59  ;;  %v567_v13 = vmax.f32 %v480_v11, 0.0 }
  0xa9   :  { %v849_v31 = vld [vmem:[#allocation2 + $0x2a9] sm:$0xff] }
  0xaa   :  { %4994 = vmatmul.msk.f32.gmra.mxu0 %vm113_vm0, %v63_v60  ;;  %v519_v6 = vmax.f32 %v336_v1, 0.0  ;;  %720 = vst.msk [vmem:[#allocation2 + $0x2b9] sm:$0xff] %vm579_vm1, %v567_v13  ;;  %v913_v42 = vld [vmem:[#allocation2 + $0x2aa] sm:$0xff]  ;;  %v912_v43 = vld [vmem:[#allocation2 + $0x2a2] sm:$0xff] }
  0xab   :  { %v865_v52 = vld [vmem:[#allocation2 + $0x3a] sm:$0xff]  ;;  %v975_v54 = vld [vmem:[#allocation2 + $0x2a8] sm:$0xff]  ;;  %v864_v5 = vld [vmem:[#allocation2 + $0x32] sm:$0xff] }
  0xac   :  { %672 = vst.msk [vmem:[#allocation2 + $0x49] sm:$0xff] %vm579_vm1, %v519_v6  ;;  %2145 = vrot.lane.b32.xlu2 %v800_v17, %s5377_s13  ;;  %1887 = vrot.lane.b32.xlu0 %v925_v32, %s5378_s14  ;;  %v801_v61 = vld [vmem:[#allocation2 + $0x39] sm:$0xff] }
  0xad   :  { %v482_v18 = vpop.f32.mrf.mxu3  ;;  %1635 = vrot.lane.b32.xlu1 %v863_v33, %s5374_s30 }
  0xae   :  { %v483_v21 = vadd.f32 %v5555_v35, %v482_v18 }
  0xaf   :  { %v338_v9 = vpop.f32.mrf.mxu0 }
  0xb0   :  { %v339_v12 = vadd.f32 %v5555_v35, %v338_v9  ;;  %v568_v23 = vmax.f32 %v483_v21, 0.0  ;;  %v5731_v21 = vpop.permute.xlu0 %1373 }
  0xb1   :  { %v850_v60 = vld [vmem:[#allocation2 + $0x2b9] sm:$0xff] }
  0xb2   :  { %v520_v14 = vmax.f32 %v339_v12, 0.0  ;;  %4995 = vmatmul.msk.f32.gmra.mxu0 %vm113_vm0, %v64_v10  ;;  %721 = vst.msk [vmem:[#allocation2 + $0x2c1] sm:$0xff] %vm579_vm1, %v568_v23  ;;  %v976_v3 = vld [vmem:[#allocation2 + $0x2b8] sm:$0xff] }
  0xb3   :  { %v802_v10 = vld [vmem:[#allocation2 + $0x49] sm:$0xff]  ;;  %v927_v12 = vld [vmem:[#allocation2 + $0x38] sm:$0xff] }
  0xb4   :  { %673 = vst.msk [vmem:[#allocation2 + $0x51] sm:$0xff] %vm579_vm1, %v520_v14  ;;  %1479 = vrot.lane.b32.xlu2 %v849_v31, %s5376_s0  ;;  %1735 = vrot.lane.b32.xlu0 %v913_v42, %s5374_s30  ;;  %v72_v14 = vld [vmem:[#allocation3 + $0xe8] sm:$0xff] }
  0xb5   :  { %v485_v34 = vpop.f32.mrf.mxu3  ;;  %2143 = vrot.lane.b32.xlu1 %v799_v25, %s5377_s13  ;;  %v928_v17 = vld [vmem:[#allocation2 + $0x48] sm:$0xff] }
  0xb6   :  { %v486_v38 = vadd.f32 %v5555_v35, %v485_v34 }
  0xb7   :  { %v341_v19 = vpop.f32.mrf.mxu0 }
  0xb8   :  { %v342_v22 = vadd.f32 %v5555_v35, %v341_v19  ;;  %v569_v40 = vmax.f32 %v486_v38, 0.0  ;;  %v5727_v19 = vpop.permute.xlu2 %1437  ;;  %v5745_v38 = vpop.permute.xlu0 %1375 }
  0xb9   :  { %v851_v11 = vld [vmem:[#allocation2 + $0x2c1] sm:$0xff]  ;;  %8550 = vst [vmem:[#allocation9_spill] sm:$0xff] %v5727_v19 }
  0xba   :  { %v521_v24 = vmax.f32 %v342_v22, 0.0  ;;  %4996 = vmatmul.msk.f32.gmra.mxu0 %vm113_vm0, %v65_v20  ;;  %722 = vst.msk [vmem:[#allocation2 + $0x2d1] sm:$0xff] %vm579_vm1, %v569_v40  ;;  %v914_v18 = vld [vmem:[#allocation2 + $0x2ba] sm:$0xff]  ;;  %v915_v20 = vld [vmem:[#allocation2 + $0x2c2] sm:$0xff] }
  0xbb   :  { %v977_v31 = vld [vmem:[#allocation2 + $0x2c0] sm:$0xff] }
  0xbc   :  { %674 = vst.msk [vmem:[#allocation2 + $0x61] sm:$0xff] %vm579_vm1, %v521_v24  ;;  %1733 = vrot.lane.b32.xlu2 %v912_v43, %s5374_s30  ;;  %1639 = vrot.lane.b32.xlu0 %v865_v52, %s5374_s30  ;;  %v73_v24 = vld [vmem:[#allocation3 + $0xf0] sm:$0xff] }
  0xbd   :  { %v488_v44 = vpop.f32.mrf.mxu3  ;;  %1477 = vrot.lane.b32.xlu1 %v848_v53, %s5376_s0  ;;  %v803_v43 = vld [vmem:[#allocation2 + $0x51] sm:$0xff] }
  0xbe   :  { %v489_v48 = vadd.f32 %v5555_v35, %v488_v44  ;;  %v866_v53 = vld [vmem:[#allocation2 + $0x4a] sm:$0xff] }
  0xbf   :  { %v344_v27 = vpop.f32.mrf.mxu0 }
  0xc0   :  { %v345_v29 = vadd.f32 %v5555_v35, %v344_v27  ;;  %v570_v50 = vmax.f32 %v489_v48, 0.0  ;;  %v5741_v33 = vpop.permute.xlu2 %1631 }
  0xc1   :  { %v852_v44 = vld [vmem:[#allocation2 + $0x2d1] sm:$0xff] }
  0xc2   :  { %v522_v30 = vmax.f32 %v345_v29, 0.0  ;;  %4997 = vmatmul.msk.f32.gmra.mxu0 %vm113_vm0, %v66_v28  ;;  %723 = vst.msk [vmem:[#allocation2 + $0x2d9] sm:$0xff] %vm579_vm1, %v570_v50 }
  0xc4   :  { %675 = vst.msk [vmem:[#allocation2 + $0x69] sm:$0xff] %vm579_vm1, %v522_v30  ;;  %1987 = vrot.lane.b32.xlu2 %v975_v54, %s5378_s14  ;;  %1481 = vrot.lane.b32.xlu0 %v850_v60, %s5376_s0  ;;  %v867_v30 = vld [vmem:[#allocation2 + $0x52] sm:$0xff] }
  0xc5   :  { %1985 = vrot.lane.b32.xlu1 %v974_v62, %s5378_s14  ;;  %v491_v22 = vpop.f32.mrf.mxu3  ;;  %v978_v54 = vld [vmem:[#allocation2 + $0x2d0] sm:$0xff] }
  0xc6   :  { %v492_v25 = vadd.f32 %v5555_v35, %v491_v22 }
  0xc7   :  { %v347_v36 = vpop.f32.mrf.mxu0 }
  0xc8   :  { %v348_v39 = vadd.f32 %v5555_v35, %v347_v36  ;;  %v571_v27 = vmax.f32 %v492_v25, 0.0  ;;  %v74_v36 = vld [vmem:[#allocation3 + $0xf8] sm:$0xff] }
  0xc9   :  { %v853_v29 = vld [vmem:[#allocation2 + $0x2d9] sm:$0xff] }
  0xca   :  { %v523_v41 = vmax.f32 %v348_v39, 0.0  ;;  %4998 = vmatmul.msk.f32.gmra.mxu0 %vm113_vm0, %v67_v37  ;;  %724 = vst.msk [vmem:[#allocation2 + $0x2e9] sm:$0xff] %vm579_vm1, %v571_v27  ;;  %v916_v42 = vld [vmem:[#allocation2 + $0x2d2] sm:$0xff] }
  0xcb   :  { %v979_v52 = vld [vmem:[#allocation2 + $0x2d8] sm:$0xff]  ;;  %v805_v62 = vld [vmem:[#allocation2 + $0x69] sm:$0xff] }
  0xcc   :  { %676 = vst.msk [vmem:[#allocation2 + $0x79] sm:$0xff] %vm579_vm1, %v523_v41  ;;  %1383 = vrot.lane.b32.xlu2 %v801_v61, %s5376_s0  ;;  %1989 = vrot.lane.b32.xlu0 %v976_v3, %s5378_s14 }
  0xcd   :  { %1889 = vrot.lane.b32.xlu1 %v926_v4, %s5378_s14  ;;  %v494_v32 = vpop.f32.mrf.mxu3 }
  0xce   :  { %v495_v37 = vadd.f32 %v5555_v35, %v494_v32 }
  0xcf   :  { %v350_v46 = vpop.f32.mrf.mxu0 }
  0xd0   :  { %v351_v49 = vadd.f32 %v5555_v35, %v350_v46  ;;  %v572_v40 = vmax.f32 %v495_v37, 0.0  ;;  %v75_v46 = vld [vmem:[#allocation3 + $0x100] sm:$0xff] }
  0xd2   :  { %v524_v51 = vmax.f32 %v351_v49, 0.0  ;;  %4999 = vmatmul.msk.f32.gmra.mxu0 %vm113_vm0, %v68_v47  ;;  %725 = vst.msk [vmem:[#allocation2 + $0x2f1] sm:$0xff] %vm579_vm1, %v572_v40  ;;  %v5757_v49 = vpop.permute.xlu0 %1439  ;;  %v854_v40 = vld [vmem:[#allocation2 + $0x2e9] sm:$0xff] }
  0xd3   :  { %8551 = vst [vmem:[#allocation10_spill] sm:$0xff] %v5757_v49 }
  0xd4   :  { %677 = vst.msk [vmem:[#allocation2 + $0x81] sm:$0xff] %vm579_vm1, %v524_v51  ;;  %1637 = vrot.lane.b32.xlu2 %v864_v5, %s5374_s30  ;;  %1385 = vrot.lane.b32.xlu0 %v802_v10, %s5376_s0  ;;  %v5761_v51 = vpop.permute.xlu1 %1629  ;;  %v77_v5 = vld [vmem:[#allocation3 + $0x110] sm:$0xff] }
  0xd5   :  { %1483 = vrot.lane.b32.xlu1 %v851_v11, %s5376_s0  ;;  %v868_v11 = vld [vmem:[#allocation2 + $0x62] sm:$0xff] }
  0xd7   :  { %v353_v56 = vpop.f32.mrf.mxu0 }
  0xd8   :  { %v354_v58 = vadd.f32 %v5555_v35, %v353_v56  ;;  %v76_v56 = vld [vmem:[#allocation3 + $0x108] sm:$0xff] }
  0xd9   :  { %v855_v25 = vld [vmem:[#allocation2 + $0x2f1] sm:$0xff] }
  0xda   :  { %v525_v59 = vmax.f32 %v354_v58, 0.0  ;;  %5000 = vmatmul.msk.f32.gmra.mxu0 %vm113_vm0, %v69_v57 }
  0xdc   :  { %678 = vst.msk [vmem:[#allocation2 + $0x91] sm:$0xff] %vm579_vm1, %v525_v59  ;;  %1891 = vrot.lane.b32.xlu2 %v927_v12, %s5378_s14  ;;  %1893 = vrot.lane.b32.xlu0 %v928_v17, %s5378_s14  ;;  %v497_v59 = vpop.f32.mrf.mxu3  ;;  %v5774_v3 = vpop.permute.xlu1 %1695 }
  0xdd   :  { %1737 = vrot.lane.b32.xlu1 %v914_v18, %s5374_s30  ;;  %v498_v61 = vadd.f32 %v5555_v35, %v497_v59  ;;  %8553 = vst [vmem:[#allocation12_spill] sm:$0xff] %v5774_v3  ;;  %v78_v18 = vld [vmem:[#allocation3 + $0x118] sm:$0xff]  ;;  %v981_v59 = vld [vmem:[#allocation2 + $0x2f0] sm:$0xff] }
  0xdf   :  { %v356_v63 = vpop.f32.mrf.mxu0 }
  0xe0   :  { %v357_v1 = vadd.f32 %v5555_v35, %v356_v63  ;;  %v5771_v63 = vpop.permute.xlu0 %1693 }
  0xe1   :  { %8552 = vst [vmem:[#allocation11_spill] sm:$0xff] %v5771_v63 }
  0xe2   :  { %v526_v2 = vmax.f32 %v357_v1, 0.0  ;;  %5001 = vmatmul.msk.f32.gmra.mxu0 %vm113_vm0, %v70_v0  ;;  %v804_v0 = vld [vmem:[#allocation2 + $0x61] sm:$0xff]  ;;  %v573_v1 = vmax.f32 %v498_v61, 0.0  ;;  %v81_v61 = vld [vmem:[#allocation3 + $0x130] sm:$0xff] }
  0xe4   :  { %679 = vst.msk [vmem:[#allocation2 + $0x99] sm:$0xff] %vm579_vm1, %v526_v2  ;;  %1739 = vrot.lane.b32.xlu2 %v915_v20, %s5374_s30  ;;  %1487 = vrot.lane.b32.xlu0 %v853_v29, %s5376_s0  ;;  %v929_v2 = vld [vmem:[#allocation2 + $0x50] sm:$0xff] }
  0xe5   :  { %1991 = vrot.lane.b32.xlu1 %v977_v31, %s5378_s14  ;;  %726 = vst.msk [vmem:[#allocation2 + $0x301] sm:$0xff] %vm579_vm1, %v573_v1 }
  0xe7   :  { %v359_v6 = vpop.f32.mrf.mxu0 }
  0xe8   :  { %v360_v8 = vadd.f32 %v5555_v35, %v359_v6 }
  0xea   :  { %v527_v9 = vmax.f32 %v360_v8, 0.0  ;;  %5002 = vmatmul.msk.f32.gmra.mxu0 %vm113_vm0, %v71_v7  ;;  %v500_v8 = vpop.f32.mrf.mxu3 }
  0xeb   :  { %v501_v10 = vadd.f32 %v5555_v35, %v500_v8  ;;  %v807_v8 = vld [vmem:[#allocation2 + $0x81] sm:$0xff] }
  0xec   :  { %680 = vst.msk [vmem:[#allocation2 + $0xa9] sm:$0xff] %vm579_vm1, %v527_v9  ;;  %1643 = vrot.lane.b32.xlu2 %v867_v30, %s5374_s30  ;;  %1741 = vrot.lane.b32.xlu0 %v916_v42, %s5374_s30  ;;  %v918_v42 = vld [vmem:[#allocation2 + $0x2ea] sm:$0xff] }
  0xed   :  { %1387 = vrot.lane.b32.xlu1 %v803_v43, %s5376_s0  ;;  %v574_v12 = vmax.f32 %v501_v10, 0.0  ;;  %v82_v10 = vld [vmem:[#allocation3 + $0x138] sm:$0xff] }
  0xef   :  { %v362_v13 = vpop.f32.mrf.mxu0  ;;  %v5755_v48 = vpop.permute.xlu2 %1885  ;;  %727 = vst.msk [vmem:[#allocation2 + $0x309] sm:$0xff] %vm579_vm1, %v574_v12 }
  0xf0   :  { %v363_v15 = vadd.f32 %v5555_v35, %v362_v13  ;;  %v917_v13 = vld [vmem:[#allocation2 + $0x2da] sm:$0xff] }
  0xf2   :  { %v528_v16 = vmax.f32 %v363_v15, 0.0  ;;  %5003 = vmatmul.msk.f32.gmra.mxu0 %vm113_vm0, %v72_v14 }
  0xf4   :  { %681 = vst.msk [vmem:[#allocation2 + $0xb1] sm:$0xff] %vm579_vm1, %v528_v16  ;;  %1485 = vrot.lane.b32.xlu2 %v852_v44, %s5376_s0  ;;  %1995 = vrot.lane.b32.xlu0 %v979_v52, %s5378_s14  ;;  %v930_v16 = vld [vmem:[#allocation2 + $0x60] sm:$0xff]  ;;  %v80_v44 = vld [vmem:[#allocation3 + $0x128] sm:$0xff] }
  0xf5   :  { %1641 = vrot.lane.b32.xlu1 %v866_v53, %s5374_s30 }
  0xf7   :  { %v365_v23 = vpop.f32.mrf.mxu0 }
  0xf8   :  { %v366_v26 = vadd.f32 %v5555_v35, %v365_v23 }
  0xfa   :  { %v529_v28 = vmax.f32 %v366_v26, 0.0  ;;  %5004 = vmatmul.msk.f32.gmra.mxu0 %vm113_vm0, %v73_v24  ;;  %v869_v24 = vld [vmem:[#allocation2 + $0x6a] sm:$0xff] }
  0xfb   :  { %v931_v26 = vld [vmem:[#allocation2 + $0x68] sm:$0xff] }
  0xfc   :  { %682 = vst.msk [vmem:[#allocation2 + $0xc1] sm:$0xff] %vm579_vm1, %v529_v28  ;;  %1993 = vrot.lane.b32.xlu2 %v978_v54, %s5378_s14  ;;  %1391 = vrot.lane.b32.xlu0 %v805_v62, %s5376_s0  ;;  %v79_v28 = vld [vmem:[#allocation3 + $0x120] sm:$0xff] }
  0xfd   :  { %1895 = vrot.lane.b32.xlu1 %v929_v2, %s5378_s14 }
  0xfe   :  { %v5767_v58 = vpop.permute.xlu2 %1381 }
  0xff   :  { %v368_v34 = vpop.f32.mrf.mxu0 }
 0x100   :  { %v369_v39 = vadd.f32 %v5555_v35, %v368_v34  ;;  %v503_v34 = vpop.f32.mrf.mxu3 }
 0x101   :  { %v504_v37 = vadd.f32 %v5555_v35, %v503_v34 }
 0x102   :  { %v530_v41 = vmax.f32 %v369_v39, 0.0  ;;  %5005 = vmatmul.msk.f32.gmra.mxu0 %vm113_vm0, %v74_v36  ;;  %v919_v39 = vld [vmem:[#allocation2 + $0x2f2] sm:$0xff] }
 0x104   :  { %683 = vst.msk [vmem:[#allocation2 + $0xc9] sm:$0xff] %vm579_vm1, %v530_v41  ;;  %1389 = vrot.lane.b32.xlu2 %v804_v0, %s5376_s0  ;;  %1645 = vrot.lane.b32.xlu0 %v868_v11, %s5374_s30  ;;  %v575_v41 = vmax.f32 %v504_v37, 0.0  ;;  %v857_v37 = vld [vmem:[#allocation2 + $0x309] sm:$0xff] }
 0x105   :  { %1743 = vrot.lane.b32.xlu1 %v917_v13, %s5374_s30 }
 0x106   :  { %v5781_v7 = vpop.permute.xlu2 %2145  ;;  %v5788_v14 = vpop.permute.xlu0 %2141  ;;  %728 = vst.msk [vmem:[#allocation2 + $0x319] sm:$0xff] %vm579_vm1, %v575_v41  ;;  %v84_v41 = vld [vmem:[#allocation3 + $0x148] sm:$0xff] }
 0x107   :  { %v371_v45 = vpop.f32.mrf.mxu0  ;;  %v5790_v15 = vpop.permute.xlu1 %1377 }
 0x108   :  { %v372_v47 = vadd.f32 %v5555_v35, %v371_v45  ;;  %v506_v52 = vpop.f32.mrf.mxu3 }
 0x109   :  { %v507_v54 = vadd.f32 %v5555_v35, %v506_v52 }
 0x10a   :  { %v531_v50 = vmax.f32 %v372_v47, 0.0  ;;  %5006 = vmatmul.msk.f32.gmra.mxu0 %vm113_vm0, %v75_v46 }
 0x10c   :  { %684 = vst.msk [vmem:[#allocation2 + $0xd9] sm:$0xff] %vm579_vm1, %v531_v50  ;;  %1897 = vrot.lane.b32.xlu2 %v930_v16, %s5378_s14  ;;  %1899 = vrot.lane.b32.xlu0 %v931_v26, %s5378_s14 }
 0x10d   :  { %1647 = vrot.lane.b32.xlu1 %v869_v24, %s5374_s30 }
 0x10e   :  { %v5795_v22 = vpop.permute.xlu2 %1479  ;;  %v5802_v29 = vpop.permute.xlu0 %1475 }
 0x10f   :  { %v374_v55 = vpop.f32.mrf.mxu0  ;;  %8554 = vst [vmem:[#allocation13_spill] sm:$0xff] %v5795_v22  ;;  %v5804_v30 = vpop.permute.xlu1 %1731 }
 0x110   :  { %v375_v57 = vadd.f32 %v5555_v35, %v374_v55  ;;  %8555 = vst [vmem:[#allocation14_spill] sm:$0xff] %v5802_v29  ;;  %v871_v55 = vld [vmem:[#allocation2 + $0x82] sm:$0xff] }
 0x111   :  { %8556 = vst [vmem:[#allocation15_spill] sm:$0xff] %v5804_v30 }
 0x112   :  { %v532_v60 = vmax.f32 %v375_v57, 0.0  ;;  %5007 = vmatmul.msk.f32.gmra.mxu0 %vm113_vm0, %v76_v56  ;;  %v576_v56 = vmax.f32 %v507_v54, 0.0  ;;  %v980_v57 = vld [vmem:[#allocation2 + $0x2e8] sm:$0xff] }
 0x113   :  { %v920_v54 = vld [vmem:[#allocation2 + $0x302] sm:$0xff] }
 0x114   :  { %685 = vst.msk [vmem:[#allocation2 + $0xe1] sm:$0xff] %vm579_vm1, %v532_v60  ;;  %1491 = vrot.lane.b32.xlu2 %v855_v25, %s5376_s0  ;;  %1747 = vrot.lane.b32.xlu0 %v919_v39, %s5374_s30  ;;  %v83_v25 = vld [vmem:[#allocation3 + $0x140] sm:$0xff] }
 0x115   :  { %1489 = vrot.lane.b32.xlu1 %v854_v40, %s5376_s0  ;;  %729 = vst.msk [vmem:[#allocation2 + $0x321] sm:$0xff] %vm579_vm1, %v576_v56  ;;  %v933_v39 = vld [vmem:[#allocation2 + $0x80] sm:$0xff] }
 0x116   :  { %v5807_v32 = vpop.permute.xlu2 %1733  ;;  %v5816_v45 = vpop.permute.xlu0 %1633 }
 0x117   :  { %v377_v4 = vpop.f32.mrf.mxu0  ;;  %8557 = vst [vmem:[#allocation16_spill] sm:$0xff] %v5807_v32  ;;  %v5818_v46 = vpop.permute.xlu1 %1379 }
 0x118   :  { %v378_v6 = vadd.f32 %v5555_v35, %v377_v4 }
 0x11a   :  { %v533_v9 = vmax.f32 %v378_v6, 0.0  ;;  %5008 = vmatmul.msk.f32.gmra.mxu0 %vm113_vm0, %v77_v5  ;;  %v856_v5 = vld [vmem:[#allocation2 + $0x301] sm:$0xff]  ;;  %v806_v6 = vld [vmem:[#allocation2 + $0x79] sm:$0xff] }
 0x11c   :  { %686 = vst.msk [vmem:[#allocation2 + $0xf1] sm:$0xff] %vm579_vm1, %v533_v9  ;;  %1745 = vrot.lane.b32.xlu2 %v918_v42, %s5374_s30  ;;  %1651 = vrot.lane.b32.xlu0 %v871_v55, %s5374_s30  ;;  %v921_v55 = vld [vmem:[#allocation2 + $0x30a] sm:$0xff] }
 0x11d   :  { %1997 = vrot.lane.b32.xlu1 %v980_v57, %s5378_s14  ;;  %v85_v57 = vld [vmem:[#allocation3 + $0x150] sm:$0xff] }
 0x11e   :  { %v5821_v50 = vpop.permute.xlu2 %1987  ;;  %v5830_v62 = vpop.permute.xlu0 %1887 }
 0x11f   :  { %v380_v17 = vpop.f32.mrf.mxu0  ;;  %8558 = vst [vmem:[#allocation17_spill] sm:$0xff] %v5821_v50  ;;  %v5832_v0 = vpop.permute.xlu1 %1635 }
 0x120   :  { %v381_v20 = vadd.f32 %v5555_v35, %v380_v17 }
 0x122   :  { %v534_v23 = vmax.f32 %v381_v20, 0.0  ;;  %5009 = vmatmul.msk.f32.gmra.mxu0 %vm113_vm0, %v78_v18  ;;  %v982_v18 = vld [vmem:[#allocation2 + $0x300] sm:$0xff]  ;;  %v932_v20 = vld [vmem:[#allocation2 + $0x78] sm:$0xff] }
 0x124   :  { %687 = vst.msk [vmem:[#allocation2 + $0xf9] sm:$0xff] %vm579_vm1, %v534_v23  ;;  %1999 = vrot.lane.b32.xlu2 %v981_v59, %s5378_s14  ;;  %1493 = vrot.lane.b32.xlu0 %v856_v5, %s5376_s0  ;;  %v870_v23 = vld [vmem:[#allocation2 + $0x7a] sm:$0xff] }
 0x125   :  { %1393 = vrot.lane.b32.xlu1 %v806_v6, %s5376_s0 }
 0x126   :  { %v5835_v2 = vpop.permute.xlu2 %1383  ;;  %v5842_v11 = vpop.permute.xlu0 %1735 }
 0x127   :  { %v383_v27 = vpop.f32.mrf.mxu0  ;;  %8559 = vst [vmem:[#allocation18_spill] sm:$0xff] %v5842_v11  ;;  %v5844_v12 = vpop.permute.xlu1 %2143 }
 0x128   :  { %v384_v31 = vadd.f32 %v5555_v35, %v383_v27 }
 0x12a   :  { %v535_v36 = vmax.f32 %v384_v31, 0.0  ;;  %5010 = vmatmul.msk.f32.gmra.mxu0 %vm113_vm0, %v79_v28 }
 0x12c   :  { %688 = vst.msk [vmem:[#allocation2 + $0x109] sm:$0xff] %vm579_vm1, %v535_v36  ;;  %1395 = vrot.lane.b32.xlu2 %v807_v8, %s5376_s0  ;;  %2001 = vrot.lane.b32.xlu0 %v982_v18, %s5378_s14  ;;  %v808_v36 = vld [vmem:[#allocation2 + $0x91] sm:$0xff]  ;;  %v859_v8 = vld [vmem:[#allocation2 + $0x321] sm:$0xff] }
 0x12d   :  { %1901 = vrot.lane.b32.xlu1 %v932_v20, %s5378_s14  ;;  %v86_v18 = vld [vmem:[#allocation3 + $0x158] sm:$0xff] }
 0x12e   :  { %v5847_v16 = vpop.permute.xlu2 %1637  ;;  %v5854_v26 = vpop.permute.xlu0 %1639 }
 0x12f   :  { %v386_v43 = vpop.f32.mrf.mxu0  ;;  %8560 = vst [vmem:[#allocation19_spill] sm:$0xff] %v5854_v26  ;;  %v5856_v27 = vpop.permute.xlu1 %1477 }
 0x130   :  { %v387_v47 = vadd.f32 %v5555_v35, %v386_v43  ;;  %8561 = vst [vmem:[#allocation20_spill] sm:$0xff] %v5856_v27 }
 0x132   :  { %v536_v53 = vmax.f32 %v387_v47, 0.0  ;;  %5011 = vmatmul.msk.f32.gmra.mxu0 %vm113_vm0, %v80_v44 }
 0x133   :  { %v944_v22 = vld [vmem:[#allocation2 + $0x108] sm:$0xff] }
 0x134   :  { %689 = vst.msk [vmem:[#allocation2 + $0x111] sm:$0xff] %vm579_vm1, %v536_v53  ;;  %1649 = vrot.lane.b32.xlu2 %v870_v23, %s5374_s30  ;;  %1397 = vrot.lane.b32.xlu0 %v808_v36, %s5376_s0  ;;  %v934_v53 = vld [vmem:[#allocation2 + $0x90] sm:$0xff] }
 0x135   :  { %1495 = vrot.lane.b32.xlu1 %v857_v37, %s5376_s0  ;;  %v922_v37 = vld [vmem:[#allocation2 + $0x31a] sm:$0xff] }
 0x136   :  { %v5859_v31 = vpop.permute.xlu2 %1891  ;;  %v5866_v42 = vpop.permute.xlu0 %1481 }
 0x137   :  { %v389_v60 = vpop.f32.mrf.mxu0  ;;  %8562 = vst [vmem:[#allocation21_spill] sm:$0xff] %v5866_v42  ;;  %v5868_v43 = vpop.permute.xlu1 %1985 }
 0x138   :  { %v390_v1 = vadd.f32 %v5555_v35, %v389_v60  ;;  %8563 = vst [vmem:[#allocation22_spill] sm:$0xff] %v5868_v43 }
 0x13a   :  { %v537_v4 = vmax.f32 %v390_v1, 0.0  ;;  %5012 = vmatmul.msk.f32.gmra.mxu0 %vm113_vm0, %v81_v61 }
 0x13c   :  { %690 = vst.msk [vmem:[#allocation2 + $0x121] sm:$0xff] %vm579_vm1, %v537_v4  ;;  %1903 = vrot.lane.b32.xlu2 %v933_v39, %s5378_s14  ;;  %1905 = vrot.lane.b32.xlu0 %v934_v53, %s5378_s14  ;;  %v509_v4 = vpop.f32.mrf.mxu3  ;;  %v809_v39 = vld [vmem:[#allocation2 + $0x99] sm:$0xff] }
 0x13d   :  { %1749 = vrot.lane.b32.xlu1 %v920_v54, %s5374_s30  ;;  %v510_v6 = vadd.f32 %v5555_v35, %v509_v4  ;;  %v872_v4 = vld [vmem:[#allocation2 + $0x92] sm:$0xff] }
 0x13e   :  { %v5871_v47 = vpop.permute.xlu2 %1739  ;;  %v5878_v59 = vpop.permute.xlu0 %1989 }
 0x13f   :  { %v392_v9 = vpop.f32.mrf.mxu0  ;;  %8564 = vst [vmem:[#allocation23_spill] sm:$0xff] %v5871_v47  ;;  %v5880_v60 = vpop.permute.xlu1 %1889  ;;  %v941_v47 = vld [vmem:[#allocation2 + $0xe0] sm:$0xff] }
 0x140   :  { %v393_v13 = vadd.f32 %v5555_v35, %v392_v9  ;;  %8565 = vst [vmem:[#allocation24_spill] sm:$0xff] %v5878_v59  ;;  %v873_v9 = vld [vmem:[#allocation2 + $0x9a] sm:$0xff]  ;;  %v945_v59 = vld [vmem:[#allocation2 + $0x110] sm:$0xff] }
 0x142   :  { %v538_v17 = vmax.f32 %v393_v13, 0.0  ;;  %5013 = vmatmul.msk.f32.gmra.mxu0 %vm113_vm0, %v82_v10  ;;  %v577_v10 = vmax.f32 %v510_v6, 0.0  ;;  %v983_v13 = vld [vmem:[#allocation2 + $0x308] sm:$0xff] }
 0x143   :  { %v946_v11 = vld [vmem:[#allocation2 + $0x120] sm:$0xff] }
 0x144   :  { %691 = vst.msk [vmem:[#allocation2 + $0x129] sm:$0xff] %vm579_vm1, %v538_v17  ;;  %1751 = vrot.lane.b32.xlu2 %v921_v55, %s5374_s30  ;;  %1499 = vrot.lane.b32.xlu0 %v859_v8, %s5376_s0  ;;  %v88_v8 = vld [vmem:[#allocation3 + $0x168] sm:$0xff] }
 0x145   :  { %2003 = vrot.lane.b32.xlu1 %v983_v13, %s5378_s14  ;;  %730 = vst.msk [vmem:[#allocation2 + $0x331] sm:$0xff] %vm579_vm1, %v577_v10 }
 0x146   :  { %v5883_v1 = vpop.permute.xlu2 %1643  ;;  %v5892_v20 = vpop.permute.xlu0 %1385 }
 0x147   :  { %v395_v24 = vpop.f32.mrf.mxu0  ;;  %8566 = vst [vmem:[#allocation25_spill] sm:$0xff] %v5883_v1  ;;  %v5894_v23 = vpop.permute.xlu1 %1483 }
 0x148   :  { %v396_v28 = vadd.f32 %v5555_v35, %v395_v24  ;;  %8567 = vst [vmem:[#allocation26_spill] sm:$0xff] %v5892_v20  ;;  %v6453_v20 = vld [vmem:[#allocation2 + $0xc1] sm:$0xff] }
 0x149   :  { %8568 = vst [vmem:[#allocation27_spill] sm:$0xff] %v5894_v23 }
 0x14a   :  { %v539_v34 = vmax.f32 %v396_v28, 0.0  ;;  %5014 = vmatmul.msk.f32.gmra.mxu0 %vm113_vm0, %v83_v25  ;;  %v512_v28 = vpop.f32.mrf.mxu3 }
 0x14b   :  { %v513_v36 = vadd.f32 %v5555_v35, %v512_v28  ;;  %v810_v28 = vld [vmem:[#allocation2 + $0xa9] sm:$0xff] }
 0x14c   :  { %692 = vst.msk [vmem:[#allocation2 + $0x139] sm:$0xff] %vm579_vm1, %v539_v34  ;;  %1655 = vrot.lane.b32.xlu2 %v873_v9, %s5374_s30  ;;  %1753 = vrot.lane.b32.xlu0 %v922_v37, %s5374_s30  ;;  %v89_v37 = vld [vmem:[#allocation3 + $0x170] sm:$0xff]  ;;  %v884_v50 = vld [vmem:[#allocation2 + $0x122] sm:$0xff] }
 0x14d   :  { %1399 = vrot.lane.b32.xlu1 %v809_v39, %s5376_s0  ;;  %v947_v43 = vld [vmem:[#allocation2 + $0x128] sm:$0xff] }
 0x14e   :  { %v5897_v25 = vpop.permute.xlu2 %1485  ;;  %v5906_v53 = vpop.permute.xlu0 %1893 }
 0x14f   :  { %v398_v40 = vpop.f32.mrf.mxu0  ;;  %8569 = vst [vmem:[#allocation28_spill] sm:$0xff] %v5897_v25  ;;  %v5908_v54 = vpop.permute.xlu1 %1737  ;;  %v817_v25 = vld [vmem:[#allocation2 + $0xf9] sm:$0xff] }
 0x150   :  { %v399_v44 = vadd.f32 %v5555_v35, %v398_v40  ;;  %v578_v40 = vmax.f32 %v513_v36, 0.0  ;;  %8570 = vst [vmem:[#allocation29_spill] sm:$0xff] %v5908_v54  ;;  %v6036_v54 = vld [vmem:[#allocation2 + $0x111] sm:$0xff] }
 0x152   :  { %v540_v52 = vmax.f32 %v399_v44, 0.0  ;;  %5015 = vmatmul.msk.f32.gmra.mxu0 %vm113_vm0, %v84_v41  ;;  %v858_v41 = vld [vmem:[#allocation2 + $0x319] sm:$0xff]  ;;  %731 = vst.msk [vmem:[#allocation2 + $0x339] sm:$0xff] %vm579_vm1, %v578_v40 }
 0x153   :  { %v6098_v30 = vld [vmem:[#allocation2 + $0x139] sm:$0xff] }
 0x154   :  { %693 = vst.msk [vmem:[#allocation2 + $0x141] sm:$0xff] %vm579_vm1, %v540_v52  ;;  %1497 = vrot.lane.b32.xlu2 %v858_v41, %s5376_s0  ;;  %v87_v52 = vld [vmem:[#allocation3 + $0x160] sm:$0xff] }
 0x155   :  { %1653 = vrot.lane.b32.xlu1 %v872_v4, %s5374_s30 }
 0x156   :  { %v5918_v9 = vpop.permute.xlu0 %1487 }
 0x157   :  { %v401_v56 = vpop.f32.mrf.mxu0  ;;  %8572 = vst [vmem:[#allocation31_spill] sm:$0xff] %v5918_v9  ;;  %v5920_v10 = vpop.permute.xlu1 %1991 }
 0x158   :  { %v402_v61 = vadd.f32 %v5555_v35, %v401_v56  ;;  %v5911_v56 = vpop.permute.xlu2 %1993  ;;  %8573 = vst [vmem:[#allocation32_spill] sm:$0xff] %v5920_v10  ;;  %v6050_v10 = vld [vmem:[#allocation2 + $0x121] sm:$0xff] }
 0x159   :  { %8571 = vst [vmem:[#allocation30_spill] sm:$0xff] %v5911_v56 }
 0x15a   :  { %v541_v5 = vmax.f32 %v402_v61, 0.0  ;;  %5016 = vmatmul.msk.f32.gmra.mxu0 %vm113_vm0, %v85_v57  ;;  %v985_v61 = vld [vmem:[#allocation2 + $0x320] sm:$0xff] }
 0x15b   :  { %2007 = vrot.lane.b32.xlu0 %v985_v61, %s5378_s14  ;;  %v936_v61 = vld [vmem:[#allocation2 + $0xa8] sm:$0xff] }
 0x15c   :  { %694 = vst.msk [vmem:[#allocation2 + $0x151] sm:$0xff] %vm579_vm1, %v541_v5  ;;  %v984_v5 = vld [vmem:[#allocation2 + $0x318] sm:$0xff]  ;;  %v6078_v27 = vld [vmem:[#allocation2 + $0x141] sm:$0xff] }
 0x15d   :  { %2005 = vrot.lane.b32.xlu2 %v984_v5, %s5378_s14  ;;  %v90_v5 = vld [vmem:[#allocation3 + $0x178] sm:$0xff] }
 0x15e   :  { %v5930_v39 = vpop.permute.xlu0 %1741 }
 0x15f   :  { %v404_v17 = vpop.f32.mrf.mxu0  ;;  %8575 = vst [vmem:[#allocation34_spill] sm:$0xff] %v5930_v39  ;;  %v5932_v40 = vpop.permute.xlu1 %1387 }
 0x160   :  { %v405_v24 = vadd.f32 %v5555_v35, %v404_v17  ;;  %v5923_v17 = vpop.permute.xlu2 %1389  ;;  %8576 = vst [vmem:[#allocation35_spill] sm:$0xff] %v5932_v40  ;;  %v6416_v40 = vld [vmem:[#allocation2 + $0x69] sm:$0xff] }
 0x161   :  { %8574 = vst [vmem:[#allocation33_spill] sm:$0xff] %v5923_v17 }
 0x162   :  { %v542_v34 = vmax.f32 %v405_v24, 0.0  ;;  %5017 = vmatmul.msk.f32.gmra.mxu0 %vm113_vm0, %v86_v18  ;;  %v811_v24 = vld [vmem:[#allocation2 + $0xb1] sm:$0xff] }
 0x163   :  { %1403 = vrot.lane.b32.xlu0 %v811_v24, %s5376_s0 }
 0x164   :  { %695 = vst.msk [vmem:[#allocation2 + $0x159] sm:$0xff] %vm579_vm1, %v542_v34  ;;  %v935_v34 = vld [vmem:[#allocation2 + $0x98] sm:$0xff] }
 0x165   :  { %1907 = vrot.lane.b32.xlu1 %v935_v34, %s5378_s14  ;;  %1401 = vrot.lane.b32.xlu2 %v810_v28, %s5376_s0  ;;  %v875_v28 = vld [vmem:[#allocation2 + $0xb2] sm:$0xff] }
 0x166   :  { %v987_v34 = vld [vmem:[#allocation2 + $0x338] sm:$0xff] }
 0x167   :  { %v407_v44 = vpop.f32.mrf.mxu0 }
 0x168   :  { %v408_v55 = vadd.f32 %v5555_v35, %v407_v44  ;;  %v5935_v44 = vpop.permute.xlu2 %1897 }
 0x169   :  { %8577 = vst [vmem:[#allocation36_spill] sm:$0xff] %v5935_v44  ;;  %v6431_v44 = vld [vmem:[#allocation2 + $0x91] sm:$0xff] }
 0x16a   :  { %v543_v57 = vmax.f32 %v408_v55, 0.0  ;;  %5018 = vmatmul.msk.f32.gmra.mxu0 %vm113_vm0, %v87_v52  ;;  %v874_v55 = vld [vmem:[#allocation2 + $0xaa] sm:$0xff] }
 0x16b   :  { %1657 = vrot.lane.b32.xlu0 %v874_v55, %s5374_s30  ;;  %v6120_v63 = vld [vmem:[#allocation2 + $0x159] sm:$0xff] }
 0x16c   :  { %696 = vst.msk [vmem:[#allocation2 + $0x169] sm:$0xff] %vm579_vm1, %v543_v57  ;;  %v923_v57 = vld [vmem:[#allocation2 + $0x322] sm:$0xff] }
 0x16d   :  { %1755 = vrot.lane.b32.xlu1 %v923_v57, %s5374_s30  ;;  %1909 = vrot.lane.b32.xlu2 %v936_v61, %s5378_s14 }
 0x16f   :  { %v410_v6 = vpop.f32.mrf.mxu0 }
 0x170   :  { %v411_v13 = vadd.f32 %v5555_v35, %v410_v6  ;;  %v5942_v6 = vpop.permute.xlu0 %1995 }
 0x171   :  { %8578 = vst [vmem:[#allocation37_spill] sm:$0xff] %v5942_v6  ;;  %v880_v6 = vld [vmem:[#allocation2 + $0xf2] sm:$0xff] }
 0x172   :  { %v544_v18 = vmax.f32 %v411_v13, 0.0  ;;  %5019 = vmatmul.msk.f32.gmra.mxu0 %vm113_vm0, %v88_v8  ;;  %v5949_v8 = vld [vmem:[%s8543_s2] ss:$0 sm:$0xff]  ;;  %s5379_s2 = smov 20  }
 0x174   :  { %697 = vst.msk [vmem:[#allocation2 + $0x171] sm:$0xff] %vm579_vm1, %v544_v18  ;;  %v5952_v18 = vpop.permute.xlu2 %1491 }
 0x175   :  { %8580 = vst [vmem:[#allocation39_spill] sm:$0xff] %v5952_v18  ;;  %1659 = vrot.lane.b32.xlu1 %v875_v28, %s5374_s30  ;;  %2011 = vrot.lane.b32.xlu2 %v987_v34, %s5378_s14  ;;  %v814_v18 = vld [vmem:[#allocation2 + $0xd9] sm:$0xff] }
 0x177   :  { %v413_v36 = vpop.f32.mrf.mxu0 }
 0x178   :  { %v414_v41 = vadd.f32 %v5555_v35, %v413_v36  ;;  %v5944_v35 = vpop.permute.xlu1 %1641  ;;  %v937_v36 = vld [vmem:[#allocation2 + $0xb0] sm:$0xff] }
 0x179   :  { %8579 = vst [vmem:[#allocation38_spill] sm:$0xff] %v5944_v35  ;;  %1911 = vrot.lane.b32.xlu0 %v937_v36, %s5378_s14  ;;  %v6437_v35 = vld [vmem:[#allocation2 + $0x99] sm:$0xff] }
 0x17a   :  { %v545_v52 = vmax.f32 %v414_v41, 0.0  ;;  %5020 = vmatmul.msk.f32.gmra.mxu0 %vm113_vm0, %v89_v37  ;;  %v91_v41 = vld [vmem:[#allocation3 + $0x180] sm:$0xff] }
 0x17c   :  { %698 = vst.msk [vmem:[#allocation2 + $0x181] sm:$0xff] %vm579_vm1, %v545_v52  ;;  %v5959_v52 = vpop.permute.xlu0 %1391  ;;  %v5964_v61 = vpop.permute.xlu2 %1745 }
 0x17d   :  { %8581 = vst [vmem:[#allocation40_spill] sm:$0xff] %v5959_v52 }
 0x17e   :  { %8583 = vst [vmem:[#allocation42_spill] sm:$0xff] %v5964_v61 }
 0x17f   :  { %v416_v4 = vpop.f32.mrf.mxu0 }
 0x180   :  { %v417_v13 = vadd.f32 %v5949_v8, %v416_v4  ;;  %v5961_v55 = vpop.permute.xlu1 %1895 }
 0x181   :  { %8582 = vst [vmem:[#allocation41_spill] sm:$0xff] %v5961_v55 }
 0x182   :  { %v546_v24 = vmax.f32 %v417_v13, 0.0  ;;  %5021 = vmatmul.msk.f32.gmra.mxu0 %vm113_vm0, %v90_v5  ;;  %v877_v5 = vld [vmem:[#allocation2 + $0xca] sm:$0xff] }
 0x183   :  { %v986_v13 = vld [vmem:[#allocation2 + $0x330] sm:$0xff]  ;;  %1663 = vrot.lane.b32.xlu0 %v877_v5, %s5374_s30  ;;  %v876_v5 = vld [vmem:[#allocation2 + $0xc2] sm:$0xff] }
 0x184   :  { %699 = vst.msk [vmem:[#allocation2 + $0x189] sm:$0xff] %vm579_vm1, %v546_v24  ;;  %v813_v24 = vld [vmem:[#allocation2 + $0xc9] sm:$0xff]  ;;  %2009 = vrot.lane.b32.xlu1 %v986_v13, %s5378_s14  ;;  %v5971_v34 = vpop.permute.xlu0 %1645 }
 0x185   :  { %1407 = vrot.lane.b32.xlu2 %v813_v24, %s5376_s0  ;;  %8584 = vst [vmem:[#allocation43_spill] sm:$0xff] %v5971_v34 }
 0x187   :  { %v419_v37 = vpop.f32.mrf.mxu0 }
 0x188   :  { %v420_v57 = vadd.f32 %v5949_v8, %v419_v37  ;;  %v5973_v36 = vpop.permute.xlu1 %1743 }
 0x189   :  { %8585 = vst [vmem:[#allocation44_spill] sm:$0xff] %v5973_v36  ;;  %v940_v36 = vld [vmem:[#allocation2 + $0xd8] sm:$0xff] }
 0x18a   :  { %v547_v4 = vmax.f32 %v420_v57, 0.0  ;;  %5022 = vmatmul.msk.f32.gmra.mxu0 %vm113_vm0, %v91_v41  ;;  %v5976_v57 = vpop.permute.xlu2 %1999 }
 0x18b   :  { %8586 = vst [vmem:[#allocation45_spill] sm:$0xff] %v5976_v57  ;;  %1409 = vrot.lane.b32.xlu0 %v814_v18, %s5376_s0  ;;  %v939_v18 = vld [vmem:[#allocation2 + $0xc8] sm:$0xff] }
 0x18c   :  { %700 = vst.msk [vmem:[#allocation2 + $0x1c9] sm:$0xff] %vm579_vm1, %v547_v4  ;;  %v812_v4 = vld [vmem:[#allocation2 + $0xc1] sm:$0xff]  ;;  %v5982_v24 = vpop.permute.xlu0 %1899 }
 0x18d   :  { %1405 = vrot.lane.b32.xlu1 %v812_v4, %s5376_s0  ;;  %1661 = vrot.lane.b32.xlu2 %v876_v5, %s5374_s30  ;;  %8587 = vst [vmem:[#allocation46_spill] sm:$0xff] %v5982_v24 }
 0x18f   :  { %v422_v28 = vpop.f32.mrf.mxu0 }
 0x190   :  { %v423_v37 = vadd.f32 %v5949_v8, %v422_v28  ;;  %v5984_v61 = vpop.permute.xlu1 %1647 }
 0x191   :  { %8588 = vst [vmem:[#allocation47_spill] sm:$0xff] %v5984_v61 }
 0x192   :  { %v548_v41 = vmax.f32 %v423_v37, 0.0  ;;  %v5987_v57 = vpop.permute.xlu2 %1395 }
 0x193   :  { %8589 = vst [vmem:[#allocation48_spill] sm:$0xff] %v5987_v57  ;;  %1917 = vrot.lane.b32.xlu0 %v940_v36, %s5378_s14  ;;  %v879_v36 = vld [vmem:[#allocation2 + $0xe2] sm:$0xff] }
 0x194   :  { %701 = vst.msk [vmem:[#allocation2 + $0x1d1] sm:$0xff] %vm579_vm1, %v548_v41  ;;  %v938_v41 = vld [vmem:[#allocation2 + $0xc0] sm:$0xff]  ;;  %v5993_v5 = vpop.permute.xlu0 %1747 }
 0x195   :  { %1913 = vrot.lane.b32.xlu1 %v938_v41, %s5378_s14  ;;  %1915 = vrot.lane.b32.xlu2 %v939_v18, %s5378_s14  ;;  %8590 = vst [vmem:[#allocation49_spill] sm:$0xff] %v5993_v5 }
 0x197   :  { %v425_v13 = vpop.f32.mrf.mxu0 }
 0x198   :  { %v426_v28 = vadd.f32 %v5949_v8, %v425_v13  ;;  %v5995_v9 = vpop.permute.xlu1 %1489 }
 0x199   :  { %8591 = vst [vmem:[#allocation50_spill] sm:$0xff] %v5995_v9 }
 0x19a   :  { %v549_v37 = vmax.f32 %v426_v28, 0.0  ;;  %v5998_v39 = vpop.permute.xlu2 %1649 }
 0x19b   :  { %8592 = vst [vmem:[#allocation51_spill] sm:$0xff] %v5998_v39  ;;  %1415 = vrot.lane.b32.xlu0 %v817_v25, %s5376_s0  ;;  %v6014_v25 = vld [vmem:[#allocation2 + $0xf1] sm:$0xff] }
 0x19c   :  { %702 = vst.msk [vmem:[#allocation2 + $0x1e1] sm:$0xff] %vm579_vm1, %v549_v37  ;;  %v815_v37 = vld [vmem:[#allocation2 + $0xe1] sm:$0xff]  ;;  %v6004_v18 = vpop.permute.xlu0 %1651 }
 0x19d   :  { %1411 = vrot.lane.b32.xlu1 %v815_v37, %s5376_s0  ;;  %1667 = vrot.lane.b32.xlu2 %v879_v36, %s5374_s30  ;;  %8593 = vst [vmem:[#allocation52_spill] sm:$0xff] %v6004_v18 }
 0x19f   :  { %v428_v4 = vpop.f32.mrf.mxu0 }
 0x1a0   :  { %v429_v13 = vadd.f32 %v5949_v8, %v428_v4  ;;  %v6006_v5 = vpop.permute.xlu1 %1997 }
 0x1a1   :  { %8594 = vst [vmem:[#allocation53_spill] sm:$0xff] %v6006_v5 }
 0x1a2   :  { %v550_v28 = vmax.f32 %v429_v13, 0.0  ;;  %v6009_v9 = vpop.permute.xlu2 %1903 }
 0x1a3   :  { %8595 = vst [vmem:[#allocation54_spill] sm:$0xff] %v6009_v9  ;;  %1669 = vrot.lane.b32.xlu0 %v880_v6, %s5374_s30  ;;  %v943_v6 = vld [vmem:[#allocation2 + $0xf8] sm:$0xff] }
 0x1a4   :  { %703 = vst.msk [vmem:[#allocation2 + $0x1e9] sm:$0xff] %vm579_vm1, %v550_v28  ;;  %v878_v28 = vld [vmem:[#allocation2 + $0xda] sm:$0xff]  ;;  %v6018_v36 = vpop.permute.xlu0 %1493 }
 0x1a5   :  { %1665 = vrot.lane.b32.xlu1 %v878_v28, %s5374_s30  ;;  %1413 = vrot.lane.b32.xlu2 %v6014_v25, %s5376_s0  ;;  %8596 = vst [vmem:[#allocation55_spill] sm:$0xff] %v6018_v36  ;;  %v942_v28 = vld [vmem:[#allocation2 + $0xf0] sm:$0xff] }
 0x1a7   :  { %v431_v41 = vpop.f32.mrf.mxu0 }
 0x1a8   :  { %v432_v4 = vadd.f32 %v5949_v8, %v431_v41  ;;  %v6020_v41 = vpop.permute.xlu1 %1393 }
 0x1a9   :  { %8597 = vst [vmem:[#allocation56_spill] sm:$0xff] %v6020_v41 }
 0x1aa   :  { %v551_v13 = vmax.f32 %v432_v4, 0.0  ;;  %v6023_v5 = vpop.permute.xlu2 %1751 }
 0x1ab   :  { %8598 = vst [vmem:[#allocation57_spill] sm:$0xff] %v6023_v5  ;;  %1923 = vrot.lane.b32.xlu0 %v943_v6, %s5378_s14  ;;  %v881_v6 = vld [vmem:[#allocation2 + $0xfa] sm:$0xff] }
 0x1ac   :  { %704 = vst.msk [vmem:[#allocation2 + $0x1f9] sm:$0xff] %vm579_vm1, %v551_v13  ;;  %v6029_v36 = vpop.permute.xlu0 %2001 }
 0x1ad   :  { %1919 = vrot.lane.b32.xlu1 %v941_v47, %s5378_s14  ;;  %1921 = vrot.lane.b32.xlu2 %v942_v28, %s5378_s14  ;;  %8599 = vst [vmem:[#allocation58_spill] sm:$0xff] %v6029_v36 }
 0x1af   :  { %v434_v37 = vpop.f32.mrf.mxu0 }
 0x1b0   :  { %v435_v4 = vadd.f32 %v5949_v8, %v434_v37  ;;  %v6031_v56 = vpop.permute.xlu1 %1901 }
 0x1b1   :  { %8600 = vst [vmem:[#allocation59_spill] sm:$0xff] %v6031_v56 }
 0x1b2   :  { %v552_v13 = vmax.f32 %v435_v4, 0.0  ;;  %v6034_v5 = vpop.permute.xlu2 %1655 }
 0x1b3   :  { %8601 = vst [vmem:[#allocation60_spill] sm:$0xff] %v6034_v5  ;;  %v951_v5 = vld [vmem:[#allocation2 + $0x158] sm:$0xff] }
 0x1b4   :  { %705 = vst.msk [vmem:[#allocation2 + $0x201] sm:$0xff] %vm579_vm1, %v552_v13  ;;  %v883_v13 = vld [vmem:[#allocation2 + $0x112] sm:$0xff]  ;;  %v6043_v28 = vpop.permute.xlu0 %1397 }
 0x1b5   :  { %1675 = vrot.lane.b32.xlu0 %v883_v13, %s5374_s30  ;;  %1671 = vrot.lane.b32.xlu1 %v881_v6, %s5374_s30  ;;  %8602 = vst [vmem:[#allocation61_spill] sm:$0xff] %v6043_v28  ;;  %v882_v13 = vld [vmem:[#allocation2 + $0x10a] sm:$0xff] }
 0x1b6   :  { %1419 = vrot.lane.b32.xlu2 %v6036_v54, %s5376_s0  ;;  %v959_v28 = vld [vmem:[#allocation2 + $0x1e8] sm:$0xff] }
 0x1b7   :  { %v437_v23 = vpop.f32.mrf.mxu0 }
 0x1b8   :  { %v438_v37 = vadd.f32 %v5949_v8, %v437_v23  ;;  %v6045_v23 = vpop.permute.xlu1 %1495 }
 0x1b9   :  { %8603 = vst [vmem:[#allocation62_spill] sm:$0xff] %v6045_v23 }
 0x1ba   :  { %v553_v4 = vmax.f32 %v438_v37, 0.0  ;;  %v6048_v36 = vpop.permute.xlu2 %1497 }
 0x1bb   :  { %8604 = vst [vmem:[#allocation63_spill] sm:$0xff] %v6048_v36 }
 0x1bc   :  { %706 = vst.msk [vmem:[#allocation2 + $0x211] sm:$0xff] %vm579_vm1, %v553_v4  ;;  %v6053_v4 = vld [vmem:[#allocation2 + $0x109] sm:$0xff] }
 0x1bd   :  { %1421 = vrot.lane.b32.xlu0 %v6050_v10, %s5376_s0  ;;  %1417 = vrot.lane.b32.xlu1 %v6053_v4, %s5376_s0 }
 0x1be   :  { %1673 = vrot.lane.b32.xlu2 %v882_v13, %s5374_s30 }
 0x1bf   :  { %v440_v47 = vpop.f32.mrf.mxu0 }
 0x1c0   :  { %v441_v37 = vadd.f32 %v5949_v8, %v440_v47  ;;  %v6060_v47 = vpop.permute.xlu0 %1905  ;;  %v6062_v36 = vpop.permute.xlu1 %1749 }
 0x1c1   :  { %8605 = vst [vmem:[#allocation64_spill] sm:$0xff] %v6060_v47 }
 0x1c2   :  { %v554_v42 = vmax.f32 %v441_v37, 0.0  ;;  %8606 = vst [vmem:[#allocation65_spill] sm:$0xff] %v6062_v36  ;;  %v6065_v23 = vpop.permute.xlu2 %2005 }
 0x1c3   :  { %8607 = vst [vmem:[#allocation66_spill] sm:$0xff] %v6065_v23 }
 0x1c4   :  { %707 = vst.msk [vmem:[#allocation2 + $0x219] sm:$0xff] %vm579_vm1, %v554_v42 }
 0x1c5   :  { %1929 = vrot.lane.b32.xlu0 %v946_v11, %s5378_s14  ;;  %1925 = vrot.lane.b32.xlu1 %v944_v22, %s5378_s14  ;;  %v885_v22 = vld [vmem:[#allocation2 + $0x12a] sm:$0xff] }
 0x1c6   :  { %1927 = vrot.lane.b32.xlu2 %v945_v59, %s5378_s14 }
 0x1c7   :  { %v443_v6 = vpop.f32.mrf.mxu0 }
 0x1c8   :  { %v444_v37 = vadd.f32 %v5949_v8, %v443_v6  ;;  %v6071_v32 = vpop.permute.xlu0 %1499  ;;  %v6073_v36 = vpop.permute.xlu1 %2003 }
 0x1c9   :  { %8608 = vst [vmem:[#allocation67_spill] sm:$0xff] %v6071_v32 }
 0x1ca   :  { %v555_v42 = vmax.f32 %v444_v37, 0.0  ;;  %8609 = vst [vmem:[#allocation68_spill] sm:$0xff] %v6073_v36  ;;  %v6076_v23 = vpop.permute.xlu2 %1401 }
 0x1cb   :  { %8610 = vst [vmem:[#allocation69_spill] sm:$0xff] %v6076_v23  ;;  %v950_v23 = vld [vmem:[#allocation2 + $0x150] sm:$0xff]  ;;  %v6267_v18 = vld [vmem:[#allocation2 + $0x219] sm:$0xff] }
 0x1cc   :  { %708 = vst.msk [vmem:[#allocation2 + $0x229] sm:$0xff] %vm579_vm1, %v555_v42  ;;  %v6080_v42 = vld [vmem:[#allocation2 + $0x129] sm:$0xff] }
 0x1cd   :  { %1427 = vrot.lane.b32.xlu0 %v6078_v27, %s5376_s0  ;;  %1423 = vrot.lane.b32.xlu1 %v6080_v42, %s5376_s0 }
 0x1ce   :  { %1679 = vrot.lane.b32.xlu2 %v885_v22, %s5374_s30 }
 0x1cf   :  { %v446_v13 = vpop.f32.mrf.mxu0 }
 0x1d0   :  { %v447_v6 = vadd.f32 %v5949_v8, %v446_v13  ;;  %v6088_v59 = vpop.permute.xlu0 %1753  ;;  %v6090_v13 = vpop.permute.xlu1 %1399 }
 0x1d1   :  { %8611 = vst [vmem:[#allocation70_spill] sm:$0xff] %v6088_v59 }
 0x1d2   :  { %v556_v37 = vmax.f32 %v447_v6, 0.0  ;;  %8612 = vst [vmem:[#allocation71_spill] sm:$0xff] %v6090_v13  ;;  %v6093_v32 = vpop.permute.xlu2 %1909  ;;  %v6162_v13 = vld [vmem:[#allocation2 + $0x171] sm:$0xff] }
 0x1d3   :  { %8613 = vst [vmem:[#allocation72_spill] sm:$0xff] %v6093_v32 }
 0x1d4   :  { %709 = vst.msk [vmem:[#allocation2 + $0x231] sm:$0xff] %vm579_vm1, %v556_v37  ;;  %v886_v37 = vld [vmem:[#allocation2 + $0x13a] sm:$0xff] }
 0x1d5   :  { %1681 = vrot.lane.b32.xlu0 %v886_v37, %s5374_s30  ;;  %1677 = vrot.lane.b32.xlu1 %v884_v50, %s5374_s30  ;;  %v949_v37 = vld [vmem:[#allocation2 + $0x140] sm:$0xff]  ;;  %v948_v50 = vld [vmem:[#allocation2 + $0x138] sm:$0xff] }
 0x1d6   :  { %1425 = vrot.lane.b32.xlu2 %v6098_v30, %s5376_s0 }
 0x1d7   :  { %v449_v11 = vpop.f32.mrf.mxu0 }
 0x1d8   :  { %v450_v6 = vadd.f32 %v5949_v8, %v449_v11  ;;  %v6102_v59 = vpop.permute.xlu0 %2007  ;;  %v6104_v11 = vpop.permute.xlu1 %1653 }
 0x1d9   :  { %8614 = vst [vmem:[#allocation73_spill] sm:$0xff] %v6102_v59 }
 0x1da   :  { %v557_v36 = vmax.f32 %v450_v6, 0.0  ;;  %8615 = vst [vmem:[#allocation74_spill] sm:$0xff] %v6104_v11  ;;  %v6107_v29 = vpop.permute.xlu2 %2011 }
 0x1db   :  { %8616 = vst [vmem:[#allocation75_spill] sm:$0xff] %v6107_v29  ;;  %v965_v41 = vld [vmem:[#allocation2 + $0x230] sm:$0xff] }
 0x1dc   :  { %710 = vst.msk [vmem:[#allocation2 + $0x241] sm:$0xff] %vm579_vm1, %v557_v36 }
 0x1dd   :  { %1935 = vrot.lane.b32.xlu0 %v949_v37, %s5378_s14  ;;  %1931 = vrot.lane.b32.xlu1 %v947_v43, %s5378_s14  ;;  %v887_v37 = vld [vmem:[#allocation2 + $0x142] sm:$0xff] }
 0x1de   :  { %1933 = vrot.lane.b32.xlu2 %v948_v50, %s5378_s14 }
 0x1df   :  { %v452_v22 = vpop.f32.mrf.mxu0 }
 0x1e0   :  { %v453_v6 = vadd.f32 %v5949_v8, %v452_v22  ;;  %v6113_v59 = vpop.permute.xlu0 %1403  ;;  %v6115_v49 = vpop.permute.xlu1 %1907 }
 0x1e1   :  { %8617 = vst [vmem:[#allocation76_spill] sm:$0xff] %v6113_v59  ;;  %v6134_v59 = vld [vmem:[#allocation2 + $0x169] sm:$0xff] }
 0x1e2   :  { %v558_v36 = vmax.f32 %v453_v6, 0.0  ;;  %8618 = vst [vmem:[#allocation77_spill] sm:$0xff] %v6115_v49  ;;  %v6118_v29 = vpop.permute.xlu2 %1407 }
 0x1e3   :  { %8619 = vst [vmem:[#allocation78_spill] sm:$0xff] %v6118_v29 }
 0x1e4   :  { %711 = vst.msk [vmem:[#allocation2 + $0x249] sm:$0xff] %vm579_vm1, %v558_v36  ;;  %v889_v36 = vld [vmem:[#allocation2 + $0x15a] sm:$0xff] }
 0x1e5   :  { %1687 = vrot.lane.b32.xlu0 %v889_v36, %s5374_s30  ;;  %1683 = vrot.lane.b32.xlu1 %v887_v37, %s5374_s30  ;;  %v888_v36 = vld [vmem:[#allocation2 + $0x152] sm:$0xff] }
 0x1e6   :  { %1431 = vrot.lane.b32.xlu2 %v6120_v63, %s5376_s0 }
 0x1e7   :  { %v455_v3 = vpop.f32.mrf.mxu0 }
 0x1e8   :  { %v456_v22 = vadd.f32 %v5949_v8, %v455_v3  ;;  %v6127_v50 = vpop.permute.xlu0 %1657  ;;  %v6129_v3 = vpop.permute.xlu1 %1755 }
 0x1e9   :  { %8620 = vst [vmem:[#allocation79_spill] sm:$0xff] %v6127_v50  ;;  %v952_v50 = vld [vmem:[#allocation2 + $0x168] sm:$0xff] }
 0x1ea   :  { %v559_v6 = vmax.f32 %v456_v22, 0.0  ;;  %8621 = vst [vmem:[#allocation80_spill] sm:$0xff] %v6129_v3  ;;  %v6132_v19 = vpop.permute.xlu2 %1661 }
 0x1eb   :  { %8622 = vst [vmem:[#allocation81_spill] sm:$0xff] %v6132_v19 }
 0x1ec   :  { %712 = vst.msk [vmem:[#allocation2 + $0x259] sm:$0xff] %vm579_vm1, %v559_v6  ;;  %v6137_v6 = vld [vmem:[#allocation2 + $0x151] sm:$0xff] }
 0x1ed   :  { %1433 = vrot.lane.b32.xlu0 %v6134_v59, %s5376_s0  ;;  %1429 = vrot.lane.b32.xlu1 %v6137_v6, %s5376_s0 }
 0x1ee   :  { %1685 = vrot.lane.b32.xlu2 %v888_v36, %s5374_s30 }
 0x1ef   :  { %v458_v43 = vpop.f32.mrf.mxu0 }
 0x1f0   :  { %v459_v22 = vadd.f32 %v5949_v8, %v458_v43  ;;  %v6144_v43 = vpop.permute.xlu0 %1911  ;;  %v6146_v3 = vpop.permute.xlu1 %1659 }
 0x1f1   :  { %8623 = vst [vmem:[#allocation82_spill] sm:$0xff] %v6144_v43 }
 0x1f2   :  { %v560_v29 = vmax.f32 %v459_v22, 0.0  ;;  %8624 = vst [vmem:[#allocation83_spill] sm:$0xff] %v6146_v3  ;;  %v6149_v19 = vpop.permute.xlu2 %1915 }
 0x1f3   :  { %8625 = vst [vmem:[#allocation84_spill] sm:$0xff] %v6149_v19  ;;  %v968_v56 = vld [vmem:[#allocation2 + $0x258] sm:$0xff] }
 0x1f4   :  { %713 = vst.msk [vmem:[#allocation2 + $0x261] sm:$0xff] %vm579_vm1, %v560_v29 }
 0x1f5   :  { %1941 = vrot.lane.b32.xlu0 %v952_v50, %s5378_s14  ;;  %1937 = vrot.lane.b32.xlu1 %v950_v23, %s5378_s14  ;;  %v991_v50 = vld [vmem:[#allocation2 + $0x39] sm:$0xff] }
 0x1f6   :  { %1939 = vrot.lane.b32.xlu2 %v951_v5, %s5378_s14  ;;  %v891_v5 = vld [vmem:[#allocation2 + $0x172] sm:$0xff] }
 0x1f7   :  { %v461_v37 = vpop.f32.mrf.mxu0 }
 0x1f8   :  { %v462_v22 = vadd.f32 %v5949_v8, %v461_v37  ;;  %v6155_v43 = vpop.permute.xlu0 %1663  ;;  %v6157_v3 = vpop.permute.xlu1 %2009 }
 0x1f9   :  { %8626 = vst [vmem:[#allocation85_spill] sm:$0xff] %v6155_v43  ;;  %v993_v43 = vld [vmem:[#allocation2 + $0x51] sm:$0xff] }
 0x1fa   :  { %v561_v29 = vmax.f32 %v462_v22, 0.0  ;;  %8627 = vst [vmem:[#allocation86_spill] sm:$0xff] %v6157_v3  ;;  %v6160_v19 = vpop.permute.xlu2 %1667 }
 0x1fb   :  { %8628 = vst [vmem:[#allocation87_spill] sm:$0xff] %v6160_v19  ;;  %v6339_v52 = vld [vmem:[#allocation2 + $0x261] sm:$0xff] }
 0x1fc   :  { %714 = vst.msk [vmem:[#allocation2 + $0x271] sm:$0xff] %vm579_vm1, %v561_v29  ;;  %v969_v34 = vld [vmem:[#allocation2 + $0x260] sm:$0xff] }
 0x1fd   :  { %2147 = vrot.lane.b32.xlu0 %v991_v50, %s5377_s13  ;;  %1435 = vrot.lane.b32.xlu1 %v6162_v13, %s5376_s0  ;;  %v890_v50 = vld [vmem:[#allocation2 + $0x16a] sm:$0xff] }
 0x1fe   :  { %1691 = vrot.lane.b32.xlu2 %v891_v5, %s5374_s30 }
 0x1ff   :  { %v464_v36 = vpop.f32.mrf.mxu0 }
 0x200   :  { %v465_v37 = vadd.f32 %v5949_v8, %v464_v36  ;;  %v6169_v29 = vpop.permute.xlu0 %1409  ;;  %v6171_v36 = vpop.permute.xlu1 %1405 }
 0x201   :  { %8629 = vst [vmem:[#allocation88_spill] sm:$0xff] %v6169_v29 }
 0x202   :  { %v562_v22 = vmax.f32 %v465_v37, 0.0  ;;  %8630 = vst [vmem:[#allocation89_spill] sm:$0xff] %v6171_v36  ;;  %v6174_v3 = vpop.permute.xlu2 %1413 }
 0x203   :  { %8631 = vst [vmem:[#allocation90_spill] sm:$0xff] %v6174_v3  ;;  %v6195_v3 = vld [vmem:[#allocation2 + $0x1d1] sm:$0xff] }
 0x204   :  { %715 = vst.msk [vmem:[#allocation2 + $0x279] sm:$0xff] %vm579_vm1, %v562_v22  ;;  %v994_v22 = vld [vmem:[#allocation2 + $0x61] sm:$0xff] }
 0x205   :  { %2153 = vrot.lane.b32.xlu0 %v994_v22, %s5377_s13  ;;  %1689 = vrot.lane.b32.xlu1 %v890_v50, %s5374_s30  ;;  %v895_v50 = vld [vmem:[#allocation2 + $0x1d2] sm:$0xff] }
 0x206   :  { %2151 = vrot.lane.b32.xlu2 %v993_v43, %s5377_s13 }
 0x207   :  { %v467_v23 = vpop.f32.mrf.mxu0 }
 0x208   :  { %v468_v37 = vadd.f32 %v5949_v8, %v467_v23  ;;  %v6180_v5 = vpop.permute.xlu0 %1917  ;;  %v6182_v29 = vpop.permute.xlu1 %1913  ;;  %v955_v8 = vld [vmem:[#allocation2 + $0x188] sm:$0xff]  ;;  %v953_v23 = vld [vmem:[#allocation2 + $0x170] sm:$0xff] }
 0x209   :  { %8632 = vst [vmem:[#allocation91_spill] sm:$0xff] %v6180_v5  ;;  %v992_v5 = vld [vmem:[#allocation2 + $0x49] sm:$0xff] }
 0x20a   :  { %v563_v19 = vmax.f32 %v468_v37, 0.0  ;;  %8633 = vst [vmem:[#allocation92_spill] sm:$0xff] %v6182_v29  ;;  %v6184_v36 = vpop.permute.xlu2 %1921 }
 0x20b   :  { %8634 = vst [vmem:[#allocation93_spill] sm:$0xff] %v6184_v36  ;;  %v956_v36 = vld [vmem:[#allocation2 + $0x1c8] sm:$0xff]  ;;  %v908_v1 = vld [vmem:[#allocation2 + $0x272] sm:$0xff] }
 0x20c   :  { %716 = vst.msk [vmem:[#allocation2 + $0x289] sm:$0xff] %vm579_vm1, %v563_v19  ;;  %v954_v19 = vld [vmem:[#allocation2 + $0x180] sm:$0xff] }
 0x20d   :  { %1947 = vrot.lane.b32.xlu0 %v955_v8, %s5378_s14  ;;  %1943 = vrot.lane.b32.xlu1 %v953_v23, %s5378_s14 }
 0x20e   :  { %1945 = vrot.lane.b32.xlu2 %v954_v19, %s5378_s14 }
 0x210   :  { %v6189_v37 = vpop.permute.xlu0 %1415  ;;  %v6191_v22 = vpop.permute.xlu1 %1411 }
 0x211   :  { %8635 = vst [vmem:[#allocation94_spill] sm:$0xff] %v6189_v37  ;;  %v6207_v37 = vld [vmem:[#allocation2 + $0x1e1] sm:$0xff] }
 0x212   :  { %8636 = vst [vmem:[#allocation95_spill] sm:$0xff] %v6191_v22  ;;  %v6193_v43 = vpop.permute.xlu2 %1419 }
 0x213   :  { %8637 = vst [vmem:[#allocation96_spill] sm:$0xff] %v6193_v43  ;;  %v6209_v43 = vld [vmem:[#allocation2 + $0x1c9] sm:$0xff] }
 0x215   :  { %1699 = vrot.lane.b32.xlu0 %v895_v50, %s5374_s30  ;;  %2149 = vrot.lane.b32.xlu1 %v992_v5, %s5377_s13  ;;  %v894_v5 = vld [vmem:[#allocation2 + $0x1ca] sm:$0xff] }
 0x216   :  { %1443 = vrot.lane.b32.xlu2 %v6195_v3, %s5376_s0 }
 0x218   :  { %v6201_v8 = vpop.permute.xlu0 %1669  ;;  %v6203_v23 = vpop.permute.xlu1 %1665 }
 0x219   :  { %8638 = vst [vmem:[#allocation97_spill] sm:$0xff] %v6201_v8 }
 0x21a   :  { %8639 = vst [vmem:[#allocation98_spill] sm:$0xff] %v6203_v23  ;;  %v6205_v19 = vpop.permute.xlu2 %1673  ;;  %v957_v23 = vld [vmem:[#allocation2 + $0x1d0] sm:$0xff] }
 0x21b   :  { %8640 = vst [vmem:[#allocation99_spill] sm:$0xff] %v6205_v19  ;;  %v958_v19 = vld [vmem:[#allocation2 + $0x1e0] sm:$0xff] }
 0x21d   :  { %1445 = vrot.lane.b32.xlu0 %v6207_v37, %s5376_s0  ;;  %1441 = vrot.lane.b32.xlu1 %v6209_v43, %s5376_s0 }
 0x21e   :  { %1697 = vrot.lane.b32.xlu2 %v894_v5, %s5374_s30 }
 0x220   :  { %v6216_v50 = vpop.permute.xlu0 %1923  ;;  %v6218_v8 = vpop.permute.xlu1 %1919 }
 0x221   :  { %8641 = vst [vmem:[#allocation100_spill] sm:$0xff] %v6216_v50  ;;  %v6231_v50 = vld [vmem:[#allocation2 + $0x201] sm:$0xff] }
 0x222   :  { %8642 = vst [vmem:[#allocation101_spill] sm:$0xff] %v6218_v8  ;;  %v6220_v22 = vpop.permute.xlu2 %1927  ;;  %v6233_v8 = vld [vmem:[#allocation2 + $0x1e9] sm:$0xff] }
 0x223   :  { %8643 = vst [vmem:[#allocation102_spill] sm:$0xff] %v6220_v22  ;;  %v896_v22 = vld [vmem:[#allocation2 + $0x1e2] sm:$0xff] }
 0x225   :  { %1953 = vrot.lane.b32.xlu0 %v958_v19, %s5378_s14  ;;  %1949 = vrot.lane.b32.xlu1 %v956_v36, %s5378_s14  ;;  %v897_v36 = vld [vmem:[#allocation2 + $0x1ea] sm:$0xff] }
 0x226   :  { %1951 = vrot.lane.b32.xlu2 %v957_v23, %s5378_s14 }
 0x228   :  { %v6225_v29 = vpop.permute.xlu0 %1675  ;;  %v6227_v32 = vpop.permute.xlu1 %1671 }
 0x229   :  { %8644 = vst [vmem:[#allocation103_spill] sm:$0xff] %v6225_v29 }
 0x22a   :  { %8645 = vst [vmem:[#allocation104_spill] sm:$0xff] %v6227_v32  ;;  %v6229_v5 = vpop.permute.xlu2 %1679  ;;  %v6248_v32 = vld [vmem:[#allocation2 + $0x1f9] sm:$0xff] }
 0x22b   :  { %8646 = vst [vmem:[#allocation105_spill] sm:$0xff] %v6229_v5  ;;  %v898_v5 = vld [vmem:[#allocation2 + $0x1fa] sm:$0xff] }
 0x22d   :  { %1451 = vrot.lane.b32.xlu0 %v6231_v50, %s5376_s0  ;;  %1447 = vrot.lane.b32.xlu1 %v6233_v8, %s5376_s0 }
 0x22e   :  { %1703 = vrot.lane.b32.xlu2 %v897_v36, %s5374_s30 }
 0x230   :  { %v6240_v23 = vpop.permute.xlu0 %1421  ;;  %v6242_v19 = vpop.permute.xlu1 %1417 }
 0x231   :  { %8647 = vst [vmem:[#allocation106_spill] sm:$0xff] %v6240_v23 }
 0x232   :  { %8648 = vst [vmem:[#allocation107_spill] sm:$0xff] %v6242_v19  ;;  %v6244_v29 = vpop.permute.xlu2 %1425  ;;  %v961_v19 = vld [vmem:[#allocation2 + $0x200] sm:$0xff] }
 0x233   :  { %8649 = vst [vmem:[#allocation108_spill] sm:$0xff] %v6244_v29 }
 0x235   :  { %1705 = vrot.lane.b32.xlu0 %v898_v5, %s5374_s30  ;;  %1701 = vrot.lane.b32.xlu1 %v896_v22, %s5374_s30  ;;  %v960_v5 = vld [vmem:[#allocation2 + $0x1f8] sm:$0xff] }
 0x236   :  { %1449 = vrot.lane.b32.xlu2 %v6248_v32, %s5376_s0 }
 0x238   :  { %v6252_v11 = vpop.permute.xlu0 %1929  ;;  %v6254_v36 = vpop.permute.xlu1 %1925 }
 0x239   :  { %8650 = vst [vmem:[#allocation109_spill] sm:$0xff] %v6252_v11  ;;  %v901_v11 = vld [vmem:[#allocation2 + $0x21a] sm:$0xff] }
 0x23a   :  { %8651 = vst [vmem:[#allocation110_spill] sm:$0xff] %v6254_v36  ;;  %v6256_v23 = vpop.permute.xlu2 %1933  ;;  %v899_v36 = vld [vmem:[#allocation2 + $0x202] sm:$0xff] }
 0x23b   :  { %8652 = vst [vmem:[#allocation111_spill] sm:$0xff] %v6256_v23  ;;  %v962_v23 = vld [vmem:[#allocation2 + $0x210] sm:$0xff] }
 0x23d   :  { %1959 = vrot.lane.b32.xlu0 %v961_v19, %s5378_s14  ;;  %1955 = vrot.lane.b32.xlu1 %v959_v28, %s5378_s14 }
 0x23e   :  { %1957 = vrot.lane.b32.xlu2 %v960_v5, %s5378_s14 }
 0x240   :  { %v6261_v22 = vpop.permute.xlu0 %1427  ;;  %v6263_v29 = vpop.permute.xlu1 %1423 }
 0x241   :  { %8653 = vst [vmem:[#allocation112_spill] sm:$0xff] %v6261_v22  ;;  %v6279_v22 = vld [vmem:[#allocation2 + $0x229] sm:$0xff] }
 0x242   :  { %8654 = vst [vmem:[#allocation113_spill] sm:$0xff] %v6263_v29  ;;  %v6265_v49 = vpop.permute.xlu2 %1431 }
 0x243   :  { %8655 = vst [vmem:[#allocation114_spill] sm:$0xff] %v6265_v49  ;;  %v6281_v49 = vld [vmem:[#allocation2 + $0x211] sm:$0xff] }
 0x245   :  { %1711 = vrot.lane.b32.xlu0 %v901_v11, %s5374_s30  ;;  %1707 = vrot.lane.b32.xlu1 %v899_v36, %s5374_s30  ;;  %v900_v11 = vld [vmem:[#allocation2 + $0x212] sm:$0xff] }
 0x246   :  { %1455 = vrot.lane.b32.xlu2 %v6267_v18, %s5376_s0 }
 0x248   :  { %v6273_v28 = vpop.permute.xlu0 %1681  ;;  %v6275_v19 = vpop.permute.xlu1 %1677 }
 0x249   :  { %8656 = vst [vmem:[#allocation115_spill] sm:$0xff] %v6273_v28 }
 0x24a   :  { %8657 = vst [vmem:[#allocation116_spill] sm:$0xff] %v6275_v19  ;;  %v6277_v5 = vpop.permute.xlu2 %1685  ;;  %v963_v19 = vld [vmem:[#allocation2 + $0x218] sm:$0xff] }
 0x24b   :  { %8658 = vst [vmem:[#allocation117_spill] sm:$0xff] %v6277_v5  ;;  %v964_v5 = vld [vmem:[#allocation2 + $0x228] sm:$0xff] }
 0x24d   :  { %1457 = vrot.lane.b32.xlu0 %v6279_v22, %s5376_s0  ;;  %1453 = vrot.lane.b32.xlu1 %v6281_v49, %s5376_s0 }
 0x24e   :  { %1709 = vrot.lane.b32.xlu2 %v900_v11, %s5374_s30 }
 0x250   :  { %v6288_v36 = vpop.permute.xlu0 %1935  ;;  %v6290_v28 = vpop.permute.xlu1 %1931 }
 0x251   :  { %8659 = vst [vmem:[#allocation118_spill] sm:$0xff] %v6288_v36  ;;  %v6303_v36 = vld [vmem:[#allocation2 + $0x249] sm:$0xff] }
 0x252   :  { %8660 = vst [vmem:[#allocation119_spill] sm:$0xff] %v6290_v28  ;;  %v6292_v29 = vpop.permute.xlu2 %1939  ;;  %v6305_v28 = vld [vmem:[#allocation2 + $0x231] sm:$0xff] }
 0x253   :  { %8661 = vst [vmem:[#allocation120_spill] sm:$0xff] %v6292_v29  ;;  %v902_v29 = vld [vmem:[#allocation2 + $0x22a] sm:$0xff] }
 0x255   :  { %1965 = vrot.lane.b32.xlu0 %v964_v5, %s5378_s14  ;;  %1961 = vrot.lane.b32.xlu1 %v962_v23, %s5378_s14  ;;  %v903_v23 = vld [vmem:[#allocation2 + $0x232] sm:$0xff] }
 0x256   :  { %1963 = vrot.lane.b32.xlu2 %v963_v19, %s5378_s14 }
 0x258   :  { %v6297_v57 = vpop.permute.xlu0 %1687  ;;  %v6299_v47 = vpop.permute.xlu1 %1683 }
 0x259   :  { %8662 = vst [vmem:[#allocation121_spill] sm:$0xff] %v6297_v57 }
 0x25a   :  { %8663 = vst [vmem:[#allocation122_spill] sm:$0xff] %v6299_v47  ;;  %v6301_v11 = vpop.permute.xlu2 %1691  ;;  %v6320_v47 = vld [vmem:[#allocation2 + $0x241] sm:$0xff] }
 0x25b   :  { %8664 = vst [vmem:[#allocation123_spill] sm:$0xff] %v6301_v11  ;;  %v904_v11 = vld [vmem:[#allocation2 + $0x242] sm:$0xff] }
 0x25d   :  { %1463 = vrot.lane.b32.xlu0 %v6303_v36, %s5376_s0  ;;  %1459 = vrot.lane.b32.xlu1 %v6305_v28, %s5376_s0 }
 0x25e   :  { %1715 = vrot.lane.b32.xlu2 %v903_v23, %s5374_s30 }
 0x260   :  { %v6312_v19 = vpop.permute.xlu0 %1433  ;;  %v6314_v5 = vpop.permute.xlu1 %1429 }
 0x261   :  { %8665 = vst [vmem:[#allocation124_spill] sm:$0xff] %v6312_v19 }
 0x262   :  { %8666 = vst [vmem:[#allocation125_spill] sm:$0xff] %v6314_v5  ;;  %v6316_v57 = vpop.permute.xlu2 %2151  ;;  %v967_v5 = vld [vmem:[#allocation2 + $0x248] sm:$0xff] }
 0x263   :  { %8667 = vst [vmem:[#allocation126_spill] sm:$0xff] %v6316_v57 }
 0x265   :  { %1717 = vrot.lane.b32.xlu0 %v904_v11, %s5374_s30  ;;  %1713 = vrot.lane.b32.xlu1 %v902_v29, %s5374_s30  ;;  %v966_v11 = vld [vmem:[#allocation2 + $0x240] sm:$0xff] }
 0x266   :  { %1461 = vrot.lane.b32.xlu2 %v6320_v47, %s5376_s0 }
 0x268   :  { %v6324_v39 = vpop.permute.xlu0 %1941  ;;  %v6326_v23 = vpop.permute.xlu1 %1937 }
 0x269   :  { %8668 = vst [vmem:[#allocation127_spill] sm:$0xff] %v6324_v39  ;;  %v907_v39 = vld [vmem:[#allocation2 + $0x262] sm:$0xff] }
 0x26a   :  { %8669 = vst [vmem:[#allocation128_spill] sm:$0xff] %v6326_v23  ;;  %v6328_v19 = vpop.permute.xlu2 %1945  ;;  %v905_v23 = vld [vmem:[#allocation2 + $0x24a] sm:$0xff] }
 0x26b   :  { %8670 = vst [vmem:[#allocation129_spill] sm:$0xff] %v6328_v19 }
 0x26d   :  { %1971 = vrot.lane.b32.xlu0 %v967_v5, %s5378_s14  ;;  %1967 = vrot.lane.b32.xlu1 %v965_v41, %s5378_s14 }
 0x26e   :  { %1969 = vrot.lane.b32.xlu2 %v966_v11, %s5378_s14 }
 0x270   :  { %v6333_v29 = vpop.permute.xlu0 %2147  ;;  %v6335_v9 = vpop.permute.xlu1 %1435 }
 0x271   :  { %8671 = vst [vmem:[#allocation130_spill] sm:$0xff] %v6335_v9  ;;  %v6351_v9 = vld [vmem:[#allocation2 + $0x271] sm:$0xff] }
 0x272   :  { %v6337_v61 = vpop.permute.xlu2 %1443 }
 0x273   :  { %8672 = vst [vmem:[#allocation131_spill] sm:$0xff] %v6337_v61  ;;  %v6353_v61 = vld [vmem:[#allocation2 + $0x259] sm:$0xff] }
 0x275   :  { %1723 = vrot.lane.b32.xlu0 %v907_v39, %s5374_s30  ;;  %1719 = vrot.lane.b32.xlu1 %v905_v23, %s5374_s30  ;;  %v906_v39 = vld [vmem:[#allocation2 + $0x25a] sm:$0xff] }
 0x276   :  { %1467 = vrot.lane.b32.xlu2 %v6339_v52, %s5376_s0 }
 0x278   :  { %v6345_v41 = vpop.permute.xlu0 %2153  ;;  %v6347_v5 = vpop.permute.xlu1 %1689 }
 0x279   :  { %8673 = vst [vmem:[#allocation132_spill] sm:$0xff] %v6345_v41 }
 0x27a   :  { %8674 = vst [vmem:[#allocation133_spill] sm:$0xff] %v6347_v5  ;;  %v6349_v11 = vpop.permute.xlu2 %1697 }
 0x27b   :  { %8675 = vst [vmem:[#allocation134_spill] sm:$0xff] %v6349_v11  ;;  %v970_v11 = vld [vmem:[#allocation2 + $0x270] sm:$0xff] }
 0x27d   :  { %1469 = vrot.lane.b32.xlu0 %v6351_v9, %s5376_s0  ;;  %1465 = vrot.lane.b32.xlu1 %v6353_v61, %s5376_s0 }
 0x27e   :  { %1721 = vrot.lane.b32.xlu2 %v906_v39, %s5374_s30 }
 0x280   :  { %v6360_v23 = vpop.permute.xlu0 %1947  ;;  %v6362_v19 = vpop.permute.xlu1 %1943 }
 0x281   :  { %8676 = vst [vmem:[#allocation135_spill] sm:$0xff] %v6360_v23  ;;  %v6375_v23 = vld [vmem:[#allocation2 + $0x279] sm:$0xff] }
 0x282   :  { %8677 = vst [vmem:[#allocation136_spill] sm:$0xff] %v6362_v19  ;;  %v6364_v5 = vpop.permute.xlu2 %1951  ;;  %v910_v19 = vld [vmem:[#allocation2 + $0x28a] sm:$0xff] }
 0x283   :  { %8678 = vst [vmem:[#allocation137_spill] sm:$0xff] %v6364_v5  ;;  %v973_v5 = vld [vmem:[#allocation2 + $0x290] sm:$0xff] }
 0x285   :  { %1977 = vrot.lane.b32.xlu0 %v970_v11, %s5378_s14  ;;  %1973 = vrot.lane.b32.xlu1 %v968_v56, %s5378_s14  ;;  %v909_v11 = vld [vmem:[#allocation2 + $0x27a] sm:$0xff] }
 0x286   :  { %1975 = vrot.lane.b32.xlu2 %v969_v34, %s5378_s14 }
 0x288   :  { %v6369_v17 = vpop.permute.xlu0 %1699  ;;  %v6371_v24 = vpop.permute.xlu1 %2149 }
 0x289   :  { %8679 = vst [vmem:[#allocation138_spill] sm:$0xff] %v6369_v17 }
 0x28a   :  { %v6373_v39 = vpop.permute.xlu2 %1703 }
 0x28b   :  { %8680 = vst [vmem:[#allocation139_spill] sm:$0xff] %v6373_v39  ;;  %v6389_v39 = vld [vmem:[#allocation2 + $0x79] sm:$0xff] }
 0x28d   :  { %1729 = vrot.lane.b32.xlu0 %v910_v19, %s5374_s30  ;;  %1471 = vrot.lane.b32.xlu1 %v6375_v23, %s5376_s0 }
 0x28e   :  { %1727 = vrot.lane.b32.xlu2 %v909_v11, %s5374_s30 }
 0x290   :  { %v6381_v56 = vpop.permute.xlu0 %1445  ;;  %v6383_v34 = vpop.permute.xlu1 %1441 }
 0x291   :  { %8681 = vst [vmem:[#allocation140_spill] sm:$0xff] %v6381_v56 }
 0x292   :  { %8682 = vst [vmem:[#allocation141_spill] sm:$0xff] %v6383_v34  ;;  %v6385_v17 = vpop.permute.xlu2 %1449  ;;  %v6399_v34 = vld [vmem:[#allocation2 + $0x81] sm:$0xff] }
 0x293   :  { %8683 = vst [vmem:[#allocation142_spill] sm:$0xff] %v6385_v17  ;;  %v971_v17 = vld [vmem:[#allocation2 + $0x278] sm:$0xff] }
 0x295   :  { %1983 = vrot.lane.b32.xlu0 %v973_v5, %s5378_s14  ;;  %1725 = vrot.lane.b32.xlu1 %v908_v1, %s5374_s30  ;;  %v6404_v1 = vld [vmem:[#allocation2 + $0x289] sm:$0xff] }
 0x296   :  { %2157 = vrot.lane.b32.xlu2 %v6389_v39, %s5377_s13 }
 0x298   :  { %v6393_v19 = vpop.permute.xlu0 %1953  ;;  %v6395_v11 = vpop.permute.xlu1 %1949 }
 0x299   :  { %8684 = vst [vmem:[#allocation143_spill] sm:$0xff] %v6393_v19 }
 0x29a   :  { %8685 = vst [vmem:[#allocation144_spill] sm:$0xff] %v6395_v11  ;;  %v6397_v56 = vpop.permute.xlu2 %1957 }
 0x29b   :  { %8686 = vst [vmem:[#allocation145_spill] sm:$0xff] %v6397_v56  ;;  %v6414_v56 = vld [vmem:[#allocation2 + $0xa9] sm:$0xff] }
 0x29d   :  { %2159 = vrot.lane.b32.xlu0 %v6399_v34, %s5377_s13  ;;  %1979 = vrot.lane.b32.xlu1 %v971_v17, %s5378_s14  ;;  %v972_v17 = vld [vmem:[#allocation2 + $0x288] sm:$0xff] }
 0x29e   :  { %1473 = vrot.lane.b32.xlu2 %v6404_v1, %s5376_s0 }
 0x2a0   :  { %v6408_v5 = vpop.permute.xlu0 %1451  ;;  %v6410_v19 = vpop.permute.xlu1 %1447 }
 0x2a1   :  { %8687 = vst [vmem:[#allocation146_spill] sm:$0xff] %v6408_v5 }
 0x2a2   :  { %8688 = vst [vmem:[#allocation147_spill] sm:$0xff] %v6410_v19  ;;  %v6412_v11 = vpop.permute.xlu2 %1455 }
 0x2a3   :  { %8689 = vst [vmem:[#allocation148_spill] sm:$0xff] %v6412_v11  ;;  %v6429_v11 = vld [vmem:[#allocation2 + $0xc9] sm:$0xff] }
 0x2a5   :  { %2165 = vrot.lane.b32.xlu0 %v6414_v56, %s5377_s13  ;;  %2155 = vrot.lane.b32.xlu1 %v6416_v40, %s5377_s13 }
 0x2a6   :  { %1981 = vrot.lane.b32.xlu2 %v972_v17, %s5378_s14 }
 0x2a8   :  { %v6423_v41 = vpop.permute.xlu0 %1705  ;;  %v6425_v5 = vpop.permute.xlu1 %1701 }
 0x2a9   :  { %8690 = vst [vmem:[#allocation149_spill] sm:$0xff] %v6423_v41 }
 0x2aa   :  { %8691 = vst [vmem:[#allocation150_spill] sm:$0xff] %v6425_v5  ;;  %v6427_v19 = vpop.permute.xlu2 %1709  ;;  %v6447_v5 = vld [vmem:[#allocation2 + $0xb1] sm:$0xff] }
 0x2ab   :  { %8692 = vst [vmem:[#allocation151_spill] sm:$0xff] %v6427_v19 }
 0x2ad   :  { %2171 = vrot.lane.b32.xlu0 %v6429_v11, %s5377_s13  ;;  %2161 = vrot.lane.b32.xlu1 %v6431_v44, %s5377_s13 }
 0x2ae   :  { %2163 = vrot.lane.b32.xlu2 %v6437_v35, %s5377_s13 }
 0x2b0   :  { %v6441_v17 = vpop.permute.xlu0 %1959  ;;  %v6443_v41 = vpop.permute.xlu1 %1955 }
 0x2b1   :  { %8693 = vst [vmem:[#allocation152_spill] sm:$0xff] %v6441_v17 }
 0x2b2   :  { %8694 = vst [vmem:[#allocation153_spill] sm:$0xff] %v6443_v41  ;;  %v6445_v19 = vpop.permute.xlu2 %1963 }
 0x2b3   :  { %8695 = vst [vmem:[#allocation154_spill] sm:$0xff] %v6445_v19  ;;  %v6463_v19 = vld [vmem:[#allocation2 + $0xd9] sm:$0xff] }
 0x2b5   :  { %2177 = vrot.lane.b32.xlu0 %v6014_v25, %s5377_s13  ;;  %2167 = vrot.lane.b32.xlu1 %v6447_v5, %s5377_s13  ;;  %v6469_v25 = vld [vmem:[#allocation2 + $0xe1] sm:$0xff] }
 0x2b6   :  { %2169 = vrot.lane.b32.xlu2 %v6453_v20, %s5377_s13 }
 0x2b8   :  { %v6457_v57 = vpop.permute.xlu0 %1711  ;;  %v6459_v17 = vpop.permute.xlu1 %1707 }
 0x2b9   :  { %8696 = vst [vmem:[#allocation155_spill] sm:$0xff] %v6457_v57 }
 0x2ba   :  { %8697 = vst [vmem:[#allocation156_spill] sm:$0xff] %v6459_v17  ;;  %v6461_v41 = vpop.permute.xlu2 %1715 }
 0x2bb   :  { %8698 = vst [vmem:[#allocation157_spill] sm:$0xff] %v6461_v41  ;;  %v6479_v41 = vld [vmem:[#allocation2 + $0xf9] sm:$0xff] }
 0x2bd   :  { %2183 = vrot.lane.b32.xlu0 %v6036_v54, %s5377_s13  ;;  %2173 = vrot.lane.b32.xlu1 %v6463_v19, %s5377_s13 }
 0x2be   :  { %2175 = vrot.lane.b32.xlu2 %v6469_v25, %s5377_s13 }
 0x2c0   :  { %v6473_v55 = vpop.permute.xlu0 %1457  ;;  %v6475_v57 = vpop.permute.xlu1 %1453 }
 0x2c1   :  { %8699 = vst [vmem:[#allocation158_spill] sm:$0xff] %v6473_v55 }
 0x2c2   :  { %8700 = vst [vmem:[#allocation159_spill] sm:$0xff] %v6475_v57  ;;  %v6477_v17 = vpop.permute.xlu2 %1461 }
 0x2c3   :  { %8701 = vst [vmem:[#allocation160_spill] sm:$0xff] %v6477_v17 }
 0x2c5   :  { %2189 = vrot.lane.b32.xlu0 %v6098_v30, %s5377_s13  ;;  %2179 = vrot.lane.b32.xlu1 %v6479_v41, %s5377_s13 }
 0x2c6   :  { %2181 = vrot.lane.b32.xlu2 %v6053_v4, %s5377_s13 }
 0x2c8   :  { %v6487_v54 = vpop.permute.xlu0 %1965  ;;  %v6489_v26 = vpop.permute.xlu1 %1961 }
 0x2c9   :  { %8702 = vst [vmem:[#allocation161_spill] sm:$0xff] %v6487_v54  ;;  %v1018_v54 = vld [vmem:[#allocation2 + $0x181] sm:$0xff] }
 0x2ca   :  { %8703 = vst [vmem:[#allocation162_spill] sm:$0xff] %v6489_v26  ;;  %v6491_v55 = vpop.permute.xlu2 %1969  ;;  %v6646_v26 = vld [vmem:[#allocation2 + $0x52] sm:$0xff] }
 0x2cb   :  { %8704 = vst [vmem:[#allocation163_spill] sm:$0xff] %v6491_v55  ;;  %v1047_v55 = vld [vmem:[#allocation2 + $0x309] sm:$0xff] }
 0x2cd   :  { %2195 = vrot.lane.b32.xlu0 %v6120_v63, %s5377_s13  ;;  %2185 = vrot.lane.b32.xlu1 %v6050_v10, %s5377_s13 }
 0x2ce   :  { %2187 = vrot.lane.b32.xlu2 %v6080_v42, %s5377_s13 }
 0x2d0   :  { %v6499_v30 = vpop.permute.xlu0 %1463  ;;  %v6501_v17 = vpop.permute.xlu1 %1459 }
 0x2d1   :  { %8705 = vst [vmem:[#allocation164_spill] sm:$0xff] %v6499_v30  ;;  %v1048_v30 = vld [vmem:[#allocation2 + $0x319] sm:$0xff] }
 0x2d2   :  { %8706 = vst [vmem:[#allocation165_spill] sm:$0xff] %v6501_v17  ;;  %v6503_v4 = vpop.permute.xlu2 %1467  ;;  %v1046_v17 = vld [vmem:[#allocation2 + $0x301] sm:$0xff] }
 0x2d3   :  { %8707 = vst [vmem:[#allocation166_spill] sm:$0xff] %v6503_v4  ;;  %v1019_v4 = vld [vmem:[#allocation2 + $0x189] sm:$0xff] }
 0x2d5   :  { %2201 = vrot.lane.b32.xlu0 %v1018_v54, %s5377_s13  ;;  %2191 = vrot.lane.b32.xlu1 %v6078_v27, %s5377_s13 }
 0x2d6   :  { %2193 = vrot.lane.b32.xlu2 %v6137_v6, %s5377_s13 }
 0x2d8   :  { %v6510_v63 = vpop.permute.xlu0 %1717  ;;  %v6512_v10 = vpop.permute.xlu1 %1713 }
 0x2d9   :  { %8708 = vst [vmem:[#allocation167_spill] sm:$0xff] %v6510_v63  ;;  %v1044_v63 = vld [vmem:[#allocation2 + $0x2e9] sm:$0xff] }
 0x2da   :  { %8709 = vst [vmem:[#allocation168_spill] sm:$0xff] %v6512_v10  ;;  %v6514_v42 = vpop.permute.xlu2 %1721  ;;  %v6634_v10 = vld [vmem:[#allocation2 + $0x32] sm:$0xff] }
 0x2db   :  { %8710 = vst [vmem:[#allocation169_spill] sm:$0xff] %v6514_v42  ;;  %v1037_v42 = vld [vmem:[#allocation2 + $0x291] sm:$0xff] }
 0x2dd   :  { %2207 = vrot.lane.b32.xlu0 %v6195_v3, %s5377_s13  ;;  %2197 = vrot.lane.b32.xlu1 %v6134_v59, %s5377_s13 }
 0x2de   :  { %2199 = vrot.lane.b32.xlu2 %v6162_v13, %s5377_s13 }
 0x2e0   :  { %v6522_v54 = vpop.permute.xlu0 %1971  ;;  %v6524_v27 = vpop.permute.xlu1 %1967 }
 0x2e1   :  { %8711 = vst [vmem:[#allocation170_spill] sm:$0xff] %v6522_v54  ;;  %v1051_v54 = vld [vmem:[#allocation2 + $0x339] sm:$0xff] }
 0x2e2   :  { %8712 = vst [vmem:[#allocation171_spill] sm:$0xff] %v6524_v27  ;;  %v6526_v6 = vpop.permute.xlu2 %1975  ;;  %v1049_v27 = vld [vmem:[#allocation2 + $0x321] sm:$0xff] }
 0x2e3   :  { %8713 = vst [vmem:[#allocation172_spill] sm:$0xff] %v6526_v6  ;;  %v1045_v6 = vld [vmem:[#allocation2 + $0x2f1] sm:$0xff] }
 0x2e5   :  { %2213 = vrot.lane.b32.xlu0 %v6248_v32, %s5377_s13  ;;  %2203 = vrot.lane.b32.xlu1 %v1019_v4, %s5377_s13 }
 0x2e6   :  { %2205 = vrot.lane.b32.xlu2 %v6209_v43, %s5377_s13 }
 0x2e8   :  { %v6533_v3 = vpop.permute.xlu0 %1723  ;;  %v6535_v59 = vpop.permute.xlu1 %1719 }
 0x2e9   :  { %8714 = vst [vmem:[#allocation173_spill] sm:$0xff] %v6533_v3  ;;  %v1039_v3 = vld [vmem:[#allocation2 + $0x2a9] sm:$0xff] }
 0x2ea   :  { %8715 = vst [vmem:[#allocation174_spill] sm:$0xff] %v6535_v59  ;;  %v6537_v13 = vpop.permute.xlu2 %1727  ;;  %v1040_v59 = vld [vmem:[#allocation2 + $0x2b9] sm:$0xff] }
 0x2eb   :  { %8716 = vst [vmem:[#allocation175_spill] sm:$0xff] %v6537_v13  ;;  %v6658_v13 = vld [vmem:[#allocation2 + $0x7a] sm:$0xff] }
 0x2ed   :  { %2219 = vrot.lane.b32.xlu0 %v6267_v18, %s5377_s13  ;;  %2209 = vrot.lane.b32.xlu1 %v6207_v37, %s5377_s13 }
 0x2ee   :  { %2211 = vrot.lane.b32.xlu2 %v6233_v8, %s5377_s13 }
 0x2f0   :  { %v6545_v32 = vpop.permute.xlu0 %1469  ;;  %v6547_v4 = vpop.permute.xlu1 %1465 }
 0x2f1   :  { %8717 = vst [vmem:[#allocation176_spill] sm:$0xff] %v6545_v32  ;;  %v6676_v32 = vld [vmem:[#allocation2 + $0x9a] sm:$0xff] }
 0x2f2   :  { %8718 = vst [vmem:[#allocation177_spill] sm:$0xff] %v6547_v4  ;;  %v6549_v43 = vpop.permute.xlu2 %2157  ;;  %v1038_v4 = vld [vmem:[#allocation2 + $0x2a1] sm:$0xff] }
 0x2f3   :  { %8719 = vst [vmem:[#allocation178_spill] sm:$0xff] %v6549_v43 }
 0x2f5   :  { %2225 = vrot.lane.b32.xlu0 %v6320_v47, %s5377_s13  ;;  %2215 = vrot.lane.b32.xlu1 %v6231_v50, %s5377_s13 }
 0x2f6   :  { %2217 = vrot.lane.b32.xlu2 %v6281_v49, %s5377_s13 }
 0x2f8   :  { %v6557_v18 = vpop.permute.xlu0 %1977  ;;  %v6559_v37 = vpop.permute.xlu1 %1973 }
 0x2f9   :  { %8720 = vst [vmem:[#allocation179_spill] sm:$0xff] %v6557_v18  ;;  %v1042_v18 = vld [vmem:[#allocation2 + $0x2d1] sm:$0xff] }
 0x2fa   :  { %8721 = vst [vmem:[#allocation180_spill] sm:$0xff] %v6559_v37  ;;  %v6561_v8 = vpop.permute.xlu2 %1473  ;;  %v1043_v37 = vld [vmem:[#allocation2 + $0x2d9] sm:$0xff] }
 0x2fb   :  { %8722 = vst [vmem:[#allocation181_spill] sm:$0xff] %v6561_v8  ;;  %v1053_v8 = vld [vmem:[#allocation2 + $0x22] sm:$0xff] }
 0x2fd   :  { %2231 = vrot.lane.b32.xlu0 %v6339_v52, %s5377_s13  ;;  %2221 = vrot.lane.b32.xlu1 %v6279_v22, %s5377_s13 }
 0x2fe   :  { %2223 = vrot.lane.b32.xlu2 %v6305_v28, %s5377_s13 }
 0x300   :  { %v6569_v47 = vpop.permute.xlu0 %1729  ;;  %v6571_v50 = vpop.permute.xlu1 %1471 }
 0x301   :  { %8723 = vst [vmem:[#allocation182_spill] sm:$0xff] %v6569_v47  ;;  %v1052_v47 = vld [vmem:[#allocation2 + $0x1a] sm:$0xff] }
 0x302   :  { %8724 = vst [vmem:[#allocation183_spill] sm:$0xff] %v6571_v50  ;;  %v6573_v49 = vpop.permute.xlu2 %1981  ;;  %v6660_v50 = vld [vmem:[#allocation2 + $0x3a] sm:$0xff] }
 0x303   :  { %8725 = vst [vmem:[#allocation184_spill] sm:$0xff] %v6573_v49 }
 0x305   :  { %2237 = vrot.lane.b32.xlu0 %v6404_v1, %s5377_s13  ;;  %2227 = vrot.lane.b32.xlu1 %v6303_v36, %s5377_s13 }
 0x306   :  { %2229 = vrot.lane.b32.xlu2 %v6353_v61, %s5377_s13 }
 0x308   :  { %v6581_v52 = vpop.permute.xlu0 %1983  ;;  %v6583_v22 = vpop.permute.xlu1 %1725 }
 0x309   :  { %8726 = vst [vmem:[#allocation185_spill] sm:$0xff] %v6581_v52 }
 0x30a   :  { %8727 = vst [vmem:[#allocation186_spill] sm:$0xff] %v6583_v22  ;;  %v6585_v28 = vpop.permute.xlu2 %2163 }
 0x30b   :  { %8728 = vst [vmem:[#allocation187_spill] sm:$0xff] %v6585_v28 }
 0x30d   :  { %2243 = vrot.lane.b32.xlu0 %v1039_v3, %s5377_s13  ;;  %2233 = vrot.lane.b32.xlu1 %v6351_v9, %s5377_s13 }
 0x30e   :  { %2235 = vrot.lane.b32.xlu2 %v6375_v23, %s5377_s13 }
 0x310   :  { %v6592_v1 = vpop.permute.xlu0 %2159  ;;  %v6594_v36 = vpop.permute.xlu1 %1979 }
 0x311   :  { %8729 = vst [vmem:[#allocation188_spill] sm:$0xff] %v6592_v1 }
 0x312   :  { %8730 = vst [vmem:[#allocation189_spill] sm:$0xff] %v6594_v36  ;;  %v6596_v61 = vpop.permute.xlu2 %2169  ;;  %v1041_v36 = vld [vmem:[#allocation2 + $0x2c1] sm:$0xff] }
 0x313   :  { %8731 = vst [vmem:[#allocation190_spill] sm:$0xff] %v6596_v61  ;;  %v1181_v61 = vld [vmem:[#allocation2 + $0x31] sm:$0xff] }
 0x315   :  { %2249 = vrot.lane.b32.xlu0 %v1042_v18, %s5377_s13  ;;  %2239 = vrot.lane.b32.xlu1 %v1037_v42, %s5377_s13 }
 0x316   :  { %2241 = vrot.lane.b32.xlu2 %v1038_v4, %s5377_s13 }
 0x318   :  { %v6601_v3 = vpop.permute.xlu0 %2165  ;;  %v6603_v9 = vpop.permute.xlu1 %2155 }
 0x319   :  { %8732 = vst [vmem:[#allocation191_spill] sm:$0xff] %v6601_v3  ;;  %v6771_v3 = vld [vmem:[#allocation2 + $0x122] sm:$0xff] }
 0x31a   :  { %v6605_v23 = vpop.permute.xlu2 %2175 }
 0x31b   :  { %8733 = vst [vmem:[#allocation192_spill] sm:$0xff] %v6605_v23  ;;  %v6748_v23 = vld [vmem:[#allocation2 + $0x12a] sm:$0xff] }
 0x31d   :  { %2255 = vrot.lane.b32.xlu0 %v1045_v6, %s5377_s13  ;;  %2245 = vrot.lane.b32.xlu1 %v1040_v59, %s5377_s13 }
 0x31e   :  { %2247 = vrot.lane.b32.xlu2 %v1041_v36, %s5377_s13 }
 0x320   :  { %v6610_v18 = vpop.permute.xlu0 %2171  ;;  %v6612_v42 = vpop.permute.xlu1 %2161 }
 0x321   :  { %8734 = vst [vmem:[#allocation193_spill] sm:$0xff] %v6610_v18  ;;  %v6756_v18 = vld [vmem:[#allocation2 + $0xfa] sm:$0xff] }
 0x322   :  { %8735 = vst [vmem:[#allocation194_spill] sm:$0xff] %v6612_v42  ;;  %v6614_v4 = vpop.permute.xlu2 %2181  ;;  %v6781_v42 = vld [vmem:[#allocation2 + $0x13a] sm:$0xff] }
 0x323   :  { %8736 = vst [vmem:[#allocation195_spill] sm:$0xff] %v6614_v4  ;;  %v6730_v4 = vld [vmem:[#allocation2 + $0x10a] sm:$0xff] }
 0x324   :  { %8770 = vst [vmem:[#allocation229_spill] sm:$0xff] %v6781_v42 }
 0x325   :  { %2261 = vrot.lane.b32.xlu0 %v1048_v30, %s5377_s13  ;;  %2251 = vrot.lane.b32.xlu1 %v1043_v37, %s5377_s13 }
 0x326   :  { %2253 = vrot.lane.b32.xlu2 %v1044_v63, %s5377_s13 }
 0x328   :  { %v6619_v6 = vpop.permute.xlu0 %2177  ;;  %v6621_v59 = vpop.permute.xlu1 %2167 }
 0x329   :  { %8737 = vst [vmem:[#allocation196_spill] sm:$0xff] %v6619_v6  ;;  %v6738_v6 = vld [vmem:[#allocation2 + $0xda] sm:$0xff] }
 0x32a   :  { %8738 = vst [vmem:[#allocation197_spill] sm:$0xff] %v6621_v59  ;;  %v6623_v36 = vpop.permute.xlu2 %2187  ;;  %v6766_v59 = vld [vmem:[#allocation2 + $0x112] sm:$0xff] }
 0x32b   :  { %8739 = vst [vmem:[#allocation198_spill] sm:$0xff] %v6623_v36  ;;  %v6712_v36 = vld [vmem:[#allocation2 + $0xe2] sm:$0xff] }
 0x32d   :  { %2267 = vrot.lane.b32.xlu0 %v1051_v54, %s5377_s13  ;;  %2257 = vrot.lane.b32.xlu1 %v1046_v17, %s5377_s13  ;;  %v1050_v54 = vld [vmem:[#allocation2 + $0x331] sm:$0xff] }
 0x32e   :  { %2259 = vrot.lane.b32.xlu2 %v1047_v55, %s5377_s13 }
 0x330   :  { %v6628_v30 = vpop.permute.xlu0 %2183  ;;  %v6630_v37 = vpop.permute.xlu1 %2173 }
 0x331   :  { %8740 = vst [vmem:[#allocation199_spill] sm:$0xff] %v6628_v30  ;;  %v6720_v30 = vld [vmem:[#allocation2 + $0xb2] sm:$0xff] }
 0x332   :  { %8741 = vst [vmem:[#allocation200_spill] sm:$0xff] %v6630_v37  ;;  %v6632_v63 = vpop.permute.xlu2 %2193  ;;  %v6750_v37 = vld [vmem:[#allocation2 + $0xf2] sm:$0xff] }
 0x333   :  { %8742 = vst [vmem:[#allocation201_spill] sm:$0xff] %v6632_v63  ;;  %v6694_v63 = vld [vmem:[#allocation2 + $0xc2] sm:$0xff] }
 0x335   :  { %2401 = vrot.lane.b32.xlu0 %v6634_v10, %s5379_s2  ;;  %2263 = vrot.lane.b32.xlu1 %v1049_v27, %s5377_s13 }
 0x336   :  { %2265 = vrot.lane.b32.xlu2 %v1050_v54, %s5377_s13 }
 0x338   :  { %v6640_v17 = vpop.permute.xlu0 %2189  ;;  %v6642_v55 = vpop.permute.xlu1 %2179 }
 0x339   :  { %8743 = vst [vmem:[#allocation202_spill] sm:$0xff] %v6640_v17  ;;  %v6702_v17 = vld [vmem:[#allocation2 + $0x92] sm:$0xff] }
 0x33a   :  { %8744 = vst [vmem:[#allocation203_spill] sm:$0xff] %v6642_v55  ;;  %v6644_v57 = vpop.permute.xlu2 %2199  ;;  %v6732_v55 = vld [vmem:[#allocation2 + $0xca] sm:$0xff] }
 0x33b   :  { %8745 = vst [vmem:[#allocation204_spill] sm:$0xff] %v6644_v57  ;;  %v6684_v57 = vld [vmem:[#allocation2 + $0x6a] sm:$0xff] }
 0x33d   :  { %2407 = vrot.lane.b32.xlu0 %v6646_v26, %s5379_s2  ;;  %2397 = vrot.lane.b32.xlu1 %v1052_v47, %s5379_s2  ;;  %v6666_v47 = vld [vmem:[#allocation2 + $0x4a] sm:$0xff] }
 0x33e   :  { %2399 = vrot.lane.b32.xlu2 %v1053_v8, %s5379_s2 }
 0x340   :  { %v6652_v27 = vpop.permute.xlu0 %2195  ;;  %v6654_v54 = vpop.permute.xlu1 %2185 }
 0x341   :  { %8746 = vst [vmem:[#allocation205_spill] sm:$0xff] %v6652_v27 }
 0x342   :  { %8747 = vst [vmem:[#allocation206_spill] sm:$0xff] %v6654_v54  ;;  %v6656_v52 = vpop.permute.xlu2 %2205  ;;  %v6714_v54 = vld [vmem:[#allocation2 + $0xaa] sm:$0xff] }
 0x343   :  { %8748 = vst [vmem:[#allocation207_spill] sm:$0xff] %v6656_v52  ;;  %v6678_v52 = vld [vmem:[#allocation2 + $0x62] sm:$0xff] }
 0x345   :  { %2413 = vrot.lane.b32.xlu0 %v6658_v13, %s5379_s2  ;;  %2403 = vrot.lane.b32.xlu1 %v6660_v50, %s5379_s2 }
 0x346   :  { %2405 = vrot.lane.b32.xlu2 %v6666_v47, %s5379_s2 }
 0x348   :  { %v6670_v8 = vpop.permute.xlu0 %2201  ;;  %v6672_v49 = vpop.permute.xlu1 %2191 }
 0x349   :  { %8749 = vst [vmem:[#allocation208_spill] sm:$0xff] %v6670_v8 }
 0x34a   :  { %8750 = vst [vmem:[#allocation209_spill] sm:$0xff] %v6672_v49  ;;  %v6674_v22 = vpop.permute.xlu2 %2211  ;;  %v6696_v49 = vld [vmem:[#allocation2 + $0x82] sm:$0xff] }
 0x34b   :  { %8751 = vst [vmem:[#allocation210_spill] sm:$0xff] %v6674_v22 }
 0x34d   :  { %2419 = vrot.lane.b32.xlu0 %v6676_v32, %s5379_s2  ;;  %2409 = vrot.lane.b32.xlu1 %v6678_v52, %s5379_s2 }
 0x34e   :  { %2411 = vrot.lane.b32.xlu2 %v6684_v57, %s5379_s2 }
 0x350   :  { %v6688_v8 = vpop.permute.xlu0 %2207  ;;  %v6690_v27 = vpop.permute.xlu1 %2197 }
 0x351   :  { %8752 = vst [vmem:[#allocation211_spill] sm:$0xff] %v6688_v8 }
 0x352   :  { %8753 = vst [vmem:[#allocation212_spill] sm:$0xff] %v6690_v27  ;;  %v6692_v22 = vpop.permute.xlu2 %2217 }
 0x353   :  { %8754 = vst [vmem:[#allocation213_spill] sm:$0xff] %v6692_v22 }
 0x355   :  { %2425 = vrot.lane.b32.xlu0 %v6694_v63, %s5379_s2  ;;  %2415 = vrot.lane.b32.xlu1 %v6696_v49, %s5379_s2 }
 0x356   :  { %2417 = vrot.lane.b32.xlu2 %v6702_v17, %s5379_s2 }
 0x358   :  { %v6706_v8 = vpop.permute.xlu0 %2213  ;;  %v6708_v27 = vpop.permute.xlu1 %2203 }
 0x359   :  { %8755 = vst [vmem:[#allocation214_spill] sm:$0xff] %v6706_v8 }
 0x35a   :  { %8756 = vst [vmem:[#allocation215_spill] sm:$0xff] %v6708_v27  ;;  %v6710_v22 = vpop.permute.xlu2 %2223 }
 0x35b   :  { %8757 = vst [vmem:[#allocation216_spill] sm:$0xff] %v6710_v22 }
 0x35d   :  { %2431 = vrot.lane.b32.xlu0 %v6712_v36, %s5379_s2  ;;  %2421 = vrot.lane.b32.xlu1 %v6714_v54, %s5379_s2 }
 0x35e   :  { %2423 = vrot.lane.b32.xlu2 %v6720_v30, %s5379_s2 }
 0x360   :  { %v6724_v8 = vpop.permute.xlu0 %2219  ;;  %v6726_v27 = vpop.permute.xlu1 %2209 }
 0x361   :  { %8758 = vst [vmem:[#allocation217_spill] sm:$0xff] %v6724_v8 }
 0x362   :  { %8759 = vst [vmem:[#allocation218_spill] sm:$0xff] %v6726_v27  ;;  %v6728_v22 = vpop.permute.xlu2 %2229 }
 0x363   :  { %8760 = vst [vmem:[#allocation219_spill] sm:$0xff] %v6728_v22 }
 0x365   :  { %2437 = vrot.lane.b32.xlu0 %v6730_v4, %s5379_s2  ;;  %2427 = vrot.lane.b32.xlu1 %v6732_v55, %s5379_s2 }
 0x366   :  { %2429 = vrot.lane.b32.xlu2 %v6738_v6, %s5379_s2 }
 0x368   :  { %v6742_v8 = vpop.permute.xlu0 %2225  ;;  %v6744_v27 = vpop.permute.xlu1 %2215 }
 0x369   :  { %8761 = vst [vmem:[#allocation220_spill] sm:$0xff] %v6742_v8 }
 0x36a   :  { %8762 = vst [vmem:[#allocation221_spill] sm:$0xff] %v6744_v27  ;;  %v6746_v22 = vpop.permute.xlu2 %2235 }
 0x36b   :  { %8763 = vst [vmem:[#allocation222_spill] sm:$0xff] %v6746_v22 }
 0x36d   :  { %2443 = vrot.lane.b32.xlu0 %v6748_v23, %s5379_s2  ;;  %2433 = vrot.lane.b32.xlu1 %v6750_v37, %s5379_s2 }
 0x36e   :  { %2435 = vrot.lane.b32.xlu2 %v6756_v18, %s5379_s2 }
 0x370   :  { %v6760_v8 = vpop.permute.xlu0 %2231  ;;  %v6762_v27 = vpop.permute.xlu1 %2221 }
 0x371   :  { %8764 = vst [vmem:[#allocation223_spill] sm:$0xff] %v6760_v8 }
 0x372   :  { %8765 = vst [vmem:[#allocation224_spill] sm:$0xff] %v6762_v27  ;;  %v6764_v22 = vpop.permute.xlu2 %2241 }
 0x373   :  { %8766 = vst [vmem:[#allocation225_spill] sm:$0xff] %v6764_v22  ;;  %v1182_v22 = vld [vmem:[#allocation2 + $0x39] sm:$0xff] }
 0x375   :  { %2909 = vrot.lane.b32.xlu0 %v1181_v61, %s5380_s17  ;;  %2439 = vrot.lane.b32.xlu1 %v6766_v59, %s5379_s2  ;;  %v1117_v61 = vld [vmem:[#allocation2 + $0x30] sm:$0xff] }
 0x376   :  { %2441 = vrot.lane.b32.xlu2 %v6771_v3, %s5379_s2 }
 0x378   :  { %v6775_v28 = vpop.permute.xlu0 %2237  ;;  %v6777_v8 = vpop.permute.xlu1 %2227 }
 0x379   :  { %8767 = vst [vmem:[#allocation226_spill] sm:$0xff] %v6775_v28 }
 0x37a   :  { %8768 = vst [vmem:[#allocation227_spill] sm:$0xff] %v6777_v8  ;;  %v6779_v27 = vpop.permute.xlu2 %2247  ;;  %v1183_v8 = vld [vmem:[#allocation2 + $0x49] sm:$0xff] }
 0x37b   :  { %8769 = vst [vmem:[#allocation228_spill] sm:$0xff] %v6779_v27 }
 0x37d   :  { %2911 = vrot.lane.b32.xlu0 %v1182_v22, %s5380_s17  ;;  %2445 = vrot.lane.b32.xlu1 %v6781_v42, %s5379_s2  ;;  %v1118_v22 = vld [vmem:[#allocation2 + $0x38] sm:$0xff] }
 0x37e   :  { %2653 = vrot.lane.b32.xlu2 %v1117_v61, %s5381_s18 }
 0x380   :  { %v6787_v1 = vpop.permute.xlu0 %2243  ;;  %v6789_v43 = vpop.permute.xlu1 %2233 }
 0x381   :  { %8771 = vst [vmem:[#allocation230_spill] sm:$0xff] %v6787_v1  ;;  %v1184_v1 = vld [vmem:[#allocation2 + $0x51] sm:$0xff] }
 0x382   :  { %8772 = vst [vmem:[#allocation231_spill] sm:$0xff] %v6789_v43  ;;  %v6791_v28 = vpop.permute.xlu2 %2253 }
 0x383   :  { %8773 = vst [vmem:[#allocation232_spill] sm:$0xff] %v6791_v28  ;;  %v1185_v28 = vld [vmem:[#allocation2 + $0x61] sm:$0xff] }
 0x385   :  { %2913 = vrot.lane.b32.xlu0 %v1183_v8, %s5380_s17  ;;  %3165 = vrot.lane.b32.xlu1 %v6634_v10, %s5382_s19  ;;  %v1119_v8 = vld [vmem:[#allocation2 + $0x48] sm:$0xff] }
 0x386   :  { %2655 = vrot.lane.b32.xlu2 %v1118_v22, %s5381_s18 }
 0x388   :  { %v6797_v27 = vpop.permute.xlu0 %2249  ;;  %v6799_v42 = vpop.permute.xlu1 %2239 }
 0x389   :  { %8774 = vst [vmem:[#allocation233_spill] sm:$0xff] %v6797_v27  ;;  %v3879_v27 = vld [vmem:[%s8544_s3 + $0x20] sm:$0xf] }
 0x38a   :  { %8775 = vst [vmem:[#allocation234_spill] sm:$0xff] %v6799_v42  ;;  %v6801_v61 = vpop.permute.xlu2 %2259  ;;  %5038 = vmatpush.msk.msra.mxu1 %vm4077_vm4, %v3879_v27  ;;  %5170 = vmatpush.msk.msrb.mxu3 %vm4077_vm4, %v3879_v27 }
 0x38b   :  { %8776 = vst [vmem:[#allocation235_spill] sm:$0xff] %v6801_v61  ;;  %v1120_v61 = vld [vmem:[#allocation2 + $0x50] sm:$0xff] }
 0x38d   :  { %2915 = vrot.lane.b32.xlu0 %v1184_v1, %s5380_s17  ;;  %3167 = vrot.lane.b32.xlu1 %v6660_v50, %s5382_s19 }
 0x38e   :  { %2657 = vrot.lane.b32.xlu2 %v1119_v8, %s5381_s18 }
 0x390   :  { %v6807_v43 = vpop.permute.xlu0 %2255  ;;  %v6809_v10 = vpop.permute.xlu1 %2245 }
 0x391   :  { %8777 = vst [vmem:[#allocation236_spill] sm:$0xff] %v6807_v43  ;;  %v1126_v43 = vld [vmem:[#allocation2 + $0x98] sm:$0xff] }
 0x392   :  { %8778 = vst [vmem:[#allocation237_spill] sm:$0xff] %v6809_v10  ;;  %v6811_v22 = vpop.permute.xlu2 %2265  ;;  %v3876_v10 = vld [vmem:[%s8544_s3 + $0x8] sm:$0xff] }
 0x393   :  { %8779 = vst [vmem:[#allocation238_spill] sm:$0xff] %v6811_v22  ;;  %v1121_v22 = vld [vmem:[#allocation2 + $0x60] sm:$0xff] }
 0x395   :  { %2917 = vrot.lane.b32.xlu0 %v1185_v28, %s5380_s17  ;;  %3169 = vrot.lane.b32.xlu1 %v6666_v47, %s5382_s19 }
 0x396   :  { %2659 = vrot.lane.b32.xlu2 %v1120_v61, %s5381_s18 }
 0x398   :  { %v6817_v1 = vpop.permute.xlu0 %2261  ;;  %v6819_v50 = vpop.permute.xlu1 %2251 }
 0x399   :  { %8780 = vst [vmem:[#allocation239_spill] sm:$0xff] %v6817_v1  ;;  %v1122_v1 = vld [vmem:[#allocation2 + $0x68] sm:$0xff] }
 0x39a   :  { %8781 = vst [vmem:[#allocation240_spill] sm:$0xff] %v6819_v50  ;;  %v6821_v8 = vpop.permute.xlu2 %2399  ;;  %v1127_v50 = vld [vmem:[#allocation2 + $0xa8] sm:$0xff] }
 0x39d   :  { %2919 = vrot.lane.b32.xlu0 %v6416_v40, %s5380_s17  ;;  %3171 = vrot.lane.b32.xlu1 %v6646_v26, %s5382_s19 }
 0x39e   :  { %2661 = vrot.lane.b32.xlu2 %v1121_v22, %s5381_s18 }
 0x3a0   :  { %v6828_v28 = vpop.permute.xlu0 %2267  ;;  %v6830_v47 = vpop.permute.xlu1 %2257 }
 0x3a1   :  { %8782 = vst [vmem:[#allocation241_spill] sm:$0xff] %v6828_v28  ;;  %v1123_v28 = vld [vmem:[#allocation2 + $0x78] sm:$0xff] }
 0x3a2   :  { %8783 = vst [vmem:[#allocation242_spill] sm:$0xff] %v6830_v47  ;;  %v6832_v61 = vpop.permute.xlu2 %2405  ;;  %v1125_v47 = vld [vmem:[#allocation2 + $0x90] sm:$0xff] }
 0x3a5   :  { %2921 = vrot.lane.b32.xlu0 %v6389_v39, %s5380_s17  ;;  %3173 = vrot.lane.b32.xlu1 %v6678_v52, %s5382_s19 }
 0x3a6   :  { %2663 = vrot.lane.b32.xlu2 %v1122_v1, %s5381_s18 }
 0x3a8   :  { %v6839_v40 = vpop.permute.xlu0 %2401  ;;  %v6841_v26 = vpop.permute.xlu1 %2263 }
 0x3a9   :  { %8784 = vst [vmem:[#allocation243_spill] sm:$0xff] %v6841_v26  ;;  %v1124_v26 = vld [vmem:[#allocation2 + $0x80] sm:$0xff] }
 0x3aa   :  { %v6843_v22 = vpop.permute.xlu2 %2411 }
 0x3ad   :  { %2923 = vrot.lane.b32.xlu0 %v6399_v34, %s5380_s17  ;;  %3175 = vrot.lane.b32.xlu1 %v6684_v57, %s5382_s19 }
 0x3ae   :  { %2665 = vrot.lane.b32.xlu2 %v1123_v28, %s5381_s18 }
 0x3b0   :  { %v6850_v39 = vpop.permute.xlu0 %2407  ;;  %v6852_v52 = vpop.permute.xlu1 %2397 }
 0x3b2   :  { %v6854_v1 = vpop.permute.xlu2 %2417 }
 0x3b5   :  { %2925 = vrot.lane.b32.xlu0 %v6431_v44, %s5380_s17  ;;  %3177 = vrot.lane.b32.xlu1 %v6658_v13, %s5382_s19 }
 0x3b6   :  { %2667 = vrot.lane.b32.xlu2 %v1124_v26, %s5381_s18 }
 0x3b8   :  { %v6861_v34 = vpop.permute.xlu0 %2413  ;;  %v6863_v57 = vpop.permute.xlu1 %2403 }
 0x3ba   :  { %v6865_v28 = vpop.permute.xlu2 %2423 }
 0x3bd   :  { %2927 = vrot.lane.b32.xlu0 %v6437_v35, %s5380_s17  ;;  %3179 = vrot.lane.b32.xlu1 %v6696_v49, %s5382_s19 }
 0x3be   :  { %2669 = vrot.lane.b32.xlu2 %v1125_v47, %s5381_s18 }
 0x3c0   :  { %v6872_v44 = vpop.permute.xlu0 %2419  ;;  %v6874_v13 = vpop.permute.xlu1 %2409 }
 0x3c2   :  { %v6876_v26 = vpop.permute.xlu2 %2429 }
 0x3c5   :  { %2929 = vrot.lane.b32.xlu0 %v6414_v56, %s5380_s17  ;;  %3181 = vrot.lane.b32.xlu1 %v6702_v17, %s5382_s19 }
 0x3c6   :  { %2671 = vrot.lane.b32.xlu2 %v1126_v43, %s5381_s18 }
 0x3c8   :  { %v6883_v35 = vpop.permute.xlu0 %2425  ;;  %v6885_v49 = vpop.permute.xlu1 %2415 }
 0x3ca   :  { %v6887_v47 = vpop.permute.xlu2 %2435 }
 0x3cd   :  { %2931 = vrot.lane.b32.xlu0 %v6447_v5, %s5380_s17  ;;  %3183 = vrot.lane.b32.xlu1 %v6676_v32, %s5382_s19  ;;  %v3878_v5 = vld [vmem:[%s8544_s3 + $0x18] sm:$0xff]  ;;  %v3877_v32 = vld [vmem:[%s8544_s3 + $0x10] sm:$0xff] }
 0x3ce   :  { %2673 = vrot.lane.b32.xlu2 %v1127_v50, %s5381_s18  ;;  %4093 = vmatpush.msra.mxu1 %v3878_v5  ;;  %v1128_v50 = vld [vmem:[#allocation2 + $0xb0] sm:$0xff] }
 0x3cf   :  { %5171 = vmatpush.msrb.mxu3 %v3878_v5 }
 0x3d0   :  { %v6894_v56 = vpop.permute.xlu0 %2431  ;;  %v6896_v17 = vpop.permute.xlu1 %2421  ;;  %4094 = vmatpush.msra.mxu1 %v3877_v32 }
 0x3d1   :  { %5172 = vmatpush.msrb.mxu3 %v3877_v32 }
 0x3d2   :  { %v6898_v43 = vpop.permute.xlu2 %2441  ;;  %4095 = vmatpush.msra.mxu1 %v3876_v10 }
 0x3d3   :  { %8785 = vst [vmem:[#allocation244_spill] sm:$0xff] %v6898_v43  ;;  %5173 = vmatpush.msrb.mxu3 %v3876_v10  ;;  %v1130_v10 = vld [vmem:[#allocation2 + $0xc8] sm:$0xff] }
 0x3d5   :  { %2933 = vrot.lane.b32.xlu0 %v6453_v20, %s5380_s17  ;;  %3185 = vrot.lane.b32.xlu1 %v6714_v54, %s5382_s19  ;;  %v3875_v20 = vld [vmem:[%s8544_s3] sm:$0xff] }
 0x3d6   :  { %2675 = vrot.lane.b32.xlu2 %v1128_v50, %s5381_s18  ;;  %4096 = vmatpush.msra.mxu1 %v3875_v20  ;;  %v1129_v54 = vld [vmem:[#allocation2 + $0xc0] sm:$0xff] }
 0x3d7   :  { %5174 = vmatpush.msrb.mxu3 %v3875_v20 }
 0x3d8   :  { %v6919_v27 = vpop.permute.xlu0 %2437  ;;  %v6921_v42 = vpop.permute.xlu1 %2427 }
 0x3d9   :  { %8786 = vst [vmem:[#allocation245_spill] sm:$0xff] %v6919_v27  ;;  %v732_v27 = vld [vmem:[#allocation2] sm:$0xff] }
 0x3da   :  { %v2654_v5 = vpop.permute.xlu2 %2653 }
 0x3dd   :  { %2935 = vrot.lane.b32.xlu0 %v6429_v11, %s5380_s17  ;;  %3187 = vrot.lane.b32.xlu1 %v6720_v30, %s5382_s19 }
 0x3de   :  { %2677 = vrot.lane.b32.xlu2 %v1129_v54, %s5381_s18  ;;  %v3357_v54 = vsel %vm579_vm1, %v732_v27, %v5731_v21  ;;  %v1197_v27 = vld [vmem:[#allocation2 + $0xf1] sm:$0xff] }
 0x3e0   :  { %v6931_v50 = vpop.permute.xlu0 %2443  ;;  %v6933_v32 = vpop.permute.xlu1 %2433 }
 0x3e1   :  { %8787 = vst [vmem:[#allocation246_spill] sm:$0xff] %v6931_v50  ;;  %v3422_v50 = vsel %vm3421_vm5, %v3357_v54, %v5761_v51  ;;  %v1132_v51 = vld [vmem:[#allocation2 + $0xe0] sm:$0xff] }
 0x3e2   :  { %v2656_v43 = vpop.permute.xlu2 %2655  ;;  %v3487_v21 = vsel %vm3486_vm6, %v3422_v50, %v5755_v48 }
 0x3e5   :  { %2937 = vrot.lane.b32.xlu0 %v6463_v19, %s5380_s17  ;;  %3189 = vrot.lane.b32.xlu1 %v6694_v63, %s5382_s19  ;;  %v1131_v19 = vld [vmem:[#allocation2 + $0xd8] sm:$0xff] }
 0x3e6   :  { %2679 = vrot.lane.b32.xlu2 %v1130_v10, %s5381_s18 }
 0x3e8   :  { %v2910_v11 = vpop.permute.xlu0 %2909  ;;  %v6940_v20 = vpop.permute.xlu1 %2439 }
 0x3e9   :  { %8788 = vst [vmem:[#allocation247_spill] sm:$0xff] %v6940_v20 }
 0x3ea   :  { %v2658_v30 = vpop.permute.xlu2 %2657 }
 0x3ed   :  { %2939 = vrot.lane.b32.xlu0 %v6469_v25, %s5380_s17  ;;  %3191 = vrot.lane.b32.xlu1 %v6732_v55, %s5382_s19  ;;  %v733_v25 = vld [vmem:[#allocation2 + $0x8] sm:$0xff]  ;;  %v3551_v55 = vsel %vm113_vm0, %v3487_v21, %v5788_v14 }
 0x3ee   :  { %2681 = vrot.lane.b32.xlu2 %v1131_v19, %s5381_s18  ;;  %v3616_v19 = vsel %vm3615_vm8, %v3551_v55, %v6852_v52  ;;  %v3358_v14 = vsel %vm579_vm1, %v733_v25, %v5745_v38 }
 0x3ef   :  { %v3681_v48 = vsel %vm3680_vm7, %v3616_v19, %v2654_v5 }
 0x3f0   :  { %v2912_v63 = vpop.permute.xlu0 %2911  ;;  %v6949_v10 = vpop.permute.xlu1 %2445  ;;  %v3746_v50 = vsel %vm3745_vm9, %v3681_v48, %v2910_v11  ;;  %v1133_v11 = vld [vmem:[#allocation2 + $0xf0] sm:$0xff] }
 0x3f2   :  { %v6953_v20 = vpop.permute.xlu2 %2659 }
 0x3f5   :  { %2941 = vrot.lane.b32.xlu0 %v1197_v27, %s5380_s17  ;;  %3193 = vrot.lane.b32.xlu1 %v6738_v6, %s5382_s19  ;;  %v3423_v6 = vsel %vm3421_vm5, %v3358_v14, %v5741_v33  ;;  %v5192_v33 = vld [vmem:[#allocation2 + $0x18] sm:$0xff] }
 0x3f6   :  { %2683 = vrot.lane.b32.xlu2 %v1132_v51, %s5381_s18  ;;  %v3488_v5 = vsel %vm3486_vm6, %v3423_v6, %v5830_v62  ;;  %v3359_v62 = vsel %vm579_vm1, %v5192_v33, %v5790_v15  ;;  %v1199_v15 = vld [vmem:[#allocation2 + $0x109] sm:$0xff]  ;;  %v5193_v6 = vld [vmem:[#allocation2 + $0x20] sm:$0xff] }
 0x3f7   :  { %v3552_v27 = vsel %vm113_vm0, %v3488_v5, %v5844_v12  ;;  %v1200_v5 = vld [vmem:[#allocation2 + $0x111] sm:$0xff] }
 0x3f8   :  { %v2914_v54 = vpop.permute.xlu0 %2913  ;;  %v3166_v21 = vpop.permute.xlu1 %3165  ;;  %v3617_v38 = vsel %vm3615_vm8, %v3552_v27, %v6821_v8  ;;  %v3424_v8 = vsel %vm3421_vm5, %v3359_v62, %v5816_v45  ;;  %v1134_v45 = vld [vmem:[#allocation2 + $0xf8] sm:$0xff] }
 0x3f9   :  { %v3811_v52 = vsel %vm3810_vm10, %v3746_v50, %v3166_v21  ;;  %v3682_v25 = vsel %vm3680_vm7, %v3617_v38, %v2656_v43 }
 0x3fa   :  { %v6970_v55 = vpop.permute.xlu2 %2661  ;;  %5039 = vmatmul.msk.f32.vlgmr.msra.gmra.mxu1 %vm3884_vm11, %v3811_v52  ;;  %v3747_v12 = vsel %vm3745_vm9, %v3682_v25, %v2912_v63 }
 0x3fd   :  { %2943 = vrot.lane.b32.xlu0 %v6479_v41, %s5380_s17  ;;  %3195 = vrot.lane.b32.xlu1 %v6712_v36, %s5382_s19  ;;  %v3489_v36 = vsel %vm3486_vm6, %v3424_v8, %v5880_v60 }
 0x3fe   :  { %2685 = vrot.lane.b32.xlu2 %v1133_v11, %s5381_s18  ;;  %v3553_v43 = vsel %vm113_vm0, %v3489_v36, %v5781_v7 }
 0x3ff   :  { %v3618_v63 = vsel %vm3615_vm8, %v3553_v43, %v6839_v40  ;;  %v3360_v40 = vsel %vm579_vm1, %v5193_v6, %v5818_v46  ;;  %v1135_v46 = vld [vmem:[#allocation2 + $0x108] sm:$0xff] }
 0x400   :  { %v2916_v19 = vpop.permute.xlu0 %2915  ;;  %v3168_v51 = vpop.permute.xlu1 %3167  ;;  %v3683_v14 = vsel %vm3680_vm7, %v3618_v63, %v2658_v30  ;;  %v8791_v63 = vld [vmem:[#allocation126_spill] sm:$0xff] }
 0x401   :  { %v3812_v41 = vsel %vm3810_vm10, %v3747_v12, %v3168_v51  ;;  %v3748_v60 = vsel %vm3745_vm9, %v3683_v14, %v2914_v54  ;;  %v1201_v12 = vld [vmem:[#allocation2 + $0x121] sm:$0xff]  ;;  %v1202_v14 = vld [vmem:[#allocation2 + $0x129] sm:$0xff] }
 0x402   :  { %v6993_v48 = vpop.permute.xlu2 %2663  ;;  %5040 = vmatmul.msk.f32.gmra.mxu1 %vm3884_vm11, %v3812_v41 }
 0x405   :  { %2945 = vrot.lane.b32.xlu0 %v1199_v15, %s5380_s17  ;;  %3197 = vrot.lane.b32.xlu1 %v6750_v37, %s5382_s19  ;;  %v3425_v37 = vsel %vm3421_vm5, %v3360_v40, %v5832_v0 }
 0x406   :  { %2687 = vrot.lane.b32.xlu2 %v1134_v45, %s5381_s18  ;;  %v3490_v30 = vsel %vm3486_vm6, %v3425_v37, %v5859_v31 }
 0x407   :  { %v3554_v54 = vsel %vm113_vm0, %v3490_v30, %v6333_v29 }
 0x408   :  { %v2918_v50 = vpop.permute.xlu0 %2917  ;;  %v3170_v21 = vpop.permute.xlu1 %3169  ;;  %v3619_v27 = vsel %vm3615_vm8, %v3554_v54, %v6863_v57  ;;  %v5194_v57 = vld [vmem:[#allocation2 + $0x30] sm:$0xff] }
 0x409   :  { %v3813_v7 = vsel %vm3810_vm10, %v3748_v60, %v3170_v21  ;;  %v3684_v38 = vsel %vm3680_vm7, %v3619_v27, %v6953_v20  ;;  %v3361_v33 = vsel %vm579_vm1, %v5194_v57, %v5767_v58  ;;  %v1136_v58 = vld [vmem:[#allocation2 + $0x110] sm:$0xff]  ;;  %v5196_v21 = vld [vmem:[#allocation2 + $0x48] sm:$0xff] }
 0x40a   :  { %v7009_v52 = vpop.permute.xlu2 %2665  ;;  %5041 = vmatmul.msk.f32.gmra.mxu1 %vm3884_vm11, %v3813_v7  ;;  %v3749_v0 = vsel %vm3745_vm9, %v3684_v38, %v2916_v19  ;;  %v8792_v7 = vld [vmem:[#allocation26_spill] sm:$0xff]  ;;  %v5197_v57 = vld [vmem:[#allocation2 + $0x50] sm:$0xff] }
 0x40b   :  { %v3363_v6 = vsel %vm579_vm1, %v5196_v21, %v8792_v7  ;;  %v8803_v7 = vld [vmem:[#allocation229_spill] sm:$0xff] }
 0x40d   :  { %2947 = vrot.lane.b32.xlu0 %v1200_v5, %s5380_s17  ;;  %3199 = vrot.lane.b32.xlu1 %v6756_v18, %s5382_s19  ;;  %v3426_v18 = vsel %vm3421_vm5, %v3361_v33, %v5847_v16  ;;  %v8796_v33 = vld [vmem:[#allocation35_spill] sm:$0xff] }
 0x40e   :  { %2689 = vrot.lane.b32.xlu2 %v1135_v46, %s5381_s18  ;;  %v3491_v20 = vsel %vm3486_vm6, %v3426_v18, %v5906_v53  ;;  %v8795_v46 = vld [vmem:[#allocation132_spill] sm:$0xff]  ;;  %v3364_v18 = vsel %vm579_vm1, %v5197_v57, %v8796_v33  ;;  %v1268_v57 = vld [vmem:[#allocation2 + $0x142] sm:$0xff] }
 0x40f   :  { %v3555_v62 = vsel %vm113_vm0, %v3491_v20, %v6371_v24 }
 0x410   :  { %v2920_v31 = vpop.permute.xlu0 %2919  ;;  %v3172_v11 = vpop.permute.xlu1 %3171  ;;  %v3620_v19 = vsel %vm3615_vm8, %v3555_v62, %v6832_v61  ;;  %v5195_v61 = vld [vmem:[#allocation2 + $0x38] sm:$0xff] }
 0x411   :  { %v3814_v29 = vsel %vm3810_vm10, %v3749_v0, %v3172_v11  ;;  %v3685_v51 = vsel %vm3680_vm7, %v3620_v19, %v6970_v55  ;;  %v3362_v36 = vsel %vm579_vm1, %v5195_v61, %v5835_v2  ;;  %v8790_v55 = vld [vmem:[#allocation41_spill] sm:$0xff]  ;;  %v1138_v11 = vld [vmem:[#allocation2 + $0x128] sm:$0xff] }
 0x412   :  { %v7030_v25 = vpop.permute.xlu2 %2667  ;;  %5042 = vmatmul.msk.f32.gmra.mxu1 %vm3884_vm11, %v3814_v29  ;;  %v3750_v16 = vsel %vm3745_vm9, %v3685_v51, %v2918_v50  ;;  %v1137_v2 = vld [vmem:[#allocation2 + $0x120] sm:$0xff] }
 0x413   :  { %v1203_v0 = vld [vmem:[#allocation2 + $0x139] sm:$0xff] }
 0x415   :  { %2949 = vrot.lane.b32.xlu0 %v1201_v12, %s5380_s17  ;;  %3201 = vrot.lane.b32.xlu1 %v6730_v4, %s5382_s19  ;;  %v8789_v4 = vld [vmem:[#allocation19_spill] sm:$0xff] }
 0x416   :  { %2691 = vrot.lane.b32.xlu2 %v1136_v58, %s5381_s18  ;;  %v3427_v43 = vsel %vm3421_vm5, %v3362_v36, %v8789_v4 }
 0x417   :  { %v3492_v15 = vsel %vm3486_vm6, %v3427_v43, %v8790_v55 }
 0x418   :  { %v2922_v53 = vpop.permute.xlu0 %2921  ;;  %v3174_v8 = vpop.permute.xlu1 %3173  ;;  %v3556_v45 = vsel %vm113_vm0, %v3492_v15, %v8791_v63  ;;  %v8799_v15 = vld [vmem:[#allocation33_spill] sm:$0xff] }
 0x419   :  { %v3815_v24 = vsel %vm3810_vm10, %v3750_v16, %v3174_v8  ;;  %v3621_v60 = vsel %vm3615_vm8, %v3556_v45, %v6850_v39  ;;  %v8793_v39 = vld [vmem:[#allocation38_spill] sm:$0xff] }
 0x41a   :  { %v7051_v41 = vpop.permute.xlu2 %2669  ;;  %5043 = vmatmul.msk.f32.gmra.mxu1 %vm3884_vm11, %v3815_v24  ;;  %v3686_v50 = vsel %vm3680_vm7, %v3621_v60, %v6993_v48  ;;  %v3428_v54 = vsel %vm3421_vm5, %v3363_v6, %v8793_v39  ;;  %v8794_v48 = vld [vmem:[#allocation36_spill] sm:$0xff]  ;;  %v1204_v8 = vld [vmem:[#allocation2 + $0x141] sm:$0xff] }
 0x41b   :  { %v3751_v40 = vsel %vm3745_vm9, %v3686_v50, %v2920_v31  ;;  %v3493_v27 = vsel %vm3486_vm6, %v3428_v54, %v8794_v48  ;;  %v1139_v24 = vld [vmem:[#allocation2 + $0x138] sm:$0xff]  ;;  %v8802_v60 = vld [vmem:[#allocation178_spill] sm:$0xff]  ;;  %v1140_v6 = vld [vmem:[#allocation2 + $0x140] sm:$0xff] }
 0x41c   :  { %v3557_v38 = vsel %vm113_vm0, %v3493_v27, %v8795_v46  ;;  %v1205_v50 = vld [vmem:[#allocation2 + $0x151] sm:$0xff] }
 0x41d   :  { %2951 = vrot.lane.b32.xlu0 %v1202_v14, %s5380_s17  ;;  %3203 = vrot.lane.b32.xlu1 %v6766_v59, %s5382_s19  ;;  %v3622_v31 = vsel %vm3615_vm8, %v3557_v38, %v6874_v13  ;;  %v8804_v48 = vld [vmem:[#allocation40_spill] sm:$0xff]  ;;  %v8805_v46 = vld [vmem:[#allocation47_spill] sm:$0xff] }
 0x41e   :  { %2693 = vrot.lane.b32.xlu2 %v1137_v2, %s5381_s18  ;;  %v3687_v29 = vsel %vm3680_vm7, %v3622_v31, %v7009_v52  ;;  %v8798_v52 = vld [vmem:[#allocation46_spill] sm:$0xff]  ;;  %v8807_v31 = vld [vmem:[#allocation188_spill] sm:$0xff] }
 0x41f   :  { %v3752_v20 = vsel %vm3745_vm9, %v3687_v29, %v2922_v53  ;;  %v1142_v29 = vld [vmem:[#allocation2 + $0x158] sm:$0xff] }
 0x420   :  { %v2924_v37 = vpop.permute.xlu0 %2923  ;;  %v3176_v30 = vpop.permute.xlu1 %3175 }
 0x421   :  { %v3816_v5 = vsel %vm3810_vm10, %v3751_v40, %v3176_v30 }
 0x422   :  { %v7076_v59 = vpop.permute.xlu2 %2671  ;;  %5044 = vmatmul.msk.f32.gmra.mxu1 %vm3884_vm11, %v3816_v5 }
 0x425   :  { %2953 = vrot.lane.b32.xlu0 %v1203_v0, %s5380_s17  ;;  %3205 = vrot.lane.b32.xlu1 %v6771_v3, %s5382_s19  ;;  %v8797_v3 = vld [vmem:[#allocation25_spill] sm:$0xff] }
 0x426   :  { %2695 = vrot.lane.b32.xlu2 %v1138_v11, %s5381_s18  ;;  %v3429_v58 = vsel %vm3421_vm5, %v3364_v18, %v8797_v3  ;;  %v1141_v18 = vld [vmem:[#allocation2 + $0x150] sm:$0xff] }
 0x427   :  { %v3494_v51 = vsel %vm3486_vm6, %v3429_v58, %v8798_v52 }
 0x428   :  { %v2926_v62 = vpop.permute.xlu0 %2925  ;;  %v3178_v12 = vpop.permute.xlu1 %3177  ;;  %v3558_v16 = vsel %vm113_vm0, %v3494_v51, %v6603_v9 }
 0x429   :  { %v3817_v13 = vsel %vm3810_vm10, %v3752_v20, %v3178_v12  ;;  %v3623_v53 = vsel %vm3615_vm8, %v3558_v16, %v6843_v22  ;;  %v5198_v22 = vld [vmem:[#allocation2 + $0x60] sm:$0xff]  ;;  %v8808_v12 = vld [vmem:[#allocation56_spill] sm:$0xff]  ;;  %v8809_v16 = vld [vmem:[#allocation51_spill] sm:$0xff] }
 0x42a   :  { %v7095_v19 = vpop.permute.xlu2 %2673  ;;  %5045 = vmatmul.msk.f32.gmra.mxu1 %vm3884_vm11, %v3817_v13  ;;  %v3688_v61 = vsel %vm3680_vm7, %v3623_v53, %v7030_v25  ;;  %v3365_v63 = vsel %vm579_vm1, %v5198_v22, %v8799_v15  ;;  %v8801_v25 = vld [vmem:[#allocation59_spill] sm:$0xff] }
 0x42b   :  { %v3753_v36 = vsel %vm3745_vm9, %v3688_v61, %v2924_v37 }
 0x42d   :  { %2955 = vrot.lane.b32.xlu0 %v1204_v8, %s5380_s17  ;;  %3207 = vrot.lane.b32.xlu1 %v6748_v23, %s5382_s19  ;;  %v8800_v23 = vld [vmem:[#allocation43_spill] sm:$0xff] }
 0x42e   :  { %2697 = vrot.lane.b32.xlu2 %v1139_v24, %s5381_s18  ;;  %v3430_v45 = vsel %vm3421_vm5, %v3365_v63, %v8800_v23  ;;  %v8811_v24 = vld [vmem:[#allocation194_spill] sm:$0xff] }
 0x42f   :  { %v3495_v14 = vsel %vm3486_vm6, %v3430_v45, %v8801_v25  ;;  %v5201_v45 = vld [vmem:[#allocation2 + $0x80] sm:$0xff]  ;;  %v8812_v25 = vld [vmem:[#allocation48_spill] sm:$0xff] }
 0x430   :  { %v2928_v4 = vpop.permute.xlu0 %2927  ;;  %v3180_v43 = vpop.permute.xlu1 %3179  ;;  %v3559_v2 = vsel %vm113_vm0, %v3495_v14, %v8802_v60  ;;  %v8813_v14 = vld [vmem:[#allocation52_spill] sm:$0xff] }
 0x431   :  { %v3818_v9 = vsel %vm3810_vm10, %v3753_v36, %v3180_v43  ;;  %v3624_v21 = vsel %vm3615_vm8, %v3559_v2, %v6861_v34  ;;  %v5199_v34 = vld [vmem:[#allocation2 + $0x68] sm:$0xff]  ;;  %v1078_v36 = vld [vmem:[#allocation2 + $0x152] sm:$0xff] }
 0x432   :  { %v7114_v55 = vpop.permute.xlu2 %2675  ;;  %5046 = vmatmul.msk.f32.gmra.mxu1 %vm3884_vm11, %v3818_v9  ;;  %v3689_v40 = vsel %vm3680_vm7, %v3624_v21, %v7051_v41  ;;  %v3366_v27 = vsel %vm579_vm1, %v5199_v34, %v8804_v48  ;;  %v8806_v41 = vld [vmem:[#allocation54_spill] sm:$0xff] }
 0x433   :  { %v3754_v37 = vsel %vm3745_vm9, %v3689_v40, %v2926_v62  ;;  %v3431_v38 = vsel %vm3421_vm5, %v3366_v27, %v8805_v46  ;;  %v5200_v62 = vld [vmem:[#allocation2 + $0x78] sm:$0xff] }
 0x434   :  { %v3496_v0 = vsel %vm3486_vm6, %v3431_v38, %v8806_v41  ;;  %v3367_v13 = vsel %vm579_vm1, %v5200_v62, %v8808_v12  ;;  %v5203_v12 = vld [vmem:[#allocation2 + $0x98] sm:$0xff] }
 0x435   :  { %2957 = vrot.lane.b32.xlu0 %v1205_v50, %s5380_s17  ;;  %3209 = vrot.lane.b32.xlu1 %v8803_v7, %s5382_s19  ;;  %v3560_v11 = vsel %vm113_vm0, %v3496_v0, %v8807_v31  ;;  %v3432_v8 = vsel %vm3421_vm5, %v3367_v13, %v8809_v16  ;;  %v8815_v50 = vld [vmem:[#allocation187_spill] sm:$0xff] }
 0x436   :  { %2699 = vrot.lane.b32.xlu2 %v1140_v6, %s5381_s18  ;;  %v3625_v33 = vsel %vm3615_vm8, %v3560_v11, %v6885_v49  ;;  %v7186_v7 = vld [vmem:[#allocation2 + $0x16a] sm:$0xff]  ;;  %v1206_v6 = vld [vmem:[#allocation2 + $0x159] sm:$0xff] }
 0x437   :  { %v3690_v20 = vsel %vm3680_vm7, %v3625_v33, %v7076_v59  ;;  %v8810_v59 = vld [vmem:[#allocation64_spill] sm:$0xff]  ;;  %v8819_v11 = vld [vmem:[#allocation191_spill] sm:$0xff]  ;;  %v1143_v33 = vld [vmem:[#allocation2 + $0x168] sm:$0xff] }
 0x438   :  { %v2930_v30 = vpop.permute.xlu0 %2929  ;;  %v3182_v39 = vpop.permute.xlu1 %3181  ;;  %v3755_v3 = vsel %vm3745_vm9, %v3690_v20, %v2928_v4  ;;  %v3497_v53 = vsel %vm3486_vm6, %v3432_v8, %v8810_v59  ;;  %v1207_v20 = vld [vmem:[#allocation2 + $0x169] sm:$0xff]  ;;  %v8821_v8 = vld [vmem:[#allocation60_spill] sm:$0xff] }
 0x439   :  { %v3819_v54 = vsel %vm3810_vm10, %v3754_v37, %v3182_v39  ;;  %v3561_v61 = vsel %vm113_vm0, %v3497_v53, %v8811_v24  ;;  %v1270_v37 = vld [vmem:[#allocation2 + $0x15a] sm:$0xff]  ;;  %v5202_v39 = vld [vmem:[#allocation2 + $0x90] sm:$0xff]  ;;  %v8822_v53 = vld [vmem:[#allocation82_spill] sm:$0xff] }
 0x43a   :  { %v7135_v5 = vpop.permute.xlu2 %2677  ;;  %5047 = vmatmul.msk.f32.gmra.mxu1 %vm3884_vm11, %v3819_v54  ;;  %v3626_v4 = vsel %vm3615_vm8, %v3561_v61, %v6854_v1  ;;  %v3368_v1 = vsel %vm579_vm1, %v5201_v45, %v8812_v25  ;;  %v8816_v54 = vld [vmem:[#allocation61_spill] sm:$0xff]  ;;  %v8820_v13 = vld [vmem:[#allocation71_spill] sm:$0xff] }
 0x43b   :  { %v3691_v43 = vsel %vm3680_vm7, %v3626_v4, %v7095_v19  ;;  %v3433_v60 = vsel %vm3421_vm5, %v3368_v1, %v8813_v14  ;;  %v8814_v19 = vld [vmem:[#allocation77_spill] sm:$0xff]  ;;  %v3369_v34 = vsel %vm579_vm1, %v5202_v39, %v8816_v54  ;;  %v5204_v14 = vld [vmem:[#allocation2 + $0xa8] sm:$0xff] }
 0x43c   :  { %v3756_v9 = vsel %vm3745_vm9, %v3691_v43, %v2930_v30  ;;  %v3498_v2 = vsel %vm3486_vm6, %v3433_v60, %v8814_v19  ;;  %v8823_v61 = vld [vmem:[#allocation197_spill] sm:$0xff]  ;;  %v8825_v19 = vld [vmem:[#allocation79_spill] sm:$0xff] }
 0x43d   :  { %2703 = vrot.lane.b32.xlu0 %v1142_v29, %s5381_s18  ;;  %3211 = vrot.lane.b32.xlu1 %v1268_v57, %s5382_s19  ;;  %v3562_v21 = vsel %vm113_vm0, %v3498_v2, %v8815_v50  ;;  %v1145_v4 = vld [vmem:[#allocation2 + $0x180] sm:$0xff] }
 0x43e   :  { %2701 = vrot.lane.b32.xlu2 %v1141_v18, %s5381_s18  ;;  %v3627_v40 = vsel %vm3615_vm8, %v3562_v21, %v6872_v44  ;;  %v8817_v44 = vld [vmem:[#allocation74_spill] sm:$0xff] }
 0x43f   :  { %v3692_v30 = vsel %vm3680_vm7, %v3627_v40, %v7114_v55  ;;  %v3434_v38 = vsel %vm3421_vm5, %v3369_v34, %v8817_v44  ;;  %v8818_v55 = vld [vmem:[#allocation72_spill] sm:$0xff]  ;;  %v8827_v21 = vld [vmem:[#allocation190_spill] sm:$0xff] }
 0x440   :  { %v2932_v58 = vpop.permute.xlu0 %2931  ;;  %v3184_v52 = vpop.permute.xlu1 %3183  ;;  %v3499_v31 = vsel %vm3486_vm6, %v3434_v38, %v8818_v55  ;;  %v1081_v40 = vld [vmem:[#allocation2 + $0x172] sm:$0xff]  ;;  %v8831_v55 = vld [vmem:[#allocation193_spill] sm:$0xff] }
 0x441   :  { %v3820_v49 = vsel %vm3810_vm10, %v3755_v3, %v3184_v52  ;;  %v3757_v48 = vsel %vm3745_vm9, %v3692_v30, %v2932_v58  ;;  %v3563_v29 = vsel %vm113_vm0, %v3499_v31, %v8819_v11  ;;  %v3370_v3 = vsel %vm579_vm1, %v5203_v12, %v8820_v13  ;;  %v8829_v38 = vld [vmem:[#allocation83_spill] sm:$0xff] }
 0x442   :  { %v7157_v51 = vpop.permute.xlu2 %2679  ;;  %5048 = vmatmul.msk.f32.gmra.mxu1 %vm3884_vm11, %v3820_v49  ;;  %v3628_v18 = vsel %vm3615_vm8, %v3563_v29, %v6896_v17  ;;  %v3435_v59 = vsel %vm3421_vm5, %v3370_v3, %v8821_v8  ;;  %v7275_v11 = vld [vmem:[#allocation2 + $0x18a] sm:$0xff]  ;;  %v1209_v29 = vld [vmem:[#allocation2 + $0x181] sm:$0xff] }
 0x443   :  { %v3693_v62 = vsel %vm3680_vm7, %v3628_v18, %v7135_v5  ;;  %v4354_v5 = vld [vmem:[%s8546_s5] sm:$0xf]  ;;  %v3500_v24 = vsel %vm3486_vm6, %v3435_v59, %v8822_v53  ;;  %v8835_v53 = vld [vmem:[#allocation200_spill] sm:$0xff] }
 0x444   :  { %5103 = vmatpush.msk.msra.mxu2 %vm4077_vm4, %v4354_v5  ;;  %5175 = vmatpush.msk.msra.mxu3 %vm4077_vm4, %v4354_v5  ;;  %v8834_v5 = vld [vmem:[#allocation91_spill] sm:$0xff]  ;;  %v7299_v59 = vld [vmem:[%s8545_s4] ss:$0 sm:$0xff] }
 0x445   :  { %2449 = vrot.lane.b32.xlu0 %v1078_v36, %s5379_s2  ;;  %3213 = vrot.lane.b32.xlu1 %v1078_v36, %s5382_s19  ;;  %v3564_v36 = vsel %vm113_vm0, %v3500_v24, %v8823_v61  ;;  %v1146_v61 = vld [vmem:[#allocation2 + $0x188] sm:$0xff] }
 0x446   :  { %2447 = vrot.lane.b32.xlu2 %v1268_v57, %s5379_s2  ;;  %v1208_v57 = vld [vmem:[#allocation2 + $0x171] sm:$0xff]  ;;  %v3629_v43 = vsel %vm3615_vm8, %v3564_v36, %v6865_v28  ;;  %v8824_v28 = vld [vmem:[#allocation69_spill] sm:$0xff] }
 0x447   :  { %v3371_v60 = vsel %vm579_vm1, %v5204_v14, %v8824_v28  ;;  %v5207_v14 = vld [vmem:[#allocation2 + $0xc8] sm:$0xff] }
 0x448   :  { %v2934_v22 = vpop.permute.xlu0 %2933  ;;  %v3186_v15 = vpop.permute.xlu1 %3185  ;;  %v3436_v2 = vsel %vm3421_vm5, %v3371_v60, %v8825_v19  ;;  %v8836_v28 = vld [vmem:[#allocation78_spill] sm:$0xff] }
 0x449   :  { %v3821_v63 = vsel %vm3810_vm10, %v3756_v9, %v3186_v15  ;;  %v3758_v58 = vsel %vm3745_vm9, %v3693_v62, %v2934_v22  ;;  %v1144_v9 = vld [vmem:[#allocation2 + $0x170] sm:$0xff]  ;;  %v3694_v22 = vsel %vm3680_vm7, %v3629_v43, %v7157_v51  ;;  %v8826_v51 = vld [vmem:[#allocation92_spill] sm:$0xff]  ;;  %v8832_v62 = vld [vmem:[#allocation89_spill] sm:$0xff]  ;;  %v3374_v60 = vsel %vm579_vm1, %v5207_v14, %v8836_v28 }
 0x44a   :  { %v7175_v23 = vpop.permute.xlu2 %2681  ;;  %5049 = vmatmul.msk.f32.gmra.mxu1 %vm3884_vm11, %v3821_v63  ;;  %v3501_v50 = vsel %vm3486_vm6, %v3436_v2, %v8826_v51  ;;  %v1148_v51 = vld [vmem:[#allocation2 + $0x1a0] sm:$0xff] }
 0x44d   :  { %3217 = vrot.lane.b32.xlu0 %v7186_v7, %s5382_s19  ;;  %2959 = vrot.lane.b32.xlu1 %v1206_v6, %s5380_s17  ;;  %v3565_v6 = vsel %vm113_vm0, %v3501_v50, %v8827_v21  ;;  %v8838_v50 = vld [vmem:[#allocation101_spill] sm:$0xff] }
 0x44e   :  { %3215 = vrot.lane.b32.xlu2 %v1270_v37, %s5382_s19 }
 0x450   :  { %v2936_v27 = vpop.permute.xlu0 %2935  ;;  %v3188_v46 = vpop.permute.xlu1 %3187 }
 0x451   :  { %v3822_v41 = vsel %vm3810_vm10, %v3757_v48, %v3188_v46  ;;  %v3759_v15 = vsel %vm3745_vm9, %v3694_v22, %v2936_v27  ;;  %v5205_v46 = vld [vmem:[#allocation2 + $0xb0] sm:$0xff] }
 0x452   :  { %v7202_v0 = vpop.permute.xlu2 %2683  ;;  %5050 = vmatmul.msk.f32.gmra.mxu1 %vm3884_vm11, %v3822_v41  ;;  %v8830_v41 = vld [vmem:[#allocation84_spill] sm:$0xff] }
 0x455   :  { %2963 = vrot.lane.b32.xlu0 %v1208_v57, %s5380_s17  ;;  %2705 = vrot.lane.b32.xlu1 %v1143_v33, %s5381_s18  ;;  %v1273_v33 = vld [vmem:[#allocation2 + $0x182] sm:$0xff] }
 0x456   :  { %2961 = vrot.lane.b32.xlu2 %v1207_v20, %s5380_s17  ;;  %v5206_v20 = vld [vmem:[#allocation2 + $0xc0] sm:$0xff] }
 0x457   :  { %v3373_v12 = vsel %vm579_vm1, %v5206_v20, %v8832_v62  ;;  %v1084_v20 = vld [vmem:[#allocation2 + $0x1ca] sm:$0xff] }
 0x458   :  { %v2938_v52 = vpop.permute.xlu0 %2937  ;;  %v3190_v49 = vpop.permute.xlu1 %3189 }
 0x459   :  { %v3823_v17 = vsel %vm3810_vm10, %v3758_v58, %v3190_v49  ;;  %v8833_v49 = vld [vmem:[#allocation81_spill] sm:$0xff] }
 0x45a   :  { %v7220_v16 = vpop.permute.xlu2 %2685  ;;  %5051 = vmatmul.msk.f32.gmra.mxu1 %vm3884_vm11, %v3823_v17  ;;  %v3438_v17 = vsel %vm3421_vm5, %v3373_v12, %v8833_v49 }
 0x45b   :  { %v3503_v8 = vsel %vm3486_vm6, %v3438_v17, %v8834_v5 }
 0x45c   :  { %v3567_v24 = vsel %vm113_vm0, %v3503_v8, %v8835_v53 }
 0x45d   :  { %2709 = vrot.lane.b32.xlu0 %v1145_v4, %s5381_s18  ;;  %2451 = vrot.lane.b32.xlu1 %v1270_v37, %s5379_s2  ;;  %v3630_v37 = vsel %vm3615_vm8, %v3565_v6, %v6883_v35  ;;  %v8828_v35 = vld [vmem:[#allocation76_spill] sm:$0xff]  ;;  %v3632_v36 = vsel %vm3615_vm8, %v3567_v24, %v6876_v26  ;;  %v1210_v4 = vld [vmem:[#allocation2 + $0x189] sm:$0xff]  ;;  %v1212_v24 = vld [vmem:[#allocation2 + $0x1a1] sm:$0xff] }
 0x45e   :  { %2707 = vrot.lane.b32.xlu2 %v1144_v9, %s5381_s18  ;;  %v3695_v30 = vsel %vm3680_vm7, %v3630_v37, %v7175_v23  ;;  %v3372_v44 = vsel %vm579_vm1, %v5205_v46, %v8828_v35  ;;  %v3697_v43 = vsel %vm3680_vm7, %v3632_v36, %v7220_v16  ;;  %v8837_v16 = vld [vmem:[#allocation85_spill] sm:$0xff]  ;;  %v1147_v6 = vld [vmem:[#allocation2 + $0x198] sm:$0xff] }
 0x45f   :  { %v3760_v39 = vsel %vm3745_vm9, %v3695_v30, %v2938_v52  ;;  %v3437_v23 = vsel %vm3421_vm5, %v3372_v44, %v8829_v38  ;;  %v3439_v2 = vsel %vm3421_vm5, %v3374_v60, %v8837_v16 }
 0x460   :  { %v2940_v63 = vpop.permute.xlu0 %2939  ;;  %v3192_v45 = vpop.permute.xlu1 %3191  ;;  %v3504_v21 = vsel %vm3486_vm6, %v3439_v2, %v8838_v50  ;;  %v8848_v2 = vld [vmem:[#allocation90_spill] sm:$0xff] }
 0x461   :  { %v3824_v25 = vsel %vm3810_vm10, %v3759_v15, %v3192_v45 }
 0x462   :  { %v7243_v1 = vpop.permute.xlu2 %2687  ;;  %5052 = vmatmul.msk.f32.gmra.mxu1 %vm3884_vm11, %v3824_v25 }
 0x465   :  { %2455 = vrot.lane.b32.xlu0 %v1081_v40, %s5379_s2  ;;  %3219 = vrot.lane.b32.xlu1 %v1081_v40, %s5382_s19  ;;  %v8839_v40 = vld [vmem:[#allocation192_spill] sm:$0xff] }
 0x466   :  { %2453 = vrot.lane.b32.xlu2 %v7186_v7, %s5379_s2  ;;  %v3502_v7 = vsel %vm3486_vm6, %v3437_v23, %v8830_v41  ;;  %v3568_v37 = vsel %vm113_vm0, %v3504_v21, %v8839_v40  ;;  %v8841_v23 = vld [vmem:[#allocation98_spill] sm:$0xff] }
 0x467   :  { %v3566_v31 = vsel %vm113_vm0, %v3502_v7, %v8831_v55  ;;  %v3633_v30 = vsel %vm3615_vm8, %v3568_v37, %v6894_v56  ;;  %v8851_v37 = vld [vmem:[#allocation195_spill] sm:$0xff] }
 0x468   :  { %v2942_v54 = vpop.permute.xlu0 %2941  ;;  %v3194_v34 = vpop.permute.xlu1 %3193  ;;  %v3631_v57 = vsel %vm3615_vm8, %v3566_v31, %v6921_v42  ;;  %v1275_v31 = vld [vmem:[#allocation2 + $0x19a] sm:$0xff] }
 0x469   :  { %v3825_v48 = vsel %vm3810_vm10, %v3760_v39, %v3194_v34  ;;  %v3696_v18 = vsel %vm3680_vm7, %v3631_v57, %v7202_v0  ;;  %v1211_v0 = vld [vmem:[#allocation2 + $0x199] sm:$0xff]  ;;  %v3762_v22 = vsel %vm3745_vm9, %v3697_v43, %v2942_v54  ;;  %v3698_v39 = vsel %vm3680_vm7, %v3633_v30, %v7243_v1  ;;  %v8847_v43 = vld [vmem:[#allocation203_spill] sm:$0xff] }
 0x46a   :  { %v7264_v27 = vpop.permute.xlu2 %2689  ;;  %5053 = vmatmul.msk.f32.gmra.mxu1 %vm3884_vm11, %v3825_v48  ;;  %v3761_v13 = vsel %vm3745_vm9, %v3696_v18, %v2940_v63  ;;  %v5208_v34 = vld [vmem:[#allocation2 + $0xd8] sm:$0xff] }
 0x46b   :  { %v8840_v48 = vld [vmem:[#allocation88_spill] sm:$0xff] }
 0x46c   :  { %v3375_v46 = vsel %vm579_vm1, %v5208_v34, %v8840_v48  ;;  %v8852_v34 = vld [vmem:[#allocation245_spill] sm:$0xff] }
 0x46d   :  { %3223 = vrot.lane.b32.xlu0 %v7275_v11, %s5382_s19  ;;  %2965 = vrot.lane.b32.xlu1 %v1209_v29, %s5380_s17  ;;  %v3440_v41 = vsel %vm3421_vm5, %v3375_v46, %v8841_v23  ;;  %v8842_v29 = vld [vmem:[#allocation93_spill] sm:$0xff]  ;;  %v1100_v46 = vld [vmem:[#allocation2 + $0x28a] sm:$0xff] }
 0x46e   :  { %3221 = vrot.lane.b32.xlu2 %v1273_v33, %s5382_s19  ;;  %v3505_v57 = vsel %vm3486_vm6, %v3440_v41, %v8842_v29  ;;  %v8854_v29 = vld [vmem:[#allocation104_spill] sm:$0xff] }
 0x470   :  { %v2944_v3 = vpop.permute.xlu0 %2943  ;;  %v3196_v58 = vpop.permute.xlu1 %3195 }
 0x471   :  { %v3826_v42 = vsel %vm3810_vm10, %v3761_v13, %v3196_v58  ;;  %v3763_v35 = vsel %vm3745_vm9, %v3698_v39, %v2944_v3  ;;  %v5209_v3 = vld [vmem:[#allocation2 + $0xe0] sm:$0xff]  ;;  %v8844_v58 = vld [vmem:[#allocation95_spill] sm:$0xff] }
 0x472   :  { %v7289_v52 = vpop.permute.xlu2 %2691  ;;  %5054 = vmatmul.msk.f32.gmra.mxu1 %vm3884_vm11, %v3826_v42  ;;  %v3376_v42 = vsel %vm579_vm1, %v5209_v3, %v8844_v58  ;;  %v1229_v39 = vld [vmem:[#allocation2 + $0x2a1] sm:$0xff] }
 0x473   :  { %v1150_v3 = vld [vmem:[#allocation2 + $0x1e8] sm:$0xff]  ;;  %v1165_v58 = vld [vmem:[#allocation2 + $0x2a0] sm:$0xff] }
 0x475   :  { %2969 = vrot.lane.b32.xlu0 %v1211_v0, %s5380_s17  ;;  %2711 = vrot.lane.b32.xlu1 %v1146_v61, %s5381_s18  ;;  %v8846_v61 = vld [vmem:[#allocation100_spill] sm:$0xff] }
 0x476   :  { %2967 = vrot.lane.b32.xlu2 %v1210_v4, %s5380_s17  ;;  %v1276_v4 = vld [vmem:[#allocation2 + $0x1a2] sm:$0xff] }
 0x477   :  { %v4098_v9 = vpop.f32.mrf.mxu1 }
 0x478   :  { %v4099_v15 = vadd.f32 %v7299_v59, %v4098_v9  ;;  %v2946_v63 = vpop.permute.xlu0 %2945  ;;  %v3198_v45 = vpop.permute.xlu1 %3197 }
 0x479   :  { %v3827_v25 = vsel %vm3810_vm10, %v3762_v22, %v3198_v45  ;;  %v1213_v22 = vld [vmem:[#allocation2 + $0x1e1] sm:$0xff] }
 0x47a   :  { %v7313_v26 = vpop.permute.xlu2 %2693  ;;  %v4290_v19 = vmax.f32 %v4099_v15, 0.0  ;;  %5055 = vmatmul.msk.f32.gmra.mxu1 %vm3884_vm11, %v3827_v25 }
 0x47c   :  { %5104 = vmatmul.msk.f32.vlgmr.msra.gmra.mxu2 %vm579_vm1, %v4290_v19 }
 0x47d   :  { %2715 = vrot.lane.b32.xlu0 %v1148_v51, %s5381_s18  ;;  %2457 = vrot.lane.b32.xlu1 %v1273_v33, %s5379_s2  ;;  %v8843_v33 = vld [vmem:[#allocation196_spill] sm:$0xff] }
 0x47e   :  { %2713 = vrot.lane.b32.xlu2 %v1147_v6, %s5381_s18  ;;  %v3569_v18 = vsel %vm113_vm0, %v3505_v57, %v8843_v33  ;;  %v8850_v6 = vld [vmem:[#allocation110_spill] sm:$0xff] }
 0x47f   :  { %v4101_v54 = vpop.f32.mrf.mxu1  ;;  %v3634_v62 = vsel %vm3615_vm8, %v3569_v18, %v6933_v32 }
 0x480   :  { %v4102_v44 = vadd.f32 %v7299_v59, %v4101_v54  ;;  %v2948_v38 = vpop.permute.xlu0 %2947  ;;  %v3200_v56 = vpop.permute.xlu1 %3199  ;;  %v3699_v12 = vsel %vm3680_vm7, %v3634_v62, %v7264_v27  ;;  %v8845_v27 = vld [vmem:[#allocation87_spill] sm:$0xff]  ;;  %v1149_v54 = vld [vmem:[#allocation2 + $0x1e0] sm:$0xff] }
 0x481   :  { %v3828_v7 = vsel %vm3810_vm10, %v3763_v35, %v3200_v56  ;;  %v3764_v49 = vsel %vm3745_vm9, %v3699_v12, %v2946_v63  ;;  %v8853_v56 = vld [vmem:[#allocation94_spill] sm:$0xff]  ;;  %v8856_v12 = vld [vmem:[#allocation199_spill] sm:$0xff] }
 0x482   :  { %v7339_v55 = vpop.permute.xlu2 %2695  ;;  %v4291_v1 = vmax.f32 %v4102_v44, 0.0  ;;  %5056 = vmatmul.msk.f32.gmra.mxu1 %vm3884_vm11, %v3828_v7 }
 0x484   :  { %5105 = vmatmul.msk.f32.gmra.mxu2 %vm579_vm1, %v4291_v1 }
 0x485   :  { %2461 = vrot.lane.b32.xlu0 %v1084_v20, %s5379_s2  ;;  %3225 = vrot.lane.b32.xlu1 %v1275_v31, %s5382_s19  ;;  %v8855_v20 = vld [vmem:[#allocation102_spill] sm:$0xff] }
 0x486   :  { %2459 = vrot.lane.b32.xlu2 %v7275_v11, %s5379_s2  ;;  %v3441_v11 = vsel %vm3421_vm5, %v3376_v42, %v8845_v27  ;;  %v8857_v42 = vld [vmem:[#allocation247_spill] sm:$0xff] }
 0x487   :  { %v4104_v13 = vpop.f32.mrf.mxu1  ;;  %v3506_v36 = vsel %vm3486_vm6, %v3441_v11, %v8846_v61 }
 0x488   :  { %v4105_v17 = vadd.f32 %v7299_v59, %v4104_v13  ;;  %v2950_v32 = vpop.permute.xlu0 %2949  ;;  %v3202_v0 = vpop.permute.xlu1 %3201  ;;  %v3570_v9 = vsel %vm113_vm0, %v3506_v36, %v8847_v43 }
 0x489   :  { %v3829_v5 = vsel %vm3810_vm10, %v3764_v49, %v3202_v0  ;;  %v3635_v15 = vsel %vm3615_vm8, %v3570_v9, %v6887_v47  ;;  %v5210_v47 = vld [vmem:[#allocation2 + $0xf0] sm:$0xff] }
 0x48a   :  { %v7360_v8 = vpop.permute.xlu2 %2697  ;;  %v4292_v53 = vmax.f32 %v4105_v17, 0.0  ;;  %5057 = vmatmul.msk.f32.gmra.mxu1 %vm3884_vm11, %v3829_v5  ;;  %v3700_v63 = vsel %vm3680_vm7, %v3635_v15, %v7289_v52  ;;  %v3377_v51 = vsel %vm579_vm1, %v5210_v47, %v8848_v2  ;;  %v8849_v52 = vld [vmem:[#allocation97_spill] sm:$0xff]  ;;  %v5212_v5 = vld [vmem:[#allocation2 + $0x108] sm:$0xff]  ;;  %v1085_v47 = vld [vmem:[#allocation2 + $0x1d2] sm:$0xff] }
 0x48b   :  { %v3765_v25 = vsel %vm3745_vm9, %v3700_v63, %v2948_v38  ;;  %v3442_v21 = vsel %vm3421_vm5, %v3377_v51, %v8849_v52  ;;  %v5211_v38 = vld [vmem:[#allocation2 + $0xf8] sm:$0xff]  ;;  %v7418_v17 = vld [vmem:[#allocation2 + $0x1e2] sm:$0xff] }
 0x48c   :  { %5106 = vmatmul.msk.f32.gmra.mxu2 %vm579_vm1, %v4292_v53  ;;  %v3507_v40 = vsel %vm3486_vm6, %v3442_v21, %v8850_v6  ;;  %v3378_v23 = vsel %vm579_vm1, %v5211_v38, %v8853_v56  ;;  %v8858_v53 = vld [vmem:[#allocation107_spill] sm:$0xff]  ;;  %v8860_v15 = vld [vmem:[#allocation109_spill] sm:$0xff] }
 0x48d   :  { %2973 = vrot.lane.b32.xlu0 %v1213_v22, %s5380_s17  ;;  %2971 = vrot.lane.b32.xlu1 %v1212_v24, %s5380_s17  ;;  %v3571_v30 = vsel %vm113_vm0, %v3507_v40, %v8851_v37  ;;  %v3443_v57 = vsel %vm3421_vm5, %v3378_v23, %v8854_v29  ;;  %v3379_v27 = vsel %vm579_vm1, %v5212_v5, %v8858_v53  ;;  %v7461_v56 = vld [vmem:[#allocation2 + $0x2aa] sm:$0xff]  ;;  %v1101_v23 = vld [vmem:[#allocation2 + $0x292] sm:$0xff] }
 0x48e   :  { %3227 = vrot.lane.b32.xlu2 %v1276_v4, %s5382_s19  ;;  %v3636_v48 = vsel %vm3615_vm8, %v3571_v30, %v8852_v34  ;;  %v3508_v62 = vsel %vm3486_vm6, %v3443_v57, %v8855_v20  ;;  %v5213_v30 = vld [vmem:[#allocation2 + $0x110] sm:$0xff]  ;;  %v5214_v57 = vld [vmem:[#allocation2 + $0x120] sm:$0xff]  ;;  %v8871_v5 = vld [vmem:[#allocation202_spill] sm:$0xff] }
 0x48f   :  { %v4107_v45 = vpop.f32.mrf.mxu1  ;;  %v3701_v35 = vsel %vm3680_vm7, %v3636_v48, %v7313_v26  ;;  %v3572_v13 = vsel %vm113_vm0, %v3508_v62, %v8856_v12 }
 0x490   :  { %v4108_v14 = vadd.f32 %v7299_v59, %v4107_v45  ;;  %v2952_v28 = vpop.permute.xlu0 %2951  ;;  %v3204_v60 = vpop.permute.xlu1 %3203  ;;  %v3766_v41 = vsel %vm3745_vm9, %v3701_v35, %v2950_v32  ;;  %v3637_v49 = vsel %vm3615_vm8, %v3572_v13, %v8857_v42  ;;  %v8861_v45 = vld [vmem:[#allocation206_spill] sm:$0xff] }
 0x491   :  { %v3830_v19 = vsel %vm3810_vm10, %v3765_v25, %v3204_v60  ;;  %v3702_v32 = vsel %vm3680_vm7, %v3637_v49, %v7339_v55  ;;  %v8859_v55 = vld [vmem:[#allocation99_spill] sm:$0xff]  ;;  %v8862_v60 = vld [vmem:[#allocation244_spill] sm:$0xff] }
 0x492   :  { %v7380_v16 = vpop.permute.xlu2 %2699  ;;  %v4293_v50 = vmax.f32 %v4108_v14, 0.0  ;;  %5058 = vmatmul.msk.f32.gmra.mxu1 %vm3884_vm11, %v3830_v19  ;;  %v3767_v11 = vsel %vm3745_vm9, %v3702_v32, %v2952_v28  ;;  %v3444_v22 = vsel %vm3421_vm5, %v3379_v27, %v8859_v55  ;;  %v1166_v14 = vld [vmem:[#allocation2 + $0x2a8] sm:$0xff]  ;;  %v8870_v32 = vld [vmem:[#allocation111_spill] sm:$0xff] }
 0x493   :  { %v3509_v63 = vsel %vm3486_vm6, %v3444_v22, %v8860_v15  ;;  %v1293_v28 = vld [vmem:[#allocation2 + $0x2a2] sm:$0xff]  ;;  %v1278_v27 = vld [vmem:[#allocation2 + $0x1ea] sm:$0xff] }
 0x494   :  { %5107 = vmatmul.msk.f32.gmra.mxu2 %vm579_vm1, %v4293_v50  ;;  %v3573_v25 = vsel %vm113_vm0, %v3509_v63, %v8861_v45  ;;  %v5215_v15 = vld [vmem:[#allocation2 + $0x128] sm:$0xff]  ;;  %v8872_v63 = vld [vmem:[#allocation113_spill] sm:$0xff] }
 0x495   :  { %3005 = vrot.lane.b32.xlu0 %v1229_v39, %s5380_s17  ;;  %2717 = vrot.lane.b32.xlu1 %v1149_v54, %s5381_s18  ;;  %v3638_v19 = vsel %vm3615_vm8, %v3573_v25, %v8862_v60  ;;  %v8863_v39 = vld [vmem:[#allocation96_spill] sm:$0xff]  ;;  %v8874_v60 = vld [vmem:[#allocation118_spill] sm:$0xff] }
 0x496   :  { %2493 = vrot.lane.b32.xlu2 %v1100_v46, %s5379_s2  ;;  %v3703_v2 = vsel %vm3680_vm7, %v3638_v19, %v7360_v8  ;;  %v3380_v54 = vsel %vm579_vm1, %v5213_v30, %v8863_v39  ;;  %v8864_v8 = vld [vmem:[#allocation103_spill] sm:$0xff] }
 0x497   :  { %v4110_v44 = vpop.f32.mrf.mxu1  ;;  %v3445_v48 = vsel %vm3421_vm5, %v3380_v54, %v8864_v8  ;;  %v8865_v46 = vld [vmem:[#allocation119_spill] sm:$0xff] }
 0x498   :  { %v4111_v7 = vadd.f32 %v7299_v59, %v4110_v44  ;;  %v2954_v1 = vpop.permute.xlu0 %2953  ;;  %v3206_v31 = vpop.permute.xlu1 %3205  ;;  %v3510_v35 = vsel %vm3486_vm6, %v3445_v48, %v8865_v46  ;;  %v8866_v44 = vld [vmem:[#allocation198_spill] sm:$0xff]  ;;  %v8876_v48 = vld [vmem:[#allocation108_spill] sm:$0xff] }
 0x499   :  { %v3831_v33 = vsel %vm3810_vm10, %v3766_v41, %v3206_v31  ;;  %v3768_v50 = vsel %vm3745_vm9, %v3703_v2, %v2954_v1  ;;  %v3574_v38 = vsel %vm113_vm0, %v3510_v35, %v8866_v44  ;;  %v8867_v41 = vld [vmem:[#allocation246_spill] sm:$0xff]  ;;  %v8875_v2 = vld [vmem:[#allocation209_spill] sm:$0xff]  ;;  %v8877_v35 = vld [vmem:[#allocation115_spill] sm:$0xff] }
 0x49a   :  { %v7406_v18 = vpop.permute.xlu2 %2701  ;;  %v4294_v26 = vmax.f32 %v4111_v7, 0.0  ;;  %5059 = vmatmul.msk.f32.gmra.mxu1 %vm3884_vm11, %v3831_v33  ;;  %v3639_v7 = vsel %vm3615_vm8, %v3574_v38, %v8867_v41  ;;  %v1214_v1 = vld [vmem:[#allocation2 + $0x1e9] sm:$0xff]  ;;  %v1215_v38 = vld [vmem:[#allocation2 + $0x1f9] sm:$0xff] }
 0x49b   :  { %v3704_v31 = vsel %vm3680_vm7, %v3639_v7, %v7380_v16  ;;  %v8868_v33 = vld [vmem:[#allocation106_spill] sm:$0xff]  ;;  %v8879_v7 = vld [vmem:[#allocation201_spill] sm:$0xff] }
 0x49c   :  { %5108 = vmatmul.msk.f32.gmra.mxu2 %vm579_vm1, %v4294_v26  ;;  %v3381_v26 = vsel %vm579_vm1, %v5214_v57, %v8868_v33 }
 0x49d   :  { %2719 = vrot.lane.b32.xlu0 %v1150_v3, %s5381_s18  ;;  %2749 = vrot.lane.b32.xlu1 %v1165_v58, %s5381_s18  ;;  %v8869_v3 = vld [vmem:[#allocation116_spill] sm:$0xff] }
 0x49e   :  { %3229 = vrot.lane.b32.xlu2 %v7418_v17, %s5382_s19  ;;  %v3446_v58 = vsel %vm3421_vm5, %v3381_v26, %v8869_v3 }
 0x49f   :  { %v4113_v0 = vpop.f32.mrf.mxu1 }
 0x4a0   :  { %v4114_v24 = vadd.f32 %v7299_v59, %v4113_v0  ;;  %v2956_v61 = vpop.permute.xlu0 %2955  ;;  %v3208_v36 = vpop.permute.xlu1 %3207  ;;  %v3511_v0 = vsel %vm3486_vm6, %v3446_v58, %v8870_v32  ;;  %v5217_v58 = vld [vmem:[#allocation2 + $0x140] sm:$0xff]  ;;  %v8881_v32 = vld [vmem:[#allocation122_spill] sm:$0xff] }
 0x4a1   :  { %v3832_v4 = vsel %vm3810_vm10, %v3767_v11, %v3208_v36  ;;  %v3769_v20 = vsel %vm3745_vm9, %v3704_v31, %v2956_v61  ;;  %v3575_v53 = vsel %vm113_vm0, %v3511_v0, %v8871_v5  ;;  %v1216_v5 = vld [vmem:[#allocation2 + $0x201] sm:$0xff] }
 0x4a2   :  { %v7429_v43 = vpop.permute.xlu2 %2447  ;;  %v4295_v9 = vmax.f32 %v4114_v24, 0.0  ;;  %5060 = vmatmul.msk.f32.gmra.mxu1 %vm3884_vm11, %v3832_v4  ;;  %v3640_v11 = vsel %vm3615_vm8, %v3575_v53, %v6949_v10  ;;  %v1230_v24 = vld [vmem:[#allocation2 + $0x2a9] sm:$0xff]  ;;  %v3382_v10 = vsel %vm579_vm1, %v5215_v15, %v8872_v63  ;;  %v1231_v53 = vld [vmem:[#allocation2 + $0x2b9] sm:$0xff] }
 0x4a3   :  { %v3705_v61 = vsel %vm3680_vm7, %v3640_v11, %v7406_v18  ;;  %v8873_v18 = vld [vmem:[#allocation105_spill] sm:$0xff]  ;;  %v8882_v11 = vld [vmem:[#allocation120_spill] sm:$0xff] }
 0x4a4   :  { %5109 = vmatmul.msk.f32.gmra.mxu2 %vm579_vm1, %v4295_v9 }
 0x4a5   :  { %2751 = vrot.lane.b32.xlu0 %v1166_v14, %s5381_s18  ;;  %3261 = vrot.lane.b32.xlu1 %v1293_v28, %s5382_s19 }
 0x4a6   :  { %2463 = vrot.lane.b32.xlu2 %v1085_v47, %s5379_s2  ;;  %v7506_v47 = vld [vmem:[#allocation2 + $0x1fa] sm:$0xff] }
 0x4a7   :  { %v4116_v51 = vpop.f32.mrf.mxu1 }
 0x4a8   :  { %v4117_v52 = vadd.f32 %v7299_v59, %v4116_v51  ;;  %v2958_v21 = vpop.permute.xlu0 %2957  ;;  %v3210_v6 = vpop.permute.xlu1 %3209 }
 0x4a9   :  { %v3833_v40 = vsel %vm3810_vm10, %v3768_v50, %v3210_v6  ;;  %v3770_v4 = vsel %vm3745_vm9, %v3705_v61, %v2958_v21  ;;  %v1151_v50 = vld [vmem:[#allocation2 + $0x1f8] sm:$0xff] }
 0x4aa   :  { %v7449_v37 = vpop.permute.xlu2 %3215  ;;  %v4296_v34 = vmax.f32 %v4117_v52, 0.0  ;;  %5061 = vmatmul.msk.f32.gmra.mxu1 %vm3884_vm11, %v3833_v40 }
 0x4ac   :  { %5110 = vmatmul.msk.f32.gmra.mxu2 %vm579_vm1, %v4296_v34 }
 0x4ad   :  { %3263 = vrot.lane.b32.xlu0 %v7461_v56, %s5382_s19  ;;  %2495 = vrot.lane.b32.xlu1 %v1101_v23, %s5379_s2  ;;  %v8878_v23 = vld [vmem:[#allocation128_spill] sm:$0xff] }
 0x4ae   :  { %2975 = vrot.lane.b32.xlu2 %v1214_v1, %s5380_s17 }
 0x4af   :  { %v4119_v29 = vpop.f32.mrf.mxu1 }
 0x4b0   :  { %v4120_v62 = vadd.f32 %v7299_v59, %v4119_v29  ;;  %v2704_v12 = vpop.permute.xlu0 %2703  ;;  %v3212_v13 = vpop.permute.xlu1 %3211 }
 0x4b1   :  { %v3834_v42 = vsel %vm3810_vm10, %v3769_v20, %v3212_v13 }
 0x4b2   :  { %v7478_v49 = vpop.permute.xlu2 %2961  ;;  %v4297_v16 = vmax.f32 %v4120_v62, 0.0  ;;  %5062 = vmatmul.msk.f32.gmra.mxu1 %vm3884_vm11, %v3834_v42  ;;  %v8880_v42 = vld [vmem:[#allocation112_spill] sm:$0xff] }
 0x4b4   :  { %5111 = vmatmul.msk.f32.gmra.mxu2 %vm579_vm1, %v4297_v16  ;;  %v3384_v16 = vsel %vm579_vm1, %v5217_v58, %v8880_v42 }
 0x4b5   :  { %2497 = vrot.lane.b32.xlu0 %v1293_v28, %s5379_s2  ;;  %3231 = vrot.lane.b32.xlu1 %v1278_v27, %s5382_s19  ;;  %v3447_v28 = vsel %vm3421_vm5, %v3382_v10, %v8873_v18  ;;  %v3449_v0 = vsel %vm3421_vm5, %v3384_v16, %v8881_v32 }
 0x4b6   :  { %3007 = vrot.lane.b32.xlu2 %v1230_v24, %s5380_s17  ;;  %v3512_v19 = vsel %vm3486_vm6, %v3447_v28, %v8874_v60  ;;  %v3514_v24 = vsel %vm3486_vm6, %v3449_v0, %v8882_v11 }
 0x4b7   :  { %v4122_v36 = vpop.f32.mrf.mxu1  ;;  %v3576_v51 = vsel %vm113_vm0, %v3512_v19, %v8875_v2 }
 0x4b8   :  { %v4123_v9 = vadd.f32 %v7299_v59, %v4122_v36  ;;  %v2450_v55 = vpop.permute.xlu0 %2449  ;;  %v3214_v22 = vpop.permute.xlu1 %3213  ;;  %v3641_v52 = vsel %vm3615_vm8, %v3576_v51, %v7429_v43  ;;  %v5216_v43 = vld [vmem:[#allocation2 + $0x138] sm:$0xff]  ;;  %v5218_v51 = vld [vmem:[#allocation2 + $0x150] sm:$0xff] }
 0x4b9   :  { %v3835_v45 = vsel %vm3810_vm10, %v3770_v4, %v3214_v22  ;;  %v3706_v6 = vsel %vm3680_vm7, %v3641_v52, %v2704_v12  ;;  %v3383_v46 = vsel %vm579_vm1, %v5216_v43, %v8876_v48  ;;  %v7585_v48 = vld [vmem:[#allocation2 + $0x202] sm:$0xff] }
 0x4ba   :  { %v7498_v25 = vpop.permute.xlu2 %2707  ;;  %v4298_v14 = vmax.f32 %v4123_v9, 0.0  ;;  %5063 = vmatmul.msk.f32.gmra.mxu1 %vm3884_vm11, %v3835_v45  ;;  %v3448_v44 = vsel %vm3421_vm5, %v3383_v46, %v8877_v35  ;;  %v8883_v9 = vld [vmem:[#allocation205_spill] sm:$0xff] }
 0x4bb   :  { %v3513_v41 = vsel %vm3486_vm6, %v3448_v44, %v8878_v23  ;;  %v1232_v45 = vld [vmem:[#allocation2 + $0x2c1] sm:$0xff] }
 0x4bc   :  { %5112 = vmatmul.msk.f32.gmra.mxu2 %vm579_vm1, %v4298_v14  ;;  %v3577_v1 = vsel %vm113_vm0, %v3513_v41, %v8879_v7  ;;  %v1152_v14 = vld [vmem:[#allocation2 + $0x200] sm:$0xff] }
 0x4bd   :  { %3233 = vrot.lane.b32.xlu0 %v7506_v47, %s5382_s19  ;;  %2465 = vrot.lane.b32.xlu1 %v7418_v17, %s5379_s2  ;;  %v3642_v29 = vsel %vm3615_vm8, %v3577_v1, %v2450_v55  ;;  %v3578_v55 = vsel %vm113_vm0, %v3514_v24, %v8883_v9 }
 0x4be   :  { %2721 = vrot.lane.b32.xlu2 %v1151_v50, %s5381_s18  ;;  %v8884_v50 = vld [vmem:[#allocation125_spill] sm:$0xff] }
 0x4bf   :  { %v4125_v21 = vpop.f32.mrf.mxu1 }
 0x4c0   :  { %v4126_v40 = vadd.f32 %v7299_v59, %v4125_v21  ;;  %v3218_v30 = vpop.permute.xlu0 %3217  ;;  %v2960_v39 = vpop.permute.xlu1 %2959 }
 0x4c1   :  { %v3771_v54 = vsel %vm3745_vm9, %v3706_v6, %v2960_v39 }
 0x4c2   :  { %v7520_v34 = vpop.permute.xlu2 %2453  ;;  %v4299_v8 = vmax.f32 %v4126_v40, 0.0  ;;  %v3836_v17 = vsel %vm3810_vm10, %v3771_v54, %v7449_v37  ;;  %v1167_v37 = vld [vmem:[#allocation2 + $0x2b8] sm:$0xff]  ;;  %v8885_v40 = vld [vmem:[#allocation117_spill] sm:$0xff]  ;;  %v1153_v54 = vld [vmem:[#allocation2 + $0x210] sm:$0xff] }
 0x4c3   :  { %5064 = vmatmul.msk.f32.gmra.mxu1 %vm3884_vm11, %v3836_v17  ;;  %v8887_v17 = vld [vmem:[#allocation212_spill] sm:$0xff] }
 0x4c4   :  { %5113 = vmatmul.msk.f32.gmra.mxu2 %vm579_vm1, %v4299_v8  ;;  %v1168_v8 = vld [vmem:[#allocation2 + $0x2c0] sm:$0xff] }
 0x4c5   :  { %2467 = vrot.lane.b32.xlu0 %v1278_v27, %s5379_s2  ;;  %2977 = vrot.lane.b32.xlu1 %v1215_v38, %s5380_s17 }
 0x4c6   :  { %2753 = vrot.lane.b32.xlu2 %v1167_v37, %s5381_s18 }
 0x4c7   :  { %v4128_v31 = vpop.f32.mrf.mxu1 }
 0x4c8   :  { %v4129_v57 = vadd.f32 %v7299_v59, %v4128_v31  ;;  %v2964_v33 = vpop.permute.xlu0 %2963  ;;  %v2706_v26 = vpop.permute.xlu1 %2705 }
 0x4c9   :  { %v3707_v20 = vsel %vm3680_vm7, %v3642_v29, %v2706_v26  ;;  %v8888_v29 = vld [vmem:[#allocation114_spill] sm:$0xff] }
 0x4ca   :  { %v3222_v62 = vpop.permute.xlu2 %3221  ;;  %v4300_v12 = vmax.f32 %v4129_v57, 0.0  ;;  %v3772_v13 = vsel %vm3745_vm9, %v3707_v20, %v7478_v49  ;;  %v7551_v49 = vld [vmem:[#allocation2 + $0x2ba] sm:$0xff]  ;;  %v1169_v20 = vld [vmem:[#allocation2 + $0x2d0] sm:$0xff] }
 0x4cb   :  { %v3837_v3 = vsel %vm3810_vm10, %v3772_v13, %v3218_v30  ;;  %v8886_v30 = vld [vmem:[#allocation127_spill] sm:$0xff]  ;;  %v8890_v13 = vld [vmem:[#allocation136_spill] sm:$0xff] }
 0x4cc   :  { %5065 = vmatmul.msk.f32.gmra.mxu1 %vm3884_vm11, %v3837_v3  ;;  %5114 = vmatmul.msk.f32.gmra.mxu2 %vm579_vm1, %v4300_v12  ;;  %v1296_v12 = vld [vmem:[#allocation2 + $0x2c2] sm:$0xff] }
 0x4cd   :  { %2979 = vrot.lane.b32.xlu0 %v1216_v5, %s5380_s17  ;;  %3009 = vrot.lane.b32.xlu1 %v1231_v53, %s5380_s17 }
 0x4ce   :  { %3265 = vrot.lane.b32.xlu2 %v7551_v49, %s5382_s19 }
 0x4cf   :  { %v4131_v27 = vpop.f32.mrf.mxu1 }
 0x4d0   :  { %v4132_v61 = vadd.f32 %v7299_v59, %v4131_v27  ;;  %v2710_v36 = vpop.permute.xlu0 %2709  ;;  %v2452_v4 = vpop.permute.xlu1 %2451 }
 0x4d1   :  { %v3643_v63 = vsel %vm3615_vm8, %v3578_v55, %v2452_v4  ;;  %v8892_v4 = vld [vmem:[#allocation124_spill] sm:$0xff] }
 0x4d2   :  { %v2968_v22 = vpop.permute.xlu2 %2967  ;;  %v4301_v15 = vmax.f32 %v4132_v61, 0.0  ;;  %v3708_v10 = vsel %vm3680_vm7, %v3643_v63, %v7498_v25  ;;  %v3385_v25 = vsel %vm579_vm1, %v5218_v51, %v8884_v50 }
 0x4d3   :  { %v3773_v19 = vsel %vm3745_vm9, %v3708_v10, %v2964_v33  ;;  %v8889_v33 = vld [vmem:[#allocation121_spill] sm:$0xff] }
 0x4d4   :  { %5115 = vmatmul.msk.f32.gmra.mxu2 %vm579_vm1, %v4301_v15  ;;  %v7624_v15 = vld [vmem:[#allocation2 + $0x2d2] sm:$0xff]  ;;  %v8894_v10 = vld [vmem:[#allocation129_spill] sm:$0xff] }
 0x4d5   :  { %3011 = vrot.lane.b32.xlu0 %v1232_v45, %s5380_s17  ;;  %2723 = vrot.lane.b32.xlu1 %v1152_v14, %s5381_s18 }
 0x4d6   :  { %2499 = vrot.lane.b32.xlu2 %v7461_v56, %s5379_s2  ;;  %v3450_v56 = vsel %vm3421_vm5, %v3385_v25, %v8885_v40  ;;  %v1281_v25 = vld [vmem:[#allocation2 + $0x212] sm:$0xff] }
 0x4d7   :  { %v4134_v18 = vpop.f32.mrf.mxu1  ;;  %v3515_v39 = vsel %vm3486_vm6, %v3450_v56, %v8886_v30 }
 0x4d8   :  { %v4135_v28 = vadd.f32 %v7299_v59, %v4134_v18  ;;  %v2456_v60 = vpop.permute.xlu0 %2455  ;;  %v3220_v2 = vpop.permute.xlu1 %3219  ;;  %v3579_v43 = vsel %vm113_vm0, %v3515_v39, %v8887_v17 }
 0x4d9   :  { %v3838_v52 = vsel %vm3810_vm10, %v3773_v19, %v3220_v2  ;;  %v3644_v46 = vsel %vm3615_vm8, %v3579_v43, %v7520_v34  ;;  %v5219_v34 = vld [vmem:[#allocation2 + $0x158] sm:$0xff] }
 0x4da   :  { %v7573_v21 = vpop.permute.xlu2 %2713  ;;  %v4302_v6 = vmax.f32 %v4135_v28, 0.0  ;;  %5066 = vmatmul.msk.f32.gmra.mxu1 %vm3884_vm11, %v3838_v52  ;;  %v3709_v44 = vsel %vm3680_vm7, %v3644_v46, %v2710_v36  ;;  %v3386_v57 = vsel %vm579_vm1, %v5219_v34, %v8888_v29  ;;  %v5220_v36 = vld [vmem:[#allocation2 + $0x168] sm:$0xff]  ;;  %v1233_v52 = vld [vmem:[#allocation2 + $0x2d1] sm:$0xff] }
 0x4db   :  { %v3451_v26 = vsel %vm3421_vm5, %v3386_v57, %v8889_v33  ;;  %v3387_v9 = vsel %vm579_vm1, %v5220_v36, %v8892_v4  ;;  %v1154_v34 = vld [vmem:[#allocation2 + $0x218] sm:$0xff]  ;;  %v764_v29 = vld [vmem:[#allocation2 + $0x1b0] sm:$0xff] }
 0x4dc   :  { %5116 = vmatmul.msk.f32.gmra.mxu2 %vm579_vm1, %v4302_v6  ;;  %v3516_v3 = vsel %vm3486_vm6, %v3451_v26, %v8890_v13  ;;  %v8902_v36 = vld [vmem:[#allocation144_spill] sm:$0xff] }
 0x4dd   :  { %2725 = vrot.lane.b32.xlu0 %v1153_v54, %s5381_s18  ;;  %2755 = vrot.lane.b32.xlu1 %v1168_v8, %s5381_s18  ;;  %v5221_v54 = vld [vmem:[#allocation2 + $0x170] sm:$0xff]  ;;  %v8896_v8 = vld [vmem:[#allocation130_spill] sm:$0xff] }
 0x4de   :  { %3235 = vrot.lane.b32.xlu2 %v7585_v48, %s5382_s19  ;;  %v3388_v17 = vsel %vm579_vm1, %v5221_v54, %v8896_v8  ;;  %v7709_v54 = vld [vmem:[#allocation2 + $0x2da] sm:$0xff]  ;;  %v8905_v8 = vld [vmem:[#allocation186_spill] sm:$0xff] }
 0x4df   :  { %v4137_v35 = vpop.f32.mrf.mxu1 }
 0x4e0   :  { %v4138_v38 = vadd.f32 %v7299_v59, %v4137_v35  ;;  %v3224_v23 = vpop.permute.xlu0 %3223  ;;  %v2966_v41 = vpop.permute.xlu1 %2965  ;;  %v8897_v35 = vld [vmem:[#allocation123_spill] sm:$0xff] }
 0x4e1   :  { %v3774_v37 = vsel %vm3745_vm9, %v3709_v44, %v2966_v41  ;;  %v3453_v44 = vsel %vm3421_vm5, %v3388_v17, %v8897_v35 }
 0x4e2   :  { %v7594_v7 = vpop.permute.xlu2 %2459  ;;  %v4303_v1 = vmax.f32 %v4138_v38, 0.0  ;;  %v3839_v31 = vsel %vm3810_vm10, %v3774_v37, %v3222_v62  ;;  %v8891_v62 = vld [vmem:[#allocation204_spill] sm:$0xff]  ;;  %v7657_v38 = vld [vmem:[%s8547_s6] ss:$0 sm:$0xff] }
 0x4e3   :  { %5067 = vmatmul.msk.f32.gmra.mxu1 %vm3884_vm11, %v3839_v31  ;;  %v3580_v58 = vsel %vm113_vm0, %v3516_v3, %v8891_v62  ;;  %v7661_v37 = vld [vmem:[#allocation2 + $0x21a] sm:$0xff] }
 0x4e4   :  { %5117 = vmatmul.msk.f32.gmra.mxu2 %vm579_vm1, %v4303_v1  ;;  %v3645_v16 = vsel %vm3615_vm8, %v3580_v58, %v2456_v60  ;;  %v8895_v60 = vld [vmem:[#allocation208_spill] sm:$0xff]  ;;  %v8899_v1 = vld [vmem:[#allocation215_spill] sm:$0xff] }
 0x4e5   :  { %2757 = vrot.lane.b32.xlu0 %v1169_v20, %s5381_s18  ;;  %3267 = vrot.lane.b32.xlu1 %v1296_v12, %s5382_s19 }
 0x4e6   :  { %2469 = vrot.lane.b32.xlu2 %v7506_v47, %s5379_s2  ;;  %v8893_v47 = vld [vmem:[#allocation133_spill] sm:$0xff] }
 0x4e7   :  { %v4140_v42 = vpop.f32.mrf.mxu1  ;;  %v3452_v55 = vsel %vm3421_vm5, %v3387_v9, %v8893_v47  ;;  %v1170_v9 = vld [vmem:[#allocation2 + $0x2d8] sm:$0xff] }
 0x4e8   :  { %v4141_v32 = vadd.f32 %v7299_v59, %v4140_v42  ;;  %v2970_v0 = vpop.permute.xlu0 %2969  ;;  %v2712_v5 = vpop.permute.xlu1 %2711  ;;  %v3517_v45 = vsel %vm3486_vm6, %v3452_v55, %v8894_v10  ;;  %v8900_v42 = vld [vmem:[#allocation9_spill] sm:$0xff] }
 0x4e9   :  { %v3710_v53 = vsel %vm3680_vm7, %v3645_v16, %v2712_v5  ;;  %v3581_v19 = vsel %vm113_vm0, %v3517_v45, %v8895_v60  ;;  %v3389_v16 = vsel %vm579_vm1, %v764_v29, %v8900_v42  ;;  %v5225_v29 = vld [vmem:[#allocation3 + $0x10] sm:$0xff] }
 0x4ea   :  { %v7614_v27 = vpop.permute.xlu2 %3227  ;;  %v4304_v11 = vmax.f32 %v4141_v32, 0.0  ;;  %v3775_v24 = vsel %vm3745_vm9, %v3710_v53, %v2968_v22  ;;  %v1217_v22 = vld [vmem:[#allocation2 + $0x211] sm:$0xff]  ;;  %v5222_v32 = vld [vmem:[#allocation3] sm:$0xff] }
 0x4eb   :  { %v3840_v61 = vsel %vm3810_vm10, %v3775_v24, %v3224_v23  ;;  %v8898_v23 = vld [vmem:[#allocation135_spill] sm:$0xff] }
 0x4ec   :  { %5068 = vmatmul.msk.f32.gmra.mxu1 %vm3884_vm11, %v3840_v61  ;;  %5118 = vmatmul.msk.f32.gmra.mxu2 %vm579_vm1, %v4304_v11  ;;  %v3518_v41 = vsel %vm3486_vm6, %v3453_v44, %v8898_v23  ;;  %v8901_v11 = vld [vmem:[#allocation11_spill] sm:$0xff]  ;;  %v1218_v61 = vld [vmem:[#allocation2 + $0x219] sm:$0xff] }
 0x4ed   :  { %3269 = vrot.lane.b32.xlu0 %v7624_v15, %s5382_s19  ;;  %2501 = vrot.lane.b32.xlu1 %v7551_v49, %s5379_s2  ;;  %v3582_v31 = vsel %vm113_vm0, %v3518_v41, %v8899_v1  ;;  %v3454_v24 = vsel %vm3421_vm5, %v3389_v16, %v8901_v11  ;;  %v8906_v1 = vld [vmem:[#allocation184_spill] sm:$0xff] }
 0x4ee   :  { %2981 = vrot.lane.b32.xlu2 %v1217_v22, %s5380_s17  ;;  %v3647_v57 = vsel %vm3615_vm8, %v3582_v31, %v7594_v7  ;;  %v3519_v4 = vsel %vm3486_vm6, %v3454_v24, %v8902_v36  ;;  %v5226_v24 = vld [vmem:[#allocation3 + $0x18] sm:$0xff] }
 0x4ef   :  { %v4143_v63 = vpop.f32.mrf.mxu1  ;;  %v765_v36 = vld [vmem:[#allocation2 + $0x1b8] sm:$0xff] }
 0x4f0   :  { %v4144_v14 = vadd.f32 %v7299_v59, %v4143_v63  ;;  %v2716_v18 = vpop.permute.xlu0 %2715  ;;  %v2458_v28 = vpop.permute.xlu1 %2457 }
 0x4f1   :  { %v3646_v50 = vsel %vm3615_vm8, %v3581_v19, %v2458_v28  ;;  %v3712_v20 = vsel %vm3680_vm7, %v3647_v57, %v2716_v18 }
 0x4f2   :  { %v7636_v2 = vpop.permute.xlu2 %2493  ;;  %v4305_v51 = vmax.f32 %v4144_v14, 0.0  ;;  %v3711_v49 = vsel %vm3680_vm7, %v3646_v50, %v7573_v21 }
 0x4f3   :  { %v3776_v30 = vsel %vm3745_vm9, %v3711_v49, %v2970_v0 }
 0x4f4   :  { %5119 = vmatmul.msk.f32.gmra.mxu2 %vm579_vm1, %v4305_v51  ;;  %v5223_v51 = vld [vmem:[#allocation3 + $0x8] sm:$0xff] }
 0x4f5   :  { %2503 = vrot.lane.b32.xlu0 %v1296_v12, %s5379_s2  ;;  %3237 = vrot.lane.b32.xlu1 %v1281_v25, %s5382_s19 }
 0x4f6   :  { %3013 = vrot.lane.b32.xlu2 %v1233_v52, %s5380_s17 }
 0x4f7   :  { %v4146_v6 = vpop.f32.mrf.mxu1 }
 0x4f8   :  { %v4147_v40 = vadd.f32 %v7299_v59, %v4146_v6  ;;  %v2462_v56 = vpop.permute.xlu0 %2461  ;;  %v3226_v39 = vpop.permute.xlu1 %3225  ;;  %v1219_v6 = vld [vmem:[#allocation2 + $0x229] sm:$0xff] }
 0x4f9   :  { %v3841_v21 = vsel %vm3810_vm10, %v3776_v30, %v3226_v39  ;;  %v8904_v30 = vld [vmem:[#allocation176_spill] sm:$0xff] }
 0x4fa   :  { %v3230_v43 = vpop.permute.xlu2 %3229  ;;  %v4306_v46 = vmax.f32 %v4147_v40, 0.0  ;;  %5069 = vmatmul.msk.f32.gmra.mxu1 %vm3884_vm11, %v3841_v21  ;;  %v1234_v40 = vld [vmem:[#allocation2 + $0x2d9] sm:$0xff] }
 0x4fc   :  { %5120 = vmatmul.msk.f32.gmra.mxu2 %vm579_vm1, %v4306_v46 }
 0x4fd   :  { %3239 = vrot.lane.b32.xlu0 %v7661_v37, %s5382_s19  ;;  %2471 = vrot.lane.b32.xlu1 %v7585_v48, %s5379_s2 }
 0x4fe   :  { %2727 = vrot.lane.b32.xlu2 %v1154_v34, %s5381_s18 }
 0x4ff   :  { %v4149_v33 = vpop.f32.mrf.mxu1  ;;  %v4571_v26 = vpop.f32.mrf.mxu2 }
 0x500   :  { %v4150_v12 = vadd.f32 %v7299_v59, %v4149_v33  ;;  %v4572_v13 = vadd.f32 %v7657_v38, %v4571_v26  ;;  %v2974_v3 = vpop.permute.xlu0 %2973  ;;  %v2972_v62 = vpop.permute.xlu1 %2971  ;;  %v8907_v33 = vld [vmem:[#allocation226_spill] sm:$0xff] }
 0x501   :  { %v3777_v58 = vsel %vm3745_vm9, %v3712_v20, %v2972_v62  ;;  %v1155_v62 = vld [vmem:[#allocation2 + $0x228] sm:$0xff] }
 0x502   :  { %v7676_v48 = vpop.permute.xlu2 %2463  ;;  %v4307_v7 = vmax.f32 %v4150_v12, 0.0  ;;  %v4763_v0 = vadd.f32 %v5222_v32, %v4572_v13  ;;  %v3842_v5 = vsel %vm3810_vm10, %v3777_v58, %v7614_v27  ;;  %v8903_v27 = vld [vmem:[#allocation207_spill] sm:$0xff] }
 0x503   :  { %5070 = vmatmul.msk.f32.gmra.mxu1 %vm3884_vm11, %v3842_v5  ;;  %v3583_v47 = vsel %vm113_vm0, %v3519_v4, %v8903_v27  ;;  %v5227_v4 = vld [vmem:[#allocation2 + $0x278] sm:$0xff] }
 0x504   :  { %v4827_v53 = vmax.f32 %v4763_v0, 0.0  ;;  %5121 = vmatmul.msk.f32.gmra.mxu2 %vm579_vm1, %v4307_v7  ;;  %v3648_v63 = vsel %vm3615_vm8, %v3583_v47, %v2462_v56  ;;  %v5224_v56 = vld [vmem:[#allocation2 + $0x270] sm:$0xff] }
 0x505   :  { %2473 = vrot.lane.b32.xlu0 %v1281_v25, %s5379_s2  ;;  %2983 = vrot.lane.b32.xlu1 %v1218_v61, %s5380_s17  ;;  %v3405_v39 = vsel %vm579_vm1, %v5224_v56, %v8904_v30  ;;  %v1156_v47 = vld [vmem:[#allocation2 + $0x230] sm:$0xff]  ;;  %v8913_v56 = vld [vmem:[#allocation12_spill] sm:$0xff] }
 0x506   :  { %4891 = vst.msk [vmem:[#allocation6] sm:$0xff] %vm113_vm0, %v4827_v53  ;;  %2759 = vrot.lane.b32.xlu2 %v1170_v9, %s5381_s18  ;;  %v3470_v17 = vsel %vm3421_vm5, %v3405_v39, %v8905_v8 }
 0x507   :  { %v4152_v55 = vpop.f32.mrf.mxu1  ;;  %v4574_v22 = vpop.f32.mrf.mxu2  ;;  %v3535_v31 = vsel %vm3486_vm6, %v3470_v17, %v8906_v1  ;;  %v8914_v17 = vld [vmem:[#allocation137_spill] sm:$0xff]  ;;  %v8915_v1 = vld [vmem:[#allocation211_spill] sm:$0xff] }
 0x508   :  { %v4153_v10 = vadd.f32 %v7299_v59, %v4152_v55  ;;  %v4575_v45 = vadd.f32 %v7657_v38, %v4574_v22  ;;  %v3006_v14 = vpop.permute.xlu0 %3005  ;;  %v2718_v18 = vpop.permute.xlu1 %2717  ;;  %v3599_v26 = vsel %vm113_vm0, %v3535_v31, %v8907_v33  ;;  %v1171_v55 = vld [vmem:[#allocation2 + $0x2e8] sm:$0xff] }
 0x509   :  { %v3713_v28 = vsel %vm3680_vm7, %v3648_v63, %v2718_v18  ;;  %v3664_v20 = vsel %vm3615_vm8, %v3599_v26, %v7636_v2  ;;  %v8909_v22 = vld [vmem:[#allocation10_spill] sm:$0xff]  ;;  %v8911_v18 = vld [vmem:[#allocation185_spill] sm:$0xff] }
 0x50a   :  { %v7698_v60 = vpop.permute.xlu2 %2975  ;;  %v4308_v19 = vmax.f32 %v4153_v10, 0.0  ;;  %v4764_v50 = vadd.f32 %v5223_v51, %v4575_v45  ;;  %v3778_v49 = vsel %vm3745_vm9, %v3713_v28, %v2974_v3  ;;  %v1235_v3 = vld [vmem:[#allocation2 + $0x2e9] sm:$0xff]  ;;  %v3390_v63 = vsel %vm579_vm1, %v765_v36, %v8909_v22 }
 0x50b   :  { %v3843_v25 = vsel %vm3810_vm10, %v3778_v49, %v3230_v43  ;;  %v8910_v10 = vld [vmem:[#allocation175_spill] sm:$0xff]  ;;  %v3455_v30 = vsel %vm3421_vm5, %v3390_v63, %v8913_v56 }
 0x50c   :  { %v4828_v52 = vmax.f32 %v4764_v50, 0.0  ;;  %5071 = vmatmul.msk.f32.gmra.mxu1 %vm3884_vm11, %v3843_v25  ;;  %5122 = vmatmul.msk.f32.gmra.mxu2 %vm579_vm1, %v4308_v19  ;;  %v8912_v50 = vld [vmem:[#allocation234_spill] sm:$0xff]  ;;  %v5231_v63 = vld [vmem:[#allocation3 + $0x30] sm:$0xff] }
 0x50d   :  { %2985 = vrot.lane.b32.xlu0 %v1219_v6, %s5380_s17  ;;  %3015 = vrot.lane.b32.xlu1 %v1234_v40, %s5380_s17 }
 0x50e   :  { %4892 = vst.msk [vmem:[#allocation6 + $0x8] sm:$0xff] %vm113_vm0, %v4828_v52  ;;  %3271 = vrot.lane.b32.xlu2 %v7709_v54, %s5382_s19 }
 0x50f   :  { %v4155_v21 = vpop.f32.mrf.mxu1  ;;  %v4577_v43 = vpop.f32.mrf.mxu2 }
 0x510   :  { %v4156_v46 = vadd.f32 %v7299_v59, %v4155_v21  ;;  %v4578_v35 = vadd.f32 %v7657_v38, %v4577_v43  ;;  %v7717_v44 = vpop.permute.xlu0 %2719  ;;  %v2750_v23 = vpop.permute.xlu1 %2749  ;;  %v3520_v21 = vsel %vm3486_vm6, %v3455_v30, %v8914_v17  ;;  %v8921_v30 = vld [vmem:[#allocation182_spill] sm:$0xff]  ;;  %v7826_v17 = vld [vmem:[%s8545_s4] ss:$0 sm:$0xff] }
 0x511   :  { %v3729_v13 = vsel %vm3680_vm7, %v3664_v20, %v2750_v23  ;;  %v3584_v31 = vsel %vm113_vm0, %v3520_v21, %v8915_v1  ;;  %v1172_v20 = vld [vmem:[#allocation2 + $0x2f0] sm:$0xff] }
 0x512   :  { %v3008_v41 = vpop.permute.xlu2 %3007  ;;  %v4309_v34 = vmax.f32 %v4156_v46, 0.0  ;;  %v4765_v57 = vadd.f32 %v5225_v29, %v4578_v35  ;;  %v3794_v32 = vsel %vm3745_vm9, %v3729_v13, %v3006_v14  ;;  %v7749_v14 = vld [vmem:[#allocation2 + $0x22a] sm:$0xff]  ;;  %v5228_v46 = vld [vmem:[#allocation3 + $0x20] sm:$0xff]  ;;  %v3649_v29 = vsel %vm3615_vm8, %v3584_v31, %v7676_v48 }
 0x513   :  { %v3714_v26 = vsel %vm3680_vm7, %v3649_v29, %v7717_v44  ;;  %v5234_v29 = vld [vmem:[#allocation3 + $0x38] sm:$0xff] }
 0x514   :  { %v4829_v12 = vmax.f32 %v4765_v57, 0.0  ;;  %5123 = vmatmul.msk.f32.gmra.mxu2 %vm579_vm1, %v4309_v34 }
 0x515   :  { %3017 = vrot.lane.b32.xlu0 %v1235_v3, %s5380_s17  ;;  %2729 = vrot.lane.b32.xlu1 %v1155_v62, %s5381_s18  ;;  %v3779_v62 = vsel %vm3745_vm9, %v3714_v26, %v7698_v60  ;;  %v1220_v60 = vld [vmem:[#allocation2 + $0x231] sm:$0xff]  ;;  %v8922_v26 = vld [vmem:[#allocation22_spill] sm:$0xff] }
 0x516   :  { %4893 = vst.msk [vmem:[#allocation6 + $0x10] sm:$0xff] %vm113_vm0, %v4829_v12  ;;  %2505 = vrot.lane.b32.xlu2 %v7624_v15, %s5379_s2  ;;  %v8908_v15 = vld [vmem:[#allocation183_spill] sm:$0xff] }
 0x517   :  { %v4158_v58 = vpop.f32.mrf.mxu1  ;;  %v4580_v42 = vpop.f32.mrf.mxu2  ;;  %v3406_v9 = vsel %vm579_vm1, %v5227_v4, %v8908_v15  ;;  %v1299_v12 = vld [vmem:[#allocation2 + $0x2ea] sm:$0xff] }
 0x518   :  { %v4159_v2 = vadd.f32 %v7299_v59, %v4158_v58  ;;  %v4581_v16 = vadd.f32 %v7657_v38, %v4580_v42  ;;  %v2752_v7 = vpop.permute.xlu0 %2751  ;;  %v3262_v0 = vpop.permute.xlu1 %3261  ;;  %v3471_v45 = vsel %vm3421_vm5, %v3406_v9, %v8910_v10 }
 0x519   :  { %v3859_v5 = vsel %vm3810_vm10, %v3794_v32, %v3262_v0  ;;  %v3536_v28 = vsel %vm3486_vm6, %v3471_v45, %v8911_v18  ;;  %v7793_v0 = vld [vmem:[#allocation2 + $0x2f2] sm:$0xff] }
 0x51a   :  { %v7736_v53 = vpop.permute.xlu2 %2721  ;;  %v4310_v11 = vmax.f32 %v4159_v2, 0.0  ;;  %v4766_v61 = vadd.f32 %v5226_v24, %v4581_v16  ;;  %5087 = vmatmul.msk.f32.vlgmr.msrb.gmra.mxu3 %vm3884_vm11, %v3859_v5  ;;  %v3600_v49 = vsel %vm113_vm0, %v3536_v28, %v8912_v50  ;;  %v5230_v5 = vld [vmem:[#allocation2 + $0x1c8] sm:$0xff]  ;;  %v8918_v45 = vld [vmem:[#allocation143_spill] sm:$0xff]  ;;  %v8920_v50 = vld [vmem:[#allocation181_spill] sm:$0xff] }
 0x51b   :  { %v8919_v28 = vld [vmem:[#allocation218_spill] sm:$0xff] }
 0x51c   :  { %v4830_v27 = vmax.f32 %v4766_v61, 0.0  ;;  %5124 = vmatmul.msk.f32.gmra.mxu2 %vm579_vm1, %v4310_v11  ;;  %v8916_v11 = vld [vmem:[#allocation141_spill] sm:$0xff] }
 0x51d   :  { %2731 = vrot.lane.b32.xlu0 %v1156_v47, %s5381_s18  ;;  %2761 = vrot.lane.b32.xlu1 %v1171_v55, %s5381_s18  ;;  %v3391_v24 = vsel %vm579_vm1, %v5230_v5, %v8916_v11  ;;  %v8917_v55 = vld [vmem:[#allocation134_spill] sm:$0xff] }
 0x51e   :  { %4894 = vst.msk [vmem:[#allocation6 + $0x18] sm:$0xff] %vm113_vm0, %v4830_v27  ;;  %3241 = vrot.lane.b32.xlu2 %v7749_v14, %s5382_s19 }
 0x51f   :  { %v4161_v19 = vpop.f32.mrf.mxu1  ;;  %v4583_v51 = vpop.f32.mrf.mxu2 }
 0x520   :  { %v4162_v25 = vadd.f32 %v7299_v59, %v4161_v19  ;;  %v4584_v52 = vadd.f32 %v7657_v38, %v4583_v51  ;;  %v3264_v6 = vpop.permute.xlu0 %3263  ;;  %v2496_v40 = vpop.permute.xlu1 %2495 }
 0x521   :  { %v3665_v39 = vsel %vm3615_vm8, %v3600_v49, %v2496_v40 }
 0x522   :  { %v7762_v8 = vpop.permute.xlu2 %2753  ;;  %v4311_v43 = vmax.f32 %v4162_v25, 0.0  ;;  %v4767_v35 = vadd.f32 %v5228_v46, %v4584_v52  ;;  %v3730_v23 = vsel %vm3680_vm7, %v3665_v39, %v2752_v7  ;;  %v5229_v7 = vld [vmem:[#allocation3 + $0x28] sm:$0xff]  ;;  %v1284_v52 = vld [vmem:[#allocation2 + $0x232] sm:$0xff] }
 0x523   :  { %v3795_v34 = vsel %vm3745_vm9, %v3730_v23, %v3008_v41 }
 0x524   :  { %v4831_v57 = vmax.f32 %v4767_v35, 0.0  ;;  %5125 = vmatmul.msk.f32.gmra.mxu2 %vm579_vm1, %v4311_v43  ;;  %v3860_v33 = vsel %vm3810_vm10, %v3795_v34, %v3264_v6  ;;  %v1236_v6 = vld [vmem:[#allocation2 + $0x2f1] sm:$0xff] }
 0x525   :  { %5088 = vmatmul.msk.f32.gmra.mxu3 %vm3884_vm11, %v3860_v33  ;;  %2763 = vrot.lane.b32.xlu0 %v1172_v20, %s5381_s18 }
 0x526   :  { %4895 = vst.msk [vmem:[#allocation6 + $0x20] sm:$0xff] %vm113_vm0, %v4831_v57  ;;  %3273 = vrot.lane.b32.xlu1 %v1299_v12, %s5382_s19  ;;  %2475 = vrot.lane.b32.xlu2 %v7661_v37, %s5379_s2 }
 0x527   :  { %v4164_v41 = vpop.f32.mrf.mxu1  ;;  %v4586_v48 = vpop.f32.mrf.mxu2 }
 0x528   :  { %v4165_v13 = vadd.f32 %v7299_v59, %v4164_v41  ;;  %v4587_v3 = vadd.f32 %v7657_v38, %v4586_v48  ;;  %v7784_v44 = vpop.permute.xlu0 %2497  ;;  %v3232_v58 = vpop.permute.xlu1 %3231 }
 0x529   :  { %v3844_v42 = vsel %vm3810_vm10, %v3779_v62, %v3232_v58 }
 0x52a   :  { %v7789_v2 = vpop.permute.xlu2 %3265  ;;  %v4312_v16 = vmax.f32 %v4165_v13, 0.0  ;;  %v4768_v32 = vadd.f32 %v5229_v7, %v4587_v3  ;;  %5072 = vmatmul.msk.f32.gmra.mxu1 %vm3884_vm11, %v3844_v42  ;;  %v7842_v13 = vld [vmem:[#allocation2 + $0x242] sm:$0xff] }
 0x52b   :  { %v1157_v3 = vld [vmem:[#allocation2 + $0x240] sm:$0xff] }
 0x52c   :  { %v4832_v37 = vmax.f32 %v4768_v32, 0.0  ;;  %5126 = vmatmul.msk.f32.gmra.mxu2 %vm579_vm1, %v4312_v16 }
 0x52d   :  { %3275 = vrot.lane.b32.xlu0 %v7793_v0, %s5382_s19 }
 0x52e   :  { %4896 = vst.msk [vmem:[#allocation6 + $0x28] sm:$0xff] %vm113_vm0, %v4832_v37  ;;  %2507 = vrot.lane.b32.xlu1 %v7709_v54, %s5379_s2  ;;  %2987 = vrot.lane.b32.xlu2 %v1220_v60, %s5380_s17  ;;  %v3456_v54 = vsel %vm3421_vm5, %v3391_v24, %v8917_v55  ;;  %v5235_v60 = vld [vmem:[#allocation3 + $0x40] sm:$0xff]  ;;  %v5236_v24 = vld [vmem:[#allocation2 + $0x1d0] sm:$0xff] }
 0x52f   :  { %v4167_v61 = vpop.f32.mrf.mxu1  ;;  %v4589_v36 = vpop.f32.mrf.mxu2  ;;  %v3521_v18 = vsel %vm3486_vm6, %v3456_v54, %v8918_v45  ;;  %v1173_v54 = vld [vmem:[#allocation2 + $0x300] sm:$0xff] }
 0x530   :  { %v4168_v4 = vadd.f32 %v7299_v59, %v4167_v61  ;;  %v4590_v15 = vadd.f32 %v7657_v38, %v4589_v36  ;;  %v3234_v9 = vpop.permute.xlu0 %3233  ;;  %v2466_v27 = vpop.permute.xlu1 %2465  ;;  %v3585_v19 = vsel %vm113_vm0, %v3521_v18, %v8919_v28  ;;  %v5232_v59 = vld [vmem:[#allocation2 + $0x288] sm:$0xff]  ;;  %v8924_v61 = vld [vmem:[#allocation131_spill] sm:$0xff] }
 0x531   :  { %v3407_v49 = vsel %vm579_vm1, %v5232_v59, %v8920_v50  ;;  %v3650_v25 = vsel %vm3615_vm8, %v3585_v19, %v2466_v27  ;;  %v3392_v36 = vsel %vm579_vm1, %v5236_v24, %v8924_v61  ;;  %v8926_v27 = vld [vmem:[#allocation153_spill] sm:$0xff] }
 0x532   :  { %v7805_v47 = vpop.permute.xlu2 %2499  ;;  %v4313_v22 = vmax.f32 %v4168_v4, 0.0  ;;  %v4769_v10 = vadd.f32 %v5231_v63, %v4590_v15  ;;  %v3472_v39 = vsel %vm3421_vm5, %v3407_v49, %v8921_v30  ;;  %v3715_v35 = vsel %vm3680_vm7, %v3650_v25, %v7736_v53  ;;  %v8925_v15 = vld [vmem:[#allocation138_spill] sm:$0xff] }
 0x533   :  { %v3537_v20 = vsel %vm3486_vm6, %v3472_v39, %v8922_v26  ;;  %v5237_v49 = vld [vmem:[#allocation3 + $0x48] sm:$0xff] }
 0x534   :  { %v4833_v51 = vmax.f32 %v4769_v10, 0.0  ;;  %5127 = vmatmul.msk.f32.gmra.mxu2 %vm579_vm1, %v4313_v22  ;;  %v8927_v22 = vld [vmem:[#allocation210_spill] sm:$0xff] }
 0x535   :  { %2509 = vrot.lane.b32.xlu0 %v1299_v12, %s5379_s2  ;;  %v8923_v12 = vld [vmem:[#allocation225_spill] sm:$0xff]  ;;  %v8928_v30 = vld [vmem:[#allocation14_spill] sm:$0xff] }
 0x536   :  { %4897 = vst.msk [vmem:[#allocation6 + $0x30] sm:$0xff] %vm113_vm0, %v4833_v51  ;;  %3243 = vrot.lane.b32.xlu1 %v1284_v52, %s5382_s19  ;;  %3019 = vrot.lane.b32.xlu2 %v1236_v6, %s5380_s17  ;;  %v3601_v41 = vsel %vm113_vm0, %v3537_v20, %v8923_v12  ;;  %v8930_v20 = vld [vmem:[#allocation17_spill] sm:$0xff] }
 0x537   :  { %v4170_v40 = vpop.f32.mrf.mxu1  ;;  %v4592_v56 = vpop.f32.mrf.mxu2  ;;  %v3666_v53 = vsel %vm3615_vm8, %v3601_v41, %v7784_v44  ;;  %v5239_v41 = vld [vmem:[#allocation3 + $0x50] sm:$0xff] }
 0x538   :  { %v4171_v21 = vadd.f32 %v7826_v17, %v4170_v40  ;;  %v4593_v43 = vadd.f32 %v7657_v38, %v4592_v56  ;;  %v2468_v46 = vpop.permute.xlu0 %2467  ;;  %v2978_v23 = vpop.permute.xlu1 %2977  ;;  %v3731_v44 = vsel %vm3680_vm7, %v3666_v53, %v7762_v8  ;;  %v5238_v56 = vld [vmem:[#allocation2 + $0x290] sm:$0xff]  ;;  %v8931_v53 = vld [vmem:[#allocation230_spill] sm:$0xff] }
 0x539   :  { %v3780_v1 = vsel %vm3745_vm9, %v3715_v35, %v2978_v23  ;;  %v3408_v39 = vsel %vm579_vm1, %v5238_v56, %v8928_v30  ;;  %v1237_v35 = vld [vmem:[#allocation2 + $0x301] sm:$0xff] }
 0x53a   :  { %v3236_v31 = vpop.permute.xlu2 %3235  ;;  %v4314_v34 = vmax.f32 %v4171_v21, 0.0  ;;  %v4770_v57 = vadd.f32 %v5234_v29, %v4593_v43  ;;  %v3845_v33 = vsel %vm3810_vm10, %v3780_v1, %v3234_v9  ;;  %v3457_v9 = vsel %vm3421_vm5, %v3392_v36, %v8925_v15  ;;  %v7887_v23 = vld [vmem:[#allocation2 + $0x302] sm:$0xff]  ;;  %v8929_v1 = vld [vmem:[#allocation15_spill] sm:$0xff] }
 0x53b   :  { %5073 = vmatmul.msk.f32.gmra.mxu1 %vm3884_vm11, %v3845_v33  ;;  %v3522_v55 = vsel %vm3486_vm6, %v3457_v9, %v8926_v27  ;;  %v5241_v15 = vld [vmem:[#allocation2 + $0x2a0] sm:$0xff]  ;;  %v8932_v9 = vld [vmem:[#allocation20_spill] sm:$0xff] }
 0x53c   :  { %v4834_v48 = vmax.f32 %v4770_v57, 0.0  ;;  %5128 = vmatmul.msk.f32.gmra.mxu2 %vm579_vm1, %v4314_v34  ;;  %v3586_v63 = vsel %vm113_vm0, %v3522_v55, %v8927_v22  ;;  %v1159_v55 = vld [vmem:[#allocation2 + $0x258] sm:$0xff]  ;;  %v5242_v22 = vld [vmem:[#allocation2 + $0x1e0] sm:$0xff] }
 0x53d   :  { %3245 = vrot.lane.b32.xlu0 %v7842_v13, %s5382_s19  ;;  %v3651_v45 = vsel %vm3615_vm8, %v3586_v63, %v2468_v46  ;;  %v1222_v46 = vld [vmem:[#allocation2 + $0x249] sm:$0xff]  ;;  %v8934_v63 = vld [vmem:[#allocation140_spill] sm:$0xff] }
 0x53e   :  { %4898 = vst.msk [vmem:[#allocation6 + $0x38] sm:$0xff] %vm113_vm0, %v4834_v48  ;;  %2477 = vrot.lane.b32.xlu1 %v7749_v14, %s5379_s2  ;;  %2733 = vrot.lane.b32.xlu2 %v1157_v3, %s5381_s18 }
 0x53f   :  { %v4595_v62 = vpop.f32.mrf.mxu2 }
 0x540   :  { %v4596_v58 = vadd.f32 %v7657_v38, %v4595_v62  ;;  %v2980_v42 = vpop.permute.xlu0 %2979  ;;  %v3010_v16 = vpop.permute.xlu1 %3009 }
 0x541   :  { %v3796_v7 = vsel %vm3745_vm9, %v3731_v44, %v3010_v16  ;;  %v4173_v32 = vpop.f32.mrf.mxu1  ;;  %v1238_v44 = vld [vmem:[#allocation2 + $0x309] sm:$0xff] }
 0x542   :  { %v7854_v37 = vpop.permute.xlu2 %2469  ;;  %v4771_v5 = vadd.f32 %v5235_v60, %v4596_v58  ;;  %v4174_v14 = vadd.f32 %v7826_v17, %v4173_v32  ;;  %v3861_v11 = vsel %vm3810_vm10, %v3796_v7, %v7789_v2  ;;  %v1221_v2 = vld [vmem:[#allocation2 + $0x241] sm:$0xff] }
 0x543   :  { %5089 = vmatmul.msk.f32.gmra.mxu3 %vm3884_vm11, %v3861_v11  ;;  %v1158_v16 = vld [vmem:[#allocation2 + $0x248] sm:$0xff] }
 0x544   :  { %v4835_v8 = vmax.f32 %v4771_v5, 0.0  ;;  %v4315_v4 = vmax.f32 %v4174_v14, 0.0 }
 0x545   :  { %2479 = vrot.lane.b32.xlu0 %v1284_v52, %s5379_s2 }
 0x546   :  { %4899 = vst.msk [vmem:[#allocation6 + $0x40] sm:$0xff] %vm113_vm0, %v4835_v8  ;;  %5129 = vmatmul.msk.f32.gmra.mxu2 %vm579_vm1, %v4315_v4  ;;  %2989 = vrot.lane.b32.xlu1 %v1221_v2, %s5380_s17  ;;  %v5240_v8 = vld [vmem:[#allocation3 + $0x58] sm:$0xff] }
 0x547   :  { %v4598_v10 = vpop.f32.mrf.mxu2  ;;  %2765 = vrot.lane.b32.xlu2 %v1173_v54, %s5381_s18  ;;  %v8933_v2 = vld [vmem:[#allocation16_spill] sm:$0xff] }
 0x548   :  { %v4599_v18 = vadd.f32 %v7657_v38, %v4598_v10  ;;  %v3012_v28 = vpop.permute.xlu0 %3011  ;;  %v2724_v19 = vpop.permute.xlu1 %2723  ;;  %v3393_v10 = vsel %vm579_vm1, %v5242_v22, %v8934_v63  ;;  %v8942_v63 = vld [vmem:[#allocation152_spill] sm:$0xff] }
 0x549   :  { %v3716_v51 = vsel %vm3680_vm7, %v3651_v45, %v2724_v19  ;;  %v4176_v59 = vpop.f32.mrf.mxu1  ;;  %v1174_v45 = vld [vmem:[#allocation2 + $0x308] sm:$0xff] }
 0x54a   :  { %v7876_v50 = vpop.permute.xlu2 %2981  ;;  %v4772_v25 = vadd.f32 %v5237_v49, %v4599_v18  ;;  %v3781_v52 = vsel %vm3745_vm9, %v3716_v51, %v2980_v42  ;;  %v4177_v6 = vadd.f32 %v7826_v17, %v4176_v59  ;;  %v7925_v18 = vld [vmem:[#allocation2 + $0x24a] sm:$0xff] }
 0x54b   :  { %v3846_v40 = vsel %vm3810_vm10, %v3781_v52, %v3236_v31  ;;  %v3473_v31 = vsel %vm3421_vm5, %v3408_v39, %v8929_v1  ;;  %v8936_v51 = vld [vmem:[#allocation150_spill] sm:$0xff] }
 0x54c   :  { %v4836_v21 = vmax.f32 %v4772_v25, 0.0  ;;  %v4316_v43 = vmax.f32 %v4177_v6, 0.0  ;;  %5074 = vmatmul.msk.f32.gmra.mxu1 %vm3884_vm11, %v3846_v40  ;;  %v3538_v12 = vsel %vm3486_vm6, %v3473_v31, %v8930_v20  ;;  %v3458_v59 = vsel %vm3421_vm5, %v3393_v10, %v8936_v51  ;;  %v8937_v25 = vld [vmem:[#allocation237_spill] sm:$0xff] }
 0x54d   :  { %2991 = vrot.lane.b32.xlu0 %v1222_v46, %s5380_s17  ;;  %v3602_v3 = vsel %vm113_vm0, %v3538_v12, %v8931_v53  ;;  %v1287_v51 = vld [vmem:[#allocation2 + $0x25a] sm:$0xff] }
 0x54e   :  { %4900 = vst.msk [vmem:[#allocation6 + $0x48] sm:$0xff] %vm113_vm0, %v4836_v21  ;;  %5130 = vmatmul.msk.f32.gmra.mxu2 %vm579_vm1, %v4316_v43  ;;  %3021 = vrot.lane.b32.xlu1 %v1237_v35, %s5380_s17  ;;  %v3667_v62 = vsel %vm3615_vm8, %v3602_v3, %v7805_v47  ;;  %v8938_v43 = vld [vmem:[#allocation145_spill] sm:$0xff] }
 0x54f   :  { %v4601_v34 = vpop.f32.mrf.mxu2  ;;  %3277 = vrot.lane.b32.xlu2 %v7887_v23, %s5382_s19  ;;  %v3523_v46 = vsel %vm3486_vm6, %v3458_v59, %v8938_v43  ;;  %v5243_v35 = vld [vmem:[#allocation3 + $0x60] sm:$0xff] }
 0x550   :  { %v4602_v29 = vadd.f32 %v7657_v38, %v4601_v34  ;;  %v7895_v57 = vpop.permute.xlu0 %2725  ;;  %v2756_v33 = vpop.permute.xlu1 %2755  ;;  %v1239_v59 = vld [vmem:[#allocation2 + $0x319] sm:$0xff] }
 0x551   :  { %v3732_v42 = vsel %vm3680_vm7, %v3667_v62, %v2756_v33  ;;  %v1175_v62 = vld [vmem:[#allocation2 + $0x318] sm:$0xff]  ;;  %v8944_v43 = vld [vmem:[#allocation13_spill] sm:$0xff] }
 0x552   :  { %v3014_v26 = vpop.permute.xlu2 %3013  ;;  %v4773_v48 = vadd.f32 %v5239_v41, %v4602_v29  ;;  %v3797_v11 = vsel %vm3745_vm9, %v3732_v42, %v3012_v28  ;;  %v8935_v28 = vld [vmem:[#allocation24_spill] sm:$0xff]  ;;  %v8939_v29 = vld [vmem:[#allocation214_spill] sm:$0xff] }
 0x553   :  { %v3587_v33 = vsel %vm113_vm0, %v3523_v46, %v8939_v29 }
 0x554   :  { %v4837_v58 = vmax.f32 %v4773_v48, 0.0  ;;  %v3652_v12 = vsel %vm3615_vm8, %v3587_v33, %v7854_v37  ;;  %v5248_v33 = vld [vmem:[#allocation3 + $0x78] sm:$0xff] }
 0x555   :  { %3023 = vrot.lane.b32.xlu0 %v1238_v44, %s5380_s17  ;;  %v3717_v3 = vsel %vm3680_vm7, %v3652_v12, %v7895_v57 }
 0x556   :  { %4901 = vst.msk [vmem:[#allocation6 + $0x50] sm:$0xff] %vm113_vm0, %v4837_v58  ;;  %2735 = vrot.lane.b32.xlu1 %v1158_v16, %s5381_s18  ;;  %v3782_v57 = vsel %vm3745_vm9, %v3717_v3, %v7876_v50  ;;  %v1223_v50 = vld [vmem:[#allocation2 + $0x259] sm:$0xff] }
 0x557   :  { %v4179_v7 = vpop.f32.mrf.mxu1  ;;  %v4604_v32 = vpop.f32.mrf.mxu2  ;;  %2511 = vrot.lane.b32.xlu2 %v7793_v0, %s5379_s2  ;;  %v3409_v0 = vsel %vm579_vm1, %v5241_v15, %v8932_v9 }
 0x558   :  { %v4180_v60 = vadd.f32 %v7826_v17, %v4179_v7  ;;  %v4605_v47 = vadd.f32 %v7657_v38, %v4604_v32  ;;  %v2758_v5 = vpop.permute.xlu0 %2757  ;;  %v3268_v14 = vpop.permute.xlu1 %3267  ;;  %v3474_v54 = vsel %vm3421_vm5, %v3409_v0, %v8933_v2 }
 0x559   :  { %v3862_v24 = vsel %vm3810_vm10, %v3797_v11, %v3268_v14  ;;  %v3539_v19 = vsel %vm3486_vm6, %v3474_v54, %v8935_v28  ;;  %v7967_v11 = vld [vmem:[#allocation2 + $0x31a] sm:$0xff]  ;;  %v5246_v54 = vld [vmem:[#allocation3 + $0x70] sm:$0xff] }
 0x55a   :  { %v7913_v61 = vpop.permute.xlu2 %2727  ;;  %v4317_v36 = vmax.f32 %v4180_v60, 0.0  ;;  %v4774_v4 = vadd.f32 %v5240_v8, %v4605_v47  ;;  %5090 = vmatmul.msk.f32.gmra.mxu3 %vm3884_vm11, %v3862_v24  ;;  %v3603_v52 = vsel %vm113_vm0, %v3539_v19, %v8937_v25  ;;  %v5244_v60 = vld [vmem:[#allocation3 + $0x68] sm:$0xff] }
 0x55b   :  { %v5245_v24 = vld [vmem:[#allocation2 + $0x1e8] sm:$0xff] }
 0x55c   :  { %v4838_v27 = vmax.f32 %v4774_v4, 0.0  ;;  %5131 = vmatmul.msk.f32.gmra.mxu2 %vm579_vm1, %v4317_v36  ;;  %v8940_v36 = vld [vmem:[#allocation147_spill] sm:$0xff] }
 0x55d   :  { %2737 = vrot.lane.b32.xlu0 %v1159_v55, %s5381_s18  ;;  %v3394_v8 = vsel %vm579_vm1, %v5245_v24, %v8940_v36  ;;  %v8941_v55 = vld [vmem:[#allocation139_spill] sm:$0xff]  ;;  %v8948_v24 = vld [vmem:[#allocation142_spill] sm:$0xff] }
 0x55e   :  { %4902 = vst.msk [vmem:[#allocation6 + $0x58] sm:$0xff] %vm113_vm0, %v4838_v27  ;;  %2767 = vrot.lane.b32.xlu1 %v1174_v45, %s5381_s18  ;;  %v3459_v2 = vsel %vm3421_vm5, %v3394_v8, %v8941_v55  ;;  %v8943_v45 = vld [vmem:[#allocation221_spill] sm:$0xff] }
 0x55f   :  { %v4607_v49 = vpop.f32.mrf.mxu2  ;;  %3247 = vrot.lane.b32.xlu2 %v7925_v18, %s5382_s19  ;;  %v3524_v10 = vsel %vm3486_vm6, %v3459_v2, %v8942_v63  ;;  %v1176_v55 = vld [vmem:[#allocation2 + $0x320] sm:$0xff] }
 0x560   :  { %v4608_v6 = vadd.f32 %v7657_v38, %v4607_v49  ;;  %v3270_v40 = vpop.permute.xlu0 %3269  ;;  %v2502_v56 = vpop.permute.xlu1 %2501  ;;  %v8951_v2 = vld [vmem:[#allocation213_spill] sm:$0xff] }
 0x561   :  { %v3668_v30 = vsel %vm3615_vm8, %v3603_v52, %v2502_v56  ;;  %v4182_v39 = vpop.f32.mrf.mxu1 }
 0x562   :  { %v7938_v21 = vpop.permute.xlu2 %2759  ;;  %v4775_v1 = vadd.f32 %v5243_v35, %v4608_v6  ;;  %v3733_v31 = vsel %vm3680_vm7, %v3668_v30, %v2758_v5  ;;  %v4183_v34 = vadd.f32 %v7826_v17, %v4182_v39  ;;  %v5247_v39 = vld [vmem:[#allocation2 + $0x2a8] sm:$0xff] }
 0x563   :  { %v3798_v20 = vsel %vm3745_vm9, %v3733_v31, %v3014_v26  ;;  %v1302_v26 = vld [vmem:[#allocation2 + $0x30a] sm:$0xff]  ;;  %v3410_v46 = vsel %vm579_vm1, %v5247_v39, %v8944_v43  ;;  %v1240_v39 = vld [vmem:[#allocation2 + $0x321] sm:$0xff] }
 0x564   :  { %v4839_v41 = vmax.f32 %v4775_v1, 0.0  ;;  %v4318_v48 = vmax.f32 %v4183_v34, 0.0  ;;  %v3863_v53 = vsel %vm3810_vm10, %v3798_v20, %v3270_v40  ;;  %v8945_v31 = vld [vmem:[#allocation18_spill] sm:$0xff] }
 0x565   :  { %5091 = vmatmul.msk.f32.gmra.mxu3 %vm3884_vm11, %v3863_v53  ;;  %2769 = vrot.lane.b32.xlu0 %v1175_v62, %s5381_s18  ;;  %v3475_v34 = vsel %vm3421_vm5, %v3410_v46, %v8945_v31  ;;  %v8052_v43 = vld [vmem:[#allocation2 + $0x322] sm:$0xff] }
 0x566   :  { %4903 = vst.msk [vmem:[#allocation6 + $0x60] sm:$0xff] %vm113_vm0, %v4839_v41  ;;  %5132 = vmatmul.msk.f32.gmra.mxu2 %vm579_vm1, %v4318_v48  ;;  %3279 = vrot.lane.b32.xlu1 %v1302_v26, %s5382_s19  ;;  %v8946_v41 = vld [vmem:[#allocation32_spill] sm:$0xff] }
 0x567   :  { %v4610_v37 = vpop.f32.mrf.mxu2  ;;  %2481 = vrot.lane.b32.xlu2 %v7842_v13, %s5379_s2  ;;  %v3540_v48 = vsel %vm3486_vm6, %v3475_v34, %v8946_v41 }
 0x568   :  { %v4611_v58 = vadd.f32 %v7657_v38, %v4610_v37  ;;  %v2504_v42 = vpop.permute.xlu0 %2503  ;;  %v3238_v44 = vpop.permute.xlu1 %3237  ;;  %v1160_v37 = vld [vmem:[#allocation2 + $0x260] sm:$0xff] }
 0x569   :  { %v3847_v16 = vsel %vm3810_vm10, %v3782_v57, %v3238_v44  ;;  %v4185_v7 = vpop.f32.mrf.mxu1 }
 0x56a   :  { %v7963_v32 = vpop.permute.xlu2 %3271  ;;  %v4776_v47 = vadd.f32 %v5244_v60, %v4611_v58  ;;  %v4186_v5 = vadd.f32 %v7826_v17, %v4185_v7  ;;  %5075 = vmatmul.msk.f32.gmra.mxu1 %vm3884_vm11, %v3847_v16 }
 0x56c   :  { %v4840_v14 = vmax.f32 %v4776_v47, 0.0  ;;  %v4319_v13 = vmax.f32 %v4186_v5, 0.0  ;;  %v5249_v5 = vld [vmem:[#allocation3 + $0x80] sm:$0xff] }
 0x56d   :  { %3281 = vrot.lane.b32.xlu0 %v7967_v11, %s5382_s19 }
 0x56e   :  { %4904 = vst.msk [vmem:[#allocation6 + $0x68] sm:$0xff] %vm113_vm0, %v4840_v14  ;;  %5133 = vmatmul.msk.f32.gmra.mxu2 %vm579_vm1, %v4319_v13  ;;  %2513 = vrot.lane.b32.xlu1 %v7887_v23, %s5379_s2  ;;  %v3588_v23 = vsel %vm113_vm0, %v3524_v10, %v8943_v45 }
 0x56f   :  { %v4613_v4 = vpop.f32.mrf.mxu2  ;;  %2993 = vrot.lane.b32.xlu2 %v1223_v50, %s5380_s17  ;;  %v5250_v50 = vld [vmem:[#allocation2 + $0x1f8] sm:$0xff] }
 0x570   :  { %v4614_v15 = vadd.f32 %v7657_v38, %v4613_v4  ;;  %v3240_v9 = vpop.permute.xlu0 %3239  ;;  %v2472_v0 = vpop.permute.xlu1 %2471  ;;  %v3395_v36 = vsel %vm579_vm1, %v5250_v50, %v8948_v24  ;;  %v8949_v4 = vld [vmem:[#allocation149_spill] sm:$0xff]  ;;  %v5254_v50 = vld [vmem:[#allocation3 + $0x98] sm:$0xff] }
 0x571   :  { %v3653_v19 = vsel %vm3615_vm8, %v3588_v23, %v2472_v0 }
 0x572   :  { %v7979_v27 = vpop.permute.xlu2 %2505  ;;  %v4777_v22 = vadd.f32 %v5246_v54, %v4614_v15  ;;  %v3718_v56 = vsel %vm3680_vm7, %v3653_v19, %v7913_v61  ;;  %v8947_v61 = vld [vmem:[#allocation228_spill] sm:$0xff]  ;;  %v3460_v15 = vsel %vm3421_vm5, %v3395_v36, %v8949_v4  ;;  %v5255_v36 = vld [vmem:[#allocation2 + $0x2c0] sm:$0xff] }
 0x573   :  { %v3604_v53 = vsel %vm113_vm0, %v3540_v48, %v8947_v61  ;;  %v8954_v48 = vld [vmem:[#allocation30_spill] sm:$0xff] }
 0x574   :  { %v4841_v28 = vmax.f32 %v4777_v22, 0.0  ;;  %v3669_v62 = vsel %vm3615_vm8, %v3604_v53, %v2504_v42  ;;  %v5253_v53 = vld [vmem:[#allocation3 + $0x90] sm:$0xff] }
 0x575   :  { %2515 = vrot.lane.b32.xlu0 %v1302_v26, %s5379_s2  ;;  %v8009_v26 = vld [vmem:[#allocation2 + $0x262] sm:$0xff]  ;;  %v3734_v42 = vsel %vm3680_vm7, %v3669_v62, %v7938_v21 }
 0x576   :  { %4905 = vst.msk [vmem:[#allocation6 + $0x70] sm:$0xff] %vm113_vm0, %v4841_v28  ;;  %3249 = vrot.lane.b32.xlu1 %v1287_v51, %s5382_s19  ;;  %v8955_v62 = vld [vmem:[#allocation233_spill] sm:$0xff] }
 0x577   :  { %v4188_v49 = vpop.f32.mrf.mxu1  ;;  %v4616_v25 = vpop.f32.mrf.mxu2  ;;  %3025 = vrot.lane.b32.xlu2 %v1239_v59, %s5380_s17  ;;  %v5251_v59 = vld [vmem:[#allocation3 + $0x88] sm:$0xff] }
 0x578   :  { %v4189_v52 = vadd.f32 %v7826_v17, %v4188_v49  ;;  %v4617_v6 = vadd.f32 %v7657_v38, %v4616_v25  ;;  %v2474_v40 = vpop.permute.xlu0 %2473  ;;  %v2984_v30 = vpop.permute.xlu1 %2983 }
 0x579   :  { %v3783_v35 = vsel %vm3745_vm9, %v3718_v56, %v2984_v30 }
 0x57a   :  { %v3242_v1 = vpop.permute.xlu2 %3241  ;;  %v4320_v29 = vmax.f32 %v4189_v52, 0.0  ;;  %v4778_v20 = vadd.f32 %v5248_v33, %v4617_v6  ;;  %v3848_v12 = vsel %vm3810_vm10, %v3783_v35, %v3240_v9  ;;  %v8950_v9 = vld [vmem:[#allocation162_spill] sm:$0xff]  ;;  %v5252_v35 = vld [vmem:[#allocation2 + $0x2b8] sm:$0xff] }
 0x57b   :  { %5076 = vmatmul.msk.f32.gmra.mxu1 %vm3884_vm11, %v3848_v12  ;;  %v3525_v0 = vsel %vm3486_vm6, %v3460_v15, %v8950_v9  ;;  %v8957_v15 = vld [vmem:[#allocation23_spill] sm:$0xff] }
 0x57c   :  { %v4842_v3 = vmax.f32 %v4778_v20, 0.0  ;;  %5134 = vmatmul.msk.f32.gmra.mxu2 %vm579_vm1, %v4320_v29  ;;  %v3589_v54 = vsel %vm113_vm0, %v3525_v0, %v8951_v2  ;;  %v8953_v20 = vld [vmem:[#allocation29_spill] sm:$0xff]  ;;  %v1177_v0 = vld [vmem:[#allocation2 + $0x330] sm:$0xff] }
 0x57d   :  { %3251 = vrot.lane.b32.xlu0 %v8009_v26, %s5382_s19  ;;  %v3654_v63 = vsel %vm3615_vm8, %v3589_v54, %v2474_v40  ;;  %v1225_v40 = vld [vmem:[#allocation2 + $0x271] sm:$0xff]  ;;  %v5256_v54 = vld [vmem:[#allocation2 + $0x200] sm:$0xff] }
 0x57e   :  { %4906 = vst.msk [vmem:[#allocation6 + $0x78] sm:$0xff] %vm113_vm0, %v4842_v3  ;;  %2483 = vrot.lane.b32.xlu1 %v7925_v18, %s5379_s2 }
 0x57f   :  { %v4619_v58 = vpop.f32.mrf.mxu2  ;;  %2739 = vrot.lane.b32.xlu2 %v1160_v37, %s5381_s18 }
 0x580   :  { %v4620_v57 = vadd.f32 %v7657_v38, %v4619_v58  ;;  %v2986_v44 = vpop.permute.xlu0 %2985  ;;  %v3016_v16 = vpop.permute.xlu1 %3015 }
 0x581   :  { %v3799_v7 = vsel %vm3745_vm9, %v3734_v42, %v3016_v16  ;;  %v4191_v60 = vpop.f32.mrf.mxu1  ;;  %v1241_v42 = vld [vmem:[#allocation2 + $0x331] sm:$0xff] }
 0x582   :  { %v8021_v47 = vpop.permute.xlu2 %2475  ;;  %v4779_v14 = vadd.f32 %v5249_v5, %v4620_v57  ;;  %v4192_v13 = vadd.f32 %v7826_v17, %v4191_v60  ;;  %v3864_v18 = vsel %vm3810_vm10, %v3799_v7, %v7963_v32  ;;  %v1224_v32 = vld [vmem:[#allocation2 + $0x261] sm:$0xff]  ;;  %v1161_v16 = vld [vmem:[#allocation2 + $0x270] sm:$0xff] }
 0x583   :  { %5092 = vmatmul.msk.f32.gmra.mxu3 %vm3884_vm11, %v3864_v18 }
 0x584   :  { %v4843_v21 = vmax.f32 %v4779_v14, 0.0  ;;  %v4321_v8 = vmax.f32 %v4192_v13, 0.0 }
 0x585   :  { %2485 = vrot.lane.b32.xlu0 %v1287_v51, %s5379_s2 }
 0x586   :  { %4907 = vst.msk [vmem:[#allocation6 + $0x80] sm:$0xff] %vm113_vm0, %v4843_v21  ;;  %5135 = vmatmul.msk.f32.gmra.mxu2 %vm579_vm1, %v4321_v8  ;;  %2995 = vrot.lane.b32.xlu1 %v1224_v32, %s5380_s17  ;;  %v8956_v21 = vld [vmem:[#allocation27_spill] sm:$0xff] }
 0x587   :  { %v4622_v22 = vpop.f32.mrf.mxu2  ;;  %2771 = vrot.lane.b32.xlu2 %v1176_v55, %s5381_s18  ;;  %v3412_v8 = vsel %vm579_vm1, %v5255_v36, %v8956_v21  ;;  %v8086_v32 = vld [vmem:[#allocation2 + $0x272] sm:$0xff]  ;;  %v8958_v55 = vld [vmem:[#allocation37_spill] sm:$0xff] }
 0x588   :  { %v4623_v10 = vadd.f32 %v7657_v38, %v4622_v22  ;;  %v3018_v45 = vpop.permute.xlu0 %3017  ;;  %v2730_v23 = vpop.permute.xlu1 %2729  ;;  %v3477_v9 = vsel %vm3421_vm5, %v3412_v8, %v8957_v15  ;;  %v8959_v22 = vld [vmem:[#allocation146_spill] sm:$0xff]  ;;  %v5261_v21 = vld [vmem:[#allocation3 + $0xb0] sm:$0xff] }
 0x589   :  { %v3719_v28 = vsel %vm3680_vm7, %v3654_v63, %v2730_v23  ;;  %v4194_v19 = vpop.f32.mrf.mxu1  ;;  %v3542_v2 = vsel %vm3486_vm6, %v3477_v9, %v8958_v55  ;;  %v3396_v63 = vsel %vm579_vm1, %v5256_v54, %v8959_v22  ;;  %v8965_v8 = vld [vmem:[#allocation151_spill] sm:$0xff]  ;;  %v1290_v54 = vld [vmem:[#allocation2 + $0x27a] sm:$0xff] }
 0x58a   :  { %v8043_v51 = vpop.permute.xlu2 %2987  ;;  %v4780_v49 = vadd.f32 %v5251_v59, %v4623_v10  ;;  %v3784_v25 = vsel %vm3745_vm9, %v3719_v28, %v2986_v44  ;;  %v4195_v52 = vadd.f32 %v7826_v17, %v4194_v19  ;;  %v8961_v28 = vld [vmem:[#allocation240_spill] sm:$0xff] }
 0x58b   :  { %v3849_v6 = vsel %vm3810_vm10, %v3784_v25, %v3242_v1  ;;  %v8952_v1 = vld [vmem:[#allocation21_spill] sm:$0xff]  ;;  %v3606_v19 = vsel %vm113_vm0, %v3542_v2, %v8961_v28 }
 0x58c   :  { %v4844_v56 = vmax.f32 %v4780_v49, 0.0  ;;  %v4322_v30 = vmax.f32 %v4195_v52, 0.0  ;;  %5077 = vmatmul.msk.f32.gmra.mxu1 %vm3884_vm11, %v3849_v6  ;;  %v3411_v31 = vsel %vm579_vm1, %v5252_v35, %v8952_v1  ;;  %v8963_v1 = vld [vmem:[#allocation217_spill] sm:$0xff] }
 0x58d   :  { %2997 = vrot.lane.b32.xlu0 %v1225_v40, %s5380_s17  ;;  %v3476_v12 = vsel %vm3421_vm5, %v3411_v31, %v8953_v20  ;;  %v1242_v22 = vld [vmem:[#allocation2 + $0x339] sm:$0xff] }
 0x58e   :  { %4908 = vst.msk [vmem:[#allocation6 + $0x88] sm:$0xff] %vm113_vm0, %v4844_v56  ;;  %5136 = vmatmul.msk.f32.gmra.mxu2 %vm579_vm1, %v4322_v30  ;;  %3027 = vrot.lane.b32.xlu1 %v1240_v39, %s5380_s17  ;;  %v3541_v61 = vsel %vm3486_vm6, %v3476_v12, %v8954_v48  ;;  %v5257_v56 = vld [vmem:[#allocation3 + $0xa0] sm:$0xff]  ;;  %v8962_v39 = vld [vmem:[#allocation154_spill] sm:$0xff]  ;;  %v1178_v12 = vld [vmem:[#allocation2 + $0x338] sm:$0xff] }
 0x58f   :  { %v4625_v46 = vpop.f32.mrf.mxu2  ;;  %3283 = vrot.lane.b32.xlu2 %v8052_v43, %s5382_s19  ;;  %v3605_v37 = vsel %vm113_vm0, %v3541_v61, %v8955_v62  ;;  %v1305_v61 = vld [vmem:[#allocation2 + $0x332] sm:$0xff] }
 0x590   :  { %v4626_v34 = vadd.f32 %v7657_v38, %v4625_v46  ;;  %v2732_v29 = vpop.permute.xlu0 %2731  ;;  %v2762_v33 = vpop.permute.xlu1 %2761  ;;  %v3670_v58 = vsel %vm3615_vm8, %v3605_v37, %v7979_v27 }
 0x591   :  { %v3735_v44 = vsel %vm3680_vm7, %v3670_v58, %v2762_v33 }
 0x592   :  { %v3020_v41 = vpop.permute.xlu2 %3019  ;;  %v4781_v3 = vadd.f32 %v5253_v53, %v4626_v34  ;;  %v3800_v27 = vsel %vm3745_vm9, %v3735_v44, %v3018_v45  ;;  %v8960_v45 = vld [vmem:[#allocation156_spill] sm:$0xff]  ;;  %v5258_v44 = vld [vmem:[#allocation3 + $0xa8] sm:$0xff] }
 0x593   :  { %v3461_v23 = vsel %vm3421_vm5, %v3396_v63, %v8960_v45 }
 0x594   :  { %v4845_v57 = vmax.f32 %v4781_v3, 0.0  ;;  %v3526_v46 = vsel %vm3486_vm6, %v3461_v23, %v8962_v39 }
 0x595   :  { %3029 = vrot.lane.b32.xlu0 %v1241_v42, %s5380_s17  ;;  %v3590_v31 = vsel %vm113_vm0, %v3526_v46, %v8963_v1  ;;  %v8969_v46 = vld [vmem:[#allocation34_spill] sm:$0xff] }
 0x596   :  { %4909 = vst.msk [vmem:[#allocation6 + $0x90] sm:$0xff] %vm113_vm0, %v4845_v57  ;;  %2741 = vrot.lane.b32.xlu1 %v1161_v16, %s5381_s18  ;;  %v3655_v20 = vsel %vm3615_vm8, %v3590_v31, %v8021_v47 }
 0x597   :  { %v4628_v7 = vpop.f32.mrf.mxu2  ;;  %2517 = vrot.lane.b32.xlu2 %v7967_v11, %s5379_s2  ;;  %v1162_v11 = vld [vmem:[#allocation2 + $0x278] sm:$0xff]  ;;  %v3720_v48 = vsel %vm3680_vm7, %v3655_v20, %v2732_v29 }
 0x598   :  { %v4629_v60 = vadd.f32 %v7657_v38, %v4628_v7  ;;  %v2764_v5 = vpop.permute.xlu0 %2763  ;;  %v3274_v14 = vpop.permute.xlu1 %3273  ;;  %v3785_v29 = vsel %vm3745_vm9, %v3720_v48, %v8043_v51  ;;  %v8971_v20 = vld [vmem:[#allocation232_spill] sm:$0xff]  ;;  %v1291_v48 = vld [vmem:[#allocation2 + $0x28a] sm:$0xff] }
 0x599   :  { %v3865_v13 = vsel %vm3810_vm10, %v3800_v27, %v3274_v14  ;;  %v8141_v27 = vld [vmem:[%s8547_s6] ss:$0 sm:$0xff] }
 0x59a   :  { %v8077_v18 = vpop.permute.xlu2 %2733  ;;  %v4782_v24 = vadd.f32 %v5254_v50, %v4629_v60  ;;  %5093 = vmatmul.msk.f32.gmra.mxu3 %vm3884_vm11, %v3865_v13  ;;  %v5259_v60 = vld [vmem:[#allocation2 + $0x210] sm:$0xff] }
 0x59c   :  { %v4846_v4 = vmax.f32 %v4782_v24, 0.0 }
 0x59d   :  { %2743 = vrot.lane.b32.xlu0 %v1162_v11, %s5381_s18  ;;  %v8966_v11 = vld [vmem:[#allocation161_spill] sm:$0xff] }
 0x59e   :  { %4910 = vst.msk [vmem:[#allocation6 + $0x98] sm:$0xff] %vm113_vm0, %v4846_v4  ;;  %2773 = vrot.lane.b32.xlu1 %v1177_v0, %s5381_s18  ;;  %v8967_v0 = vld [vmem:[#allocation224_spill] sm:$0xff] }
 0x59f   :  { %v4631_v10 = vpop.f32.mrf.mxu2  ;;  %3253 = vrot.lane.b32.xlu2 %v8086_v32, %s5382_s19 }
 0x5a0   :  { %v4632_v59 = vadd.f32 %v7657_v38, %v4631_v10  ;;  %v3276_v49 = vpop.permute.xlu0 %3275  ;;  %v2508_v25 = vpop.permute.xlu1 %2507 }
 0x5a1   :  { %v3671_v52 = vsel %vm3615_vm8, %v3606_v19, %v2508_v25  ;;  %v5262_v25 = vld [vmem:[#allocation2 + $0x2d0] sm:$0xff] }
 0x5a2   :  { %v8101_v6 = vpop.permute.xlu2 %2765  ;;  %v4783_v30 = vadd.f32 %v5257_v56, %v4632_v59  ;;  %v3736_v40 = vsel %vm3680_vm7, %v3671_v52, %v2764_v5  ;;  %v8964_v5 = vld [vmem:[#allocation159_spill] sm:$0xff]  ;;  %v8968_v52 = vld [vmem:[#allocation28_spill] sm:$0xff] }
 0x5a3   :  { %v3801_v35 = vsel %vm3745_vm9, %v3736_v40, %v3020_v41  ;;  %v3397_v14 = vsel %vm579_vm1, %v5259_v60, %v8964_v5  ;;  %v3413_v56 = vsel %vm579_vm1, %v5262_v25, %v8968_v52  ;;  %v8973_v5 = vld [vmem:[#allocation155_spill] sm:$0xff]  ;;  %v5267_v25 = vld [vmem:[#allocation2 + $0x2d8] sm:$0xff] }
 0x5a4   :  { %v4847_v34 = vmax.f32 %v4783_v30, 0.0  ;;  %v3866_v33 = vsel %vm3810_vm10, %v3801_v35, %v3276_v49  ;;  %v3462_v4 = vsel %vm3421_vm5, %v3397_v14, %v8965_v8  ;;  %v5263_v30 = vld [vmem:[#allocation3 + $0xb8] sm:$0xff]  ;;  %v3478_v35 = vsel %vm3421_vm5, %v3413_v56, %v8969_v46  ;;  %v1227_v14 = vld [vmem:[#allocation2 + $0x289] sm:$0xff] }
 0x5a5   :  { %5094 = vmatmul.msk.f32.gmra.mxu3 %vm3884_vm11, %v3866_v33  ;;  %2775 = vrot.lane.b32.xlu0 %v1178_v12, %s5381_s18  ;;  %v3527_v15 = vsel %vm3486_vm6, %v3462_v4, %v8966_v11 }
 0x5a6   :  { %4911 = vst.msk [vmem:[#allocation6 + $0xa0] sm:$0xff] %vm113_vm0, %v4847_v34  ;;  %3285 = vrot.lane.b32.xlu1 %v1305_v61, %s5382_s19  ;;  %v3591_v55 = vsel %vm113_vm0, %v3527_v15, %v8967_v0  ;;  %v8970_v34 = vld [vmem:[#allocation53_spill] sm:$0xff] }
 0x5a7   :  { %v4197_v41 = vpop.f32.mrf.mxu1  ;;  %v4634_v53 = vpop.f32.mrf.mxu2  ;;  %2487 = vrot.lane.b32.xlu2 %v8009_v26, %s5379_s2  ;;  %v8128_v26 = vld [vmem:[#allocation2 + $0x33a] sm:$0xff] }
 0x5a8   :  { %v4198_v3 = vadd.f32 %v7826_v17, %v4197_v41  ;;  %v4635_v47 = vadd.f32 %v7657_v38, %v4634_v53  ;;  %v2510_v62 = vpop.permute.xlu0 %2509  ;;  %v3244_v37 = vpop.permute.xlu1 %3243  ;;  %v1226_v38 = vld [vmem:[#allocation2 + $0x279] sm:$0xff]  ;;  %v1163_v41 = vld [vmem:[#allocation2 + $0x288] sm:$0xff] }
 0x5a9   :  { %v3850_v16 = vsel %vm3810_vm10, %v3785_v29, %v3244_v37 }
 0x5aa   :  { %v8123_v58 = vpop.permute.xlu2 %3277  ;;  %v4323_v57 = vmax.f32 %v4198_v3, 0.0  ;;  %v4784_v42 = vadd.f32 %v5258_v44, %v4635_v47  ;;  %5078 = vmatmul.msk.f32.gmra.mxu1 %vm3884_vm11, %v3850_v16 }
 0x5ac   :  { %v4848_v7 = vmax.f32 %v4784_v42, 0.0  ;;  %5137 = vmatmul.msk.f32.gmra.mxu2 %vm579_vm1, %v4323_v57 }
 0x5ad   :  { %3287 = vrot.lane.b32.xlu0 %v8128_v26, %s5382_s19 }
 0x5ae   :  { %4912 = vst.msk [vmem:[#allocation6 + $0xa8] sm:$0xff] %vm113_vm0, %v4848_v7  ;;  %2519 = vrot.lane.b32.xlu1 %v8052_v43, %s5379_s2  ;;  %v1179_v7 = vld [vmem:[#allocation2 + $0x348] sm:$0xff] }
 0x5af   :  { %v4637_v51 = vpop.f32.mrf.mxu2  ;;  %2999 = vrot.lane.b32.xlu2 %v1226_v38, %s5380_s17  ;;  %v5265_v38 = vld [vmem:[#allocation2 + $0x218] sm:$0xff] }
 0x5b0   :  { %v4638_v13 = vadd.f32 %v8141_v27, %v4637_v51  ;;  %v3246_v50 = vpop.permute.xlu0 %3245  ;;  %v2478_v24 = vpop.permute.xlu1 %2477  ;;  %v8972_v51 = vld [vmem:[#allocation148_spill] sm:$0xff] }
 0x5b1   :  { %v3656_v2 = vsel %vm3615_vm8, %v3591_v55, %v2478_v24  ;;  %v3398_v60 = vsel %vm579_vm1, %v5265_v38, %v8972_v51  ;;  %v5270_v38 = vld [vmem:[#allocation2 + $0x228] sm:$0xff] }
 0x5b2   :  { %v8144_v36 = vpop.permute.xlu2 %2511  ;;  %v4785_v43 = vadd.f32 %v5261_v21, %v4638_v13  ;;  %v3721_v28 = vsel %vm3680_vm7, %v3656_v2, %v8077_v18  ;;  %v3543_v18 = vsel %vm3486_vm6, %v3478_v35, %v8970_v34  ;;  %v8974_v13 = vld [vmem:[#allocation171_spill] sm:$0xff]  ;;  %v8982_v51 = vld [vmem:[#allocation158_spill] sm:$0xff] }
 0x5b3   :  { %v3607_v12 = vsel %vm113_vm0, %v3543_v18, %v8971_v20  ;;  %v1244_v34 = vld [vmem:[#allocation2 + $0x351] sm:$0xff] }
 0x5b4   :  { %v4849_v9 = vmax.f32 %v4785_v43, 0.0  ;;  %v8979_v18 = vld [vmem:[#allocation236_spill] sm:$0xff]  ;;  %v5268_v20 = vld [vmem:[#allocation3 + $0xd0] sm:$0xff] }
 0x5b5   :  { %2521 = vrot.lane.b32.xlu0 %v1305_v61, %s5379_s2  ;;  %v3672_v61 = vsel %vm3615_vm8, %v3607_v12, %v2510_v62  ;;  %v5264_v62 = vld [vmem:[#allocation3 + $0xc0] sm:$0xff] }
 0x5b6   :  { %4913 = vst.msk [vmem:[#allocation6 + $0xb0] sm:$0xff] %vm113_vm0, %v4849_v9  ;;  %3255 = vrot.lane.b32.xlu1 %v1290_v54, %s5382_s19  ;;  %v3737_v29 = vsel %vm3680_vm7, %v3672_v61, %v8101_v6  ;;  %v3463_v6 = vsel %vm3421_vm5, %v3398_v60, %v8973_v5  ;;  %v1292_v5 = vld [vmem:[#allocation2 + $0x292] sm:$0xff] }
 0x5b7   :  { %v4640_v63 = vpop.f32.mrf.mxu2  ;;  %3031 = vrot.lane.b32.xlu2 %v1242_v22, %s5380_s17 }
 0x5b8   :  { %v4641_v10 = vadd.f32 %v8141_v27, %v4640_v63  ;;  %v2480_v45 = vpop.permute.xlu0 %2479  ;;  %v4200_v23 = vpop.f32.mrf.mxu1 }
 0x5b9   :  { %v2990_v19 = vpop.permute.xlu1 %2989  ;;  %v4201_v59 = vadd.f32 %v7826_v17, %v4200_v23 }
 0x5ba   :  { %v3248_v49 = vpop.permute.xlu2 %3247  ;;  %v4786_v40 = vadd.f32 %v5263_v30, %v4641_v10  ;;  %v3786_v39 = vsel %vm3745_vm9, %v3721_v28, %v2990_v19  ;;  %v1243_v10 = vld [vmem:[#allocation2 + $0x349] sm:$0xff] }
 0x5bb   :  { %v4324_v1 = vmax.f32 %v4201_v59, 0.0  ;;  %v3851_v31 = vsel %vm3810_vm10, %v3786_v39, %v3246_v50  ;;  %v3528_v50 = vsel %vm3486_vm6, %v3463_v6, %v8974_v13  ;;  %v1307_v28 = vld [vmem:[#allocation2 + $0x34a] sm:$0xff]  ;;  %v8984_v13 = vld [vmem:[#allocation168_spill] sm:$0xff] }
 0x5bc   :  { %v4850_v33 = vmax.f32 %v4786_v40, 0.0  ;;  %5079 = vmatmul.msk.f32.gmra.mxu1 %vm3884_vm11, %v3851_v31  ;;  %v8977_v40 = vld [vmem:[#allocation44_spill] sm:$0xff]  ;;  %v8983_v6 = vld [vmem:[#allocation58_spill] sm:$0xff] }
 0x5bd   :  { %5138 = vmatmul.msk.f32.gmra.mxu2 %vm579_vm1, %v4324_v1  ;;  %3257 = vrot.lane.b32.xlu0 %v1291_v48, %s5382_s19  ;;  %v8978_v1 = vld [vmem:[#allocation45_spill] sm:$0xff] }
 0x5be   :  { %4914 = vst.msk [vmem:[#allocation6 + $0xb8] sm:$0xff] %vm113_vm0, %v4850_v33  ;;  %2489 = vrot.lane.b32.xlu1 %v8086_v32, %s5379_s2 }
 0x5bf   :  { %v4643_v53 = vpop.f32.mrf.mxu2  ;;  %2745 = vrot.lane.b32.xlu2 %v1163_v41, %s5381_s18 }
 0x5c0   :  { %v4644_v3 = vadd.f32 %v8141_v27, %v4643_v53  ;;  %v2992_v47 = vpop.permute.xlu0 %2991  ;;  %v1164_v53 = vld [vmem:[#allocation2 + $0x290] sm:$0xff] }
 0x5c1   :  { %v3022_v37 = vpop.permute.xlu1 %3021 }
 0x5c2   :  { %v8182_v57 = vpop.permute.xlu2 %2481  ;;  %v4787_v44 = vadd.f32 %v5264_v62, %v4644_v3  ;;  %v3802_v42 = vsel %vm3745_vm9, %v3737_v29, %v3022_v37  ;;  %v5269_v62 = vld [vmem:[#allocation2 + $0x2e8] sm:$0xff] }
 0x5c3   :  { %v3867_v16 = vsel %vm3810_vm10, %v3802_v42, %v8123_v58  ;;  %v8975_v58 = vld [vmem:[#allocation216_spill] sm:$0xff] }
 0x5c4   :  { %v4851_v32 = vmax.f32 %v4787_v44, 0.0  ;;  %5095 = vmatmul.msk.f32.gmra.mxu3 %vm3884_vm11, %v3867_v16  ;;  %v3592_v24 = vsel %vm113_vm0, %v3528_v50, %v8975_v58  ;;  %v8980_v44 = vld [vmem:[#allocation50_spill] sm:$0xff]  ;;  %v1180_v16 = vld [vmem:[#allocation2 + $0x350] sm:$0xff] }
 0x5c5   :  { %2491 = vrot.lane.b32.xlu0 %v1290_v54, %s5379_s2  ;;  %v3657_v43 = vsel %vm3615_vm8, %v3592_v24, %v2480_v45  ;;  %v5266_v54 = vld [vmem:[#allocation3 + $0xc8] sm:$0xff]  ;;  %v1228_v45 = vld [vmem:[#allocation2 + $0x291] sm:$0xff]  ;;  %v3415_v42 = vsel %vm579_vm1, %v5269_v62, %v8980_v44 }
 0x5c6   :  { %4915 = vst.msk [vmem:[#allocation6 + $0xc0] sm:$0xff] %vm113_vm0, %v4851_v32  ;;  %3001 = vrot.lane.b32.xlu1 %v1227_v14, %s5380_s17  ;;  %v8981_v32 = vld [vmem:[#allocation42_spill] sm:$0xff]  ;;  %v8991_v62 = vld [vmem:[#allocation227_spill] sm:$0xff] }
 0x5c7   :  { %2777 = vrot.lane.b32.xlu2 %v1179_v7, %s5381_s18  ;;  %v3480_v7 = vsel %vm3421_vm5, %v3415_v42, %v8981_v32 }
 0x5c8   :  { %v3024_v21 = vpop.permute.xlu0 %3023  ;;  %v3545_v14 = vsel %vm3486_vm6, %v3480_v7, %v8983_v6  ;;  %v8992_v6 = vld [vmem:[#allocation39_spill] sm:$0xff] }
 0x5c9   :  { %v2736_v8 = vpop.permute.xlu1 %2735  ;;  %v4646_v4 = vpop.f32.mrf.mxu2 }
 0x5ca   :  { %v3722_v11 = vsel %vm3680_vm7, %v3657_v43, %v2736_v8  ;;  %v4647_v15 = vadd.f32 %v8141_v27, %v4646_v4  ;;  %v4203_v9 = vpop.f32.mrf.mxu1  ;;  %v8203_v0 = vpop.permute.xlu2 %2993  ;;  %v5271_v4 = vld [vmem:[#allocation3 + $0xd8] sm:$0xff] }
 0x5cb   :  { %v3787_v55 = vsel %vm3745_vm9, %v3722_v11, %v2992_v47  ;;  %v4204_v2 = vadd.f32 %v7826_v17, %v4203_v9 }
 0x5cc   :  { %v4788_v22 = vadd.f32 %v5266_v54, %v4647_v15  ;;  %v3852_v63 = vsel %vm3810_vm10, %v3787_v55, %v3248_v49  ;;  %v8976_v49 = vld [vmem:[#allocation31_spill] sm:$0xff] }
 0x5cd   :  { %v4325_v23 = vmax.f32 %v4204_v2, 0.0  ;;  %5080 = vmatmul.msk.f32.gmra.mxu1 %vm3884_vm11, %v3852_v63  ;;  %3003 = vrot.lane.b32.xlu0 %v1228_v45, %s5380_s17  ;;  %v3414_v52 = vsel %vm579_vm1, %v5267_v25, %v8976_v49  ;;  %v8986_v55 = vld [vmem:[#allocation163_spill] sm:$0xff] }
 0x5ce   :  { %v4852_v19 = vmax.f32 %v4788_v22, 0.0  ;;  %3033 = vrot.lane.b32.xlu1 %v1243_v10, %s5380_s17  ;;  %v3479_v39 = vsel %vm3421_vm5, %v3414_v52, %v8977_v40  ;;  %v8987_v22 = vld [vmem:[#allocation220_spill] sm:$0xff] }
 0x5cf   :  { %5139 = vmatmul.msk.f32.gmra.mxu2 %vm579_vm1, %v4325_v23  ;;  %3289 = vrot.lane.b32.xlu2 %v1307_v28, %s5382_s19  ;;  %v3544_v31 = vsel %vm3486_vm6, %v3479_v39, %v8978_v1  ;;  %v1308_v45 = vld [vmem:[#allocation2 + $0x352] sm:$0xff]  ;;  %v5272_v1 = vld [vmem:[#allocation3 + $0xe0] sm:$0xff] }
 0x5d0   :  { %4916 = vst.msk [vmem:[#allocation6 + $0xc8] sm:$0xff] %vm113_vm0, %v4852_v19  ;;  %v2738_v59 = vpop.permute.xlu0 %2737  ;;  %v3608_v33 = vsel %vm113_vm0, %v3544_v31, %v8979_v18  ;;  %v8988_v18 = vld [vmem:[#allocation165_spill] sm:$0xff] }
 0x5d1   :  { %v2768_v56 = vpop.permute.xlu1 %2767  ;;  %v4649_v30 = vpop.f32.mrf.mxu2  ;;  %v3673_v48 = vsel %vm3615_vm8, %v3608_v33, %v8144_v36 }
 0x5d2   :  { %v4650_v46 = vadd.f32 %v8141_v27, %v4649_v30  ;;  %v3026_v35 = vpop.permute.xlu2 %3025  ;;  %v3738_v61 = vsel %vm3680_vm7, %v3673_v48, %v2768_v56 }
 0x5d3   :  { %v3803_v47 = vsel %vm3745_vm9, %v3738_v61, %v3024_v21  ;;  %v8985_v21 = vld [vmem:[#allocation242_spill] sm:$0xff] }
 0x5d4   :  { %v4789_v12 = vadd.f32 %v5268_v20, %v4650_v46  ;;  %v3609_v43 = vsel %vm113_vm0, %v3545_v14, %v8985_v21 }
 0x5d5   :  { %3035 = vrot.lane.b32.xlu0 %v1244_v34, %s5380_s17 }
 0x5d6   :  { %v4853_v41 = vmax.f32 %v4789_v12, 0.0  ;;  %2747 = vrot.lane.b32.xlu1 %v1164_v53, %s5381_s18 }
 0x5d7   :  { %2523 = vrot.lane.b32.xlu2 %v8128_v26, %s5379_s2  ;;  %v3399_v26 = vsel %vm579_vm1, %v5270_v38, %v8982_v51 }
 0x5d8   :  { %4917 = vst.msk [vmem:[#allocation6 + $0xd0] sm:$0xff] %vm113_vm0, %v4853_v41  ;;  %v2770_v3 = vpop.permute.xlu0 %2769  ;;  %v3464_v50 = vsel %vm3421_vm5, %v3399_v26, %v8984_v13  ;;  %v8989_v41 = vld [vmem:[#allocation157_spill] sm:$0xff] }
 0x5d9   :  { %v3280_v29 = vpop.permute.xlu1 %3279  ;;  %v3529_v2 = vsel %vm3486_vm6, %v3464_v50, %v8986_v55  ;;  %v8293_v26 = vld [vmem:[%s8545_s4] ss:$0 sm:$0xff] }
 0x5da   :  { %v3868_v37 = vsel %vm3810_vm10, %v3803_v47, %v3280_v29  ;;  %v8233_v36 = vpop.permute.xlu2 %2739  ;;  %v3593_v63 = vsel %vm113_vm0, %v3529_v2, %v8987_v22  ;;  %v5274_v29 = vld [vmem:[#allocation3 + $0xe8] sm:$0xff]  ;;  %v8993_v50 = vld [vmem:[#allocation49_spill] sm:$0xff] }
 0x5db   :  { %5096 = vmatmul.msk.f32.gmra.mxu3 %vm3884_vm11, %v3868_v37  ;;  %v3658_v28 = vsel %vm3615_vm8, %v3593_v63, %v8182_v57 }
 0x5dc   :  { %v3723_v25 = vsel %vm3680_vm7, %v3658_v28, %v2738_v59 }
 0x5dd   :  { %v3788_v30 = vsel %vm3745_vm9, %v3723_v25, %v8203_v0  ;;  %v5278_v25 = vld [vmem:[#allocation2 + $0x240] sm:$0xff] }
 0x5de   :  { %2779 = vrot.lane.b32.xlu1 %v1180_v16, %s5381_s18 }
 0x5df   :  { %v4652_v60 = vpop.f32.mrf.mxu2  ;;  %3259 = vrot.lane.b32.xlu2 %v1292_v5, %s5382_s19  ;;  %v5276_v5 = vld [vmem:[#allocation2 + $0x2f0] sm:$0xff] }
 0x5e0   :  { %v4653_v58 = vadd.f32 %v8141_v27, %v4652_v60  ;;  %v3282_v24 = vpop.permute.xlu0 %3281  ;;  %v3416_v14 = vsel %vm579_vm1, %v5276_v5, %v8992_v6  ;;  %v5281_v6 = vld [vmem:[#allocation3 + $0x100] sm:$0xff] }
 0x5e1   :  { %v2514_v8 = vpop.permute.xlu1 %2513 }
 0x5e2   :  { %v4790_v11 = vadd.f32 %v5271_v4, %v4653_v58  ;;  %v3674_v15 = vsel %vm3615_vm8, %v3609_v43, %v2514_v8  ;;  %v8252_v9 = vpop.permute.xlu2 %2771  ;;  %v3481_v58 = vsel %vm3421_vm5, %v3416_v14, %v8993_v50  ;;  %v8994_v43 = vld [vmem:[#allocation68_spill] sm:$0xff]  ;;  %v8995_v4 = vld [vmem:[#allocation235_spill] sm:$0xff] }
 0x5e3   :  { %v3739_v54 = vsel %vm3680_vm7, %v3674_v15, %v2770_v3  ;;  %v8990_v3 = vld [vmem:[#allocation170_spill] sm:$0xff]  ;;  %v3546_v8 = vsel %vm3486_vm6, %v3481_v58, %v8994_v43 }
 0x5e4   :  { %v4854_v10 = vmax.f32 %v4790_v11, 0.0  ;;  %v3804_v23 = vsel %vm3745_vm9, %v3739_v54, %v3026_v35  ;;  %v3610_v11 = vsel %vm113_vm0, %v3546_v8, %v8995_v4  ;;  %v5282_v4 = vld [vmem:[#allocation2 + $0x308] sm:$0xff] }
 0x5e5   :  { %v3869_v19 = vsel %vm3810_vm10, %v3804_v23, %v3282_v24 }
 0x5e6   :  { %4918 = vst.msk [vmem:[#allocation6 + $0xd8] sm:$0xff] %vm113_vm0, %v4854_v10  ;;  %5097 = vmatmul.msk.f32.gmra.mxu3 %vm3884_vm11, %v3869_v19  ;;  %3291 = vrot.lane.b32.xlu1 %v1308_v45, %s5382_s19  ;;  %v5277_v10 = vld [vmem:[#allocation3 + $0xf0] sm:$0xff] }
 0x5e7   :  { %v4206_v49 = vpop.f32.mrf.mxu1 }
 0x5e8   :  { %v4207_v52 = vadd.f32 %v7826_v17, %v4206_v49  ;;  %v2516_v56 = vpop.permute.xlu0 %2515  ;;  %v5273_v17 = vld [vmem:[#allocation2 + $0x230] sm:$0xff]  ;;  %v8996_v49 = vld [vmem:[#allocation160_spill] sm:$0xff] }
 0x5e9   :  { %v3250_v40 = vpop.permute.xlu1 %3249  ;;  %v4655_v39 = vpop.f32.mrf.mxu2  ;;  %v3400_v33 = vsel %vm579_vm1, %v5273_v17, %v8988_v18  ;;  %v3675_v15 = vsel %vm3615_vm8, %v3610_v11, %v2516_v56  ;;  %v9004_v11 = vld [vmem:[#allocation62_spill] sm:$0xff] }
 0x5ea   :  { %v4326_v57 = vmax.f32 %v4207_v52, 0.0  ;;  %v3853_v46 = vsel %vm3810_vm10, %v3788_v30, %v3250_v40  ;;  %v4656_v59 = vadd.f32 %v8141_v27, %v4655_v39  ;;  %v3284_v35 = vpop.permute.xlu2 %3283  ;;  %v3465_v53 = vsel %vm3421_vm5, %v3400_v33, %v8989_v41  ;;  %v8997_v30 = vld [vmem:[#allocation167_spill] sm:$0xff] }
 0x5eb   :  { %5081 = vmatmul.msk.f32.gmra.mxu1 %vm3884_vm11, %v3853_v46  ;;  %v3530_v47 = vsel %vm3486_vm6, %v3465_v53, %v8990_v3  ;;  %v3740_v22 = vsel %vm3680_vm7, %v3675_v15, %v8252_v9  ;;  %v3401_v52 = vsel %vm579_vm1, %v5278_v25, %v8996_v49  ;;  %v8998_v9 = vld [vmem:[#allocation180_spill] sm:$0xff]  ;;  %v3418_v15 = vsel %vm579_vm1, %v5282_v4, %v9004_v11 }
 0x5ec   :  { %v4791_v31 = vadd.f32 %v5272_v1, %v4656_v59  ;;  %5140 = vmatmul.msk.f32.gmra.mxu2 %vm579_vm1, %v4326_v57  ;;  %v3594_v44 = vsel %vm113_vm0, %v3530_v47, %v8991_v62  ;;  %v3466_v40 = vsel %vm3421_vm5, %v3401_v52, %v8997_v30  ;;  %v8999_v57 = vld [vmem:[#allocation219_spill] sm:$0xff]  ;;  %v9010_v30 = vld [vmem:[#allocation172_spill] sm:$0xff] }
 0x5ed   :  { %v3531_v39 = vsel %vm3486_vm6, %v3466_v40, %v8998_v9 }
 0x5ee   :  { %v4855_v34 = vmax.f32 %v4791_v31, 0.0  ;;  %v3595_v46 = vsel %vm113_vm0, %v3531_v39, %v8999_v57  ;;  %v9011_v57 = vld [vmem:[#allocation223_spill] sm:$0xff] }
 0x5f0   :  { %4919 = vst.msk [vmem:[#allocation6 + $0xe0] sm:$0xff] %vm113_vm0, %v4855_v34  ;;  %v3252_v0 = vpop.permute.xlu0 %3251 }
 0x5f1   :  { %v2484_v20 = vpop.permute.xlu1 %2483  ;;  %v4658_v12 = vpop.f32.mrf.mxu2 }
 0x5f2   :  { %v4659_v48 = vadd.f32 %v8141_v27, %v4658_v12  ;;  %v8278_v61 = vpop.permute.xlu2 %2517  ;;  %v3659_v42 = vsel %vm3615_vm8, %v3594_v44, %v2484_v20  ;;  %v5279_v20 = vld [vmem:[#allocation3 + $0xf8] sm:$0xff] }
 0x5f3   :  { %v3724_v38 = vsel %vm3680_vm7, %v3659_v42, %v8233_v36 }
 0x5f4   :  { %v4792_v37 = vadd.f32 %v5274_v29, %v4659_v48  ;;  %v5280_v29 = vld [vmem:[#allocation2 + $0x300] sm:$0xff] }
 0x5f6   :  { %v4856_v16 = vmax.f32 %v4792_v37, 0.0  ;;  %v9000_v37 = vld [vmem:[#allocation55_spill] sm:$0xff] }
 0x5f7   :  { %v3417_v62 = vsel %vm579_vm1, %v5280_v29, %v9000_v37 }
 0x5f8   :  { %4920 = vst.msk [vmem:[#allocation6 + $0xe8] sm:$0xff] %vm113_vm0, %v4856_v16  ;;  %v2486_v32 = vpop.permute.xlu0 %2485  ;;  %v4209_v7 = vpop.f32.mrf.mxu1  ;;  %v9001_v16 = vld [vmem:[#allocation65_spill] sm:$0xff] }
 0x5f9   :  { %v2996_v51 = vpop.permute.xlu1 %2995  ;;  %v4210_v60 = vadd.f32 %v8293_v26, %v4209_v7 }
 0x5fa   :  { %v3789_v13 = vsel %vm3745_vm9, %v3724_v38, %v2996_v51  ;;  %v3254_v21 = vpop.permute.xlu2 %3253  ;;  %v9002_v38 = vld [vmem:[#allocation66_spill] sm:$0xff] }
 0x5fb   :  { %v4327_v24 = vmax.f32 %v4210_v60, 0.0  ;;  %v3854_v36 = vsel %vm3810_vm10, %v3789_v13, %v3252_v0  ;;  %v9003_v60 = vld [vmem:[#allocation239_spill] sm:$0xff] }
 0x5fc   :  { %5082 = vmatmul.msk.f32.gmra.mxu1 %vm3884_vm11, %v3854_v36 }
 0x5fd   :  { %5141 = vmatmul.msk.f32.gmra.mxu2 %vm579_vm1, %v4327_v24 }
 0x5ff   :  { %v4661_v55 = vpop.f32.mrf.mxu2 }
 0x600   :  { %v4662_v2 = vadd.f32 %v8141_v27, %v4661_v55  ;;  %v2998_v54 = vpop.permute.xlu0 %2997  ;;  %v9005_v55 = vld [vmem:[#allocation57_spill] sm:$0xff] }
 0x601   :  { %v3028_v63 = vpop.permute.xlu1 %3027 }
 0x602   :  { %v4793_v23 = vadd.f32 %v5277_v10, %v4662_v2  ;;  %v3805_v45 = vsel %vm3745_vm9, %v3740_v22, %v3028_v63  ;;  %v2488_v56 = vpop.permute.xlu2 %2487  ;;  %v5283_v2 = vld [vmem:[#allocation2 + $0x248] sm:$0xff]  ;;  %v9007_v63 = vld [vmem:[#allocation73_spill] sm:$0xff] }
 0x603   :  { %v3870_v28 = vsel %vm3810_vm10, %v3805_v45, %v3284_v35  ;;  %v3660_v35 = vsel %vm3615_vm8, %v3595_v46, %v2486_v32  ;;  %v3482_v32 = vsel %vm3421_vm5, %v3417_v62, %v9001_v16  ;;  %v5285_v62 = vld [vmem:[#allocation3 + $0x108] sm:$0xff]  ;;  %v9014_v16 = vld [vmem:[#allocation179_spill] sm:$0xff] }
 0x604   :  { %v4857_v19 = vmax.f32 %v4793_v23, 0.0  ;;  %5098 = vmatmul.msk.f32.gmra.mxu3 %vm3884_vm11, %v3870_v28  ;;  %v3547_v51 = vsel %vm3486_vm6, %v3482_v32, %v9002_v38  ;;  %v9008_v23 = vld [vmem:[#allocation174_spill] sm:$0xff]  ;;  %v9009_v28 = vld [vmem:[#allocation243_spill] sm:$0xff] }
 0x605   :  { %v3611_v5 = vsel %vm113_vm0, %v3547_v51, %v9003_v60  ;;  %v9015_v38 = vld [vmem:[#allocation231_spill] sm:$0xff] }
 0x606   :  { %4921 = vst.msk [vmem:[#allocation6 + $0xf0] sm:$0xff] %vm113_vm0, %v4857_v19  ;;  %v3676_v13 = vsel %vm3615_vm8, %v3611_v5, %v8278_v61  ;;  %v3483_v61 = vsel %vm3421_vm5, %v3418_v15, %v9005_v55  ;;  %v9018_v15 = vld [vmem:[#allocation86_spill] sm:$0xff] }
 0x607   :  { %v3548_v10 = vsel %vm3486_vm6, %v3483_v61, %v9007_v63 }
 0x608   :  { %v3030_v59 = vpop.permute.xlu0 %3029  ;;  %v3612_v19 = vsel %vm113_vm0, %v3548_v10, %v9009_v28 }
 0x609   :  { %v2742_v1 = vpop.permute.xlu1 %2741  ;;  %v4664_v31 = vpop.f32.mrf.mxu2 }
 0x60a   :  { %v3725_v34 = vsel %vm3680_vm7, %v3660_v35, %v2742_v1  ;;  %v4665_v17 = vadd.f32 %v8141_v27, %v4664_v31  ;;  %v4212_v18 = vpop.f32.mrf.mxu1  ;;  %v3000_v3 = vpop.permute.xlu2 %2999 }
 0x60b   :  { %v3790_v33 = vsel %vm3745_vm9, %v3725_v34, %v2998_v54  ;;  %v4213_v0 = vadd.f32 %v8293_v26, %v4212_v18  ;;  %v9006_v54 = vld [vmem:[#allocation164_spill] sm:$0xff] }
 0x60c   :  { %v4794_v12 = vadd.f32 %v5279_v20, %v4665_v17  ;;  %v3855_v48 = vsel %vm3810_vm10, %v3790_v33, %v3254_v21  ;;  %v3402_v22 = vsel %vm579_vm1, %v5283_v2, %v9006_v54  ;;  %v9019_v2 = vld [vmem:[#allocation238_spill] sm:$0xff] }
 0x60d   :  { %v4328_v41 = vmax.f32 %v4213_v0, 0.0  ;;  %5083 = vmatmul.msk.f32.gmra.mxu1 %vm3884_vm11, %v3855_v48  ;;  %v3467_v45 = vsel %vm3421_vm5, %v3402_v22, %v9008_v23 }
 0x60e   :  { %v4858_v53 = vmax.f32 %v4794_v12, 0.0  ;;  %v3532_v40 = vsel %vm3486_vm6, %v3467_v45, %v9010_v30 }
 0x60f   :  { %5142 = vmatmul.msk.f32.gmra.mxu2 %vm579_vm1, %v4328_v41  ;;  %v3596_v46 = vsel %vm113_vm0, %v3532_v40, %v9011_v57  ;;  %v5284_v41 = vld [vmem:[#allocation2 + $0x258] sm:$0xff]  ;;  %v5288_v40 = vld [vmem:[#allocation2 + $0x260] sm:$0xff] }
 0x610   :  { %4922 = vst.msk [vmem:[#allocation6 + $0xf8] sm:$0xff] %vm113_vm0, %v4858_v53  ;;  %v2744_v47 = vpop.permute.xlu0 %2743  ;;  %v3661_v35 = vsel %vm3615_vm8, %v3596_v46, %v2488_v56  ;;  %v9012_v53 = vld [vmem:[#allocation177_spill] sm:$0xff] }
 0x611   :  { %v2774_v44 = vpop.permute.xlu1 %2773  ;;  %v4667_v42 = vpop.f32.mrf.mxu2  ;;  %v3726_v31 = vsel %vm3680_vm7, %v3661_v35, %v2744_v47  ;;  %v3403_v47 = vsel %vm579_vm1, %v5284_v41, %v9012_v53  ;;  %v9021_v46 = vld [vmem:[#allocation173_spill] sm:$0xff] }
 0x612   :  { %v4668_v7 = vadd.f32 %v8141_v27, %v4667_v42  ;;  %v3741_v50 = vsel %vm3680_vm7, %v3676_v13, %v2774_v44  ;;  %v3032_v36 = vpop.permute.xlu2 %3031  ;;  %v3791_v18 = vsel %vm3745_vm9, %v3726_v31, %v3000_v3  ;;  %v9013_v44 = vld [vmem:[#allocation169_spill] sm:$0xff]  ;;  %v9023_v31 = vld [vmem:[#allocation222_spill] sm:$0xff] }
 0x613   :  { %v3806_v21 = vsel %vm3745_vm9, %v3741_v50, %v3030_v59  ;;  %v3468_v42 = vsel %vm3421_vm5, %v3403_v47, %v9013_v44  ;;  %v9022_v35 = vld [vmem:[#allocation189_spill] sm:$0xff] }
 0x614   :  { %v4795_v14 = vadd.f32 %v5281_v6, %v4668_v7  ;;  %v3533_v32 = vsel %vm3486_vm6, %v3468_v42, %v9014_v16  ;;  %v5289_v47 = vld [vmem:[#allocation2 + $0x320] sm:$0xff]  ;;  %v8428_v42 = vpop.f32.mrf.mxu3 }
 0x615   :  { %v3597_v51 = vsel %vm113_vm0, %v3533_v32, %v9015_v38  ;;  %v9026_v32 = vld [vmem:[#allocation75_spill] sm:$0xff] }
 0x616   :  { %v4859_v58 = vmax.f32 %v4795_v14, 0.0 }
 0x618   :  { %4923 = vst.msk [vmem:[#allocation6 + $0x100] sm:$0xff] %vm113_vm0, %v4859_v58  ;;  %v2776_v24 = vpop.permute.xlu0 %2775  ;;  %v5286_v58 = vld [vmem:[#allocation2 + $0x318] sm:$0xff] }
 0x619   :  { %v3286_v43 = vpop.permute.xlu1 %3285 }
 0x61a   :  { %v3871_v8 = vsel %vm3810_vm10, %v3806_v21, %v3286_v43  ;;  %v2746_v9 = vpop.permute.xlu2 %2745 }
 0x61b   :  { %5099 = vmatmul.msk.f32.gmra.mxu3 %vm3884_vm11, %v3871_v8  ;;  %v9017_v8 = vld [vmem:[#allocation70_spill] sm:$0xff] }
 0x620   :  { %v3288_v49 = vpop.permute.xlu0 %3287 }
 0x621   :  { %v2520_v25 = vpop.permute.xlu1 %2519 }
 0x622   :  { %v3677_v52 = vsel %vm3615_vm8, %v3612_v19, %v2520_v25  ;;  %v2778_v48 = vpop.permute.xlu2 %2777 }
 0x623   :  { %v3742_v39 = vsel %vm3680_vm7, %v3677_v52, %v2776_v24  ;;  %v9016_v24 = vld [vmem:[#allocation63_spill] sm:$0xff] }
 0x624   :  { %v3807_v59 = vsel %vm3745_vm9, %v3742_v39, %v3032_v36  ;;  %v3419_v36 = vsel %vm579_vm1, %v5286_v58, %v9016_v24 }
 0x625   :  { %v3872_v1 = vsel %vm3810_vm10, %v3807_v59, %v3288_v49  ;;  %v3484_v4 = vsel %vm3421_vm5, %v3419_v36, %v9017_v8  ;;  %v5287_v49 = vld [vmem:[#allocation3 + $0x110] sm:$0xff] }
 0x626   :  { %5100 = vmatmul.msk.f32.gmra.mxu3 %vm3884_vm11, %v3872_v1  ;;  %v3549_v55 = vsel %vm3486_vm6, %v3484_v4, %v9018_v15 }
 0x627   :  { %v4215_v34 = vpop.f32.mrf.mxu1  ;;  %v3613_v54 = vsel %vm113_vm0, %v3549_v55, %v9019_v2 }
 0x628   :  { %v4216_v17 = vadd.f32 %v8293_v26, %v4215_v34  ;;  %v2522_v12 = vpop.permute.xlu0 %2521 }
 0x629   :  { %v3256_v33 = vpop.permute.xlu1 %3255  ;;  %v3678_v22 = vsel %vm3615_vm8, %v3613_v54, %v2522_v12 }
 0x62a   :  { %v3856_v0 = vsel %vm3810_vm10, %v3791_v18, %v3256_v33  ;;  %v4329_v20 = vmax.f32 %v4216_v17, 0.0  ;;  %v3290_v6 = vpop.permute.xlu2 %3289  ;;  %v3743_v45 = vsel %vm3680_vm7, %v3678_v22, %v2778_v48 }
 0x62b   :  { %5084 = vmatmul.msk.f32.gmra.mxu1 %vm3884_vm11, %v3856_v0 }
 0x62c   :  { %5143 = vmatmul.msk.f32.gmra.mxu2 %vm579_vm1, %v4329_v20 }
 0x62f   :  { %v4670_v56 = vpop.f32.mrf.mxu2 }
 0x630   :  { %v4671_v29 = vadd.f32 %v8141_v27, %v4670_v56  ;;  %v3258_v60 = vpop.permute.xlu0 %3257 }
 0x631   :  { %v2490_v37 = vpop.permute.xlu1 %2489 }
 0x632   :  { %v4796_v3 = vadd.f32 %v5285_v62, %v4671_v29  ;;  %v3662_v5 = vsel %vm3615_vm8, %v3597_v51, %v2490_v37  ;;  %v2524_v23 = vpop.permute.xlu2 %2523  ;;  %v9024_v29 = vld [vmem:[#allocation67_spill] sm:$0xff]  ;;  %v9025_v62 = vld [vmem:[#allocation80_spill] sm:$0xff]  ;;  %v9027_v51 = vld [vmem:[#allocation241_spill] sm:$0xff] }
 0x633   :  { %v3727_v14 = vsel %vm3680_vm7, %v3662_v5, %v2746_v9  ;;  %v9020_v9 = vld [vmem:[#allocation166_spill] sm:$0xff]  ;;  %v3420_v37 = vsel %vm579_vm1, %v5289_v47, %v9024_v29 }
 0x634   :  { %v4860_v7 = vmax.f32 %v4796_v3, 0.0  ;;  %v3404_v39 = vsel %vm579_vm1, %v5288_v40, %v9020_v9  ;;  %v3485_v3 = vsel %vm3421_vm5, %v3420_v37, %v9025_v62 }
 0x635   :  { %v3469_v59 = vsel %vm3421_vm5, %v3404_v39, %v9021_v46 }
 0x636   :  { %4924 = vst.msk [vmem:[#allocation6 + $0x108] sm:$0xff] %vm113_vm0, %v4860_v7  ;;  %v3534_v1 = vsel %vm3486_vm6, %v3469_v59, %v9022_v35  ;;  %v3550_v7 = vsel %vm3486_vm6, %v3485_v3, %v9026_v32  ;;  %v5293_v3 = vld [vmem:[#allocation3 + $0x130] sm:$0xff] }
 0x637   :  { %v3598_v34 = vsel %vm113_vm0, %v3534_v1, %v9023_v31 }
 0x638   :  { %v2492_v63 = vpop.permute.xlu0 %2491 }
 0x639   :  { %v3002_v13 = vpop.permute.xlu1 %3001  ;;  %v4218_v50 = vpop.f32.mrf.mxu1  ;;  %v3663_v17 = vsel %vm3615_vm8, %v3598_v34, %v2492_v63  ;;  %v5292_v34 = vld [vmem:[#allocation3 + $0x128] sm:$0xff] }
 0x63a   :  { %v3792_v21 = vsel %vm3745_vm9, %v3727_v14, %v3002_v13  ;;  %v4219_v43 = vadd.f32 %v8293_v26, %v4218_v50  ;;  %v3260_v12 = vpop.permute.xlu2 %3259 }
 0x63b   :  { %v3857_v11 = vsel %vm3810_vm10, %v3792_v21, %v3258_v60  ;;  %v3614_v60 = vsel %vm113_vm0, %v3550_v7, %v9027_v51  ;;  %v4245_v21 = vpop.f32.mrf.mxu3 }
 0x63c   :  { %v4330_v61 = vmax.f32 %v4219_v43, 0.0  ;;  %5085 = vmatmul.msk.f32.gmra.mxu1 %vm3884_vm11, %v3857_v11  ;;  %v3679_v5 = vsel %vm3615_vm8, %v3614_v60, %v2524_v23  ;;  %v4246_v8 = vadd.f32 %v8293_v26, %v4245_v21 }
 0x63e   :  { %5144 = vmatmul.msk.f32.gmra.mxu2 %vm579_vm1, %v4330_v61  ;;  %v4339_v4 = vmax.f32 %v4246_v8, 0.0 }
 0x640   :  { %v4673_v10 = vpop.f32.mrf.mxu2  ;;  %v3004_v33 = vpop.permute.xlu0 %3003 }
 0x641   :  { %v3034_v28 = vpop.permute.xlu1 %3033  ;;  %v4674_v19 = vadd.f32 %v8141_v27, %v4673_v10 }
 0x642   :  { %v3808_v25 = vsel %vm3745_vm9, %v3743_v45, %v3034_v28 }
 0x643   :  { %v4797_v52 = vadd.f32 %v5287_v49, %v4674_v19  ;;  %v3873_v30 = vsel %vm3810_vm10, %v3808_v25, %v3290_v6  ;;  %v5290_v6 = vld [vmem:[#allocation3 + $0x118] sm:$0xff]  ;;  %v4248_v11 = vpop.f32.mrf.mxu3  ;;  %v5291_v19 = vld [vmem:[#allocation3 + $0x120] sm:$0xff] }
 0x644   :  { %5101 = vmatmul.msk.f32.gmra.mxu3 %vm3884_vm11, %v3873_v30  ;;  %v4249_v15 = vadd.f32 %v8293_v26, %v4248_v11 }
 0x645   :  { %v4861_v57 = vmax.f32 %v4797_v52, 0.0 }
 0x646   :  { %v4340_v61 = vmax.f32 %v4249_v15, 0.0 }
 0x647   :  { %4925 = vst.msk [vmem:[#allocation6 + $0x110] sm:$0xff] %vm113_vm0, %v4861_v57 }
 0x648   :  { %v3036_v50 = vpop.permute.xlu0 %3035 }
 0x649   :  { %v2748_v18 = vpop.permute.xlu1 %2747 }
 0x64a   :  { %v3728_v0 = vsel %vm3680_vm7, %v3663_v17, %v2748_v18  ;;  %v4221_v20 = vpop.f32.mrf.mxu1 }
 0x64b   :  { %v3793_v48 = vsel %vm3745_vm9, %v3728_v0, %v3004_v33  ;;  %v4222_v56 = vadd.f32 %v8293_v26, %v4221_v20  ;;  %v4251_v54 = vpop.f32.mrf.mxu3 }
 0x64c   :  { %v3858_v41 = vsel %vm3810_vm10, %v3793_v48, %v3260_v12  ;;  %v4252_v63 = vadd.f32 %v8293_v26, %v4251_v54 }
 0x64d   :  { %v4331_v53 = vmax.f32 %v4222_v56, 0.0  ;;  %5086 = vmatmul.msk.f32.gmra.mxu1 %vm3884_vm11, %v3858_v41 }
 0x64e   :  { %v4341_v45 = vmax.f32 %v4252_v63, 0.0 }
 0x64f   :  { %5145 = vmatmul.msk.f32.gmra.mxu2 %vm579_vm1, %v4331_v53 }
 0x651   :  { %v2780_v44 = vpop.permute.xlu1 %2779 }
 0x652   :  { %v4676_v16 = vpop.f32.mrf.mxu2  ;;  %v3744_v13 = vsel %vm3680_vm7, %v3679_v5, %v2780_v44 }
 0x653   :  { %v4677_v38 = vadd.f32 %v8141_v27, %v4676_v16  ;;  %v3809_v24 = vsel %vm3745_vm9, %v3744_v13, %v3036_v50  ;;  %v4254_v28 = vpop.f32.mrf.mxu3 }
 0x654   :  { %v4255_v52 = vadd.f32 %v8293_v26, %v4254_v28 }
 0x655   :  { %v4798_v14 = vadd.f32 %v5290_v6, %v4677_v38 }
 0x656   :  { %v4342_v30 = vmax.f32 %v4255_v52, 0.0 }
 0x657   :  { %v4862_v58 = vmax.f32 %v4798_v14, 0.0 }
 0x659   :  { %4926 = vst.msk [vmem:[#allocation6 + $0x118] sm:$0xff] %vm113_vm0, %v4862_v58  ;;  %v3292_v36 = vpop.permute.xlu1 %3291 }
 0x65a   :  { %v3874_v43 = vsel %vm3810_vm10, %v3809_v24, %v3292_v36 }
 0x65b   :  { %5102 = vmatmul.msk.f32.gmra.mxu3 %vm3884_vm11, %v3874_v43  ;;  %v4257_v9 = vpop.f32.mrf.mxu3 }
 0x65c   :  { %v4258_v46 = vadd.f32 %v8293_v26, %v4257_v9 }
 0x65e   :  { %v4343_v35 = vmax.f32 %v4258_v46, 0.0  ;;  %v4243_v46 = vadd.f32 %v8293_v26, %v8428_v42 }
 0x663   :  { %5153 = vmatmul.msk.f32.vlgmr.msra.gmra.mxu3 %vm579_vm1, %v4339_v4  ;;  %v4260_v31 = vpop.f32.mrf.mxu3  ;;  %v5294_v4 = vld [vmem:[#allocation3 + $0x138] sm:$0xff] }
 0x664   :  { %v4261_v18 = vadd.f32 %v8293_v26, %v4260_v31  ;;  %v5296_v31 = vld [vmem:[#allocation3 + $0x148] sm:$0xff] }
 0x666   :  { %v4344_v0 = vmax.f32 %v4261_v18, 0.0 }
 0x668   :  { %v4224_v55 = vpop.f32.mrf.mxu1 }
 0x669   :  { %v4225_v2 = vadd.f32 %v8293_v26, %v4224_v55 }
 0x66b   :  { %v4332_v22 = vmax.f32 %v4225_v2, 0.0  ;;  %5154 = vmatmul.msk.f32.gmra.mxu3 %vm579_vm1, %v4340_v61  ;;  %v4263_v20 = vpop.f32.mrf.mxu3 }
 0x66c   :  { %v4264_v56 = vadd.f32 %v8293_v26, %v4263_v20 }
 0x66d   :  { %5146 = vmatmul.msk.f32.gmra.mxu2 %vm579_vm1, %v4332_v22 }
 0x66e   :  { %v4345_v53 = vmax.f32 %v4264_v56, 0.0 }
 0x66f   :  { %v4679_v10 = vpop.f32.mrf.mxu2 }
 0x670   :  { %v4680_v23 = vadd.f32 %v8141_v27, %v4679_v10 }
 0x672   :  { %v4799_v25 = vadd.f32 %v5291_v19, %v4680_v23  ;;  %v5295_v19 = vld [vmem:[#allocation3 + $0x140] sm:$0xff] }
 0x673   :  { %5155 = vmatmul.msk.f32.gmra.mxu3 %vm579_vm1, %v4341_v45  ;;  %v4266_v47 = vpop.f32.mrf.mxu3 }
 0x674   :  { %v4863_v49 = vmax.f32 %v4799_v25, 0.0  ;;  %v4267_v62 = vadd.f32 %v8293_v26, %v4266_v47 }
 0x676   :  { %4927 = vst.msk [vmem:[#allocation6 + $0x120] sm:$0xff] %vm113_vm0, %v4863_v49  ;;  %v4346_v32 = vmax.f32 %v4267_v62, 0.0 }
 0x679   :  { %v4227_v40 = vpop.f32.mrf.mxu1 }
 0x67a   :  { %v4228_v39 = vadd.f32 %v8293_v26, %v4227_v40 }
 0x67b   :  { %5156 = vmatmul.msk.f32.gmra.mxu3 %vm579_vm1, %v4342_v30  ;;  %v4269_v7 = vpop.f32.mrf.mxu3 }
 0x67c   :  { %v4333_v57 = vmax.f32 %v4228_v39, 0.0  ;;  %v4270_v38 = vadd.f32 %v8293_v26, %v4269_v7 }
 0x67e   :  { %5147 = vmatmul.msk.f32.gmra.mxu2 %vm579_vm1, %v4333_v57  ;;  %v4347_v51 = vmax.f32 %v4270_v38, 0.0  ;;  %v5300_v38 = vld [vmem:[#allocation3 + $0x198] sm:$0xff] }
 0x680   :  { %v4682_v59 = vpop.f32.mrf.mxu2 }
 0x681   :  { %v4683_v1 = vadd.f32 %v8141_v27, %v4682_v59 }
 0x683   :  { %v4800_v17 = vadd.f32 %v5292_v34, %v4683_v1  ;;  %5157 = vmatmul.msk.f32.gmra.mxu3 %vm579_vm1, %v4343_v35  ;;  %v4272_v60 = vpop.f32.mrf.mxu3  ;;  %v4338_v1 = vmax.f32 %v4243_v46, 0.0 }
 0x684   :  { %v4273_v5 = vadd.f32 %v8293_v26, %v4272_v60 }
 0x685   :  { %v4864_v33 = vmax.f32 %v4800_v17, 0.0 }
 0x686   :  { %v4348_v14 = vmax.f32 %v4273_v5, 0.0 }
 0x687   :  { %4928 = vst.msk [vmem:[#allocation6 + $0x128] sm:$0xff] %vm113_vm0, %v4864_v33 }
 0x68a   :  { %v4230_v12 = vpop.f32.mrf.mxu1 }
 0x68b   :  { %v4231_v48 = vadd.f32 %v8293_v26, %v4230_v12  ;;  %5158 = vmatmul.msk.f32.gmra.mxu3 %vm579_vm1, %v4344_v0  ;;  %v4275_v50 = vpop.f32.mrf.mxu3  ;;  %v5297_v12 = vld [vmem:[#allocation3 + $0x188] sm:$0xff] }
 0x68c   :  { %v4276_v24 = vadd.f32 %v8293_v26, %v4275_v50 }
 0x68d   :  { %v4334_v41 = vmax.f32 %v4231_v48, 0.0 }
 0x68e   :  { %v4349_v21 = vmax.f32 %v4276_v24, 0.0 }
 0x68f   :  { %5148 = vmatmul.msk.f32.gmra.mxu2 %vm579_vm1, %v4334_v41 }
 0x692   :  { %v4685_v29 = vpop.f32.mrf.mxu2 }
 0x693   :  { %v4686_v37 = vadd.f32 %v8141_v27, %v4685_v29  ;;  %5159 = vmatmul.msk.f32.gmra.mxu3 %vm579_vm1, %v4345_v53  ;;  %v5298_v29 = vld [vmem:[#allocation3 + $0x190] sm:$0xff] }
 0x695   :  { %v4801_v44 = vadd.f32 %v5293_v3, %v4686_v37  ;;  %v5299_v3 = vld [vmem:[#allocation3 + $0x150] sm:$0xff] }
 0x697   :  { %v4865_v16 = vmax.f32 %v4801_v44, 0.0 }
 0x699   :  { %4929 = vst.msk [vmem:[#allocation6 + $0x130] sm:$0xff] %vm113_vm0, %v4865_v16 }
 0x69b   :  { %5160 = vmatmul.msk.f32.gmra.mxu3 %vm579_vm1, %v4346_v32 }
 0x69e   :  { %v4278_v8 = vpop.f32.mrf.mxu3 }
 0x69f   :  { %v4279_v15 = vadd.f32 %v8293_v26, %v4278_v8 }
 0x6a1   :  { %v4350_v61 = vmax.f32 %v4279_v15, 0.0 }
 0x6a3   :  { %5161 = vmatmul.msk.f32.gmra.mxu3 %vm579_vm1, %v4347_v51 }
 0x6a8   :  { %v4233_v6 = vpop.f32.mrf.mxu1 }
 0x6a9   :  { %v4234_v13 = vadd.f32 %v8293_v26, %v4233_v6  ;;  %v4281_v54 = vpop.f32.mrf.mxu3 }
 0x6aa   :  { %v4282_v10 = vadd.f32 %v8293_v26, %v4281_v54  ;;  %v5304_v54 = vld [vmem:[#allocation3 + $0x1b0] sm:$0xff] }
 0x6ab   :  { %v4335_v58 = vmax.f32 %v4234_v13, 0.0  ;;  %5162 = vmatmul.msk.f32.gmra.mxu3 %vm579_vm1, %v4348_v14  ;;  %v5301_v14 = vld [vmem:[#allocation3 + $0x1a0] sm:$0xff] }
 0x6ac   :  { %v4351_v23 = vmax.f32 %v4282_v10, 0.0 }
 0x6ad   :  { %5149 = vmatmul.msk.f32.gmra.mxu2 %vm579_vm1, %v4335_v58 }
 0x6af   :  { %v4688_v36 = vpop.f32.mrf.mxu2 }
 0x6b0   :  { %v4689_v43 = vadd.f32 %v8141_v27, %v4688_v36  ;;  %v5302_v36 = vld [vmem:[#allocation3 + $0x158] sm:$0xff] }
 0x6b2   :  { %v4802_v11 = vadd.f32 %v5294_v4, %v4689_v43 }
 0x6b3   :  { %5163 = vmatmul.msk.f32.gmra.mxu3 %vm579_vm1, %v4349_v21 }
 0x6b4   :  { %v4866_v55 = vmax.f32 %v4802_v11, 0.0  ;;  %v5303_v11 = vld [vmem:[#allocation3 + $0x1a8] sm:$0xff] }
 0x6b6   :  { %4930 = vst.msk [vmem:[#allocation6 + $0x138] sm:$0xff] %vm113_vm0, %v4866_v55 }
 0x6b9   :  { %v4236_v2 = vpop.f32.mrf.mxu1 }
 0x6ba   :  { %v4237_v22 = vadd.f32 %v8293_v26, %v4236_v2 }
 0x6bb   :  { %5164 = vmatmul.msk.f32.gmra.mxu3 %vm579_vm1, %v4350_v61 }
 0x6bc   :  { %v4336_v63 = vmax.f32 %v4237_v22, 0.0 }
 0x6be   :  { %5150 = vmatmul.msk.f32.gmra.mxu2 %vm579_vm1, %v4336_v63 }
 0x6c1   :  { %v4691_v45 = vpop.f32.mrf.mxu2 }
 0x6c2   :  { %v4692_v28 = vadd.f32 %v8141_v27, %v4691_v45  ;;  %v5305_v45 = vld [vmem:[#allocation3 + $0x160] sm:$0xff] }
 0x6c3   :  { %5165 = vmatmul.msk.f32.gmra.mxu3 %vm579_vm1, %v4351_v23 }
 0x6c4   :  { %v4803_v25 = vadd.f32 %v5295_v19, %v4692_v28 }
 0x6c6   :  { %v4867_v49 = vmax.f32 %v4803_v25, 0.0 }
 0x6c7   :  { %v4284_v52 = vpop.f32.mrf.mxu3 }
 0x6c8   :  { %4931 = vst.msk [vmem:[#allocation6 + $0x140] sm:$0xff] %vm113_vm0, %v4867_v49  ;;  %v4285_v30 = vadd.f32 %v8293_v26, %v4284_v52  ;;  %v5306_v52 = vld [vmem:[#allocation3 + $0x1b8] sm:$0xff] }
 0x6ca   :  { %v4352_v40 = vmax.f32 %v4285_v30, 0.0  ;;  %v4239_v9 = vpop.f32.mrf.mxu1 }
 0x6cb   :  { %v4240_v39 = vadd.f32 %v8293_v26, %v4239_v9 }
 0x6cc   :  { %5166 = vmatmul.msk.f32.gmra.mxu3 %vm579_vm1, %v4352_v40 }
 0x6cd   :  { %v4337_v57 = vmax.f32 %v4240_v39, 0.0 }
 0x6cf   :  { %5151 = vmatmul.msk.f32.gmra.mxu2 %vm579_vm1, %v4337_v57  ;;  %v5307_v57 = vld [vmem:[#allocation3 + $0x1c0] sm:$0xff] }
 0x6d2   :  { %v4694_v59 = vpop.f32.mrf.mxu2 }
 0x6d3   :  { %v4695_v35 = vadd.f32 %v8141_v27, %v4694_v59 }
 0x6d5   :  { %v4804_v34 = vadd.f32 %v5296_v31, %v4695_v35  ;;  %v5308_v31 = vld [vmem:[#allocation3 + $0x1c8] sm:$0xff] }
 0x6d7   :  { %v4868_v17 = vmax.f32 %v4804_v34, 0.0  ;;  %5152 = vmatmul.msk.f32.gmra.mxu2 %vm579_vm1, %v4338_v1 }
 0x6d9   :  { %4932 = vst.msk [vmem:[#allocation6 + $0x148] sm:$0xff] %vm113_vm0, %v4868_v17 }
 0x6de   :  { %v4287_v18 = vpop.f32.mrf.mxu3 }
 0x6df   :  { %v4288_v33 = vadd.f32 %v8293_v26, %v4287_v18 }
 0x6e1   :  { %v4353_v0 = vmax.f32 %v4288_v33, 0.0  ;;  %v5309_v33 = vld [vmem:[%s8547_s6] ss:$0 sm:$0xff]  ;;  %s5383_s6 = smov [#allocation6]  }
 0x6e2   :  { %s4959_s17 = sshll.u32 %s5383_s6, 4  ;;  %s4960_s17 = int_to_ptr.vmem [resolvable:$true] %s4959_s17 }
 0x6e3   :  { %5167 = vmatmul.msk.f32.gmra.mxu3 %vm579_vm1, %v4353_v0 }
 0x6e6   :  { %v4718_v20 = vpop.f32.mrf.mxu3 }
 0x6e7   :  { %v4719_v42 = vadd.f32 %v8141_v27, %v4718_v20 }
 0x6e9   :  { %v4812_v48 = vadd.f32 %v5297_v12, %v4719_v42  ;;  %v5310_v42 = vld [vmem:[#allocation3 + $0x1d0] sm:$0xff] }
 0x6eb   :  { %v4876_v56 = vmax.f32 %v4812_v48, 0.0 }
 0x6ed   :  { %4940 = vst.msk [vmem:[#allocation6 + $0x188] sm:$0xff] %vm113_vm0, %v4876_v56 }
 0x6ee   :  { %v4721_v41 = vpop.f32.mrf.mxu3 }
 0x6ef   :  { %v4722_v53 = vadd.f32 %v8141_v27, %v4721_v41  ;;  %v5311_v41 = vld [vmem:[#allocation3 + $0x168] sm:$0xff] }
 0x6f0   :  { %v4697_v47 = vpop.f32.mrf.mxu2 }
 0x6f1   :  { %v4813_v37 = vadd.f32 %v5298_v29, %v4722_v53  ;;  %v4698_v62 = vadd.f32 %v8141_v27, %v4697_v47 }
 0x6f3   :  { %v4877_v26 = vmax.f32 %v4813_v37, 0.0  ;;  %v4805_v44 = vadd.f32 %v5299_v3, %v4698_v62  ;;  %v5312_v37 = vld [vmem:[#allocation3 + $0x1d8] sm:$0xff] }
 0x6f5   :  { %4941 = vst.msk [vmem:[#allocation6 + $0x190] sm:$0xff] %vm113_vm0, %v4877_v26  ;;  %v4869_v16 = vmax.f32 %v4805_v44, 0.0 }
 0x6f6   :  { %v4724_v32 = vpop.f32.mrf.mxu3 }
 0x6f7   :  { %4933 = vst.msk [vmem:[#allocation6 + $0x150] sm:$0xff] %vm113_vm0, %v4869_v16  ;;  %v4725_v7 = vadd.f32 %v8141_v27, %v4724_v32  ;;  %v5313_v16 = vld [vmem:[#allocation3 + $0x1e0] sm:$0xff] }
 0x6f9   :  { %v4814_v51 = vadd.f32 %v5300_v38, %v4725_v7 }
 0x6fb   :  { %v4878_v60 = vmax.f32 %v4814_v51, 0.0 }
 0x6fd   :  { %4942 = vst.msk [vmem:[#allocation6 + $0x198] sm:$0xff] %vm113_vm0, %v4878_v60  ;;  %v5314_v60 = vld [vmem:[#allocation3 + $0x170] sm:$0xff] }
 0x6fe   :  { %v4727_v5 = vpop.f32.mrf.mxu3 }
 0x6ff   :  { %v4728_v6 = vadd.f32 %v8141_v27, %v4727_v5 }
 0x701   :  { %v4815_v13 = vadd.f32 %v5301_v14, %v4728_v6  ;;  %v4700_v50 = vpop.f32.mrf.mxu2 }
 0x702   :  { %v4701_v58 = vadd.f32 %v8141_v27, %v4700_v50  ;;  %v5315_v50 = vld [vmem:[#allocation3 + $0x1e8] sm:$0xff] }
 0x703   :  { %v4879_v24 = vmax.f32 %v4815_v13, 0.0 }
 0x704   :  { %v4806_v21 = vadd.f32 %v5302_v36, %v4701_v58 }
 0x705   :  { %4943 = vst.msk [vmem:[#allocation6 + $0x1a0] sm:$0xff] %vm113_vm0, %v4879_v24 }
 0x706   :  { %v4870_v43 = vmax.f32 %v4806_v21, 0.0  ;;  %v4730_v8 = vpop.f32.mrf.mxu3 }
 0x707   :  { %v4731_v4 = vadd.f32 %v8141_v27, %v4730_v8 }
 0x708   :  { %4934 = vst.msk [vmem:[#allocation6 + $0x158] sm:$0xff] %vm113_vm0, %v4870_v43  ;;  %v5316_v43 = vld [vmem:[#allocation3 + $0x1f0] sm:$0xff] }
 0x709   :  { %v4816_v15 = vadd.f32 %v5303_v11, %v4731_v4 }
 0x70b   :  { %v4880_v55 = vmax.f32 %v4816_v15, 0.0 }
 0x70d   :  { %4944 = vst.msk [vmem:[#allocation6 + $0x1a8] sm:$0xff] %vm113_vm0, %v4880_v55  ;;  %v5317_v55 = vld [vmem:[#allocation3 + $0x178] sm:$0xff] }
 0x70e   :  { %v4733_v61 = vpop.f32.mrf.mxu3 }
 0x70f   :  { %v4734_v2 = vadd.f32 %v8141_v27, %v4733_v61 }
 0x711   :  { %v4817_v22 = vadd.f32 %v5304_v54, %v4734_v2 }
 0x712   :  { %v4703_v63 = vpop.f32.mrf.mxu2 }
 0x713   :  { %v4881_v10 = vmax.f32 %v4817_v22, 0.0  ;;  %v4704_v23 = vadd.f32 %v8141_v27, %v4703_v63  ;;  %v5318_v63 = vld [vmem:[#allocation3 + $0x180] sm:$0xff] }
 0x715   :  { %4945 = vst.msk [vmem:[#allocation6 + $0x1b0] sm:$0xff] %vm113_vm0, %v4881_v10  ;;  %v4807_v28 = vadd.f32 %v5305_v45, %v4704_v23 }
 0x716   :  { %v4736_v19 = vpop.f32.mrf.mxu3 }
 0x717   :  { %v4871_v25 = vmax.f32 %v4807_v28, 0.0  ;;  %v4737_v49 = vadd.f32 %v8141_v27, %v4736_v19  ;;  %v5319_v19 = vld [vmem:[#allocation3 + $0x1f8] sm:$0xff] }
 0x719   :  { %4935 = vst.msk [vmem:[#allocation6 + $0x160] sm:$0xff] %vm113_vm0, %v4871_v25  ;;  %v4818_v30 = vadd.f32 %v5306_v52, %v4737_v49 }
 0x71b   :  { %v4882_v40 = vmax.f32 %v4818_v30, 0.0 }
 0x71d   :  { %4946 = vst.msk [vmem:[#allocation6 + $0x1b8] sm:$0xff] %vm113_vm0, %v4882_v40 }
 0x71e   :  { %v4739_v9 = vpop.f32.mrf.mxu3 }
 0x71f   :  { %v4740_v39 = vadd.f32 %v8141_v27, %v4739_v9 }
 0x721   :  { %v4819_v46 = vadd.f32 %v5307_v57, %v4740_v39 }
 0x723   :  { %v4883_v59 = vmax.f32 %v4819_v46, 0.0 }
 0x725   :  { %4947 = vst.msk [vmem:[#allocation6 + $0x1c0] sm:$0xff] %vm113_vm0, %v4883_v59 }
 0x726   :  { %v4742_v35 = vpop.f32.mrf.mxu3 }
 0x727   :  { %v4743_v1 = vadd.f32 %v8141_v27, %v4742_v35 }
 0x729   :  { %v4820_v34 = vadd.f32 %v5308_v31, %v4743_v1 }
 0x72b   :  { %v4884_v17 = vmax.f32 %v4820_v34, 0.0 }
 0x72d   :  { %4948 = vst.msk [vmem:[#allocation6 + $0x1c8] sm:$0xff] %vm113_vm0, %v4884_v17 }
 0x72e   :  { %v4745_v18 = vpop.f32.mrf.mxu3 }
 0x72f   :  { %v4746_v0 = vadd.f32 %v5309_v33, %v4745_v18 }
 0x730   :  { %v4706_v20 = vpop.f32.mrf.mxu2 }
 0x731   :  { %v4821_v12 = vadd.f32 %v5310_v42, %v4746_v0  ;;  %v4707_v48 = vadd.f32 %v5309_v33, %v4706_v20 }
 0x733   :  { %v4885_v56 = vmax.f32 %v4821_v12, 0.0  ;;  %v4808_v53 = vadd.f32 %v5311_v41, %v4707_v48 }
 0x735   :  { %4949 = vst.msk [vmem:[#allocation6 + $0x1d0] sm:$0xff] %vm113_vm0, %v4885_v56  ;;  %v4872_v27 = vmax.f32 %v4808_v53, 0.0 }
 0x736   :  { %v4748_v47 = vpop.f32.mrf.mxu3 }
 0x737   :  { %4936 = vst.msk [vmem:[#allocation6 + $0x168] sm:$0xff] %vm113_vm0, %v4872_v27  ;;  %v4749_v29 = vadd.f32 %v5309_v33, %v4748_v47 }
 0x739   :  { %v4822_v62 = vadd.f32 %v5312_v37, %v4749_v29 }
 0x73b   :  { %v4886_v26 = vmax.f32 %v4822_v62, 0.0 }
 0x73d   :  { %4950 = vst.msk [vmem:[#allocation6 + $0x1d8] sm:$0xff] %vm113_vm0, %v4886_v26 }
 0x73e   :  { %v4751_v3 = vpop.f32.mrf.mxu3 }
 0x73f   :  { %v4752_v44 = vadd.f32 %v5309_v33, %v4751_v3 }
 0x741   :  { %v4823_v32 = vadd.f32 %v5313_v16, %v4752_v44  ;;  %v4709_v7 = vpop.f32.mrf.mxu2 }
 0x742   :  { %v4710_v38 = vadd.f32 %v5309_v33, %v4709_v7 }
 0x743   :  { %v4887_v51 = vmax.f32 %v4823_v32, 0.0 }
 0x744   :  { %v4809_v5 = vadd.f32 %v5314_v60, %v4710_v38 }
 0x745   :  { %4951 = vst.msk [vmem:[#allocation6 + $0x1e0] sm:$0xff] %vm113_vm0, %v4887_v51 }
 0x746   :  { %v4873_v6 = vmax.f32 %v4809_v5, 0.0  ;;  %v4754_v14 = vpop.f32.mrf.mxu3 }
 0x747   :  { %v4755_v13 = vadd.f32 %v5309_v33, %v4754_v14 }
 0x748   :  { %4937 = vst.msk [vmem:[#allocation6 + $0x170] sm:$0xff] %vm113_vm0, %v4873_v6 }
 0x749   :  { %v4824_v58 = vadd.f32 %v5315_v50, %v4755_v13 }
 0x74b   :  { %v4888_v24 = vmax.f32 %v4824_v58, 0.0 }
 0x74d   :  { %4952 = vst.msk [vmem:[#allocation6 + $0x1e8] sm:$0xff] %vm113_vm0, %v4888_v24 }
 0x74f   :  { %v4757_v36 = vpop.f32.mrf.mxu3 }
 0x750   :  { %v4758_v21 = vadd.f32 %v5309_v33, %v4757_v36 }
 0x752   :  { %v4825_v8 = vadd.f32 %v5316_v43, %v4758_v21  ;;  %v4712_v4 = vpop.f32.mrf.mxu2 }
 0x753   :  { %v4713_v11 = vadd.f32 %v5309_v33, %v4712_v4 }
 0x754   :  { %v4889_v15 = vmax.f32 %v4825_v8, 0.0 }
 0x755   :  { %v4810_v61 = vadd.f32 %v5317_v55, %v4713_v11 }
 0x756   :  { %4953 = vst.msk [vmem:[#allocation6 + $0x1f0] sm:$0xff] %vm113_vm0, %v4889_v15 }
 0x757   :  { %v4874_v2 = vmax.f32 %v4810_v61, 0.0 }
 0x759   :  { %4938 = vst.msk [vmem:[#allocation6 + $0x178] sm:$0xff] %vm113_vm0, %v4874_v2 }
 0x75a   :  { %v4715_v54 = vpop.f32.mrf.mxu2 }
 0x75b   :  { %v4716_v22 = vadd.f32 %v5309_v33, %v4715_v54 }
 0x75d   :  { %v4811_v10 = vadd.f32 %v5318_v63, %v4716_v22 }
 0x75f   :  { %v4875_v23 = vmax.f32 %v4811_v10, 0.0 }
 0x761   :  { %4939 = vst.msk [vmem:[#allocation6 + $0x180] sm:$0xff] %vm113_vm0, %v4875_v23 }
 0x766   :  { %v4760_v45 = vpop.f32.mrf.mxu3 }
 0x767   :  { %v4761_v28 = vadd.f32 %v5309_v33, %v4760_v45 }
 0x769   :  { %v4826_v25 = vadd.f32 %v5319_v19, %v4761_v28 }
 0x76b   :  { %v4890_v49 = vmax.f32 %v4826_v25, 0.0 }
 0x76d   :  { %4954 = vst.msk [vmem:[#allocation6 + $0x1f8] sm:$0xff] %vm113_vm0, %v4890_v49 }
 0x76e   :  { %4967 = dma.vmem_to_hbm [thread:$0]  %s4960_s17, 8192, %s4962_s20, [#allocation5], %s5373_s29, %s5373_s29, %s5374_s30  }
 0x76f   :  { %5370 = dma.done.wait [#allocation5], 8192  }
 0x770   :  { %5371 = vsyncadd [#allocation5], 4294959104 }
 0x771   :  { %4972 = vsyncpa [#allocation4], 1 }
 0x772   :  { %4973 = vsyncpa [#allocation5], 1 }

</bundles_post_ra>
